<compile_context>
chip_gen: v7x
topology: tpu7x:2x2x1
jax: 0.10.0
libtpu: 0.0.40
codegen_flags: <defaults>
</compile_context>

<pallas_src>
import functools

import numpy as np

import jax
import jax.numpy as jnp
from jax.experimental import pallas as pl
from jax.experimental.pallas import tpu as pltpu


# ----------------------------------- fused forward kernel -----------------------------------

def _pool_matrix(h_out, h_in):
    """(h_out, h_in) matrix P with P[i, j] = 0.25 for j in [2i-1, 2i+2] (clipped to the input),
    i.e. AvgPool2d((4,1), stride=(2,1), padding=(1,0), count_include_pad=True) along H."""
    r = jax.lax.broadcasted_iota(jnp.int32, (h_out, h_in), 0)
    c = jax.lax.broadcasted_iota(jnp.int32, (h_out, h_in), 1)
    win = (c >= 2 * r - 1) & (c <= 2 * r + 2)
    return jnp.where(win, jnp.float32(0.25), jnp.float32(0.0))


def _cnn0_kernel(x_ref, m1_ref, s1_ref, m2_ref, s2_ref, mf1_ref, sf1_ref,
                 mf2_ref, sf2_ref, o_ref,
                 pad1_ref, pad2_ref, padf1_ref, padf2_ref,
                 *, N, H1, H2, H3, W):
    # x_ref : (N, H1, W)                  full batch (Cin = 1)
    # m*_ref: (KH, W*Cin, W*Cout) bf16    banded conv matrices (BN scale folded in)
    # s*_ref: (1, W*Cout) f32             folded bias + BN shift, tiled over W
    # o_ref : (N, H3, W) f32              final Cout = 1 output
    bf16 = jnp.bfloat16
    f32 = jnp.float32

    # ---- zero only the halo rows of the padded scratch slabs (interiors are overwritten) ----
    pad1_ref[0:4, :] = jnp.zeros((4, W), f32)
    pad1_ref[4 + H1:8 + H1, :] = jnp.zeros((4, W), f32)
    pad2_ref[0:2, :] = jnp.zeros((2, 32 * W), f32)
    pad2_ref[2 + H2:4 + H2, :] = jnp.zeros((2, 32 * W), f32)
    padf1_ref[0:1, :] = jnp.zeros((1, 32 * W), f32)
    padf1_ref[1 + H3:2 + H3, :] = jnp.zeros((1, 32 * W), f32)
    padf2_ref[0:1, :] = jnp.zeros((1, 16 * W), f32)
    padf2_ref[1 + H3:2 + H3, :] = jnp.zeros((1, 16 * W), f32)

    # Pooling matrices (built once, reused for both batch elements).
    P1 = _pool_matrix(H2, H1)   # (H2, H1)
    P2 = _pool_matrix(H3, H2)   # (H3, H2)

    for n in range(N):          # N is tiny (2): unrolled, weights stay VMEM-resident.
        # ------------- stage 1: merged 9x9 conv (1 -> 32) + folded BN + ReLU -------------
        pad1_ref[4:4 + H1, :] = x_ref[n]                 # H-pad by 4; W-pad lives in m1
        acc1 = jnp.zeros((H1, 32 * W), f32)
        for kh in range(9):
            acc1 += jnp.dot(pad1_ref[kh:kh + H1, :].astype(bf16), m1_ref[kh],
                            preferred_element_type=f32)
        act1 = jnp.maximum(acc1 + s1_ref[...], 0.0)      # (H1, W*32) lane-dense

        # -------- pool1 as one tiny matmul; result goes straight into stage-2's slab --------
        pad2_ref[2:2 + H2, :] = jnp.dot(P1, act1, preferred_element_type=f32)

        # ------------- stage 2: merged 5x5 conv (32 -> 32) + folded BN + ReLU -------------
        acc2 = jnp.zeros((H2, 32 * W), f32)
        for kh in range(5):
            acc2 += jnp.dot(pad2_ref[kh:kh + H2, :].astype(bf16), m2_ref[kh],
                            preferred_element_type=f32)
        act2 = jnp.maximum(acc2 + s2_ref[...], 0.0)

        # ----------------- pool2 -> rows written into convf1's padded slab -----------------
        padf1_ref[1:1 + H3, :] = jnp.dot(P2, act2, preferred_element_type=f32)

        # ------------- convf1: 3x3 (32 -> 16) + folded BN + LeakyReLU(0.01) -------------
        accf1 = jnp.zeros((H3, 16 * W), f32)
        for kh in range(3):
            accf1 += jnp.dot(padf1_ref[kh:kh + H3, :].astype(bf16), mf1_ref[kh],
                             preferred_element_type=f32)
        accf1 = accf1 + sf1_ref[...]
        actf1 = jnp.where(accf1 >= 0.0, accf1, 0.01 * accf1)

        # ------------- convf2: 3x3 (16 -> 1) + folded BN + LeakyReLU(0.01) -------------
        padf2_ref[1:1 + H3, :] = actf1
        accf2 = jnp.zeros((H3, W), f32)
        for kh in range(3):
            accf2 += jnp.dot(padf2_ref[kh:kh + H3, :].astype(bf16), mf2_ref[kh],
                             preferred_element_type=f32)
        accf2 = accf2 + sf2_ref[...]
        o_ref[n, :, :] = jnp.where(accf2 >= 0.0, accf2, 0.01 * accf2)   # (H3, W), Cout = 1


def cnn0_forward(x_nchw, bands):
    """x_nchw: (N, 1, H, W) float32.  bands: prepared (banded, bf16) parameters."""
    N, C, H, W = x_nchw.shape
    assert C == 1
    H1 = H
    H2 = (H1 + 2 - 4) // 2 + 1
    H3 = (H2 + 2 - 4) // 2 + 1
    x = x_nchw.reshape(N, H, W).astype(jnp.float32)

    kernel = functools.partial(_cnn0_kernel, N=N, H1=H1, H2=H2, H3=H3, W=W)
    # Single invocation (no grid): weights are fetched to VMEM exactly once, single-buffered;
    # the batch is folded into the kernel, so on v7x only one TensorCore fetches the weights.
    out = pl.pallas_call(
        kernel,
        out_shape=jax.ShapeDtypeStruct((N, H3, W), jnp.float32),
        scratch_shapes=[
            pltpu.VMEM((H1 + 8, W), jnp.float32),        # stage-1 H-padded input
            pltpu.VMEM((H2 + 4, W * 32), jnp.float32),   # pool1 output, H-padded for 5x5
            pltpu.VMEM((H3 + 2, W * 32), jnp.float32),   # pool2 output, H-padded for 3x3
            pltpu.VMEM((H3 + 2, W * 16), jnp.float32),   # convf1 output, H-padded for 3x3
        ],
        compiler_params=pltpu.CompilerParams(
            vmem_limit_bytes=32 * 1024 * 1024,
        ),
    )(x, bands["m1"], bands["s1"], bands["m2"], bands["s2"],
      bands["mf1"], bands["sf1"], bands["mf2"], bands["sf2"])
    return out.reshape(N, 1, H3, W)


# ------------------------------- host-side parameter preparation -----------------------------

def _band_matrix(w, W):
    """w: (KH, KW, Cin, Cout).  Returns (KH, W*Cin, W*Cout) Toeplitz-banded matrices M such
    that sum_kh (H-padded input)[h+kh, :] @ M[kh] implements the 'same'-padded stride-1 conv
    in the lane-dense (H, W*C) layout (W zero-padding is implicit: out-of-range taps are 0)."""
    KH, KW, Cin, Cout = w.shape
    p = (KW - 1) // 2
    m = np.zeros((KH, W * Cin, W * Cout), np.float32)
    for kh in range(KH):
        for wo in range(W):
            for kw in range(KW):
                wi = wo + kw - p
                if 0 <= wi < W:
                    m[kh, wi * Cin:(wi + 1) * Cin, wo * Cout:(wo + 1) * Cout] = w[kh, kw]
    return m


def _fold_bn(w, b, scale, shift):
    """Fold conv bias + inference-mode BatchNorm affine into weights and a per-channel shift."""
    w = np.asarray(w, np.float32) * np.asarray(scale, np.float32)[None, None, None, :]
    s = np.asarray(shift, np.float32) + np.asarray(scale, np.float32) * np.asarray(b, np.float32)
    return w, s


def prepare_params(p, W=16):
    # Stage 1: embed 3/5/7/9 branches into one 9x9 (1 -> 32) kernel (channel order = concat order).
    w1 = np.zeros((9, 9, 1, 32), np.float32)
    w1[3:6, 3:6, :, 0:8] = np.asarray(p["w1_1"])
    w1[2:7, 2:7, :, 8:16] = np.asarray(p["w1_2"])
    w1[1:8, 1:8, :, 16:24] = np.asarray(p["w1_3"])
    w1[:, :, :, 24:32] = np.asarray(p["w1_4"])
    b1 = np.concatenate([np.asarray(p["b1_1"]), np.asarray(p["b1_2"]),
                         np.asarray(p["b1_3"]), np.asarray(p["b1_4"])])
    w1, s1 = _fold_bn(w1, b1, p["bn1_scale"], p["bn1_shift"])

    # Stage 2: embed 3/5 branches into one 5x5 (32 -> 32) kernel.
    w2 = np.zeros((5, 5, 32, 32), np.float32)
    w2[1:4, 1:4, :, 0:16] = np.asarray(p["w2_1"])
    w2[:, :, :, 16:32] = np.asarray(p["w2_2"])
    b2 = np.concatenate([np.asarray(p["b2_1"]), np.asarray(p["b2_2"])])
    w2, s2 = _fold_bn(w2, b2, p["bn2_scale"], p["bn2_shift"])

    wf1, sf1 = _fold_bn(p["wf1"], p["bf1"], p["bnf1_scale"], p["bnf1_shift"])
    wf2, sf2 = _fold_bn(p["wf2"], p["bf2"], p["bnf2_scale"], p["bnf2_shift"])

    def tile_shift(s):
        s = np.asarray(s, np.float32)
        return jnp.asarray(np.tile(s, W).reshape(1, W * s.shape[0]))

    def band_bf16(w):
        # bf16 banded weights halve the dominant HBM DMA / VMEM residency; matmuls accumulate
        # in f32 (preferred_element_type) so the folded-BN dynamic range stays safe.
        return jnp.asarray(_band_matrix(w, W), dtype=jnp.bfloat16)

    return {
        "m1": band_bf16(w1), "s1": tile_shift(s1),
        "m2": band_bf16(w2), "s2": tile_shift(s2),
        "mf1": band_bf16(wf1), "sf1": tile_shift(sf1),
        "mf2": band_bf16(wf2), "sf2": tile_shift(sf2),
    }


# ---------------------------------------- parameters ----------------------------------------

def init_conv(key, KH, KW, Cin, Cout):
    k1, k2 = jax.random.split(key)
    fan_in = Cin * KH * KW
    w = jax.random.normal(k1, (KH, KW, Cin, Cout), jnp.float32) / jnp.sqrt(float(fan_in))
    b = 0.05 * jax.random.normal(k2, (Cout,), jnp.float32)
    return w, b


def init_bn(key, C, eps=1e-5):
    k1, k2, k3, k4 = jax.random.split(key, 4)
    gamma = 1.0 + 0.1 * jax.random.normal(k1, (C,), jnp.float32)
    beta = 0.1 * jax.random.normal(k2, (C,), jnp.float32)
    mean = 0.1 * jax.random.normal(k3, (C,), jnp.float32)
    var = 1.0 + 0.1 * jax.random.uniform(k4, (C,), jnp.float32)
    scale = gamma / jnp.sqrt(var + eps)
    shift = beta - mean * scale
    return scale, shift


def init_params(key):
    ks = jax.random.split(key, 12)
    p = {}
    p["w1_1"], p["b1_1"] = init_conv(ks[0], 3, 3, 1, 8)
    p["w1_2"], p["b1_2"] = init_conv(ks[1], 5, 5, 1, 8)
    p["w1_3"], p["b1_3"] = init_conv(ks[2], 7, 7, 1, 8)
    p["w1_4"], p["b1_4"] = init_conv(ks[3], 9, 9, 1, 8)
    p["bn1_scale"], p["bn1_shift"] = init_bn(ks[4], 32)
    p["w2_1"], p["b2_1"] = init_conv(ks[5], 3, 3, 32, 16)
    p["w2_2"], p["b2_2"] = init_conv(ks[6], 5, 5, 32, 16)
    p["bn2_scale"], p["bn2_shift"] = init_bn(ks[7], 32)
    p["wf1"], p["bf1"] = init_conv(ks[8], 3, 3, 32, 16)
    p["bnf1_scale"], p["bnf1_shift"] = init_bn(ks[9], 16)
    p["wf2"], p["bf2"] = init_conv(ks[10], 3, 3, 16, 1)
    p["bnf2_scale"], p["bnf2_shift"] = init_bn(ks[11], 1)
    return p


# ------------------------------------------- main --------------------------------------------

if __name__ == "__main__":
    key = jax.random.PRNGKey(0)
    kx, kp = jax.random.split(key)
    # PyTorch input is NCHW with 1 channel: (N=2, C=1, H=16, W=16)
    x = jax.random.normal(kx, (2, 1, 16, 16), jnp.float32)
    params = init_params(kp)
    bands = prepare_params(params, W=16)

    fwd = jax.jit(cnn0_forward)
    out = jax.block_until_ready(fwd(x, bands))

    # 16 -> pool1 -> 8 -> pool2 -> 4 along H; W unchanged; final channels = 1.
    assert out.shape == (2, 1, 4, 16), out.shape
    assert out.dtype == jnp.float32
    assert bool(jnp.all(jnp.isfinite(out)))
    print("KERNEL_OK")
</pallas_src>

<mosaic_0001>
module attributes {stable_mosaic.version = 11 : i64} {
  func.func @_cnn0_kernel(%arg0: memref<2x16x16xf32, #tpu.memory_space<vmem>>, %arg1: memref<9x16x512xbf16, #tpu.memory_space<vmem>>, %arg2: memref<1x512xf32, #tpu.memory_space<vmem>>, %arg3: memref<5x512x512xbf16, #tpu.memory_space<vmem>>, %arg4: memref<1x512xf32, #tpu.memory_space<vmem>>, %arg5: memref<3x512x256xbf16, #tpu.memory_space<vmem>>, %arg6: memref<1x256xf32, #tpu.memory_space<vmem>>, %arg7: memref<3x256x16xbf16, #tpu.memory_space<vmem>>, %arg8: memref<1x16xf32, #tpu.memory_space<vmem>>, %arg9: memref<2x4x16xf32, #tpu.memory_space<vmem>>, %arg10: memref<24x16xf32, #tpu.memory_space<vmem>>, %arg11: memref<12x512xf32, #tpu.memory_space<vmem>>, %arg12: memref<6x512xf32, #tpu.memory_space<vmem>>, %arg13: memref<6x256xf32, #tpu.memory_space<vmem>>) attributes {dimension_semantics = [], scalar_prefetch = 0 : i64, scratch_operands = 4 : i64, tpu.core_type = #tpu.core_type<tc>} {
    %cst = arith.constant 0.000000e+00 : f32
    %0 = vector.broadcast %cst : f32 to vector<4x16xf32>
    %c0 = arith.constant 0 : index
    %c0_0 = arith.constant 0 : index
    %1 = vector.load %arg10[%c0, %c0_0] : memref<24x16xf32, #tpu.memory_space<vmem>>, vector<4x16xf32>
    tpu.vector_store %arg10[%c0, %c0_0], %0 {strides = array<i32>} : memref<24x16xf32, #tpu.memory_space<vmem>>, vector<4x16xf32>,
    %cst_1 = arith.constant 0.000000e+00 : f32
    %2 = vector.broadcast %cst_1 : f32 to vector<4x16xf32>
    %c20 = arith.constant 20 : index
    %c0_2 = arith.constant 0 : index
    %3 = vector.load %arg10[%c20, %c0_2] : memref<24x16xf32, #tpu.memory_space<vmem>>, vector<4x16xf32>
    tpu.vector_store %arg10[%c20, %c0_2], %2 {strides = array<i32>} : memref<24x16xf32, #tpu.memory_space<vmem>>, vector<4x16xf32>,
    %cst_3 = arith.constant 0.000000e+00 : f32
    %4 = vector.broadcast %cst_3 : f32 to vector<2x512xf32>
    %c0_4 = arith.constant 0 : index
    %c0_5 = arith.constant 0 : index
    %5 = vector.load %arg11[%c0_4, %c0_5] : memref<12x512xf32, #tpu.memory_space<vmem>>, vector<2x512xf32>
    tpu.vector_store %arg11[%c0_4, %c0_5], %4 {strides = array<i32>} : memref<12x512xf32, #tpu.memory_space<vmem>>, vector<2x512xf32>,
    %cst_6 = arith.constant 0.000000e+00 : f32
    %6 = vector.broadcast %cst_6 : f32 to vector<2x512xf32>
    %c10 = arith.constant 10 : index
    %c0_7 = arith.constant 0 : index
    %7 = vector.load %arg11[%c10, %c0_7] : memref<12x512xf32, #tpu.memory_space<vmem>>, vector<2x512xf32>
    tpu.vector_store %arg11[%c10, %c0_7], %6 {strides = array<i32>} : memref<12x512xf32, #tpu.memory_space<vmem>>, vector<2x512xf32>,
    %cst_8 = arith.constant 0.000000e+00 : f32
    %8 = vector.broadcast %cst_8 : f32 to vector<1x512xf32>
    %c0_9 = arith.constant 0 : index
    %c0_10 = arith.constant 0 : index
    %9 = vector.load %arg12[%c0_9, %c0_10] : memref<6x512xf32, #tpu.memory_space<vmem>>, vector<1x512xf32>
    tpu.vector_store %arg12[%c0_9, %c0_10], %8 {strides = array<i32>} : memref<6x512xf32, #tpu.memory_space<vmem>>, vector<1x512xf32>,
    %cst_11 = arith.constant 0.000000e+00 : f32
    %10 = vector.broadcast %cst_11 : f32 to vector<1x512xf32>
    %c5 = arith.constant 5 : index
    %c0_12 = arith.constant 0 : index
    %11 = vector.load %arg12[%c5, %c0_12] : memref<6x512xf32, #tpu.memory_space<vmem>>, vector<1x512xf32>
    tpu.vector_store %arg12[%c5, %c0_12], %10 {strides = array<i32>} : memref<6x512xf32, #tpu.memory_space<vmem>>, vector<1x512xf32>,
    %cst_13 = arith.constant 0.000000e+00 : f32
    %12 = vector.broadcast %cst_13 : f32 to vector<1x256xf32>
    %c0_14 = arith.constant 0 : index
    %c0_15 = arith.constant 0 : index
    %13 = vector.load %arg13[%c0_14, %c0_15] : memref<6x256xf32, #tpu.memory_space<vmem>>, vector<1x256xf32>
    tpu.vector_store %arg13[%c0_14, %c0_15], %12 {strides = array<i32>} : memref<6x256xf32, #tpu.memory_space<vmem>>, vector<1x256xf32>,
    %cst_16 = arith.constant 0.000000e+00 : f32
    %14 = vector.broadcast %cst_16 : f32 to vector<1x256xf32>
    %c5_17 = arith.constant 5 : index
    %c0_18 = arith.constant 0 : index
    %15 = vector.load %arg13[%c5_17, %c0_18] : memref<6x256xf32, #tpu.memory_space<vmem>>, vector<1x256xf32>
    tpu.vector_store %arg13[%c5_17, %c0_18], %14 {strides = array<i32>} : memref<6x256xf32, #tpu.memory_space<vmem>>, vector<1x256xf32>,
    %16 = tpu.iota {dimensions = array<i32: 0>} : vector<8x16xi32>
    %17 = tpu.iota {dimensions = array<i32: 1>} : vector<8x16xi32>
    %c2_i32 = arith.constant 2 : i32
    %18 = vector.broadcast %c2_i32 : i32 to vector<8x16xi32>
    %19 = arith.muli %18, %16 : vector<8x16xi32>
    %c1_i32 = arith.constant 1 : i32
    %20 = vector.broadcast %c1_i32 : i32 to vector<8x16xi32>
    %21 = arith.subi %19, %20 : vector<8x16xi32>
    %22 = arith.cmpi sge, %17, %21 : vector<8x16xi32>
    %c2_i32_19 = arith.constant 2 : i32
    %23 = vector.broadcast %c2_i32_19 : i32 to vector<8x16xi32>
    %24 = arith.muli %23, %16 : vector<8x16xi32>
    %c2_i32_20 = arith.constant 2 : i32
    %25 = vector.broadcast %c2_i32_20 : i32 to vector<8x16xi32>
    %26 = arith.addi %24, %25 : vector<8x16xi32>
    %27 = arith.cmpi sle, %17, %26 : vector<8x16xi32>
    %28 = arith.andi %22, %27 : vector<8x16xi1>
    %cst_21 = arith.constant 2.500000e-01 : f32
    %cst_22 = arith.constant 0.000000e+00 : f32
    %29 = vector.broadcast %cst_21 : f32 to vector<8x16xf32>
    %30 = vector.broadcast %cst_22 : f32 to vector<8x16xf32>
    %31 = arith.select %28, %29, %30 : vector<8x16xi1>, vector<8x16xf32>
    %32 = tpu.iota {dimensions = array<i32: 0>} : vector<4x8xi32>
    %33 = tpu.iota {dimensions = array<i32: 1>} : vector<4x8xi32>
    %c2_i32_23 = arith.constant 2 : i32
    %34 = vector.broadcast %c2_i32_23 : i32 to vector<4x8xi32>
    %35 = arith.muli %34, %32 : vector<4x8xi32>
    %c1_i32_24 = arith.constant 1 : i32
    %36 = vector.broadcast %c1_i32_24 : i32 to vector<4x8xi32>
    %37 = arith.subi %35, %36 : vector<4x8xi32>
    %38 = arith.cmpi sge, %33, %37 : vector<4x8xi32>
    %c2_i32_25 = arith.constant 2 : i32
    %39 = vector.broadcast %c2_i32_25 : i32 to vector<4x8xi32>
    %40 = arith.muli %39, %32 : vector<4x8xi32>
    %c2_i32_26 = arith.constant 2 : i32
    %41 = vector.broadcast %c2_i32_26 : i32 to vector<4x8xi32>
    %42 = arith.addi %40, %41 : vector<4x8xi32>
    %43 = arith.cmpi sle, %33, %42 : vector<4x8xi32>
    %44 = arith.andi %38, %43 : vector<4x8xi1>
    %cst_27 = arith.constant 2.500000e-01 : f32
    %cst_28 = arith.constant 0.000000e+00 : f32
    %45 = vector.broadcast %cst_27 : f32 to vector<4x8xf32>
    %46 = vector.broadcast %cst_28 : f32 to vector<4x8xf32>
    %47 = arith.select %44, %45, %46 : vector<4x8xi1>, vector<4x8xf32>
    %c0_29 = arith.constant 0 : index
    %c0_30 = arith.constant 0 : index
    %c0_31 = arith.constant 0 : index
    %48 = vector.load %arg0[%c0_29, %c0_30, %c0_31] : memref<2x16x16xf32, #tpu.memory_space<vmem>>, vector<1x16x16xf32>
    %49 = vector.shape_cast %48 : vector<1x16x16xf32> to vector<16x16xf32>
    %c4 = arith.constant 4 : index
    %c0_32 = arith.constant 0 : index
    %50 = vector.load %arg10[%c4, %c0_32] : memref<24x16xf32, #tpu.memory_space<vmem>>, vector<16x16xf32>
    tpu.vector_store %arg10[%c4, %c0_32], %49 {strides = array<i32>} : memref<24x16xf32, #tpu.memory_space<vmem>>, vector<16x16xf32>,
    %cst_33 = arith.constant 0.000000e+00 : f32
    %51 = vector.broadcast %cst_33 : f32 to vector<16x512xf32>
    %c0_34 = arith.constant 0 : index
    %c0_35 = arith.constant 0 : index
    %52 = vector.load %arg10[%c0_34, %c0_35] : memref<24x16xf32, #tpu.memory_space<vmem>>, vector<16x16xf32>
    %53 = arith.truncf %52 : vector<16x16xf32> to vector<16x16xbf16>
    %c0_36 = arith.constant 0 : index
    %c0_37 = arith.constant 0 : index
    %c0_38 = arith.constant 0 : index
    %54 = vector.load %arg1[%c0_36, %c0_37, %c0_38] : memref<9x16x512xbf16, #tpu.memory_space<vmem>>, vector<1x16x512xbf16>
    %55 = vector.shape_cast %54 : vector<1x16x512xbf16> to vector<16x512xbf16>
    %cst_39 = arith.constant dense<0.000000e+00> : vector<16x512xf32>
    %56 = tpu.matmul %53, %55, %cst_39 {dimension_numbers = #tpu.dot_dimension_numbers<[1], [0], [0], [1], [0, 0, 1, 1], [], []>} : vector<16x16xbf16>, vector<16x512xbf16>, vector<16x512xf32> -> vector<16x512xf32>
    %57 = arith.addf %51, %56 : vector<16x512xf32>
    %c1 = arith.constant 1 : index
    %c0_40 = arith.constant 0 : index
    %58 = vector.load %arg10[%c1, %c0_40] : memref<24x16xf32, #tpu.memory_space<vmem>>, vector<16x16xf32>
    %59 = arith.truncf %58 : vector<16x16xf32> to vector<16x16xbf16>
    %c1_41 = arith.constant 1 : index
    %c0_42 = arith.constant 0 : index
    %c0_43 = arith.constant 0 : index
    %60 = vector.load %arg1[%c1_41, %c0_42, %c0_43] : memref<9x16x512xbf16, #tpu.memory_space<vmem>>, vector<1x16x512xbf16>
    %61 = vector.shape_cast %60 : vector<1x16x512xbf16> to vector<16x512xbf16>
    %cst_44 = arith.constant dense<0.000000e+00> : vector<16x512xf32>
    %62 = tpu.matmul %59, %61, %cst_44 {dimension_numbers = #tpu.dot_dimension_numbers<[1], [0], [0], [1], [0, 0, 1, 1], [], []>} : vector<16x16xbf16>, vector<16x512xbf16>, vector<16x512xf32> -> vector<16x512xf32>
    %63 = arith.addf %57, %62 : vector<16x512xf32>
    %c2 = arith.constant 2 : index
    %c0_45 = arith.constant 0 : index
    %64 = vector.load %arg10[%c2, %c0_45] : memref<24x16xf32, #tpu.memory_space<vmem>>, vector<16x16xf32>
    %65 = arith.truncf %64 : vector<16x16xf32> to vector<16x16xbf16>
    %c2_46 = arith.constant 2 : index
    %c0_47 = arith.constant 0 : index
    %c0_48 = arith.constant 0 : index
    %66 = vector.load %arg1[%c2_46, %c0_47, %c0_48] : memref<9x16x512xbf16, #tpu.memory_space<vmem>>, vector<1x16x512xbf16>
    %67 = vector.shape_cast %66 : vector<1x16x512xbf16> to vector<16x512xbf16>
    %cst_49 = arith.constant dense<0.000000e+00> : vector<16x512xf32>
    %68 = tpu.matmul %65, %67, %cst_49 {dimension_numbers = #tpu.dot_dimension_numbers<[1], [0], [0], [1], [0, 0, 1, 1], [], []>} : vector<16x16xbf16>, vector<16x512xbf16>, vector<16x512xf32> -> vector<16x512xf32>
    %69 = arith.addf %63, %68 : vector<16x512xf32>
    %c3 = arith.constant 3 : index
    %c0_50 = arith.constant 0 : index
    %70 = vector.load %arg10[%c3, %c0_50] : memref<24x16xf32, #tpu.memory_space<vmem>>, vector<16x16xf32>
    %71 = arith.truncf %70 : vector<16x16xf32> to vector<16x16xbf16>
    %c3_51 = arith.constant 3 : index
    %c0_52 = arith.constant 0 : index
    %c0_53 = arith.constant 0 : index
    %72 = vector.load %arg1[%c3_51, %c0_52, %c0_53] : memref<9x16x512xbf16, #tpu.memory_space<vmem>>, vector<1x16x512xbf16>
    %73 = vector.shape_cast %72 : vector<1x16x512xbf16> to vector<16x512xbf16>
    %cst_54 = arith.constant dense<0.000000e+00> : vector<16x512xf32>
    %74 = tpu.matmul %71, %73, %cst_54 {dimension_numbers = #tpu.dot_dimension_numbers<[1], [0], [0], [1], [0, 0, 1, 1], [], []>} : vector<16x16xbf16>, vector<16x512xbf16>, vector<16x512xf32> -> vector<16x512xf32>
    %75 = arith.addf %69, %74 : vector<16x512xf32>
    %c4_55 = arith.constant 4 : index
    %c0_56 = arith.constant 0 : index
    %76 = vector.load %arg10[%c4_55, %c0_56] : memref<24x16xf32, #tpu.memory_space<vmem>>, vector<16x16xf32>
    %77 = arith.truncf %76 : vector<16x16xf32> to vector<16x16xbf16>
    %c4_57 = arith.constant 4 : index
    %c0_58 = arith.constant 0 : index
    %c0_59 = arith.constant 0 : index
    %78 = vector.load %arg1[%c4_57, %c0_58, %c0_59] : memref<9x16x512xbf16, #tpu.memory_space<vmem>>, vector<1x16x512xbf16>
    %79 = vector.shape_cast %78 : vector<1x16x512xbf16> to vector<16x512xbf16>
    %cst_60 = arith.constant dense<0.000000e+00> : vector<16x512xf32>
    %80 = tpu.matmul %77, %79, %cst_60 {dimension_numbers = #tpu.dot_dimension_numbers<[1], [0], [0], [1], [0, 0, 1, 1], [], []>} : vector<16x16xbf16>, vector<16x512xbf16>, vector<16x512xf32> -> vector<16x512xf32>
    %81 = arith.addf %75, %80 : vector<16x512xf32>
    %c5_61 = arith.constant 5 : index
    %c0_62 = arith.constant 0 : index
    %82 = vector.load %arg10[%c5_61, %c0_62] : memref<24x16xf32, #tpu.memory_space<vmem>>, vector<16x16xf32>
    %83 = arith.truncf %82 : vector<16x16xf32> to vector<16x16xbf16>
    %c5_63 = arith.constant 5 : index
    %c0_64 = arith.constant 0 : index
    %c0_65 = arith.constant 0 : index
    %84 = vector.load %arg1[%c5_63, %c0_64, %c0_65] : memref<9x16x512xbf16, #tpu.memory_space<vmem>>, vector<1x16x512xbf16>
    %85 = vector.shape_cast %84 : vector<1x16x512xbf16> to vector<16x512xbf16>
    %cst_66 = arith.constant dense<0.000000e+00> : vector<16x512xf32>
    %86 = tpu.matmul %83, %85, %cst_66 {dimension_numbers = #tpu.dot_dimension_numbers<[1], [0], [0], [1], [0, 0, 1, 1], [], []>} : vector<16x16xbf16>, vector<16x512xbf16>, vector<16x512xf32> -> vector<16x512xf32>
    %87 = arith.addf %81, %86 : vector<16x512xf32>
    %c6 = arith.constant 6 : index
    %c0_67 = arith.constant 0 : index
    %88 = vector.load %arg10[%c6, %c0_67] : memref<24x16xf32, #tpu.memory_space<vmem>>, vector<16x16xf32>
    %89 = arith.truncf %88 : vector<16x16xf32> to vector<16x16xbf16>
    %c6_68 = arith.constant 6 : index
    %c0_69 = arith.constant 0 : index
    %c0_70 = arith.constant 0 : index
    %90 = vector.load %arg1[%c6_68, %c0_69, %c0_70] : memref<9x16x512xbf16, #tpu.memory_space<vmem>>, vector<1x16x512xbf16>
    %91 = vector.shape_cast %90 : vector<1x16x512xbf16> to vector<16x512xbf16>
    %cst_71 = arith.constant dense<0.000000e+00> : vector<16x512xf32>
    %92 = tpu.matmul %89, %91, %cst_71 {dimension_numbers = #tpu.dot_dimension_numbers<[1], [0], [0], [1], [0, 0, 1, 1], [], []>} : vector<16x16xbf16>, vector<16x512xbf16>, vector<16x512xf32> -> vector<16x512xf32>
    %93 = arith.addf %87, %92 : vector<16x512xf32>
    %c7 = arith.constant 7 : index
    %c0_72 = arith.constant 0 : index
    %94 = vector.load %arg10[%c7, %c0_72] : memref<24x16xf32, #tpu.memory_space<vmem>>, vector<16x16xf32>
    %95 = arith.truncf %94 : vector<16x16xf32> to vector<16x16xbf16>
    %c7_73 = arith.constant 7 : index
    %c0_74 = arith.constant 0 : index
    %c0_75 = arith.constant 0 : index
    %96 = vector.load %arg1[%c7_73, %c0_74, %c0_75] : memref<9x16x512xbf16, #tpu.memory_space<vmem>>, vector<1x16x512xbf16>
    %97 = vector.shape_cast %96 : vector<1x16x512xbf16> to vector<16x512xbf16>
    %cst_76 = arith.constant dense<0.000000e+00> : vector<16x512xf32>
    %98 = tpu.matmul %95, %97, %cst_76 {dimension_numbers = #tpu.dot_dimension_numbers<[1], [0], [0], [1], [0, 0, 1, 1], [], []>} : vector<16x16xbf16>, vector<16x512xbf16>, vector<16x512xf32> -> vector<16x512xf32>
    %99 = arith.addf %93, %98 : vector<16x512xf32>
    %c8 = arith.constant 8 : index
    %c0_77 = arith.constant 0 : index
    %100 = vector.load %arg10[%c8, %c0_77] : memref<24x16xf32, #tpu.memory_space<vmem>>, vector<16x16xf32>
    %101 = arith.truncf %100 : vector<16x16xf32> to vector<16x16xbf16>
    %c8_78 = arith.constant 8 : index
    %c0_79 = arith.constant 0 : index
    %c0_80 = arith.constant 0 : index
    %102 = vector.load %arg1[%c8_78, %c0_79, %c0_80] : memref<9x16x512xbf16, #tpu.memory_space<vmem>>, vector<1x16x512xbf16>
    %103 = vector.shape_cast %102 : vector<1x16x512xbf16> to vector<16x512xbf16>
    %cst_81 = arith.constant dense<0.000000e+00> : vector<16x512xf32>
    %104 = tpu.matmul %101, %103, %cst_81 {dimension_numbers = #tpu.dot_dimension_numbers<[1], [0], [0], [1], [0, 0, 1, 1], [], []>} : vector<16x16xbf16>, vector<16x512xbf16>, vector<16x512xf32> -> vector<16x512xf32>
    %105 = arith.addf %99, %104 : vector<16x512xf32>
    %c0_82 = arith.constant 0 : index
    %c0_83 = arith.constant 0 : index
    %106 = vector.load %arg2[%c0_82, %c0_83] : memref<1x512xf32, #tpu.memory_space<vmem>>, vector<1x512xf32>
    %107 = vector.broadcast %106 : vector<1x512xf32> to vector<16x512xf32>
    %108 = arith.addf %105, %107 : vector<16x512xf32>
    %cst_84 = arith.constant 0.000000e+00 : f32
    %109 = vector.broadcast %cst_84 : f32 to vector<16x512xf32>
    %110 = arith.maximumf %108, %109 : vector<16x512xf32>
    %cst_85 = arith.constant dense<0.000000e+00> : vector<8x512xf32>
    %111 = tpu.matmul %31, %110, %cst_85 {dimension_numbers = #tpu.dot_dimension_numbers<[1], [0], [0], [1], [0, 0, 1, 1], [], []>} : vector<8x16xf32>, vector<16x512xf32>, vector<8x512xf32> -> vector<8x512xf32>
    %c2_86 = arith.constant 2 : index
    %c0_87 = arith.constant 0 : index
    %112 = vector.load %arg11[%c2_86, %c0_87] : memref<12x512xf32, #tpu.memory_space<vmem>>, vector<8x512xf32>
    tpu.vector_store %arg11[%c2_86, %c0_87], %111 {strides = array<i32>} : memref<12x512xf32, #tpu.memory_space<vmem>>, vector<8x512xf32>,
    %cst_88 = arith.constant 0.000000e+00 : f32
    %113 = vector.broadcast %cst_88 : f32 to vector<8x512xf32>
    %c0_89 = arith.constant 0 : index
    %c0_90 = arith.constant 0 : index
    %114 = vector.load %arg11[%c0_89, %c0_90] : memref<12x512xf32, #tpu.memory_space<vmem>>, vector<8x512xf32>
    %115 = arith.truncf %114 : vector<8x512xf32> to vector<8x512xbf16>
    %c0_91 = arith.constant 0 : index
    %c0_92 = arith.constant 0 : index
    %c0_93 = arith.constant 0 : index
    %116 = vector.load %arg3[%c0_91, %c0_92, %c0_93] : memref<5x512x512xbf16, #tpu.memory_space<vmem>>, vector<1x512x512xbf16>
    %117 = vector.shape_cast %116 : vector<1x512x512xbf16> to vector<512x512xbf16>
    %cst_94 = arith.constant dense<0.000000e+00> : vector<8x512xf32>
    %118 = tpu.matmul %115, %117, %cst_94 {dimension_numbers = #tpu.dot_dimension_numbers<[1], [0], [0], [1], [0, 0, 1, 1], [], []>} : vector<8x512xbf16>, vector<512x512xbf16>, vector<8x512xf32> -> vector<8x512xf32>
    %119 = arith.addf %113, %118 : vector<8x512xf32>
    %c1_95 = arith.constant 1 : index
    %c0_96 = arith.constant 0 : index
    %120 = vector.load %arg11[%c1_95, %c0_96] : memref<12x512xf32, #tpu.memory_space<vmem>>, vector<8x512xf32>
    %121 = arith.truncf %120 : vector<8x512xf32> to vector<8x512xbf16>
    %c1_97 = arith.constant 1 : index
    %c0_98 = arith.constant 0 : index
    %c0_99 = arith.constant 0 : index
    %122 = vector.load %arg3[%c1_97, %c0_98, %c0_99] : memref<5x512x512xbf16, #tpu.memory_space<vmem>>, vector<1x512x512xbf16>
    %123 = vector.shape_cast %122 : vector<1x512x512xbf16> to vector<512x512xbf16>
    %cst_100 = arith.constant dense<0.000000e+00> : vector<8x512xf32>
    %124 = tpu.matmul %121, %123, %cst_100 {dimension_numbers = #tpu.dot_dimension_numbers<[1], [0], [0], [1], [0, 0, 1, 1], [], []>} : vector<8x512xbf16>, vector<512x512xbf16>, vector<8x512xf32> -> vector<8x512xf32>
    %125 = arith.addf %119, %124 : vector<8x512xf32>
    %c2_101 = arith.constant 2 : index
    %c0_102 = arith.constant 0 : index
    %126 = vector.load %arg11[%c2_101, %c0_102] : memref<12x512xf32, #tpu.memory_space<vmem>>, vector<8x512xf32>
    %127 = arith.truncf %126 : vector<8x512xf32> to vector<8x512xbf16>
    %c2_103 = arith.constant 2 : index
    %c0_104 = arith.constant 0 : index
    %c0_105 = arith.constant 0 : index
    %128 = vector.load %arg3[%c2_103, %c0_104, %c0_105] : memref<5x512x512xbf16, #tpu.memory_space<vmem>>, vector<1x512x512xbf16>
    %129 = vector.shape_cast %128 : vector<1x512x512xbf16> to vector<512x512xbf16>
    %cst_106 = arith.constant dense<0.000000e+00> : vector<8x512xf32>
    %130 = tpu.matmul %127, %129, %cst_106 {dimension_numbers = #tpu.dot_dimension_numbers<[1], [0], [0], [1], [0, 0, 1, 1], [], []>} : vector<8x512xbf16>, vector<512x512xbf16>, vector<8x512xf32> -> vector<8x512xf32>
    %131 = arith.addf %125, %130 : vector<8x512xf32>
    %c3_107 = arith.constant 3 : index
    %c0_108 = arith.constant 0 : index
    %132 = vector.load %arg11[%c3_107, %c0_108] : memref<12x512xf32, #tpu.memory_space<vmem>>, vector<8x512xf32>
    %133 = arith.truncf %132 : vector<8x512xf32> to vector<8x512xbf16>
    %c3_109 = arith.constant 3 : index
    %c0_110 = arith.constant 0 : index
    %c0_111 = arith.constant 0 : index
    %134 = vector.load %arg3[%c3_109, %c0_110, %c0_111] : memref<5x512x512xbf16, #tpu.memory_space<vmem>>, vector<1x512x512xbf16>
    %135 = vector.shape_cast %134 : vector<1x512x512xbf16> to vector<512x512xbf16>
    %cst_112 = arith.constant dense<0.000000e+00> : vector<8x512xf32>
    %136 = tpu.matmul %133, %135, %cst_112 {dimension_numbers = #tpu.dot_dimension_numbers<[1], [0], [0], [1], [0, 0, 1, 1], [], []>} : vector<8x512xbf16>, vector<512x512xbf16>, vector<8x512xf32> -> vector<8x512xf32>
    %137 = arith.addf %131, %136 : vector<8x512xf32>
    %c4_113 = arith.constant 4 : index
    %c0_114 = arith.constant 0 : index
    %138 = vector.load %arg11[%c4_113, %c0_114] : memref<12x512xf32, #tpu.memory_space<vmem>>, vector<8x512xf32>
    %139 = arith.truncf %138 : vector<8x512xf32> to vector<8x512xbf16>
    %c4_115 = arith.constant 4 : index
    %c0_116 = arith.constant 0 : index
    %c0_117 = arith.constant 0 : index
    %140 = vector.load %arg3[%c4_115, %c0_116, %c0_117] : memref<5x512x512xbf16, #tpu.memory_space<vmem>>, vector<1x512x512xbf16>
    %141 = vector.shape_cast %140 : vector<1x512x512xbf16> to vector<512x512xbf16>
    %cst_118 = arith.constant dense<0.000000e+00> : vector<8x512xf32>
    %142 = tpu.matmul %139, %141, %cst_118 {dimension_numbers = #tpu.dot_dimension_numbers<[1], [0], [0], [1], [0, 0, 1, 1], [], []>} : vector<8x512xbf16>, vector<512x512xbf16>, vector<8x512xf32> -> vector<8x512xf32>
    %143 = arith.addf %137, %142 : vector<8x512xf32>
    %c0_119 = arith.constant 0 : index
    %c0_120 = arith.constant 0 : index
    %144 = vector.load %arg4[%c0_119, %c0_120] : memref<1x512xf32, #tpu.memory_space<vmem>>, vector<1x512xf32>
    %145 = vector.broadcast %144 : vector<1x512xf32> to vector<8x512xf32>
    %146 = arith.addf %143, %145 : vector<8x512xf32>
    %cst_121 = arith.constant 0.000000e+00 : f32
    %147 = vector.broadcast %cst_121 : f32 to vector<8x512xf32>
    %148 = arith.maximumf %146, %147 : vector<8x512xf32>
    %cst_122 = arith.constant dense<0.000000e+00> : vector<4x512xf32>
    %149 = tpu.matmul %47, %148, %cst_122 {dimension_numbers = #tpu.dot_dimension_numbers<[1], [0], [0], [1], [0, 0, 1, 1], [], []>} : vector<4x8xf32>, vector<8x512xf32>, vector<4x512xf32> -> vector<4x512xf32>
    %c1_123 = arith.constant 1 : index
    %c0_124 = arith.constant 0 : index
    %150 = vector.load %arg12[%c1_123, %c0_124] : memref<6x512xf32, #tpu.memory_space<vmem>>, vector<4x512xf32>
    tpu.vector_store %arg12[%c1_123, %c0_124], %149 {strides = array<i32>} : memref<6x512xf32, #tpu.memory_space<vmem>>, vector<4x512xf32>,
    %cst_125 = arith.constant 0.000000e+00 : f32
    %151 = vector.broadcast %cst_125 : f32 to vector<4x256xf32>
    %c0_126 = arith.constant 0 : index
    %c0_127 = arith.constant 0 : index
    %152 = vector.load %arg12[%c0_126, %c0_127] : memref<6x512xf32, #tpu.memory_space<vmem>>, vector<4x512xf32>
    %153 = arith.truncf %152 : vector<4x512xf32> to vector<4x512xbf16>
    %c0_128 = arith.constant 0 : index
    %c0_129 = arith.constant 0 : index
    %c0_130 = arith.constant 0 : index
    %154 = vector.load %arg5[%c0_128, %c0_129, %c0_130] : memref<3x512x256xbf16, #tpu.memory_space<vmem>>, vector<1x512x256xbf16>
    %155 = vector.shape_cast %154 : vector<1x512x256xbf16> to vector<512x256xbf16>
    %cst_131 = arith.constant dense<0.000000e+00> : vector<4x256xf32>
    %156 = tpu.matmul %153, %155, %cst_131 {dimension_numbers = #tpu.dot_dimension_numbers<[1], [0], [0], [1], [0, 0, 1, 1], [], []>} : vector<4x512xbf16>, vector<512x256xbf16>, vector<4x256xf32> -> vector<4x256xf32>
    %157 = arith.addf %151, %156 : vector<4x256xf32>
    %c1_132 = arith.constant 1 : index
    %c0_133 = arith.constant 0 : index
    %158 = vector.load %arg12[%c1_132, %c0_133] : memref<6x512xf32, #tpu.memory_space<vmem>>, vector<4x512xf32>
    %159 = arith.truncf %158 : vector<4x512xf32> to vector<4x512xbf16>
    %c1_134 = arith.constant 1 : index
    %c0_135 = arith.constant 0 : index
    %c0_136 = arith.constant 0 : index
    %160 = vector.load %arg5[%c1_134, %c0_135, %c0_136] : memref<3x512x256xbf16, #tpu.memory_space<vmem>>, vector<1x512x256xbf16>
    %161 = vector.shape_cast %160 : vector<1x512x256xbf16> to vector<512x256xbf16>
    %cst_137 = arith.constant dense<0.000000e+00> : vector<4x256xf32>
    %162 = tpu.matmul %159, %161, %cst_137 {dimension_numbers = #tpu.dot_dimension_numbers<[1], [0], [0], [1], [0, 0, 1, 1], [], []>} : vector<4x512xbf16>, vector<512x256xbf16>, vector<4x256xf32> -> vector<4x256xf32>
    %163 = arith.addf %157, %162 : vector<4x256xf32>
    %c2_138 = arith.constant 2 : index
    %c0_139 = arith.constant 0 : index
    %164 = vector.load %arg12[%c2_138, %c0_139] : memref<6x512xf32, #tpu.memory_space<vmem>>, vector<4x512xf32>
    %165 = arith.truncf %164 : vector<4x512xf32> to vector<4x512xbf16>
    %c2_140 = arith.constant 2 : index
    %c0_141 = arith.constant 0 : index
    %c0_142 = arith.constant 0 : index
    %166 = vector.load %arg5[%c2_140, %c0_141, %c0_142] : memref<3x512x256xbf16, #tpu.memory_space<vmem>>, vector<1x512x256xbf16>
    %167 = vector.shape_cast %166 : vector<1x512x256xbf16> to vector<512x256xbf16>
    %cst_143 = arith.constant dense<0.000000e+00> : vector<4x256xf32>
    %168 = tpu.matmul %165, %167, %cst_143 {dimension_numbers = #tpu.dot_dimension_numbers<[1], [0], [0], [1], [0, 0, 1, 1], [], []>} : vector<4x512xbf16>, vector<512x256xbf16>, vector<4x256xf32> -> vector<4x256xf32>
    %169 = arith.addf %163, %168 : vector<4x256xf32>
    %c0_144 = arith.constant 0 : index
    %c0_145 = arith.constant 0 : index
    %170 = vector.load %arg6[%c0_144, %c0_145] : memref<1x256xf32, #tpu.memory_space<vmem>>, vector<1x256xf32>
    %171 = vector.broadcast %170 : vector<1x256xf32> to vector<4x256xf32>
    %172 = arith.addf %169, %171 : vector<4x256xf32>
    %cst_146 = arith.constant 0.000000e+00 : f32
    %173 = vector.broadcast %cst_146 : f32 to vector<4x256xf32>
    %174 = arith.cmpf oge, %172, %173 : vector<4x256xf32>
    %cst_147 = arith.constant 0.00999999977 : f32
    %175 = vector.broadcast %cst_147 : f32 to vector<4x256xf32>
    %176 = arith.mulf %175, %172 : vector<4x256xf32>
    %177 = arith.select %174, %172, %176 : vector<4x256xi1>, vector<4x256xf32>
    %c1_148 = arith.constant 1 : index
    %c0_149 = arith.constant 0 : index
    %178 = vector.load %arg13[%c1_148, %c0_149] : memref<6x256xf32, #tpu.memory_space<vmem>>, vector<4x256xf32>
    tpu.vector_store %arg13[%c1_148, %c0_149], %177 {strides = array<i32>} : memref<6x256xf32, #tpu.memory_space<vmem>>, vector<4x256xf32>,
    %cst_150 = arith.constant 0.000000e+00 : f32
    %179 = vector.broadcast %cst_150 : f32 to vector<4x16xf32>
    %c0_151 = arith.constant 0 : index
    %c0_152 = arith.constant 0 : index
    %180 = vector.load %arg13[%c0_151, %c0_152] : memref<6x256xf32, #tpu.memory_space<vmem>>, vector<4x256xf32>
    %181 = arith.truncf %180 : vector<4x256xf32> to vector<4x256xbf16>
    %c0_153 = arith.constant 0 : index
    %c0_154 = arith.constant 0 : index
    %c0_155 = arith.constant 0 : index
    %182 = vector.load %arg7[%c0_153, %c0_154, %c0_155] : memref<3x256x16xbf16, #tpu.memory_space<vmem>>, vector<1x256x16xbf16>
    %183 = vector.shape_cast %182 : vector<1x256x16xbf16> to vector<256x16xbf16>
    %cst_156 = arith.constant dense<0.000000e+00> : vector<4x16xf32>
    %184 = tpu.matmul %181, %183, %cst_156 {dimension_numbers = #tpu.dot_dimension_numbers<[1], [0], [0], [1], [0, 0, 1, 1], [], []>} : vector<4x256xbf16>, vector<256x16xbf16>, vector<4x16xf32> -> vector<4x16xf32>
    %185 = arith.addf %179, %184 : vector<4x16xf32>
    %c1_157 = arith.constant 1 : index
    %c0_158 = arith.constant 0 : index
    %186 = vector.load %arg13[%c1_157, %c0_158] : memref<6x256xf32, #tpu.memory_space<vmem>>, vector<4x256xf32>
    %187 = arith.truncf %186 : vector<4x256xf32> to vector<4x256xbf16>
    %c1_159 = arith.constant 1 : index
    %c0_160 = arith.constant 0 : index
    %c0_161 = arith.constant 0 : index
    %188 = vector.load %arg7[%c1_159, %c0_160, %c0_161] : memref<3x256x16xbf16, #tpu.memory_space<vmem>>, vector<1x256x16xbf16>
    %189 = vector.shape_cast %188 : vector<1x256x16xbf16> to vector<256x16xbf16>
    %cst_162 = arith.constant dense<0.000000e+00> : vector<4x16xf32>
    %190 = tpu.matmul %187, %189, %cst_162 {dimension_numbers = #tpu.dot_dimension_numbers<[1], [0], [0], [1], [0, 0, 1, 1], [], []>} : vector<4x256xbf16>, vector<256x16xbf16>, vector<4x16xf32> -> vector<4x16xf32>
    %191 = arith.addf %185, %190 : vector<4x16xf32>
    %c2_163 = arith.constant 2 : index
    %c0_164 = arith.constant 0 : index
    %192 = vector.load %arg13[%c2_163, %c0_164] : memref<6x256xf32, #tpu.memory_space<vmem>>, vector<4x256xf32>
    %193 = arith.truncf %192 : vector<4x256xf32> to vector<4x256xbf16>
    %c2_165 = arith.constant 2 : index
    %c0_166 = arith.constant 0 : index
    %c0_167 = arith.constant 0 : index
    %194 = vector.load %arg7[%c2_165, %c0_166, %c0_167] : memref<3x256x16xbf16, #tpu.memory_space<vmem>>, vector<1x256x16xbf16>
    %195 = vector.shape_cast %194 : vector<1x256x16xbf16> to vector<256x16xbf16>
    %cst_168 = arith.constant dense<0.000000e+00> : vector<4x16xf32>
    %196 = tpu.matmul %193, %195, %cst_168 {dimension_numbers = #tpu.dot_dimension_numbers<[1], [0], [0], [1], [0, 0, 1, 1], [], []>} : vector<4x256xbf16>, vector<256x16xbf16>, vector<4x16xf32> -> vector<4x16xf32>
    %197 = arith.addf %191, %196 : vector<4x16xf32>
    %c0_169 = arith.constant 0 : index
    %c0_170 = arith.constant 0 : index
    %198 = vector.load %arg8[%c0_169, %c0_170] : memref<1x16xf32, #tpu.memory_space<vmem>>, vector<1x16xf32>
    %199 = vector.broadcast %198 : vector<1x16xf32> to vector<4x16xf32>
    %200 = arith.addf %197, %199 : vector<4x16xf32>
    %cst_171 = arith.constant 0.000000e+00 : f32
    %201 = vector.broadcast %cst_171 : f32 to vector<4x16xf32>
    %202 = arith.cmpf oge, %200, %201 : vector<4x16xf32>
    %cst_172 = arith.constant 0.00999999977 : f32
    %203 = vector.broadcast %cst_172 : f32 to vector<4x16xf32>
    %204 = arith.mulf %203, %200 : vector<4x16xf32>
    %205 = arith.select %202, %200, %204 : vector<4x16xi1>, vector<4x16xf32>
    %c0_173 = arith.constant 0 : index
    %c0_174 = arith.constant 0 : index
    %c0_175 = arith.constant 0 : index
    %206 = vector.load %arg9[%c0_173, %c0_174, %c0_175] : memref<2x4x16xf32, #tpu.memory_space<vmem>>, vector<1x4x16xf32>
    %207 = vector.shape_cast %206 : vector<1x4x16xf32> to vector<4x16xf32>
    %208 = vector.shape_cast %205 : vector<4x16xf32> to vector<1x4x16xf32>
    tpu.vector_store %arg9[%c0_173, %c0_174, %c0_175], %208 {strides = array<i32>} : memref<2x4x16xf32, #tpu.memory_space<vmem>>, vector<1x4x16xf32>,
    %c1_176 = arith.constant 1 : index
    %c0_177 = arith.constant 0 : index
    %c0_178 = arith.constant 0 : index
    %209 = vector.load %arg0[%c1_176, %c0_177, %c0_178] : memref<2x16x16xf32, #tpu.memory_space<vmem>>, vector<1x16x16xf32>
    %210 = vector.shape_cast %209 : vector<1x16x16xf32> to vector<16x16xf32>
    %c4_179 = arith.constant 4 : index
    %c0_180 = arith.constant 0 : index
    %211 = vector.load %arg10[%c4_179, %c0_180] : memref<24x16xf32, #tpu.memory_space<vmem>>, vector<16x16xf32>
    tpu.vector_store %arg10[%c4_179, %c0_180], %210 {strides = array<i32>} : memref<24x16xf32, #tpu.memory_space<vmem>>, vector<16x16xf32>,
    %cst_181 = arith.constant 0.000000e+00 : f32
    %212 = vector.broadcast %cst_181 : f32 to vector<16x512xf32>
    %c0_182 = arith.constant 0 : index
    %c0_183 = arith.constant 0 : index
    %213 = vector.load %arg10[%c0_182, %c0_183] : memref<24x16xf32, #tpu.memory_space<vmem>>, vector<16x16xf32>
    %214 = arith.truncf %213 : vector<16x16xf32> to vector<16x16xbf16>
    %c0_184 = arith.constant 0 : index
    %c0_185 = arith.constant 0 : index
    %c0_186 = arith.constant 0 : index
    %215 = vector.load %arg1[%c0_184, %c0_185, %c0_186] : memref<9x16x512xbf16, #tpu.memory_space<vmem>>, vector<1x16x512xbf16>
    %216 = vector.shape_cast %215 : vector<1x16x512xbf16> to vector<16x512xbf16>
    %cst_187 = arith.constant dense<0.000000e+00> : vector<16x512xf32>
    %217 = tpu.matmul %214, %216, %cst_187 {dimension_numbers = #tpu.dot_dimension_numbers<[1], [0], [0], [1], [0, 0, 1, 1], [], []>} : vector<16x16xbf16>, vector<16x512xbf16>, vector<16x512xf32> -> vector<16x512xf32>
    %218 = arith.addf %212, %217 : vector<16x512xf32>
    %c1_188 = arith.constant 1 : index
    %c0_189 = arith.constant 0 : index
    %219 = vector.load %arg10[%c1_188, %c0_189] : memref<24x16xf32, #tpu.memory_space<vmem>>, vector<16x16xf32>
    %220 = arith.truncf %219 : vector<16x16xf32> to vector<16x16xbf16>
    %c1_190 = arith.constant 1 : index
    %c0_191 = arith.constant 0 : index
    %c0_192 = arith.constant 0 : index
    %221 = vector.load %arg1[%c1_190, %c0_191, %c0_192] : memref<9x16x512xbf16, #tpu.memory_space<vmem>>, vector<1x16x512xbf16>
    %222 = vector.shape_cast %221 : vector<1x16x512xbf16> to vector<16x512xbf16>
    %cst_193 = arith.constant dense<0.000000e+00> : vector<16x512xf32>
    %223 = tpu.matmul %220, %222, %cst_193 {dimension_numbers = #tpu.dot_dimension_numbers<[1], [0], [0], [1], [0, 0, 1, 1], [], []>} : vector<16x16xbf16>, vector<16x512xbf16>, vector<16x512xf32> -> vector<16x512xf32>
    %224 = arith.addf %218, %223 : vector<16x512xf32>
    %c2_194 = arith.constant 2 : index
    %c0_195 = arith.constant 0 : index
    %225 = vector.load %arg10[%c2_194, %c0_195] : memref<24x16xf32, #tpu.memory_space<vmem>>, vector<16x16xf32>
    %226 = arith.truncf %225 : vector<16x16xf32> to vector<16x16xbf16>
    %c2_196 = arith.constant 2 : index
    %c0_197 = arith.constant 0 : index
    %c0_198 = arith.constant 0 : index
    %227 = vector.load %arg1[%c2_196, %c0_197, %c0_198] : memref<9x16x512xbf16, #tpu.memory_space<vmem>>, vector<1x16x512xbf16>
    %228 = vector.shape_cast %227 : vector<1x16x512xbf16> to vector<16x512xbf16>
    %cst_199 = arith.constant dense<0.000000e+00> : vector<16x512xf32>
    %229 = tpu.matmul %226, %228, %cst_199 {dimension_numbers = #tpu.dot_dimension_numbers<[1], [0], [0], [1], [0, 0, 1, 1], [], []>} : vector<16x16xbf16>, vector<16x512xbf16>, vector<16x512xf32> -> vector<16x512xf32>
    %230 = arith.addf %224, %229 : vector<16x512xf32>
    %c3_200 = arith.constant 3 : index
    %c0_201 = arith.constant 0 : index
    %231 = vector.load %arg10[%c3_200, %c0_201] : memref<24x16xf32, #tpu.memory_space<vmem>>, vector<16x16xf32>
    %232 = arith.truncf %231 : vector<16x16xf32> to vector<16x16xbf16>
    %c3_202 = arith.constant 3 : index
    %c0_203 = arith.constant 0 : index
    %c0_204 = arith.constant 0 : index
    %233 = vector.load %arg1[%c3_202, %c0_203, %c0_204] : memref<9x16x512xbf16, #tpu.memory_space<vmem>>, vector<1x16x512xbf16>
    %234 = vector.shape_cast %233 : vector<1x16x512xbf16> to vector<16x512xbf16>
    %cst_205 = arith.constant dense<0.000000e+00> : vector<16x512xf32>
    %235 = tpu.matmul %232, %234, %cst_205 {dimension_numbers = #tpu.dot_dimension_numbers<[1], [0], [0], [1], [0, 0, 1, 1], [], []>} : vector<16x16xbf16>, vector<16x512xbf16>, vector<16x512xf32> -> vector<16x512xf32>
    %236 = arith.addf %230, %235 : vector<16x512xf32>
    %c4_206 = arith.constant 4 : index
    %c0_207 = arith.constant 0 : index
    %237 = vector.load %arg10[%c4_206, %c0_207] : memref<24x16xf32, #tpu.memory_space<vmem>>, vector<16x16xf32>
    %238 = arith.truncf %237 : vector<16x16xf32> to vector<16x16xbf16>
    %c4_208 = arith.constant 4 : index
    %c0_209 = arith.constant 0 : index
    %c0_210 = arith.constant 0 : index
    %239 = vector.load %arg1[%c4_208, %c0_209, %c0_210] : memref<9x16x512xbf16, #tpu.memory_space<vmem>>, vector<1x16x512xbf16>
    %240 = vector.shape_cast %239 : vector<1x16x512xbf16> to vector<16x512xbf16>
    %cst_211 = arith.constant dense<0.000000e+00> : vector<16x512xf32>
    %241 = tpu.matmul %238, %240, %cst_211 {dimension_numbers = #tpu.dot_dimension_numbers<[1], [0], [0], [1], [0, 0, 1, 1], [], []>} : vector<16x16xbf16>, vector<16x512xbf16>, vector<16x512xf32> -> vector<16x512xf32>
    %242 = arith.addf %236, %241 : vector<16x512xf32>
    %c5_212 = arith.constant 5 : index
    %c0_213 = arith.constant 0 : index
    %243 = vector.load %arg10[%c5_212, %c0_213] : memref<24x16xf32, #tpu.memory_space<vmem>>, vector<16x16xf32>
    %244 = arith.truncf %243 : vector<16x16xf32> to vector<16x16xbf16>
    %c5_214 = arith.constant 5 : index
    %c0_215 = arith.constant 0 : index
    %c0_216 = arith.constant 0 : index
    %245 = vector.load %arg1[%c5_214, %c0_215, %c0_216] : memref<9x16x512xbf16, #tpu.memory_space<vmem>>, vector<1x16x512xbf16>
    %246 = vector.shape_cast %245 : vector<1x16x512xbf16> to vector<16x512xbf16>
    %cst_217 = arith.constant dense<0.000000e+00> : vector<16x512xf32>
    %247 = tpu.matmul %244, %246, %cst_217 {dimension_numbers = #tpu.dot_dimension_numbers<[1], [0], [0], [1], [0, 0, 1, 1], [], []>} : vector<16x16xbf16>, vector<16x512xbf16>, vector<16x512xf32> -> vector<16x512xf32>
    %248 = arith.addf %242, %247 : vector<16x512xf32>
    %c6_218 = arith.constant 6 : index
    %c0_219 = arith.constant 0 : index
    %249 = vector.load %arg10[%c6_218, %c0_219] : memref<24x16xf32, #tpu.memory_space<vmem>>, vector<16x16xf32>
    %250 = arith.truncf %249 : vector<16x16xf32> to vector<16x16xbf16>
    %c6_220 = arith.constant 6 : index
    %c0_221 = arith.constant 0 : index
    %c0_222 = arith.constant 0 : index
    %251 = vector.load %arg1[%c6_220, %c0_221, %c0_222] : memref<9x16x512xbf16, #tpu.memory_space<vmem>>, vector<1x16x512xbf16>
    %252 = vector.shape_cast %251 : vector<1x16x512xbf16> to vector<16x512xbf16>
    %cst_223 = arith.constant dense<0.000000e+00> : vector<16x512xf32>
    %253 = tpu.matmul %250, %252, %cst_223 {dimension_numbers = #tpu.dot_dimension_numbers<[1], [0], [0], [1], [0, 0, 1, 1], [], []>} : vector<16x16xbf16>, vector<16x512xbf16>, vector<16x512xf32> -> vector<16x512xf32>
    %254 = arith.addf %248, %253 : vector<16x512xf32>
    %c7_224 = arith.constant 7 : index
    %c0_225 = arith.constant 0 : index
    %255 = vector.load %arg10[%c7_224, %c0_225] : memref<24x16xf32, #tpu.memory_space<vmem>>, vector<16x16xf32>
    %256 = arith.truncf %255 : vector<16x16xf32> to vector<16x16xbf16>
    %c7_226 = arith.constant 7 : index
    %c0_227 = arith.constant 0 : index
    %c0_228 = arith.constant 0 : index
    %257 = vector.load %arg1[%c7_226, %c0_227, %c0_228] : memref<9x16x512xbf16, #tpu.memory_space<vmem>>, vector<1x16x512xbf16>
    %258 = vector.shape_cast %257 : vector<1x16x512xbf16> to vector<16x512xbf16>
    %cst_229 = arith.constant dense<0.000000e+00> : vector<16x512xf32>
    %259 = tpu.matmul %256, %258, %cst_229 {dimension_numbers = #tpu.dot_dimension_numbers<[1], [0], [0], [1], [0, 0, 1, 1], [], []>} : vector<16x16xbf16>, vector<16x512xbf16>, vector<16x512xf32> -> vector<16x512xf32>
    %260 = arith.addf %254, %259 : vector<16x512xf32>
    %c8_230 = arith.constant 8 : index
    %c0_231 = arith.constant 0 : index
    %261 = vector.load %arg10[%c8_230, %c0_231] : memref<24x16xf32, #tpu.memory_space<vmem>>, vector<16x16xf32>
    %262 = arith.truncf %261 : vector<16x16xf32> to vector<16x16xbf16>
    %c8_232 = arith.constant 8 : index
    %c0_233 = arith.constant 0 : index
    %c0_234 = arith.constant 0 : index
    %263 = vector.load %arg1[%c8_232, %c0_233, %c0_234] : memref<9x16x512xbf16, #tpu.memory_space<vmem>>, vector<1x16x512xbf16>
    %264 = vector.shape_cast %263 : vector<1x16x512xbf16> to vector<16x512xbf16>
    %cst_235 = arith.constant dense<0.000000e+00> : vector<16x512xf32>
    %265 = tpu.matmul %262, %264, %cst_235 {dimension_numbers = #tpu.dot_dimension_numbers<[1], [0], [0], [1], [0, 0, 1, 1], [], []>} : vector<16x16xbf16>, vector<16x512xbf16>, vector<16x512xf32> -> vector<16x512xf32>
    %266 = arith.addf %260, %265 : vector<16x512xf32>
    %c0_236 = arith.constant 0 : index
    %c0_237 = arith.constant 0 : index
    %267 = vector.load %arg2[%c0_236, %c0_237] : memref<1x512xf32, #tpu.memory_space<vmem>>, vector<1x512xf32>
    %268 = vector.broadcast %267 : vector<1x512xf32> to vector<16x512xf32>
    %269 = arith.addf %266, %268 : vector<16x512xf32>
    %cst_238 = arith.constant 0.000000e+00 : f32
    %270 = vector.broadcast %cst_238 : f32 to vector<16x512xf32>
    %271 = arith.maximumf %269, %270 : vector<16x512xf32>
    %cst_239 = arith.constant dense<0.000000e+00> : vector<8x512xf32>
    %272 = tpu.matmul %31, %271, %cst_239 {dimension_numbers = #tpu.dot_dimension_numbers<[1], [0], [0], [1], [0, 0, 1, 1], [], []>} : vector<8x16xf32>, vector<16x512xf32>, vector<8x512xf32> -> vector<8x512xf32>
    %c2_240 = arith.constant 2 : index
    %c0_241 = arith.constant 0 : index
    %273 = vector.load %arg11[%c2_240, %c0_241] : memref<12x512xf32, #tpu.memory_space<vmem>>, vector<8x512xf32>
    tpu.vector_store %arg11[%c2_240, %c0_241], %272 {strides = array<i32>} : memref<12x512xf32, #tpu.memory_space<vmem>>, vector<8x512xf32>,
    %cst_242 = arith.constant 0.000000e+00 : f32
    %274 = vector.broadcast %cst_242 : f32 to vector<8x512xf32>
    %c0_243 = arith.constant 0 : index
    %c0_244 = arith.constant 0 : index
    %275 = vector.load %arg11[%c0_243, %c0_244] : memref<12x512xf32, #tpu.memory_space<vmem>>, vector<8x512xf32>
    %276 = arith.truncf %275 : vector<8x512xf32> to vector<8x512xbf16>
    %c0_245 = arith.constant 0 : index
    %c0_246 = arith.constant 0 : index
    %c0_247 = arith.constant 0 : index
    %277 = vector.load %arg3[%c0_245, %c0_246, %c0_247] : memref<5x512x512xbf16, #tpu.memory_space<vmem>>, vector<1x512x512xbf16>
    %278 = vector.shape_cast %277 : vector<1x512x512xbf16> to vector<512x512xbf16>
    %cst_248 = arith.constant dense<0.000000e+00> : vector<8x512xf32>
    %279 = tpu.matmul %276, %278, %cst_248 {dimension_numbers = #tpu.dot_dimension_numbers<[1], [0], [0], [1], [0, 0, 1, 1], [], []>} : vector<8x512xbf16>, vector<512x512xbf16>, vector<8x512xf32> -> vector<8x512xf32>
    %280 = arith.addf %274, %279 : vector<8x512xf32>
    %c1_249 = arith.constant 1 : index
    %c0_250 = arith.constant 0 : index
    %281 = vector.load %arg11[%c1_249, %c0_250] : memref<12x512xf32, #tpu.memory_space<vmem>>, vector<8x512xf32>
    %282 = arith.truncf %281 : vector<8x512xf32> to vector<8x512xbf16>
    %c1_251 = arith.constant 1 : index
    %c0_252 = arith.constant 0 : index
    %c0_253 = arith.constant 0 : index
    %283 = vector.load %arg3[%c1_251, %c0_252, %c0_253] : memref<5x512x512xbf16, #tpu.memory_space<vmem>>, vector<1x512x512xbf16>
    %284 = vector.shape_cast %283 : vector<1x512x512xbf16> to vector<512x512xbf16>
    %cst_254 = arith.constant dense<0.000000e+00> : vector<8x512xf32>
    %285 = tpu.matmul %282, %284, %cst_254 {dimension_numbers = #tpu.dot_dimension_numbers<[1], [0], [0], [1], [0, 0, 1, 1], [], []>} : vector<8x512xbf16>, vector<512x512xbf16>, vector<8x512xf32> -> vector<8x512xf32>
    %286 = arith.addf %280, %285 : vector<8x512xf32>
    %c2_255 = arith.constant 2 : index
    %c0_256 = arith.constant 0 : index
    %287 = vector.load %arg11[%c2_255, %c0_256] : memref<12x512xf32, #tpu.memory_space<vmem>>, vector<8x512xf32>
    %288 = arith.truncf %287 : vector<8x512xf32> to vector<8x512xbf16>
    %c2_257 = arith.constant 2 : index
    %c0_258 = arith.constant 0 : index
    %c0_259 = arith.constant 0 : index
    %289 = vector.load %arg3[%c2_257, %c0_258, %c0_259] : memref<5x512x512xbf16, #tpu.memory_space<vmem>>, vector<1x512x512xbf16>
    %290 = vector.shape_cast %289 : vector<1x512x512xbf16> to vector<512x512xbf16>
    %cst_260 = arith.constant dense<0.000000e+00> : vector<8x512xf32>
    %291 = tpu.matmul %288, %290, %cst_260 {dimension_numbers = #tpu.dot_dimension_numbers<[1], [0], [0], [1], [0, 0, 1, 1], [], []>} : vector<8x512xbf16>, vector<512x512xbf16>, vector<8x512xf32> -> vector<8x512xf32>
    %292 = arith.addf %286, %291 : vector<8x512xf32>
    %c3_261 = arith.constant 3 : index
    %c0_262 = arith.constant 0 : index
    %293 = vector.load %arg11[%c3_261, %c0_262] : memref<12x512xf32, #tpu.memory_space<vmem>>, vector<8x512xf32>
    %294 = arith.truncf %293 : vector<8x512xf32> to vector<8x512xbf16>
    %c3_263 = arith.constant 3 : index
    %c0_264 = arith.constant 0 : index
    %c0_265 = arith.constant 0 : index
    %295 = vector.load %arg3[%c3_263, %c0_264, %c0_265] : memref<5x512x512xbf16, #tpu.memory_space<vmem>>, vector<1x512x512xbf16>
    %296 = vector.shape_cast %295 : vector<1x512x512xbf16> to vector<512x512xbf16>
    %cst_266 = arith.constant dense<0.000000e+00> : vector<8x512xf32>
    %297 = tpu.matmul %294, %296, %cst_266 {dimension_numbers = #tpu.dot_dimension_numbers<[1], [0], [0], [1], [0, 0, 1, 1], [], []>} : vector<8x512xbf16>, vector<512x512xbf16>, vector<8x512xf32> -> vector<8x512xf32>
    %298 = arith.addf %292, %297 : vector<8x512xf32>
    %c4_267 = arith.constant 4 : index
    %c0_268 = arith.constant 0 : index
    %299 = vector.load %arg11[%c4_267, %c0_268] : memref<12x512xf32, #tpu.memory_space<vmem>>, vector<8x512xf32>
    %300 = arith.truncf %299 : vector<8x512xf32> to vector<8x512xbf16>
    %c4_269 = arith.constant 4 : index
    %c0_270 = arith.constant 0 : index
    %c0_271 = arith.constant 0 : index
    %301 = vector.load %arg3[%c4_269, %c0_270, %c0_271] : memref<5x512x512xbf16, #tpu.memory_space<vmem>>, vector<1x512x512xbf16>
    %302 = vector.shape_cast %301 : vector<1x512x512xbf16> to vector<512x512xbf16>
    %cst_272 = arith.constant dense<0.000000e+00> : vector<8x512xf32>
    %303 = tpu.matmul %300, %302, %cst_272 {dimension_numbers = #tpu.dot_dimension_numbers<[1], [0], [0], [1], [0, 0, 1, 1], [], []>} : vector<8x512xbf16>, vector<512x512xbf16>, vector<8x512xf32> -> vector<8x512xf32>
    %304 = arith.addf %298, %303 : vector<8x512xf32>
    %c0_273 = arith.constant 0 : index
    %c0_274 = arith.constant 0 : index
    %305 = vector.load %arg4[%c0_273, %c0_274] : memref<1x512xf32, #tpu.memory_space<vmem>>, vector<1x512xf32>
    %306 = vector.broadcast %305 : vector<1x512xf32> to vector<8x512xf32>
    %307 = arith.addf %304, %306 : vector<8x512xf32>
    %cst_275 = arith.constant 0.000000e+00 : f32
    %308 = vector.broadcast %cst_275 : f32 to vector<8x512xf32>
    %309 = arith.maximumf %307, %308 : vector<8x512xf32>
    %cst_276 = arith.constant dense<0.000000e+00> : vector<4x512xf32>
    %310 = tpu.matmul %47, %309, %cst_276 {dimension_numbers = #tpu.dot_dimension_numbers<[1], [0], [0], [1], [0, 0, 1, 1], [], []>} : vector<4x8xf32>, vector<8x512xf32>, vector<4x512xf32> -> vector<4x512xf32>
    %c1_277 = arith.constant 1 : index
    %c0_278 = arith.constant 0 : index
    %311 = vector.load %arg12[%c1_277, %c0_278] : memref<6x512xf32, #tpu.memory_space<vmem>>, vector<4x512xf32>
    tpu.vector_store %arg12[%c1_277, %c0_278], %310 {strides = array<i32>} : memref<6x512xf32, #tpu.memory_space<vmem>>, vector<4x512xf32>,
    %cst_279 = arith.constant 0.000000e+00 : f32
    %312 = vector.broadcast %cst_279 : f32 to vector<4x256xf32>
    %c0_280 = arith.constant 0 : index
    %c0_281 = arith.constant 0 : index
    %313 = vector.load %arg12[%c0_280, %c0_281] : memref<6x512xf32, #tpu.memory_space<vmem>>, vector<4x512xf32>
    %314 = arith.truncf %313 : vector<4x512xf32> to vector<4x512xbf16>
    %c0_282 = arith.constant 0 : index
    %c0_283 = arith.constant 0 : index
    %c0_284 = arith.constant 0 : index
    %315 = vector.load %arg5[%c0_282, %c0_283, %c0_284] : memref<3x512x256xbf16, #tpu.memory_space<vmem>>, vector<1x512x256xbf16>
    %316 = vector.shape_cast %315 : vector<1x512x256xbf16> to vector<512x256xbf16>
    %cst_285 = arith.constant dense<0.000000e+00> : vector<4x256xf32>
    %317 = tpu.matmul %314, %316, %cst_285 {dimension_numbers = #tpu.dot_dimension_numbers<[1], [0], [0], [1], [0, 0, 1, 1], [], []>} : vector<4x512xbf16>, vector<512x256xbf16>, vector<4x256xf32> -> vector<4x256xf32>
    %318 = arith.addf %312, %317 : vector<4x256xf32>
    %c1_286 = arith.constant 1 : index
    %c0_287 = arith.constant 0 : index
    %319 = vector.load %arg12[%c1_286, %c0_287] : memref<6x512xf32, #tpu.memory_space<vmem>>, vector<4x512xf32>
    %320 = arith.truncf %319 : vector<4x512xf32> to vector<4x512xbf16>
    %c1_288 = arith.constant 1 : index
    %c0_289 = arith.constant 0 : index
    %c0_290 = arith.constant 0 : index
    %321 = vector.load %arg5[%c1_288, %c0_289, %c0_290] : memref<3x512x256xbf16, #tpu.memory_space<vmem>>, vector<1x512x256xbf16>
    %322 = vector.shape_cast %321 : vector<1x512x256xbf16> to vector<512x256xbf16>
    %cst_291 = arith.constant dense<0.000000e+00> : vector<4x256xf32>
    %323 = tpu.matmul %320, %322, %cst_291 {dimension_numbers = #tpu.dot_dimension_numbers<[1], [0], [0], [1], [0, 0, 1, 1], [], []>} : vector<4x512xbf16>, vector<512x256xbf16>, vector<4x256xf32> -> vector<4x256xf32>
    %324 = arith.addf %318, %323 : vector<4x256xf32>
    %c2_292 = arith.constant 2 : index
    %c0_293 = arith.constant 0 : index
    %325 = vector.load %arg12[%c2_292, %c0_293] : memref<6x512xf32, #tpu.memory_space<vmem>>, vector<4x512xf32>
    %326 = arith.truncf %325 : vector<4x512xf32> to vector<4x512xbf16>
    %c2_294 = arith.constant 2 : index
    %c0_295 = arith.constant 0 : index
    %c0_296 = arith.constant 0 : index
    %327 = vector.load %arg5[%c2_294, %c0_295, %c0_296] : memref<3x512x256xbf16, #tpu.memory_space<vmem>>, vector<1x512x256xbf16>
    %328 = vector.shape_cast %327 : vector<1x512x256xbf16> to vector<512x256xbf16>
    %cst_297 = arith.constant dense<0.000000e+00> : vector<4x256xf32>
    %329 = tpu.matmul %326, %328, %cst_297 {dimension_numbers = #tpu.dot_dimension_numbers<[1], [0], [0], [1], [0, 0, 1, 1], [], []>} : vector<4x512xbf16>, vector<512x256xbf16>, vector<4x256xf32> -> vector<4x256xf32>
    %330 = arith.addf %324, %329 : vector<4x256xf32>
    %c0_298 = arith.constant 0 : index
    %c0_299 = arith.constant 0 : index
    %331 = vector.load %arg6[%c0_298, %c0_299] : memref<1x256xf32, #tpu.memory_space<vmem>>, vector<1x256xf32>
    %332 = vector.broadcast %331 : vector<1x256xf32> to vector<4x256xf32>
    %333 = arith.addf %330, %332 : vector<4x256xf32>
    %cst_300 = arith.constant 0.000000e+00 : f32
    %334 = vector.broadcast %cst_300 : f32 to vector<4x256xf32>
    %335 = arith.cmpf oge, %333, %334 : vector<4x256xf32>
    %cst_301 = arith.constant 0.00999999977 : f32
    %336 = vector.broadcast %cst_301 : f32 to vector<4x256xf32>
    %337 = arith.mulf %336, %333 : vector<4x256xf32>
    %338 = arith.select %335, %333, %337 : vector<4x256xi1>, vector<4x256xf32>
    %c1_302 = arith.constant 1 : index
    %c0_303 = arith.constant 0 : index
    %339 = vector.load %arg13[%c1_302, %c0_303] : memref<6x256xf32, #tpu.memory_space<vmem>>, vector<4x256xf32>
    tpu.vector_store %arg13[%c1_302, %c0_303], %338 {strides = array<i32>} : memref<6x256xf32, #tpu.memory_space<vmem>>, vector<4x256xf32>,
    %cst_304 = arith.constant 0.000000e+00 : f32
    %340 = vector.broadcast %cst_304 : f32 to vector<4x16xf32>
    %c0_305 = arith.constant 0 : index
    %c0_306 = arith.constant 0 : index
    %341 = vector.load %arg13[%c0_305, %c0_306] : memref<6x256xf32, #tpu.memory_space<vmem>>, vector<4x256xf32>
    %342 = arith.truncf %341 : vector<4x256xf32> to vector<4x256xbf16>
    %c0_307 = arith.constant 0 : index
    %c0_308 = arith.constant 0 : index
    %c0_309 = arith.constant 0 : index
    %343 = vector.load %arg7[%c0_307, %c0_308, %c0_309] : memref<3x256x16xbf16, #tpu.memory_space<vmem>>, vector<1x256x16xbf16>
    %344 = vector.shape_cast %343 : vector<1x256x16xbf16> to vector<256x16xbf16>
    %cst_310 = arith.constant dense<0.000000e+00> : vector<4x16xf32>
    %345 = tpu.matmul %342, %344, %cst_310 {dimension_numbers = #tpu.dot_dimension_numbers<[1], [0], [0], [1], [0, 0, 1, 1], [], []>} : vector<4x256xbf16>, vector<256x16xbf16>, vector<4x16xf32> -> vector<4x16xf32>
    %346 = arith.addf %340, %345 : vector<4x16xf32>
    %c1_311 = arith.constant 1 : index
    %c0_312 = arith.constant 0 : index
    %347 = vector.load %arg13[%c1_311, %c0_312] : memref<6x256xf32, #tpu.memory_space<vmem>>, vector<4x256xf32>
    %348 = arith.truncf %347 : vector<4x256xf32> to vector<4x256xbf16>
    %c1_313 = arith.constant 1 : index
    %c0_314 = arith.constant 0 : index
    %c0_315 = arith.constant 0 : index
    %349 = vector.load %arg7[%c1_313, %c0_314, %c0_315] : memref<3x256x16xbf16, #tpu.memory_space<vmem>>, vector<1x256x16xbf16>
    %350 = vector.shape_cast %349 : vector<1x256x16xbf16> to vector<256x16xbf16>
    %cst_316 = arith.constant dense<0.000000e+00> : vector<4x16xf32>
    %351 = tpu.matmul %348, %350, %cst_316 {dimension_numbers = #tpu.dot_dimension_numbers<[1], [0], [0], [1], [0, 0, 1, 1], [], []>} : vector<4x256xbf16>, vector<256x16xbf16>, vector<4x16xf32> -> vector<4x16xf32>
    %352 = arith.addf %346, %351 : vector<4x16xf32>
    %c2_317 = arith.constant 2 : index
    %c0_318 = arith.constant 0 : index
    %353 = vector.load %arg13[%c2_317, %c0_318] : memref<6x256xf32, #tpu.memory_space<vmem>>, vector<4x256xf32>
    %354 = arith.truncf %353 : vector<4x256xf32> to vector<4x256xbf16>
    %c2_319 = arith.constant 2 : index
    %c0_320 = arith.constant 0 : index
    %c0_321 = arith.constant 0 : index
    %355 = vector.load %arg7[%c2_319, %c0_320, %c0_321] : memref<3x256x16xbf16, #tpu.memory_space<vmem>>, vector<1x256x16xbf16>
    %356 = vector.shape_cast %355 : vector<1x256x16xbf16> to vector<256x16xbf16>
    %cst_322 = arith.constant dense<0.000000e+00> : vector<4x16xf32>
    %357 = tpu.matmul %354, %356, %cst_322 {dimension_numbers = #tpu.dot_dimension_numbers<[1], [0], [0], [1], [0, 0, 1, 1], [], []>} : vector<4x256xbf16>, vector<256x16xbf16>, vector<4x16xf32> -> vector<4x16xf32>
    %358 = arith.addf %352, %357 : vector<4x16xf32>
    %c0_323 = arith.constant 0 : index
    %c0_324 = arith.constant 0 : index
    %359 = vector.load %arg8[%c0_323, %c0_324] : memref<1x16xf32, #tpu.memory_space<vmem>>, vector<1x16xf32>
    %360 = vector.broadcast %359 : vector<1x16xf32> to vector<4x16xf32>
    %361 = arith.addf %358, %360 : vector<4x16xf32>
    %cst_325 = arith.constant 0.000000e+00 : f32
    %362 = vector.broadcast %cst_325 : f32 to vector<4x16xf32>
    %363 = arith.cmpf oge, %361, %362 : vector<4x16xf32>
    %cst_326 = arith.constant 0.00999999977 : f32
    %364 = vector.broadcast %cst_326 : f32 to vector<4x16xf32>
    %365 = arith.mulf %364, %361 : vector<4x16xf32>
    %366 = arith.select %363, %361, %365 : vector<4x16xi1>, vector<4x16xf32>
    %c1_327 = arith.constant 1 : index
    %c0_328 = arith.constant 0 : index
    %c0_329 = arith.constant 0 : index
    %367 = vector.load %arg9[%c1_327, %c0_328, %c0_329] : memref<2x4x16xf32, #tpu.memory_space<vmem>>, vector<1x4x16xf32>
    %368 = vector.shape_cast %367 : vector<1x4x16xf32> to vector<4x16xf32>
    %369 = vector.shape_cast %366 : vector<4x16xf32> to vector<1x4x16xf32>
    tpu.vector_store %arg9[%c1_327, %c0_328, %c0_329], %369 {strides = array<i32>} : memref<2x4x16xf32, #tpu.memory_space<vmem>>, vector<1x4x16xf32>,
    return
  }
}

</mosaic_0001>

<bundles_post_ra>
// kernel: cnn0_forward.1
= control target key start
LH: loop header
LB: loop body
LE: loop exit
PB: predicated region body
PF: predicated region fallthrough
CT: control target
= control target key end

     0   :  { %14 = vsyncpa [#allocation7], 0  ;;  %s23051_s0 = inlined_call_operand.hbm [shape: f32[2,16,16], index: 0, kind: input, shape index: {}]   ;;  %s23052_s1 = inlined_call_operand.hbm [shape: bf16[9,16,512], index: 1, kind: input, shape index: {}]   ;;  %s23053_s2 = inlined_call_operand.hbm [shape: f32[1,512], index: 2, kind: input, shape index: {}]   ;;  %s23054_s3 = inlined_call_operand.hbm [shape: bf16[5,512,512], index: 3, kind: input, shape index: {}]   ;;  %s23055_s4 = inlined_call_operand.hbm [shape: f32[1,512], index: 4, kind: input, shape index: {}]   ;;  %s23056_s5 = inlined_call_operand.hbm [shape: bf16[3,512,256], index: 5, kind: input, shape index: {}]   ;;  %s23057_s6 = inlined_call_operand.hbm [shape: f32[1,256], index: 6, kind: input, shape index: {}]   ;;  %s23058_s7 = inlined_call_operand.vmem [shape: bf16[3,256,16], index: 7, kind: input, shape index: {}]   ;;  %s23059_s8 = inlined_call_operand.hbm [shape: f32[1,16], index: 8, kind: input, shape index: {}]   ;;  %s23060_s9 = inlined_call_operand.hbm [shape: f32[2,4,16], index: 9, kind: output, shape index: {}]  }
   0x1   :  { %15 = vsyncpa [#allocation10], 0 }
   0x2   :  { %16 = vsyncpa [#allocation13], 0 }
   0x3   :  { %17 = vsyncpa [#allocation16], 0 }
   0x4   :  { %18 = vsyncpa [#allocation19], 0 }
   0x5   :  { %19 = vsyncpa [#allocation8], 0  ;;  %s22147_s30 = smov [#allocation9]   ;;  %s21937_s13 = scalar_lea.hbm %s23052_s1, 4608 }
   0x6   :  { %s37_s10 = sshll.u32 %s22147_s30, 4  ;;  %p21938_p0 = scmp.ne.s32.totalorder %s23052_s1, %s21937_s13  ;;  %s38_s10 = int_to_ptr.vmem [resolvable:$true] %s37_s10 }
   0x7   :  { %p21941_p1 = scmp.lt.u32.totalorder %s21937_s13, %s23052_s1 }
   0x9   :  { %p21943_p2 = pnand %p21941_p1, %p21938_p0 }
   0xb   :  { %21946 = shalt.err (!%p21943_p2)
}
   0xc   :  { %s21947_s18 = scalar_lea.vmem %s38_s10, 4608  ;;  %p21952_p4 = scmp.lt.s32.totalorder %s38_s10, %s38_s10 }
   0xd   :  { %p21948_p3 = scmp.ne.s32.totalorder %s38_s10, %s21947_s18  ;;  %p21953_p5 = scmp.lt.s32.totalorder %s21947_s18, %s21947_s18 }
   0xf   :  { %p21954_p6 = por %p21953_p5, %p21952_p4 }
  0x11   :  { %p21955_p7 = pnand %p21954_p6, %p21948_p3 }
  0x13   :  { %21958 = shalt.err (!%p21955_p7)
}
  0x14   :  { %s22148_s19 = smov 256   ;;  %s22149_s20 = smov 16  }
  0x15   :  { %43 = dma.hbm_to_vmem [thread:$0]  %s23052_s1, 4608, %s38_s10, [#allocation10], %s22148_s19, %s22148_s19, %s22149_s20  }
  0x16   :  { %s22150_s23 = smov [#allocation12]   ;;  %s21959_s27 = scalar_lea.hbm %s23054_s3, 81920 }
  0x17   :  { %s59_s24 = sshll.u32 %s22150_s23, 4  ;;  %p21960_p8 = scmp.ne.s32.totalorder %s23054_s3, %s21959_s27  ;;  %s60_s24 = int_to_ptr.vmem [resolvable:$true] %s59_s24 }
  0x18   :  { %p21963_p9 = scmp.lt.u32.totalorder %s21959_s27, %s23054_s3 }
  0x1a   :  { %p21965_p10 = pnand %p21963_p9, %p21960_p8 }
  0x1c   :  { %21968 = shalt.err (!%p21965_p10)
}
  0x1d   :  { %s21969_s12 = scalar_lea.vmem %s60_s24, 81920  ;;  %p21974_p12 = scmp.lt.s32.totalorder %s60_s24, %s60_s24 }
  0x1e   :  { %p21970_p11 = scmp.ne.s32.totalorder %s60_s24, %s21969_s12  ;;  %p21975_p13 = scmp.lt.s32.totalorder %s21969_s12, %s21969_s12 }
  0x20   :  { %p21976_p0 = por %p21975_p13, %p21974_p12 }
  0x22   :  { %p21977_p1 = pnand %p21976_p0, %p21970_p11 }
  0x24   :  { %21980 = shalt.err (!%p21977_p1)
}
  0x25   :  { %65 = dma.hbm_to_vmem [thread:$0]  %s23054_s3, 81920, %s60_s24, [#allocation13], %s22148_s19, %s22148_s19, %s22149_s20  }
  0x26   :  { %s22151_s13 = smov [#allocation15]   ;;  %s22152_s15 = smov [#allocation6]  }
  0x27   :  { %s81_s14 = sshll.u32 %s22151_s13, 4  ;;  %s25_s16 = sshll.u32 %s22152_s15, 4  ;;  %s82_s14 = int_to_ptr.vmem [resolvable:$true] %s81_s14  ;;  %s22238_s16 = int_to_ptr.vmem [resolvable:$true] %s25_s16 }
  0x28   :  { %s21981_s21 = scalar_lea.hbm %s23056_s5, 24576 }
  0x29   :  { %p21982_p2 = scmp.ne.s32.totalorder %s23056_s5, %s21981_s21  ;;  %p21985_p3 = scmp.lt.u32.totalorder %s21981_s21, %s23056_s5 }
  0x2b   :  { %p21987_p4 = pnand %p21985_p3, %p21982_p2 }
  0x2d   :  { %21990 = shalt.err (!%p21987_p4)
}
  0x2e   :  { %s21991_s3 = scalar_lea.vmem %s82_s14, 24576  ;;  %p21996_p6 = scmp.lt.s32.totalorder %s82_s14, %s82_s14 }
  0x2f   :  { %p21992_p5 = scmp.ne.s32.totalorder %s82_s14, %s21991_s3  ;;  %p21997_p7 = scmp.lt.s32.totalorder %s21991_s3, %s21991_s3 }
  0x31   :  { %p21998_p8 = por %p21997_p7, %p21996_p6 }
  0x33   :  { %p21999_p9 = pnand %p21998_p8, %p21992_p5 }
  0x35   :  { %22002 = shalt.err (!%p21999_p9)
}
  0x36   :  { %s22153_s19 = smov 128   ;;  %s22154_s20 = smov 8  }
  0x37   :  { %87 = dma.hbm_to_vmem [thread:$0]  %s23056_s5, 24576, %s82_s14, [#allocation16], %s22153_s19, %s22153_s19, %s22154_s20  }
  0x38   :  { %s22003_s30 = scalar_lea.hbm %s23051_s0, 512 }
  0x39   :  { %p22004_p10 = scmp.ne.s32.totalorder %s23051_s0, %s22003_s30  ;;  %p22007_p11 = scmp.lt.u32.totalorder %s22003_s30, %s23051_s0 }
  0x3b   :  { %p22009_p12 = pnand %p22007_p11, %p22004_p10 }
  0x3d   :  { %22012 = shalt.err (!%p22009_p12)
}
  0x3e   :  { %s22013_s13 = scalar_lea.vmem %s22238_s16, 512  ;;  %p22018_p0 = scmp.lt.s32.totalorder %s22238_s16, %s22238_s16 }
  0x3f   :  { %p22014_p13 = scmp.ne.s32.totalorder %s22238_s16, %s22013_s13  ;;  %p22019_p1 = scmp.lt.s32.totalorder %s22013_s13, %s22013_s13 }
  0x41   :  { %p22020_p2 = por %p22019_p1, %p22018_p0 }
  0x43   :  { %p22021_p3 = pnand %p22020_p2, %p22014_p13 }
  0x45   :  { %22024 = shalt.err (!%p22021_p3)
}
  0x46   :  { %31 = dma.hbm_to_vmem [thread:$0]  %s23051_s0, 512, %s22238_s16, [#allocation7], %s22153_s19, %s22153_s19, %s22154_s20  }
  0x47   :  { %s22155_s15 = smov [#allocation11]   ;;  %s22156_s18 = smov [#allocation14]  }
  0x48   :  { %s50_s17 = sshll.u32 %s22155_s15, 4  ;;  %s72_s21 = sshll.u32 %s22156_s18, 4  ;;  %s51_s17 = int_to_ptr.vmem [resolvable:$true] %s50_s17  ;;  %s73_s21 = int_to_ptr.vmem [resolvable:$true] %s72_s21 }
  0x49   :  { %s22025_s25 = scalar_lea.hbm %s23053_s2, 64 }
  0x4a   :  { %p22026_p4 = scmp.ne.s32.totalorder %s23053_s2, %s22025_s25  ;;  %p22029_p5 = scmp.lt.u32.totalorder %s22025_s25, %s23053_s2 }
  0x4c   :  { %p22031_p6 = pnand %p22029_p5, %p22026_p4 }
  0x4e   :  { %22034 = shalt.err (!%p22031_p6)
}
  0x4f   :  { %s22035_s0 = scalar_lea.vmem %s51_s17, 64  ;;  %p22040_p8 = scmp.lt.s32.totalorder %s51_s17, %s51_s17 }
  0x50   :  { %p22036_p7 = scmp.ne.s32.totalorder %s51_s17, %s22035_s0  ;;  %p22041_p9 = scmp.lt.s32.totalorder %s22035_s0, %s22035_s0 }
  0x52   :  { %p22042_p10 = por %p22041_p9, %p22040_p8 }
  0x54   :  { %p22043_p11 = pnand %p22042_p10, %p22036_p7 }
  0x56   :  { %22046 = shalt.err (!%p22043_p11)
}
  0x57   :  { %53 = dma.hbm_to_vmem [thread:$0]  %s23053_s2, 64, %s51_s17, [#allocation10]  }
  0x58   :  { %s22047_s29 = scalar_lea.hbm %s23055_s4, 64 }
  0x59   :  { %p22048_p12 = scmp.ne.s32.totalorder %s23055_s4, %s22047_s29  ;;  %p22051_p13 = scmp.lt.u32.totalorder %s22047_s29, %s23055_s4 }
  0x5b   :  { %p22053_p0 = pnand %p22051_p13, %p22048_p12 }
  0x5d   :  { %22056 = shalt.err (!%p22053_p0)
}
  0x5e   :  { %s22057_s10 = scalar_lea.vmem %s73_s21, 64  ;;  %p22062_p2 = scmp.lt.s32.totalorder %s73_s21, %s73_s21 }
  0x5f   :  { %p22058_p1 = scmp.ne.s32.totalorder %s73_s21, %s22057_s10  ;;  %p22063_p3 = scmp.lt.s32.totalorder %s22057_s10, %s22057_s10 }
  0x61   :  { %p22064_p4 = por %p22063_p3, %p22062_p2 }
  0x63   :  { %p22065_p5 = pnand %p22064_p4, %p22058_p1 }
  0x65   :  { %22068 = shalt.err (!%p22065_p5)
}
  0x66   :  { %75 = dma.hbm_to_vmem [thread:$0]  %s23055_s4, 64, %s73_s21, [#allocation13]  }
  0x67   :  { %s22157_s5 = smov [#allocation17]   ;;  %s22158_s15 = smov [#allocation18]  }
  0x68   :  { %s94_s14 = sshll.u32 %s22157_s5, 4  ;;  %s106_s17 = sshll.u32 %s22158_s15, 4  ;;  %s95_s14 = int_to_ptr.vmem [resolvable:$true] %s94_s14  ;;  %s107_s17 = int_to_ptr.vmem [resolvable:$true] %s106_s17 }
  0x69   :  { %s22069_s23 = scalar_lea.hbm %s23057_s6, 32 }
  0x6a   :  { %p22070_p6 = scmp.ne.s32.totalorder %s23057_s6, %s22069_s23  ;;  %p22073_p7 = scmp.lt.u32.totalorder %s22069_s23, %s23057_s6 }
  0x6c   :  { %p22075_p8 = pnand %p22073_p7, %p22070_p6 }
  0x6e   :  { %22078 = shalt.err (!%p22075_p8)
}
  0x6f   :  { %s22079_s4 = scalar_lea.vmem %s95_s14, 32  ;;  %p22084_p10 = scmp.lt.s32.totalorder %s95_s14, %s95_s14 }
  0x70   :  { %p22080_p9 = scmp.ne.s32.totalorder %s95_s14, %s22079_s4  ;;  %p22085_p11 = scmp.lt.s32.totalorder %s22079_s4, %s22079_s4 }
  0x72   :  { %p22086_p12 = por %p22085_p11, %p22084_p10 }
  0x74   :  { %p22087_p13 = pnand %p22086_p12, %p22080_p9 }
  0x76   :  { %22090 = shalt.err (!%p22087_p13)
}
  0x77   :  { %97 = dma.hbm_to_vmem [thread:$0]  %s23057_s6, 32, %s95_s14, [#allocation16]  }
  0x78   :  { %s22091_s19 = scalar_lea.hbm %s23059_s8, 16 }
  0x79   :  { %p22092_p0 = scmp.ne.s32.totalorder %s23059_s8, %s22091_s19  ;;  %p22095_p1 = scmp.lt.u32.totalorder %s22091_s19, %s23059_s8 }
  0x7b   :  { %p22097_p2 = pnand %p22095_p1, %p22092_p0 }
  0x7d   :  { %22100 = shalt.err (!%p22097_p2)
}
  0x7e   :  { %s22101_s11 = scalar_lea.vmem %s107_s17, 16  ;;  %s22105_s12 = scalar_lea.vmem %s107_s17, 32 }
  0x7f   :  { %p22102_p3 = scmp.ne.s32.totalorder %s107_s17, %s22101_s11  ;;  %p22106_p4 = scmp.lt.s32.totalorder %s107_s17, %s107_s17 }
  0x80   :  { %p22107_p5 = scmp.lt.s32.totalorder %s22105_s12, %s22101_s11 }
  0x82   :  { %p22108_p6 = por %p22107_p5, %p22106_p4 }
  0x84   :  { %p22109_p7 = pnand %p22108_p6, %p22102_p3 }
  0x86   :  { %22112 = shalt.err (!%p22109_p7)
}
  0x87   :  { %109 = dma.hbm_to_vmem [thread:$0]  %s23059_s8, 16, %s107_s17, [#allocation19]  }
  0x88   :  { %22135 = dma.done.wait [#allocation7], 512  }
  0x89   :  { %22136 = vsyncadd [#allocation7], 4294966784 }
  0x8a   :  { %22137 = dma.done.wait [#allocation10], 4672  }
  0x8b   :  { %22138 = vsyncadd [#allocation10], 4294962624 }
  0x8c   :  { %22139 = dma.done.wait [#allocation13], 81984  }
  0x8d   :  { %22140 = vsyncadd [#allocation13], 4294885312 }
  0x8e   :  { %22141 = dma.done.wait [#allocation16], 24608  }
  0x8f   :  { %22142 = vsyncadd [#allocation16], 4294942688 }
  0x90   :  { %22143 = dma.done.wait [#allocation19], 16  }
  0x91   :  { %22144 = vsyncadd [#allocation19], 4294967280  ;;  %vm135_vm0 = vcmask 125952   ;;  %v22159_v0 = vmov 0   ;;  %v22160_v1 = vmov 0.0   ;;  %vm175_vm1 = vcmask 130048  }
  0x92   :  { %248 = vmatprep.mubr.bf16.mxu0 %v22159_v0  ;;  %400 = vmatprep.mubr.bf16.mxu1 %v22159_v0  ;;  %136 = vst.msk [vmem:[#allocation2] sm:$0xf] %vm135_vm0, %v22160_v1  ;;  %137 = vst.msk [vmem:[#allocation2 + $0x14] sm:$0xf] %vm135_vm0, %v22160_v1  ;;  %v19237_v2 = vld [vmem:[#allocation9 + $0x24] ss:$16 sps:$4 sm:$0xff]  }
  0x93   :  { %138 = vst [vmem:[#allocation3] sm:$0x3] %v22160_v1  ;;  %139 = vst [vmem:[#allocation3 + $0x8] sm:$0x3] %v22160_v1  ;;  %v19239_v3 = vld [vmem:[#allocation9 + $0xc] ss:$16 sps:$4 sm:$0xff]   ;;  %216 = vmatprep.subr.bf16.mxu0 %v19237_v2 }
  0x94   :  { %140 = vst [vmem:[#allocation3 + $0x10] sm:$0x3] %v22160_v1  ;;  %141 = vst [vmem:[#allocation3 + $0x18] sm:$0x3] %v22160_v1  ;;  %v19241_v4 = vld [vmem:[#allocation9 + $0x20] ss:$16 sps:$4 sm:$0xff]   ;;  %368 = vmatprep.subr.bf16.mxu1 %v19239_v3 }
  0x95   :  { %142 = vst [vmem:[#allocation3 + $0x20] sm:$0xc] %v22160_v1  ;;  %143 = vst [vmem:[#allocation3 + $0x28] sm:$0xc] %v22160_v1  ;;  %v19242_v5 = vld [vmem:[#allocation9 + $0x8] ss:$16 sps:$4 sm:$0xff]   ;;  %217 = vmatpush1.bf16.msra.mxu0 %v19241_v4 }
  0x96   :  { %144 = vst [vmem:[#allocation3 + $0x30] sm:$0xc] %v22160_v1  ;;  %145 = vst [vmem:[#allocation3 + $0x38] sm:$0xc] %v22160_v1  ;;  %v173_v6 = vld [vmem:[#allocation6] sm:$0xff]  ;;  %v174_v7 = vld [vmem:[#allocation6 + $0x8] sm:$0xff]  ;;  %369 = vmatpush1.bf16.msra.mxu1 %v19242_v5 }
  0x97   :  { %176 = vst.msk [vmem:[#allocation2 + $0x4] sm:$0xff] %vm175_vm1, %v173_v6  ;;  %177 = vst.msk [vmem:[#allocation2 + $0xc] sm:$0xff] %vm175_vm1, %v174_v7  ;;  %v19245_v8 = vld [vmem:[#allocation9 + $0x2c] ss:$16 sps:$4 sm:$0xff]   ;;  %v19243_v14 = vld [vmem:[#allocation9 + $0x28] ss:$16 sps:$4 sm:$0xff]  }
  0x98   :  { %v19248_v9 = vld [vmem:[#allocation9 + $0x4c] ss:$16 sps:$4 sm:$0xff]   ;;  %259 = vmatprep.subr.bf16.mxu0 %v19245_v8  ;;  %v19246_v17 = vld [vmem:[#allocation9 + $0x48] ss:$16 sps:$4 sm:$0xff]   ;;  %v19251_v18 = vld [vmem:[#allocation9 + $0x4] ss:$16 sps:$4 sm:$0xff]   ;;  %v146_v8 = vlaneseq }
  0x99   :  { %485 = vmatprep.subr.bf16.mxu1 %v19248_v9  ;;  %v19254_v19 = vld [vmem:[#allocation9 + $0x6c] ss:$16 sps:$4 sm:$0xff]   ;;  %v19249_v20 = vld [vmem:[#allocation9] ss:$16 sps:$4 sm:$0xff]   ;;  %v19257_v23 = vld [vmem:[#allocation9 + $0x44] ss:$16 sps:$4 sm:$0xff]  }
  0x9a   :  { %v19252_v25 = vld [vmem:[#allocation9 + $0x68] ss:$16 sps:$4 sm:$0xff]   ;;  %v19260_v26 = vld [vmem:[#allocation9 + $0x8c] ss:$16 sps:$4 sm:$0xff]   ;;  %v19255_v27 = vld [vmem:[#allocation9 + $0x40] ss:$16 sps:$4 sm:$0xff]  }
  0x9b   :  { %v19263_v28 = vld [vmem:[#allocation9 + $0x64] ss:$16 sps:$4 sm:$0xff]   ;;  %v19258_v31 = vld [vmem:[#allocation9 + $0x88] ss:$16 sps:$4 sm:$0xff]   ;;  %v19266_v33 = vld [vmem:[#allocation9 + $0xac] ss:$16 sps:$4 sm:$0xff]  }
  0x9c   :  { %v19261_v34 = vld [vmem:[#allocation9 + $0x60] ss:$16 sps:$4 sm:$0xff]   ;;  %v19269_v35 = vld [vmem:[#allocation9 + $0x84] ss:$16 sps:$4 sm:$0xff]   ;;  %v19264_v38 = vld [vmem:[#allocation9 + $0xa8] ss:$16 sps:$4 sm:$0xff]  }
  0x9d   :  { %v19272_v40 = vld [vmem:[#allocation9 + $0xcc] ss:$16 sps:$4 sm:$0xff]   ;;  %v19267_v41 = vld [vmem:[#allocation9 + $0x80] ss:$16 sps:$4 sm:$0xff]   ;;  %v19275_v42 = vld [vmem:[#allocation9 + $0xa4] ss:$16 sps:$4 sm:$0xff]  }
  0x9e   :  { %v185_v10 = vld [vmem:[#allocation2 + $0x1] sm:$0xff]  ;;  %v186_v12 = vld [vmem:[#allocation2 + $0x9] sm:$0xff]  ;;  %v163_v9 = vshrl.u32 %v146_v8, 7  ;;  %vm6343_vm5 = vcmask 64512   ;;  %vm148_vm6 = vcmp.lt.s32.totalorder %v146_v8, 512  ;;  %vm155_vm7 = vcmp.lt.s32.totalorder %v146_v8, 256 }
  0x9f   :  { %v178_v11 = vld [vmem:[#allocation2] sm:$0xff]  ;;  %v22333_v13 = vld [vmem:[#allocation2 + $0x8] sm:$0xff]  ;;  %v187_v15 = vpack.c.bf16 %v186_v12, %v185_v10  ;;  %v1162_v63 = vld [vmem:[#allocation2 + $0x10] sm:$0xff]  ;;  %150 = vst.msk [vmem:[#allocation4] ss:$8 sm:$0xf] %vm148_vm6, %v22160_v1 }
  0xa0   :  { %v180_v16 = vpack.c.bf16 %v22333_v13, %v178_v11  ;;  %v411_v21 = vld [vmem:[#allocation2 + $0x2] sm:$0xff]  ;;  %v412_v22 = vld [vmem:[#allocation2 + $0xa] sm:$0xff]  ;;  %v1163_v2 = vpack.c.bf16 %v1162_v63, %v22333_v13  ;;  %v166_v10 = vmul.u32 2, %v163_v9  ;;  %v165_v11 = vand.u32 127, %v146_v8 }
  0xa1   :  { %16942 = vmatmul.mubr.msk.bf16.vlgmr.msra.gmra.mrb[0].mxu0 %vm175_vm1, %v187_v15  ;;  %v413_v24 = vpack.c.bf16 %v412_v22, %v411_v21  ;;  %v536_v29 = vld [vmem:[#allocation2 + $0x3] sm:$0xff]  ;;  %v537_v30 = vld [vmem:[#allocation2 + $0xb] sm:$0xff]  ;;  %153 = vst.msk [vmem:[#allocation4 + $0x5] ss:$8 sm:$0xf] %vm148_vm6, %v22160_v1 }
  0xa2   :  { %16949 = vmatmul.mubr.msk.bf16.vlgmr.msra.gmra.mrb[0].mxu1 %vm175_vm1, %v180_v16  ;;  %260 = vmatpush1.bf16.msra.mxu0 %v19243_v14  ;;  %v538_v32 = vpack.c.bf16 %v537_v30, %v536_v29  ;;  %v661_v36 = vld [vmem:[#allocation2 + $0x4] sm:$0xff]  ;;  %v662_v37 = vld [vmem:[#allocation2 + $0xc] sm:$0xff]  ;;  %v16937_v12 = vadd.s32 4294967295, %v166_v10  ;;  %v169_v13 = vadd.s32 2, %v166_v10 }
  0xa3   :  { %291 = vmatprep.mubr.bf16.mxu0 %v22159_v0  ;;  %486 = vmatpush1.bf16.msra.mxu1 %v19246_v17  ;;  %v663_v39 = vpack.c.bf16 %v662_v37, %v661_v36  ;;  %v786_v43 = vld [vmem:[#allocation2 + $0x5] sm:$0xff]  ;;  %v787_v44 = vld [vmem:[#allocation2 + $0xd] sm:$0xff]  ;;  %157 = vst.msk [vmem:[#allocation5] ss:$8 sm:$0x3] %vm155_vm7, %v22160_v1 }
  0xa4   :  { %517 = vmatprep.mubr.bf16.mxu1 %v22159_v0  ;;  %325 = vmatprep.subr.bf16.mxu0 %v19251_v18  ;;  %v19270_v45 = vld [vmem:[#allocation9 + $0xc8] ss:$16 sps:$4 sm:$0xff]   ;;  %v788_v46 = vpack.c.bf16 %v787_v44, %v786_v43  ;;  %v19278_v47 = vld [vmem:[#allocation9 + $0xec] ss:$16 sps:$4 sm:$0xff]   ;;  %v19273_v48 = vld [vmem:[#allocation9 + $0xa0] ss:$16 sps:$4 sm:$0xff]   ;;  %vm168_vm2 = vcmp.ge.s32.totalorder %v165_v11, %v16937_v12  ;;  %vm170_vm3 = vcmp.le.s32.totalorder %v165_v11, %v169_v13 }
  0xa5   :  { %610 = vmatprep.subr.bf16.mxu1 %v19254_v19  ;;  %v19281_v49 = vld [vmem:[#allocation9 + $0xc4] ss:$16 sps:$4 sm:$0xff]   ;;  %v19276_v52 = vld [vmem:[#allocation9 + $0xe8] ss:$16 sps:$4 sm:$0xff]   ;;  %v19284_v54 = vld [vmem:[#allocation9 + $0x10c] ss:$16 sps:$4 sm:$0xff]  }
  0xa6   :  { %v911_v50 = vld [vmem:[#allocation2 + $0x6] sm:$0xff]  ;;  %v912_v51 = vld [vmem:[#allocation2 + $0xe] sm:$0xff]  ;;  %vm22381_vm4 = vmand %vm168_vm2, %vm170_vm3  ;;  %160 = vst.msk [vmem:[#allocation5 + $0x5] ss:$8 sm:$0x3] %vm155_vm7, %v22160_v1 }
  0xa7   :  { %v913_v53 = vpack.c.bf16 %v912_v51, %v911_v50  ;;  %v19279_v55 = vld [vmem:[#allocation9 + $0xc0] ss:$16 sps:$4 sm:$0xff]   ;;  %v19287_v56 = vld [vmem:[#allocation9 + $0xe4] ss:$16 sps:$4 sm:$0xff]   ;;  %v19282_v59 = vld [vmem:[#allocation9 + $0x108] ss:$16 sps:$4 sm:$0xff]  }
  0xa8   :  { %v1036_v57 = vld [vmem:[#allocation2 + $0x7] sm:$0xff]  ;;  %v1037_v58 = vld [vmem:[#allocation2 + $0xf] sm:$0xff] }
  0xa9   :  { %16943 = vmatmul.mubr.msk.bf16.vlgmr.msra.gmra.mrb[4].mxu0 %vm175_vm1, %v187_v15  ;;  %v1038_v60 = vpack.c.bf16 %v1037_v58, %v1036_v57  ;;  %v19285_v61 = vld [vmem:[#allocation9 + $0xe0] ss:$16 sps:$4 sm:$0xff]   ;;  %v19290_v62 = vld [vmem:[#allocation9 + $0x104] ss:$16 sps:$4 sm:$0xff]   ;;  %v22375_v15 = vsub.s32 2, %v163_v9  ;;  %v20555_v8 = vld [vmem:[%s23058_s7 + $0x20] sm:$0xff]  }
  0xaa   :  { %326 = vmatpush1.bf16.msra.mxu0 %v19249_v20  ;;  %357 = vmatprep.mubr.bf16.mxu0 %v22159_v0  ;;  %v19288_v3 = vld [vmem:[#allocation9 + $0x100] ss:$16 sps:$4 sm:$0xff]   ;;  %v19293_v36 = vld [vmem:[#allocation12 + $0x604] ss:$16 sps:$4 sm:$0xff]   ;;  %v19309_v10 = vld [vmem:[#allocation12 + $0x420] ss:$16 sps:$4 sm:$0xff]  }
  0xab   :  { %442 = vmatprep.subr.bf16.mxu0 %v19257_v23  ;;  %v1286_v14 = vld [vmem:[#allocation11] sm:$0xf]  ;;  %v19296_v43 = vld [vmem:[#allocation12 + $0x624] ss:$16 sps:$4 sm:$0xff]   ;;  %v19312_v12 = vld [vmem:[#allocation12 + $0x6a0] ss:$16 sps:$4 sm:$0xff]  }
  0xac   :  { %v1299_v17 = vrot.slane %v1286_v14, %v22375_v15  ;;  %v19317_v11 = vld [vmem:[#allocation12 + $0x444] ss:$16 sps:$4 sm:$0xff]   ;;  %v19321_v20 = vld [vmem:[#allocation12 + $0x460] ss:$16 sps:$4 sm:$0xff]  }
  0xad   :  { %v19320_v13 = vld [vmem:[#allocation12 + $0x6c4] ss:$16 sps:$4 sm:$0xff]  }
  0xae   :  { %16955 = vmatmul.mubr.msk.bf16.vlgmr.msra.gmra.mrb[0].mxu1 %vm175_vm1, %v413_v24 }
  0xaf   :  { %611 = vmatpush1.bf16.msra.mxu1 %v19252_v25  ;;  %642 = vmatprep.mubr.bf16.mxu1 %v22159_v0 }
  0xb0   :  { %735 = vmatprep.subr.bf16.mxu1 %v19260_v26 }
  0xb1   :  { %16948 = vmatmul.mubr.msk.bf16.vlgmr.msra.gmra.mrb[0].mxu0 %vm175_vm1, %v180_v16  ;;  %v22377_v16 = vsub.s32 3, %v163_v9 }
  0xb2   :  { %443 = vmatpush1.bf16.msra.mxu0 %v19255_v27  ;;  %474 = vmatprep.mubr.bf16.mxu0 %v22159_v0 }
  0xb3   :  { %567 = vmatprep.subr.bf16.mxu0 %v19263_v28  ;;  %v1303_v19 = vrot.slane %v1286_v14, %v22377_v16 }
  0xba   :  { %16961 = vmatmul.mubr.msk.bf16.vlgmr.msra.gmra.mrb[0].mxu1 %vm175_vm1, %v538_v32 }
  0xbb   :  { %736 = vmatpush1.bf16.msra.mxu1 %v19258_v31  ;;  %767 = vmatprep.mubr.bf16.mxu1 %v22159_v0 }
  0xbc   :  { %860 = vmatprep.subr.bf16.mxu1 %v19266_v33 }
  0xbd   :  { %16954 = vmatmul.mubr.msk.bf16.vlgmr.msra.gmra.mrb[0].mxu0 %vm175_vm1, %v413_v24 }
  0xbe   :  { %568 = vmatpush1.bf16.msra.mxu0 %v19261_v34  ;;  %599 = vmatprep.mubr.bf16.mxu0 %v22159_v0 }
  0xbf   :  { %692 = vmatprep.subr.bf16.mxu0 %v19269_v35 }
  0xc6   :  { %16967 = vmatmul.mubr.msk.bf16.vlgmr.msra.gmra.mrb[0].mxu1 %vm175_vm1, %v663_v39 }
  0xc7   :  { %861 = vmatpush1.bf16.msra.mxu1 %v19264_v38  ;;  %892 = vmatprep.mubr.bf16.mxu1 %v22159_v0  ;;  %v22385_v38 = vsub.s32 0, %v163_v9 }
  0xc8   :  { %985 = vmatprep.subr.bf16.mxu1 %v19272_v40  ;;  %v22387_v40 = vsub.s32 1, %v163_v9  ;;  %v19314_v9 = vld [vmem:[#allocation12 + $0x6a4] ss:$16 sps:$4 sm:$0xff]  }
  0xc9   :  { %16960 = vmatmul.mubr.msk.bf16.vlgmr.msra.gmra.mrb[0].mxu0 %vm175_vm1, %v538_v32  ;;  %v1291_v44 = vrot.slane %v1286_v14, %v22385_v38 }
  0xca   :  { %693 = vmatpush1.bf16.msra.mxu0 %v19267_v41  ;;  %724 = vmatprep.mubr.bf16.mxu0 %v22159_v0  ;;  %v22392_v41 = vsel %vm22381_vm4, 0.25, %v22160_v1 }
  0xcb   :  { %817 = vmatprep.subr.bf16.mxu0 %v19275_v42  ;;  %v19291_v42 = vld [vmem:[#allocation12 + $0x600] ss:$16 sps:$4 sm:$0xff]  }
  0xd2   :  { %16973 = vmatmul.mubr.msk.bf16.vlgmr.msra.gmra.mrb[0].mxu1 %vm175_vm1, %v788_v46 }
  0xd3   :  { %986 = vmatpush1.bf16.msra.mxu1 %v19270_v45  ;;  %1017 = vmatprep.mubr.bf16.mxu1 %v22159_v0  ;;  %v1295_v45 = vrot.slane %v1286_v14, %v22387_v40  ;;  %v19315_v14 = vld [vmem:[#allocation12 + $0x440] ss:$16 sps:$4 sm:$0xff]  }
  0xd4   :  { %1110 = vmatprep.subr.bf16.mxu1 %v19278_v47 }
  0xd5   :  { %16966 = vmatmul.mubr.msk.bf16.vlgmr.msra.gmra.mrb[0].mxu0 %vm175_vm1, %v663_v39 }
  0xd6   :  { %818 = vmatpush1.bf16.msra.mxu0 %v19273_v48  ;;  %849 = vmatprep.mubr.bf16.mxu0 %v22159_v0  ;;  %v19299_v48 = vld [vmem:[#allocation12 + $0x644] ss:$16 sps:$4 sm:$0xff]  }
  0xd7   :  { %942 = vmatprep.subr.bf16.mxu0 %v19281_v49 }
  0xde   :  { %16979 = vmatmul.mubr.msk.bf16.vlgmr.msra.gmra.mrb[0].mxu1 %vm175_vm1, %v913_v53 }
  0xdf   :  { %1111 = vmatpush1.bf16.msra.mxu1 %v19276_v52  ;;  %1142 = vmatprep.mubr.bf16.mxu1 %v22159_v0 }
  0xe0   :  { %1235 = vmatprep.subr.bf16.mxu1 %v19284_v54 }
  0xe1   :  { %16972 = vmatmul.mubr.msk.bf16.vlgmr.msra.gmra.mrb[0].mxu0 %vm175_vm1, %v788_v46  ;;  %v19294_v46 = vld [vmem:[#allocation12 + $0x620] ss:$16 sps:$4 sm:$0xff]  }
  0xe2   :  { %943 = vmatpush1.bf16.msra.mxu0 %v19279_v55  ;;  %974 = vmatprep.mubr.bf16.mxu0 %v22159_v0 }
  0xe3   :  { %1067 = vmatprep.subr.bf16.mxu0 %v19287_v56  ;;  %v19297_v56 = vld [vmem:[#allocation12 + $0x640] ss:$16 sps:$4 sm:$0xff]  }
  0xea   :  { %16985 = vmatmul.mubr.msk.bf16.vlgmr.msra.gmra.mrb[0].mxu1 %vm175_vm1, %v1038_v60 }
  0xeb   :  { %1236 = vmatpush1.bf16.msra.mxu1 %v19282_v59  ;;  %1267 = vmatprep.mubr.bf16.mxu1 %v22159_v0  ;;  %v19302_v59 = vld [vmem:[#allocation12 + $0x664] ss:$16 sps:$4 sm:$0xff]  }
  0xed   :  { %16978 = vmatmul.mubr.msk.bf16.vlgmr.msra.gmra.mrb[0].mxu0 %vm175_vm1, %v913_v53 }
  0xee   :  { %1068 = vmatpush1.bf16.msra.mxu0 %v19285_v61  ;;  %1099 = vmatprep.mubr.bf16.mxu0 %v22159_v0 }
  0xef   :  { %1192 = vmatprep.subr.bf16.mxu0 %v19290_v62  ;;  %v19305_v62 = vld [vmem:[#allocation12 + $0x404] ss:$16 sps:$4 sm:$0xff]  }
  0xf6   :  { %16991 = vmatmul.mubr.msk.bf16.vlgmr.msra.gmra.mrb[0].mxu1 %vm175_vm1, %v1163_v2 }
  0xf7   :  { %1462 = vmatprep.mubr.f32.mxu1 %v22160_v1 }
  0xf9   :  { %16984 = vmatmul.mubr.msk.bf16.vlgmr.msra.gmra.mrb[0].mxu0 %vm175_vm1, %v1038_v60 }
  0xfa   :  { %1193 = vmatpush1.bf16.msra.mxu0 %v19288_v3  ;;  %1224 = vmatprep.mubr.bf16.mxu0 %v22159_v0 }
 0x105   :  { %16990 = vmatmul.mubr.msk.bf16.vlgmr.msra.gmra.mrb[0].mxu0 %vm175_vm1, %v1163_v2  ;;  %v19300_v2 = vld [vmem:[#allocation12 + $0x660] ss:$16 sps:$4 sm:$0xff]  }
 0x106   :  { %1391 = vmatprep.mubr.f32.mxu0 %v22160_v1 }
 0x17c   :  { %v293_v4 = vpop.f32.mrb[4].mxu0 }
 0x17d   :  { %v295_v5 = vpop.f32.mrb[5].mxu0 }
 0x17e   :  { %v297_v6 = vpop.f32.mrb[6].mxu0 }
 0x17f   :  { %v299_v7 = vpop.f32.mrb[7].mxu0 }
 0x1c9   :  { %v1269_v18 = vpop.f32.mrb[0].mxu1 }
 0x1ca   :  { %v19092_v21 = vadd.f32 %v1269_v18, %v293_v4  ;;  %v1271_v22 = vpop.f32.mrb[1].mxu1  ;;  %v19308_v4 = vld [vmem:[#allocation12 + $0x684] ss:$16 sps:$4 sm:$0xff]   ;;  %v19318_v18 = vld [vmem:[#allocation12 + $0x6c0] ss:$16 sps:$4 sm:$0xff]  }
 0x1cb   :  { %v19093_v23 = vadd.f32 %v1271_v22, %v295_v5  ;;  %v1273_v24 = vpop.f32.mrb[2].mxu1  ;;  %v19303_v5 = vld [vmem:[#allocation12 + $0x400] ss:$16 sps:$4 sm:$0xff]  }
 0x1cc   :  { %v1310_v25 = vadd.f32 %v19092_v21, %v1299_v17  ;;  %v19094_v26 = vadd.f32 %v1273_v24, %v297_v6  ;;  %v1275_v27 = vpop.f32.mrb[3].mxu1  ;;  %v19311_v6 = vld [vmem:[#allocation12 + $0x424] ss:$16 sps:$4 sm:$0xff]   ;;  %v19324_v22 = vld [vmem:[#allocation12 + $0x6e0] ss:$16 sps:$4 sm:$0xff]  }
 0x1cd   :  { %v1311_v28 = vadd.f32 %v19093_v23, %v1303_v19  ;;  %v19095_v29 = vadd.f32 %v1275_v27, %v299_v7  ;;  %v19306_v7 = vld [vmem:[#allocation12 + $0x680] ss:$16 sps:$4 sm:$0xff]   ;;  %v19329_v21 = vld [vmem:[#allocation12 + $0x484] ss:$16 sps:$4 sm:$0xff]  }
 0x1ce   :  { %v1314_v30 = vadd.f32 %v19094_v26, %v1299_v17  ;;  %v1318_v32 = vmax.f32 %v1310_v25, 0.0  ;;  %v19323_v17 = vld [vmem:[#allocation12 + $0x464] ss:$16 sps:$4 sm:$0xff]   ;;  %v19327_v24 = vld [vmem:[#allocation12 + $0x480] ss:$16 sps:$4 sm:$0xff]  }
 0x1cf   :  { %v1315_v31 = vadd.f32 %v19095_v29, %v1303_v19  ;;  %v1319_v34 = vmax.f32 %v1311_v28, 0.0  ;;  %v19326_v19 = vld [vmem:[#allocation12 + $0x6e4] ss:$16 sps:$4 sm:$0xff]   ;;  %v19330_v26 = vld [vmem:[#allocation12 + $0x700] ss:$16 sps:$4 sm:$0xff]  }
 0x1d0   :  { %v1322_v33 = vmax.f32 %v1314_v30, 0.0  ;;  %v19332_v23 = vld [vmem:[#allocation12 + $0x704] ss:$16 sps:$4 sm:$0xff]   ;;  %v19333_v28 = vld [vmem:[#allocation12 + $0x4a0] ss:$16 sps:$4 sm:$0xff]  }
 0x1d1   :  { %v1323_v35 = vmax.f32 %v1315_v31, 0.0  ;;  %v19335_v25 = vld [vmem:[#allocation12 + $0x4a4] ss:$16 sps:$4 sm:$0xff]   ;;  %v19336_v30 = vld [vmem:[#allocation12 + $0x720] ss:$16 sps:$4 sm:$0xff]  }
 0x1d2   :  { %v19082_v37 = vpack.c.bf16 %v1322_v33, %v1318_v32  ;;  %v19338_v27 = vld [vmem:[#allocation12 + $0x724] ss:$16 sps:$4 sm:$0xff]   ;;  %v19339_v32 = vld [vmem:[#allocation12 + $0x4c0] ss:$16 sps:$4 sm:$0xff]  }
 0x1d3   :  { %v19080_v39 = vpack.c.bf16 %v1323_v35, %v1319_v34  ;;  %v19341_v29 = vld [vmem:[#allocation12 + $0x4c4] ss:$16 sps:$4 sm:$0xff]   ;;  %v19342_v34 = vld [vmem:[#allocation12 + $0x740] ss:$16 sps:$4 sm:$0xff]  }
 0x1d4   :  { %v19344_v31 = vld [vmem:[#allocation12 + $0x744] ss:$16 sps:$4 sm:$0xff]   ;;  %v19345_v35 = vld [vmem:[#allocation12 + $0x4e0] ss:$16 sps:$4 sm:$0xff]  }
 0x1d5   :  { %19081 = vmatprep.subr.bf16.mxu1 %v19080_v39  ;;  %v19347_v33 = vld [vmem:[#allocation12 + $0x4e4] ss:$16 sps:$4 sm:$0xff]  }
 0x1d6   :  { %19083 = vmatpush1.bf16.msra.mxu1 %v19082_v37  ;;  %v19348_v37 = vld [vmem:[#allocation12 + $0x760] ss:$16 sps:$4 sm:$0xff]   ;;  %v19353_v39 = vld [vmem:[#allocation12 + $0x504] ss:$16 sps:$4 sm:$0xff]  }
 0x1d7   :  { %2479 = vmatprep.subr.bf16.mxu1 %v19293_v36  ;;  %v19350_v36 = vld [vmem:[#allocation12 + $0x764] ss:$16 sps:$4 sm:$0xff]  }
 0x1d8   :  { %v1226_v47 = vpop.f32.mrb[0].mxu0 }
 0x1d9   :  { %16993 = vmatmul.mubr.msk.f32.vlgmr.msra.gmra.mrb[4].mxu1 %vm175_vm1, %v22392_v41  ;;  %v1308_v49 = vadd.f32 %v1291_v44, %v1226_v47  ;;  %v1228_v50 = vpop.f32.mrb[1].mxu0  ;;  %v19360_v47 = vld [vmem:[#allocation12 + $0x7a0] ss:$16 sps:$4 sm:$0xff]  }
 0x1da   :  { %2480 = vmatpush1.bf16.msra.mxu1 %v19291_v42  ;;  %v1309_v51 = vadd.f32 %v1295_v45, %v1228_v50  ;;  %v1230_v52 = vpop.f32.mrb[2].mxu0  ;;  %v19351_v42 = vld [vmem:[#allocation12 + $0x500] ss:$16 sps:$4 sm:$0xff]  }
 0x1db   :  { %2481 = vmatprep.subr.bf16.mxu1 %v19296_v43  ;;  %v1316_v53 = vmax.f32 %v1308_v49, 0.0  ;;  %v1312_v54 = vadd.f32 %v1291_v44, %v1230_v52  ;;  %v1232_v55 = vpop.f32.mrb[3].mxu0  ;;  %v19356_v43 = vld [vmem:[#allocation12 + $0x784] ss:$16 sps:$4 sm:$0xff]   ;;  %v19354_v44 = vld [vmem:[#allocation12 + $0x780] ss:$16 sps:$4 sm:$0xff]  }
 0x1dc   :  { %v1317_v57 = vmax.f32 %v1309_v51, 0.0  ;;  %v1313_v58 = vadd.f32 %v1295_v45, %v1232_v55  ;;  %v19357_v45 = vld [vmem:[#allocation12 + $0x520] ss:$16 sps:$4 sm:$0xff]   ;;  %v19365_v49 = vld [vmem:[#allocation12 + $0x544] ss:$16 sps:$4 sm:$0xff]  }
 0x1dd   :  { %v1320_v60 = vmax.f32 %v1312_v54, 0.0  ;;  %v19363_v50 = vld [vmem:[#allocation12 + $0x540] ss:$16 sps:$4 sm:$0xff]   ;;  %v19368_v51 = vld [vmem:[#allocation12 + $0x7c4] ss:$16 sps:$4 sm:$0xff]  }
 0x1de   :  { %2482 = vmatpush1.bf16.msra.mxu1 %v19294_v46  ;;  %v1321_v61 = vmax.f32 %v1313_v58, 0.0  ;;  %v19359_v46 = vld [vmem:[#allocation12 + $0x524] ss:$16 sps:$4 sm:$0xff]   ;;  %v19366_v52 = vld [vmem:[#allocation12 + $0x7c0] ss:$16 sps:$4 sm:$0xff]  }
 0x1df   :  { %2483 = vmatprep.subr.bf16.mxu1 %v19299_v48  ;;  %v19078_v63 = vpack.c.bf16 %v1320_v60, %v1316_v53  ;;  %v19362_v48 = vld [vmem:[#allocation12 + $0x7a4] ss:$16 sps:$4 sm:$0xff]   ;;  %v19369_v54 = vld [vmem:[#allocation12 + $0x560] ss:$16 sps:$4 sm:$0xff]  }
 0x1e0   :  { %v19076_v3 = vpack.c.bf16 %v1321_v61, %v1317_v57  ;;  %v19371_v53 = vld [vmem:[#allocation12 + $0x564] ss:$16 sps:$4 sm:$0xff]   ;;  %v19375_v58 = vld [vmem:[#allocation12 + $0x580] ss:$16 sps:$4 sm:$0xff]  }
 0x1e1   :  { %v19374_v55 = vld [vmem:[#allocation12 + $0x7e4] ss:$16 sps:$4 sm:$0xff]   ;;  %v19381_v61 = vld [vmem:[#allocation12 + $0x5a0] ss:$16 sps:$4 sm:$0xff]  }
 0x1e2   :  { %2484 = vmatpush1.bf16.msra.mxu1 %v19297_v56  ;;  %19077 = vmatprep.subr.bf16.mxu0 %v19076_v3  ;;  %v19372_v56 = vld [vmem:[#allocation12 + $0x7e0] ss:$16 sps:$4 sm:$0xff]   ;;  %v19377_v57 = vld [vmem:[#allocation12 + $0x584] ss:$16 sps:$4 sm:$0xff]  }
 0x1e3   :  { %2485 = vmatprep.subr.bf16.mxu1 %v19302_v59  ;;  %19079 = vmatpush1.bf16.msra.mxu0 %v19078_v63  ;;  %v19380_v59 = vld [vmem:[#allocation12 + $0x60c] ss:$16 sps:$4 sm:$0xff]   ;;  %v19383_v60 = vld [vmem:[#allocation12 + $0x5a4] ss:$16 sps:$4 sm:$0xff]   ;;  %v19387_v63 = vld [vmem:[#allocation12 + $0x5c0] ss:$16 sps:$4 sm:$0xff]  }
 0x1e4   :  { %2438 = vmatprep.subr.bf16.mxu0 %v19305_v62  ;;  %v19389_v62 = vld [vmem:[#allocation12 + $0x5c4] ss:$16 sps:$4 sm:$0xff]   ;;  %v19393_v3 = vld [vmem:[#allocation12 + $0x5e0] ss:$16 sps:$4 sm:$0xff]  }
 0x1e6   :  { %2486 = vmatpush1.bf16.msra.mxu1 %v19300_v2  ;;  %16992 = vmatmul.mubr.msk.f32.vlgmr.msra.gmra.mrb[8].mxu0 %vm175_vm1, %v22392_v41  ;;  %v19395_v2 = vld [vmem:[#allocation12 + $0x5e4] ss:$16 sps:$4 sm:$0xff]  }
 0x1e7   :  { %2487 = vmatprep.subr.bf16.mxu1 %v19308_v4  ;;  %2439 = vmatpush1.bf16.msra.mxu0 %v19303_v5  ;;  %v19401_v4 = vld [vmem:[#allocation12 + $0x40c] ss:$16 sps:$4 sm:$0xff]  }
 0x1e8   :  { %2440 = vmatprep.subr.bf16.mxu0 %v19311_v6 }
 0x1ea   :  { %2488 = vmatpush1.bf16.msra.mxu1 %v19306_v7 }
 0x1eb   :  { %2489 = vmatprep.subr.bf16.mxu1 %v19314_v9  ;;  %2441 = vmatpush1.bf16.msra.mxu0 %v19309_v10 }
 0x1ec   :  { %2442 = vmatprep.subr.bf16.mxu0 %v19317_v11 }
 0x1ee   :  { %2490 = vmatpush1.bf16.msra.mxu1 %v19312_v12 }
 0x1ef   :  { %2491 = vmatprep.subr.bf16.mxu1 %v19320_v13  ;;  %2443 = vmatpush1.bf16.msra.mxu0 %v19315_v14 }
 0x1f0   :  { %2444 = vmatprep.subr.bf16.mxu0 %v19323_v17 }
 0x1f2   :  { %2492 = vmatpush1.bf16.msra.mxu1 %v19318_v18 }
 0x1f3   :  { %2493 = vmatprep.subr.bf16.mxu1 %v19326_v19  ;;  %2445 = vmatpush1.bf16.msra.mxu0 %v19321_v20 }
 0x1f4   :  { %2446 = vmatprep.subr.bf16.mxu0 %v19329_v21 }
 0x1f6   :  { %2494 = vmatpush1.bf16.msra.mxu1 %v19324_v22 }
 0x1f7   :  { %2495 = vmatprep.subr.bf16.mxu1 %v19332_v23  ;;  %2447 = vmatpush1.bf16.msra.mxu0 %v19327_v24 }
 0x1f8   :  { %2448 = vmatprep.subr.bf16.mxu0 %v19335_v25 }
 0x1fa   :  { %2496 = vmatpush1.bf16.msra.mxu1 %v19330_v26 }
 0x1fb   :  { %2497 = vmatprep.subr.bf16.mxu1 %v19338_v27  ;;  %2449 = vmatpush1.bf16.msra.mxu0 %v19333_v28 }
 0x1fc   :  { %2450 = vmatprep.subr.bf16.mxu0 %v19341_v29 }
 0x1fe   :  { %2498 = vmatpush1.bf16.msra.mxu1 %v19336_v30  ;;  %v19378_v30 = vld [vmem:[#allocation12 + $0x608] ss:$16 sps:$4 sm:$0xff]  }
 0x1ff   :  { %2499 = vmatprep.subr.bf16.mxu1 %v19344_v31  ;;  %2451 = vmatpush1.bf16.msra.mxu0 %v19339_v32  ;;  %v19386_v31 = vld [vmem:[#allocation12 + $0x62c] ss:$16 sps:$4 sm:$0xff]   ;;  %v19384_v32 = vld [vmem:[#allocation12 + $0x628] ss:$16 sps:$4 sm:$0xff]  }
 0x200   :  { %2452 = vmatprep.subr.bf16.mxu0 %v19347_v33  ;;  %v19392_v33 = vld [vmem:[#allocation12 + $0x64c] ss:$16 sps:$4 sm:$0xff]  }
 0x202   :  { %2500 = vmatpush1.bf16.msra.mxu1 %v19342_v34 }
 0x203   :  { %2453 = vmatpush1.bf16.msra.mxu0 %v19345_v35  ;;  %2501 = vmatprep.subr.bf16.mxu1 %v19350_v36 }
 0x204   :  { %2454 = vmatprep.subr.bf16.mxu0 %v19353_v39 }
 0x206   :  { %2502 = vmatpush1.bf16.msra.mxu1 %v19348_v37 }
 0x207   :  { %2455 = vmatpush1.bf16.msra.mxu0 %v19351_v42  ;;  %2503 = vmatprep.subr.bf16.mxu1 %v19356_v43  ;;  %v19390_v42 = vld [vmem:[#allocation12 + $0x648] ss:$16 sps:$4 sm:$0xff]  }
 0x208   :  { %2456 = vmatprep.subr.bf16.mxu0 %v19359_v46 }
 0x20a   :  { %2504 = vmatpush1.bf16.msra.mxu1 %v19354_v44  ;;  %v19398_v44 = vld [vmem:[#allocation12 + $0x66c] ss:$16 sps:$4 sm:$0xff]  }
 0x20b   :  { %2457 = vmatpush1.bf16.msra.mxu0 %v19357_v45  ;;  %2505 = vmatprep.subr.bf16.mxu1 %v19362_v48  ;;  %v19396_v48 = vld [vmem:[#allocation12 + $0x668] ss:$16 sps:$4 sm:$0xff]  }
 0x20c   :  { %2458 = vmatprep.subr.bf16.mxu0 %v19365_v49 }
 0x20e   :  { %2506 = vmatpush1.bf16.msra.mxu1 %v19360_v47 }
 0x20f   :  { %2507 = vmatprep.subr.bf16.mxu1 %v19368_v51  ;;  %2459 = vmatpush1.bf16.msra.mxu0 %v19363_v50 }
 0x210   :  { %2460 = vmatprep.subr.bf16.mxu0 %v19371_v53 }
 0x212   :  { %2508 = vmatpush1.bf16.msra.mxu1 %v19366_v52  ;;  %v19404_v52 = vld [vmem:[#allocation12 + $0x68c] ss:$16 sps:$4 sm:$0xff]  }
 0x213   :  { %2461 = vmatpush1.bf16.msra.mxu0 %v19369_v54  ;;  %2509 = vmatprep.subr.bf16.mxu1 %v19374_v55  ;;  %v19399_v54 = vld [vmem:[#allocation12 + $0x408] ss:$16 sps:$4 sm:$0xff]  }
 0x214   :  { %2462 = vmatprep.subr.bf16.mxu0 %v19377_v57  ;;  %v19402_v57 = vld [vmem:[#allocation12 + $0x688] ss:$16 sps:$4 sm:$0xff]  }
 0x216   :  { %2510 = vmatpush1.bf16.msra.mxu1 %v19372_v56  ;;  %v19407_v56 = vld [vmem:[#allocation12 + $0x42c] ss:$16 sps:$4 sm:$0xff]  }
 0x217   :  { %2463 = vmatpush1.bf16.msra.mxu0 %v19375_v58  ;;  %2561 = vmatprep.subr.bf16.mxu1 %v19380_v59  ;;  %v19410_v58 = vld [vmem:[#allocation12 + $0x6ac] ss:$16 sps:$4 sm:$0xff]   ;;  %v19405_v59 = vld [vmem:[#allocation12 + $0x428] ss:$16 sps:$4 sm:$0xff]  }
 0x218   :  { %2464 = vmatprep.subr.bf16.mxu0 %v19383_v60  ;;  %v19413_v60 = vld [vmem:[#allocation12 + $0x44c] ss:$16 sps:$4 sm:$0xff]  }
 0x21b   :  { %2465 = vmatpush1.bf16.msra.mxu0 %v19381_v61  ;;  %v19408_v61 = vld [vmem:[#allocation12 + $0x6a8] ss:$16 sps:$4 sm:$0xff]  }
 0x21c   :  { %2466 = vmatprep.subr.bf16.mxu0 %v19389_v62  ;;  %v19411_v62 = vld [vmem:[#allocation12 + $0x448] ss:$16 sps:$4 sm:$0xff]  }
 0x21f   :  { %2467 = vmatpush1.bf16.msra.mxu0 %v19387_v63  ;;  %v19416_v63 = vld [vmem:[#allocation12 + $0x6cc] ss:$16 sps:$4 sm:$0xff]  }
 0x220   :  { %2468 = vmatprep.subr.bf16.mxu0 %v19395_v2  ;;  %v19414_v2 = vld [vmem:[#allocation12 + $0x6c8] ss:$16 sps:$4 sm:$0xff]  }
 0x223   :  { %2469 = vmatpush1.bf16.msra.mxu0 %v19393_v3  ;;  %v19419_v3 = vld [vmem:[#allocation12 + $0x46c] ss:$16 sps:$4 sm:$0xff]  }
 0x224   :  { %2520 = vmatprep.subr.bf16.mxu0 %v19401_v4  ;;  %v19417_v4 = vld [vmem:[#allocation12 + $0x468] ss:$16 sps:$4 sm:$0xff]  }
 0x2ac   :  { %v1464_v5 = vpop.f32.mrb[4].mxu1 }
 0x2ad   :  { %v1475_v6 = vrot.slane %v1464_v5, 6  ;;  %v1466_v7 = vpop.f32.mrb[5].mxu1  ;;  %v19422_v5 = vld [vmem:[#allocation12 + $0x6ec] ss:$16 sps:$4 sm:$0xff]  }
 0x2ae   :  { %v1476_v9 = vrot.slane %v1466_v7, 6  ;;  %v19425_v7 = vld [vmem:[#allocation12 + $0x48c] ss:$16 sps:$4 sm:$0xff]  }
 0x2af   :  { %1483 = vst [vmem:[#allocation3 + $0x10] sm:$0xfc] %v1475_v6  ;;  %1487 = vst [vmem:[#allocation3 + $0x30] sm:$0x3] %v1475_v6  ;;  %v19420_v6 = vld [vmem:[#allocation12 + $0x6e8] ss:$16 sps:$4 sm:$0xff]  }
 0x2b0   :  { %1484 = vst [vmem:[#allocation3 + $0x18] sm:$0xfc] %v1476_v9  ;;  %1488 = vst [vmem:[#allocation3 + $0x38] sm:$0x3] %v1476_v9  ;;  %v19423_v9 = vld [vmem:[#allocation12 + $0x488] ss:$16 sps:$4 sm:$0xff]  }
 0x2b6   :  { %v1627_v10 = vld [vmem:[#allocation3 + $0x10] sm:$0xfe]  ;;  %v1631_v11 = vld [vmem:[#allocation3 + $0x30] sm:$0x1] }
 0x2b7   :  { %v1628_v12 = vld [vmem:[#allocation3 + $0x18] sm:$0xfe]  ;;  %v1632_v13 = vld [vmem:[#allocation3 + $0x38] sm:$0x1]  ;;  %v1635_v14 = vpack.c.bf16 %v1631_v11, %v1627_v10  ;;  %v19428_v10 = vld [vmem:[#allocation12 + $0x70c] ss:$16 sps:$4 sm:$0xff]  }
 0x2b8   :  { %v1636_v17 = vpack.c.bf16 %v1632_v13, %v1628_v12  ;;  %v19426_v11 = vld [vmem:[#allocation12 + $0x708] ss:$16 sps:$4 sm:$0xff]   ;;  %v19431_v12 = vld [vmem:[#allocation12 + $0x4ac] ss:$16 sps:$4 sm:$0xff]  }
 0x2b9   :  { %v1781_v18 = vshrl.u32 %v1635_v14, 16  ;;  %v1783_v19 = vshll.u32 %v1635_v14, 16  ;;  %v1393_v20 = vpop.f32.mrb[8].mxu0  ;;  %v19429_v13 = vld [vmem:[#allocation12 + $0x4a8] ss:$16 sps:$4 sm:$0xff]  }
 0x2ba   :  { %v1788_v21 = vshrl.u32 %v1636_v17, 16  ;;  %v1790_v22 = vshll.u32 %v1636_v17, 16  ;;  %v1473_v23 = vrot.slane %v1393_v20, 6  ;;  %v1395_v24 = vpop.f32.mrb[9].mxu0  ;;  %v19434_v14 = vld [vmem:[#allocation12 + $0x72c] ss:$16 sps:$4 sm:$0xff]  }
 0x2bb   :  { %v1785_v25 = vrot.slane %v1783_v19, 1  ;;  %v1474_v26 = vrot.slane %v1395_v24, 6  ;;  %v19432_v17 = vld [vmem:[#allocation12 + $0x728] ss:$16 sps:$4 sm:$0xff]   ;;  %v19440_v20 = vld [vmem:[#allocation12 + $0x74c] ss:$16 sps:$4 sm:$0xff]  }
 0x2bc   :  { %v1792_v27 = vrot.slane %v1790_v22, 1  ;;  %1481 = vst [vmem:[#allocation3] sm:$0xfc] %v1473_v23  ;;  %1485 = vst [vmem:[#allocation3 + $0x20] sm:$0x3] %v1473_v23 }
 0x2bd   :  { %v22400_v28 = vor.u32 %v1785_v25, %v1781_v18  ;;  %1482 = vst [vmem:[#allocation3 + $0x8] sm:$0xfc] %v1474_v26  ;;  %1486 = vst [vmem:[#allocation3 + $0x28] sm:$0x3] %v1474_v26  ;;  %v19437_v18 = vld [vmem:[#allocation12 + $0x4cc] ss:$16 sps:$4 sm:$0xff]  }
 0x2be   :  { %v1793_v29 = vor.u32 %v1792_v27, %v1788_v21  ;;  %v19435_v19 = vld [vmem:[#allocation12 + $0x4c8] ss:$16 sps:$4 sm:$0xff]   ;;  %v19443_v22 = vld [vmem:[#allocation12 + $0x4ec] ss:$16 sps:$4 sm:$0xff]  }
 0x2bf   :  { %v19438_v21 = vld [vmem:[#allocation12 + $0x748] ss:$16 sps:$4 sm:$0xff]   ;;  %v19446_v24 = vld [vmem:[#allocation12 + $0x76c] ss:$16 sps:$4 sm:$0xff]  }
 0x2c0   :  { %2511 = vmatprep.mubr.bf16.mxu1 %v1793_v29  ;;  %v19441_v23 = vld [vmem:[#allocation12 + $0x4e8] ss:$16 sps:$4 sm:$0xff]   ;;  %v19449_v26 = vld [vmem:[#allocation12 + $0x50c] ss:$16 sps:$4 sm:$0xff]  }
 0x2c1   :  { %2512 = vmatmul.mubr.bf16.vlgmr.msra.gmra.mrb[8].mxu1 %v22400_v28  ;;  %v19444_v25 = vld [vmem:[#allocation12 + $0x768] ss:$16 sps:$4 sm:$0xff]  }
 0x2c2   :  { %2562 = vmatpush1.bf16.msra.mxu1 %v19378_v30  ;;  %2593 = vmatprep.mubr.bf16.mxu1 %v1793_v29  ;;  %v19447_v27 = vld [vmem:[#allocation12 + $0x508] ss:$16 sps:$4 sm:$0xff]   ;;  %v19452_v29 = vld [vmem:[#allocation12 + $0x78c] ss:$16 sps:$4 sm:$0xff]  }
 0x2c3   :  { %2563 = vmatprep.subr.bf16.mxu1 %v19386_v31  ;;  %v1625_v34 = vld [vmem:[#allocation3] sm:$0xfe]  ;;  %v1629_v35 = vld [vmem:[#allocation3 + $0x20] sm:$0x1]  ;;  %v19450_v30 = vld [vmem:[#allocation12 + $0x788] ss:$16 sps:$4 sm:$0xff]  }
 0x2c4   :  { %v1626_v36 = vld [vmem:[#allocation3 + $0x8] sm:$0xfe]  ;;  %v1630_v37 = vld [vmem:[#allocation3 + $0x28] sm:$0x1]  ;;  %v1633_v39 = vpack.c.bf16 %v1629_v35, %v1625_v34  ;;  %v19455_v31 = vld [vmem:[#allocation12 + $0x52c] ss:$16 sps:$4 sm:$0xff]  }
 0x2c5   :  { %v1634_v43 = vpack.c.bf16 %v1630_v37, %v1626_v36  ;;  %v19456_v34 = vld [vmem:[#allocation12 + $0x7a8] ss:$16 sps:$4 sm:$0xff]   ;;  %v19461_v35 = vld [vmem:[#allocation12 + $0x54c] ss:$16 sps:$4 sm:$0xff]  }
 0x2c6   :  { %2564 = vmatpush1.bf16.msra.mxu1 %v19384_v32  ;;  %v1769_v45 = vshll.u32 %v1633_v39, 16  ;;  %v1767_v51 = vshrl.u32 %v1633_v39, 16  ;;  %v19453_v32 = vld [vmem:[#allocation12 + $0x528] ss:$16 sps:$4 sm:$0xff]   ;;  %v19464_v37 = vld [vmem:[#allocation12 + $0x7cc] ss:$16 sps:$4 sm:$0xff]  }
 0x2c7   :  { %2565 = vmatprep.subr.bf16.mxu1 %v19392_v33  ;;  %v1776_v46 = vshll.u32 %v1634_v43, 16  ;;  %v1774_v49 = vshrl.u32 %v1634_v43, 16  ;;  %v19458_v33 = vld [vmem:[#allocation12 + $0x7ac] ss:$16 sps:$4 sm:$0xff]   ;;  %v19459_v36 = vld [vmem:[#allocation12 + $0x548] ss:$16 sps:$4 sm:$0xff]  }
 0x2c8   :  { %v1771_v47 = vrot.slane %v1769_v45, 1  ;;  %v19462_v39 = vld [vmem:[#allocation12 + $0x7c8] ss:$16 sps:$4 sm:$0xff]  }
 0x2c9   :  { %v1778_v50 = vrot.slane %v1776_v46, 1  ;;  %v19465_v43 = vld [vmem:[#allocation12 + $0x568] ss:$16 sps:$4 sm:$0xff]   ;;  %v19473_v46 = vld [vmem:[#allocation12 + $0x58c] ss:$16 sps:$4 sm:$0xff]  }
 0x2ca   :  { %2566 = vmatpush1.bf16.msra.mxu1 %v19390_v42  ;;  %v22403_v55 = vor.u32 %v1771_v47, %v1767_v51  ;;  %v19467_v42 = vld [vmem:[#allocation12 + $0x56c] ss:$16 sps:$4 sm:$0xff]   ;;  %v19468_v45 = vld [vmem:[#allocation12 + $0x7e8] ss:$16 sps:$4 sm:$0xff]  }
 0x2cb   :  { %2567 = vmatprep.subr.bf16.mxu1 %v19398_v44  ;;  %v1779_v53 = vor.u32 %v1778_v50, %v1774_v49  ;;  %v19470_v44 = vld [vmem:[#allocation12 + $0x7ec] ss:$16 sps:$4 sm:$0xff]   ;;  %v19471_v47 = vld [vmem:[#allocation12 + $0x588] ss:$16 sps:$4 sm:$0xff]   ;;  %v19474_v49 = vld [vmem:[#allocation12 + $0x200] ss:$16 sps:$4 sm:$0xff]  }
 0x2cc   :  { %v1492_v50 = vld [vmem:[#allocation3 + $0x18] sm:$0xff]  ;;  %v19479_v51 = vld [vmem:[#allocation12 + $0x5ac] ss:$16 sps:$4 sm:$0xff]  }
 0x2cd   :  { %2470 = vmatprep.mubr.bf16.mxu0 %v1779_v53 }
 0x2ce   :  { %2568 = vmatpush1.bf16.msra.mxu1 %v19396_v48  ;;  %2471 = vmatmul.mubr.bf16.vlgmr.msra.gmra.mrb[12].mxu0 %v22403_v55  ;;  %v19476_v48 = vld [vmem:[#allocation12 + $0x204] ss:$16 sps:$4 sm:$0xff]  }
 0x2cf   :  { %2569 = vmatprep.subr.bf16.mxu1 %v19404_v52  ;;  %2521 = vmatpush1.bf16.msra.mxu0 %v19399_v54  ;;  %v19477_v52 = vld [vmem:[#allocation12 + $0x5a8] ss:$16 sps:$4 sm:$0xff]   ;;  %v22406_v54 = vpack.c.bf16 %v1492_v50, %v1492_v50  ;;  %v19557_v50 = vld [vmem:[#allocation12 + $0x144] ss:$16 sps:$4 sm:$0xff]  }
 0x2d0   :  { %2552 = vmatprep.mubr.bf16.mxu0 %v1779_v53  ;;  %2522 = vmatprep.subr.bf16.mxu0 %v19407_v56  ;;  %v19482_v53 = vld [vmem:[#allocation12 + $0x224] ss:$16 sps:$4 sm:$0xff]   ;;  %v19480_v56 = vld [vmem:[#allocation12 + $0x220] ss:$16 sps:$4 sm:$0xff]  }
 0x2d2   :  { %2570 = vmatpush1.bf16.msra.mxu1 %v19402_v57  ;;  %v19485_v57 = vld [vmem:[#allocation12 + $0x5cc] ss:$16 sps:$4 sm:$0xff]  }
 0x2d3   :  { %2571 = vmatprep.subr.bf16.mxu1 %v19410_v58  ;;  %2523 = vmatpush1.bf16.msra.mxu0 %v19405_v59  ;;  %v19483_v58 = vld [vmem:[#allocation12 + $0x5c8] ss:$16 sps:$4 sm:$0xff]   ;;  %v19488_v59 = vld [vmem:[#allocation12 + $0x244] ss:$16 sps:$4 sm:$0xff]  }
 0x2d4   :  { %2524 = vmatprep.subr.bf16.mxu0 %v19413_v60  ;;  %v19486_v60 = vld [vmem:[#allocation12 + $0x240] ss:$16 sps:$4 sm:$0xff]  }
 0x2d6   :  { %2572 = vmatpush1.bf16.msra.mxu1 %v19408_v61  ;;  %v19491_v61 = vld [vmem:[#allocation12 + $0x5ec] ss:$16 sps:$4 sm:$0xff]  }
 0x2d7   :  { %2573 = vmatprep.subr.bf16.mxu1 %v19416_v63  ;;  %2525 = vmatpush1.bf16.msra.mxu0 %v19411_v62  ;;  %v19489_v62 = vld [vmem:[#allocation12 + $0x5e8] ss:$16 sps:$4 sm:$0xff]   ;;  %v19494_v63 = vld [vmem:[#allocation12 + $0x264] ss:$16 sps:$4 sm:$0xff]  }
 0x2d8   :  { %2526 = vmatprep.subr.bf16.mxu0 %v19419_v3  ;;  %v19497_v3 = vld [vmem:[#allocation12 + $0x4] ss:$16 sps:$4 sm:$0xff]  }
 0x2da   :  { %2574 = vmatpush1.bf16.msra.mxu1 %v19414_v2  ;;  %v19492_v2 = vld [vmem:[#allocation12 + $0x260] ss:$16 sps:$4 sm:$0xff]  }
 0x2db   :  { %2575 = vmatprep.subr.bf16.mxu1 %v19422_v5  ;;  %2527 = vmatpush1.bf16.msra.mxu0 %v19417_v4  ;;  %v1490_v4 = vld [vmem:[#allocation3 + $0x8] sm:$0xff] }
 0x2dc   :  { %2528 = vmatprep.subr.bf16.mxu0 %v19425_v7  ;;  %v19500_v5 = vld [vmem:[#allocation12 + $0x284] ss:$16 sps:$4 sm:$0xff]  }
 0x2dd   :  { %v19503_v7 = vld [vmem:[#allocation12 + $0x24] ss:$16 sps:$4 sm:$0xff]  }
 0x2de   :  { %2576 = vmatpush1.bf16.msra.mxu1 %v19420_v6  ;;  %v19498_v6 = vld [vmem:[#allocation12 + $0x280] ss:$16 sps:$4 sm:$0xff]  }
 0x2df   :  { %2577 = vmatprep.subr.bf16.mxu1 %v19428_v10  ;;  %2529 = vmatpush1.bf16.msra.mxu0 %v19423_v9  ;;  %v22410_v9 = vpack.c.bf16 %v1490_v4, %v1490_v4  ;;  %v19501_v10 = vld [vmem:[#allocation12 + $0x20] ss:$16 sps:$4 sm:$0xff]   ;;  %v19578_v4 = vld [vmem:[#allocation12 + $0x22c] ss:$16 sps:$4 sm:$0xff]  }
 0x2e0   :  { %2530 = vmatprep.subr.bf16.mxu0 %v19431_v12  ;;  %v19504_v12 = vld [vmem:[#allocation12 + $0x2a0] ss:$16 sps:$4 sm:$0xff]  }
 0x2e2   :  { %2578 = vmatpush1.bf16.msra.mxu1 %v19426_v11  ;;  %v19506_v11 = vld [vmem:[#allocation12 + $0x2a4] ss:$16 sps:$4 sm:$0xff]  }
 0x2e3   :  { %2579 = vmatprep.subr.bf16.mxu1 %v19434_v14  ;;  %2531 = vmatpush1.bf16.msra.mxu0 %v19429_v13  ;;  %v19509_v13 = vld [vmem:[#allocation12 + $0x44] ss:$16 sps:$4 sm:$0xff]   ;;  %v19507_v14 = vld [vmem:[#allocation12 + $0x40] ss:$16 sps:$4 sm:$0xff]  }
 0x2e4   :  { %2532 = vmatprep.subr.bf16.mxu0 %v19437_v18  ;;  %v19510_v18 = vld [vmem:[#allocation12 + $0x2c0] ss:$16 sps:$4 sm:$0xff]  }
 0x2e6   :  { %2580 = vmatpush1.bf16.msra.mxu1 %v19432_v17  ;;  %v19512_v17 = vld [vmem:[#allocation12 + $0x2c4] ss:$16 sps:$4 sm:$0xff]  }
 0x2e7   :  { %2581 = vmatprep.subr.bf16.mxu1 %v19440_v20  ;;  %2533 = vmatpush1.bf16.msra.mxu0 %v19435_v19  ;;  %v19515_v19 = vld [vmem:[#allocation12 + $0x64] ss:$16 sps:$4 sm:$0xff]   ;;  %v19513_v20 = vld [vmem:[#allocation12 + $0x60] ss:$16 sps:$4 sm:$0xff]  }
 0x2e8   :  { %2534 = vmatprep.subr.bf16.mxu0 %v19443_v22  ;;  %v19521_v22 = vld [vmem:[#allocation12 + $0x84] ss:$16 sps:$4 sm:$0xff]  }
 0x2ea   :  { %2582 = vmatpush1.bf16.msra.mxu1 %v19438_v21  ;;  %v19518_v21 = vld [vmem:[#allocation12 + $0x2e4] ss:$16 sps:$4 sm:$0xff]  }
 0x2eb   :  { %2583 = vmatprep.subr.bf16.mxu1 %v19446_v24  ;;  %2535 = vmatpush1.bf16.msra.mxu0 %v19441_v23  ;;  %v19519_v23 = vld [vmem:[#allocation12 + $0x80] ss:$16 sps:$4 sm:$0xff]   ;;  %v19524_v24 = vld [vmem:[#allocation12 + $0x304] ss:$16 sps:$4 sm:$0xff]  }
 0x2ec   :  { %2536 = vmatprep.subr.bf16.mxu0 %v19449_v26  ;;  %v19527_v26 = vld [vmem:[#allocation12 + $0xa4] ss:$16 sps:$4 sm:$0xff]  }
 0x2ee   :  { %2584 = vmatpush1.bf16.msra.mxu1 %v19444_v25  ;;  %v19522_v25 = vld [vmem:[#allocation12 + $0x300] ss:$16 sps:$4 sm:$0xff]  }
 0x2ef   :  { %2585 = vmatprep.subr.bf16.mxu1 %v19452_v29  ;;  %2537 = vmatpush1.bf16.msra.mxu0 %v19447_v27  ;;  %v19525_v27 = vld [vmem:[#allocation12 + $0xa0] ss:$16 sps:$4 sm:$0xff]   ;;  %v19530_v29 = vld [vmem:[#allocation12 + $0x324] ss:$16 sps:$4 sm:$0xff]  }
 0x2f0   :  { %2538 = vmatprep.subr.bf16.mxu0 %v19455_v31  ;;  %v19533_v31 = vld [vmem:[#allocation12 + $0xc4] ss:$16 sps:$4 sm:$0xff]  }
 0x2f2   :  { %2586 = vmatpush1.bf16.msra.mxu1 %v19450_v30  ;;  %v19528_v30 = vld [vmem:[#allocation12 + $0x320] ss:$16 sps:$4 sm:$0xff]  }
 0x2f3   :  { %2587 = vmatprep.subr.bf16.mxu1 %v19458_v33  ;;  %2539 = vmatpush1.bf16.msra.mxu0 %v19453_v32  ;;  %v19531_v32 = vld [vmem:[#allocation12 + $0xc0] ss:$16 sps:$4 sm:$0xff]   ;;  %v19536_v33 = vld [vmem:[#allocation12 + $0x344] ss:$16 sps:$4 sm:$0xff]  }
 0x2f4   :  { %2540 = vmatprep.subr.bf16.mxu0 %v19461_v35  ;;  %v19539_v35 = vld [vmem:[#allocation12 + $0xe4] ss:$16 sps:$4 sm:$0xff]  }
 0x2f6   :  { %2588 = vmatpush1.bf16.msra.mxu1 %v19456_v34  ;;  %v19534_v34 = vld [vmem:[#allocation12 + $0x340] ss:$16 sps:$4 sm:$0xff]  }
 0x2f7   :  { %2589 = vmatprep.subr.bf16.mxu1 %v19464_v37  ;;  %2541 = vmatpush1.bf16.msra.mxu0 %v19459_v36  ;;  %v19537_v36 = vld [vmem:[#allocation12 + $0xe0] ss:$16 sps:$4 sm:$0xff]   ;;  %v19542_v37 = vld [vmem:[#allocation12 + $0x364] ss:$16 sps:$4 sm:$0xff]  }
 0x2f8   :  { %2542 = vmatprep.subr.bf16.mxu0 %v19467_v42  ;;  %v19545_v42 = vld [vmem:[#allocation12 + $0x104] ss:$16 sps:$4 sm:$0xff]  }
 0x2fa   :  { %2590 = vmatpush1.bf16.msra.mxu1 %v19462_v39  ;;  %v19540_v39 = vld [vmem:[#allocation12 + $0x360] ss:$16 sps:$4 sm:$0xff]  }
 0x2fb   :  { %2591 = vmatprep.subr.bf16.mxu1 %v19470_v44  ;;  %2543 = vmatpush1.bf16.msra.mxu0 %v19465_v43  ;;  %v19543_v43 = vld [vmem:[#allocation12 + $0x100] ss:$16 sps:$4 sm:$0xff]   ;;  %v19548_v44 = vld [vmem:[#allocation12 + $0x384] ss:$16 sps:$4 sm:$0xff]  }
 0x2fc   :  { %2544 = vmatprep.subr.bf16.mxu0 %v19473_v46  ;;  %v19551_v46 = vld [vmem:[#allocation12 + $0x124] ss:$16 sps:$4 sm:$0xff]  }
 0x2fe   :  { %2592 = vmatpush1.bf16.msra.mxu1 %v19468_v45  ;;  %v19546_v45 = vld [vmem:[#allocation12 + $0x380] ss:$16 sps:$4 sm:$0xff]  }
 0x2ff   :  { %3283 = vmatprep.subr.bf16.mxu1 %v19476_v48  ;;  %2545 = vmatpush1.bf16.msra.mxu0 %v19471_v47  ;;  %v19549_v47 = vld [vmem:[#allocation12 + $0x120] ss:$16 sps:$4 sm:$0xff]   ;;  %v19554_v48 = vld [vmem:[#allocation12 + $0x3a4] ss:$16 sps:$4 sm:$0xff]  }
 0x300   :  { %2546 = vmatprep.subr.bf16.mxu0 %v19479_v51  ;;  %v19555_v51 = vld [vmem:[#allocation12 + $0x140] ss:$16 sps:$4 sm:$0xff]  }
 0x301   :  { %2594 = vmatmul.mubr.bf16.vlgmr.msra.gmra.mrb[12].mxu1 %v22400_v28  ;;  %v19495_v28 = vld [vmem:[#allocation12] ss:$16 sps:$4 sm:$0xff]  }
 0x302   :  { %3284 = vmatpush1.bf16.msra.mxu1 %v19474_v49  ;;  %3315 = vmatprep.mubr.bf16.mxu1 %v22406_v54  ;;  %v19552_v49 = vld [vmem:[#allocation12 + $0x3a0] ss:$16 sps:$4 sm:$0xff]  }
 0x303   :  { %3285 = vmatprep.subr.bf16.mxu1 %v19482_v53  ;;  %2547 = vmatpush1.bf16.msra.mxu0 %v19477_v52  ;;  %v19560_v52 = vld [vmem:[#allocation12 + $0x3c4] ss:$16 sps:$4 sm:$0xff]   ;;  %v19558_v53 = vld [vmem:[#allocation12 + $0x3c0] ss:$16 sps:$4 sm:$0xff]  }
 0x304   :  { %2548 = vmatprep.subr.bf16.mxu0 %v19485_v57  ;;  %v19561_v57 = vld [vmem:[#allocation12 + $0x160] ss:$16 sps:$4 sm:$0xff]  }
 0x306   :  { %3286 = vmatpush1.bf16.msra.mxu1 %v19480_v56  ;;  %v19563_v56 = vld [vmem:[#allocation12 + $0x164] ss:$16 sps:$4 sm:$0xff]  }
 0x307   :  { %3287 = vmatprep.subr.bf16.mxu1 %v19488_v59  ;;  %2549 = vmatpush1.bf16.msra.mxu0 %v19483_v58  ;;  %v19566_v58 = vld [vmem:[#allocation12 + $0x3e4] ss:$16 sps:$4 sm:$0xff]   ;;  %v19564_v59 = vld [vmem:[#allocation12 + $0x3e0] ss:$16 sps:$4 sm:$0xff]  }
 0x308   :  { %2550 = vmatprep.subr.bf16.mxu0 %v19491_v61  ;;  %v19567_v61 = vld [vmem:[#allocation12 + $0x180] ss:$16 sps:$4 sm:$0xff]  }
 0x30a   :  { %3288 = vmatpush1.bf16.msra.mxu1 %v19486_v60  ;;  %v19569_v60 = vld [vmem:[#allocation12 + $0x184] ss:$16 sps:$4 sm:$0xff]  }
 0x30b   :  { %3289 = vmatprep.subr.bf16.mxu1 %v19494_v63  ;;  %2551 = vmatpush1.bf16.msra.mxu0 %v19489_v62  ;;  %v1491_v62 = vld [vmem:[#allocation3 + $0x10] sm:$0xff] }
 0x30c   :  { %3242 = vmatprep.subr.bf16.mxu0 %v19497_v3  ;;  %v19572_v63 = vld [vmem:[#allocation12 + $0x20c] ss:$16 sps:$4 sm:$0xff]   ;;  %v19575_v3 = vld [vmem:[#allocation12 + $0x1a4] ss:$16 sps:$4 sm:$0xff]  }
 0x30e   :  { %3290 = vmatpush1.bf16.msra.mxu1 %v19492_v2  ;;  %2553 = vmatmul.mubr.bf16.vlgmr.msra.gmra.mrb[16].mxu0 %v22403_v55  ;;  %v19516_v55 = vld [vmem:[#allocation12 + $0x2e0] ss:$16 sps:$4 sm:$0xff]   ;;  %v19570_v2 = vld [vmem:[#allocation12 + $0x208] ss:$16 sps:$4 sm:$0xff]  }
 0x30f   :  { %3291 = vmatprep.subr.bf16.mxu1 %v19500_v5  ;;  %3243 = vmatpush1.bf16.msra.mxu0 %v19495_v28  ;;  %v19573_v28 = vld [vmem:[#allocation12 + $0x1a0] ss:$16 sps:$4 sm:$0xff]   ;;  %v22414_v5 = vpack.c.bf16 %v1491_v62, %v1491_v62  ;;  %v19650_v62 = vld [vmem:[#allocation12 + $0x3ac] ss:$16 sps:$4 sm:$0xff]  }
 0x310   :  { %3274 = vmatprep.mubr.bf16.mxu0 %v22410_v9  ;;  %3244 = vmatprep.subr.bf16.mxu0 %v19503_v7  ;;  %v19581_v7 = vld [vmem:[#allocation12 + $0x1c4] ss:$16 sps:$4 sm:$0xff]  }
 0x312   :  { %3292 = vmatpush1.bf16.msra.mxu1 %v19498_v6  ;;  %v19576_v6 = vld [vmem:[#allocation12 + $0x228] ss:$16 sps:$4 sm:$0xff]  }
 0x313   :  { %3293 = vmatprep.subr.bf16.mxu1 %v19506_v11  ;;  %3245 = vmatpush1.bf16.msra.mxu0 %v19501_v10  ;;  %v19579_v10 = vld [vmem:[#allocation12 + $0x1c0] ss:$16 sps:$4 sm:$0xff]   ;;  %v19584_v11 = vld [vmem:[#allocation12 + $0x24c] ss:$16 sps:$4 sm:$0xff]  }
 0x314   :  { %3246 = vmatprep.subr.bf16.mxu0 %v19509_v13  ;;  %v19587_v13 = vld [vmem:[#allocation12 + $0x1e4] ss:$16 sps:$4 sm:$0xff]  }
 0x316   :  { %3294 = vmatpush1.bf16.msra.mxu1 %v19504_v12  ;;  %v19582_v12 = vld [vmem:[#allocation12 + $0x248] ss:$16 sps:$4 sm:$0xff]  }
 0x317   :  { %3295 = vmatprep.subr.bf16.mxu1 %v19512_v17  ;;  %3247 = vmatpush1.bf16.msra.mxu0 %v19507_v14  ;;  %v19585_v14 = vld [vmem:[#allocation12 + $0x1e0] ss:$16 sps:$4 sm:$0xff]   ;;  %v19590_v17 = vld [vmem:[#allocation12 + $0x26c] ss:$16 sps:$4 sm:$0xff]  }
 0x318   :  { %3248 = vmatprep.subr.bf16.mxu0 %v19515_v19  ;;  %v1489_v19 = vld [vmem:[#allocation3] sm:$0xff] }
 0x31a   :  { %3296 = vmatpush1.bf16.msra.mxu1 %v19510_v18  ;;  %v19588_v18 = vld [vmem:[#allocation12 + $0x268] ss:$16 sps:$4 sm:$0xff]  }
 0x31b   :  { %3297 = vmatprep.subr.bf16.mxu1 %v19518_v21  ;;  %3249 = vmatpush1.bf16.msra.mxu0 %v19513_v20  ;;  %v19593_v20 = vld [vmem:[#allocation12 + $0xc] ss:$16 sps:$4 sm:$0xff]   ;;  %v19591_v21 = vld [vmem:[#allocation12 + $0x8] ss:$16 sps:$4 sm:$0xff]  }
 0x31c   :  { %3250 = vmatprep.subr.bf16.mxu0 %v19521_v22  ;;  %v19599_v22 = vld [vmem:[#allocation12 + $0x2c] ss:$16 sps:$4 sm:$0xff]  }
 0x31e   :  { %3298 = vmatpush1.bf16.msra.mxu1 %v19516_v55  ;;  %v19596_v55 = vld [vmem:[#allocation12 + $0x28c] ss:$16 sps:$4 sm:$0xff]  }
 0x31f   :  { %3299 = vmatprep.subr.bf16.mxu1 %v19524_v24  ;;  %3251 = vmatpush1.bf16.msra.mxu0 %v19519_v23  ;;  %v22418_v23 = vpack.c.bf16 %v1489_v19, %v1489_v19  ;;  %v19597_v24 = vld [vmem:[#allocation12 + $0x28] ss:$16 sps:$4 sm:$0xff]   ;;  %v19666_v19 = vld [vmem:[#allocation12 + $0xa00] ss:$16 sps:$4 sm:$0xff]  }
 0x320   :  { %3252 = vmatprep.subr.bf16.mxu0 %v19527_v26  ;;  %v19600_v26 = vld [vmem:[#allocation12 + $0x2a8] ss:$16 sps:$4 sm:$0xff]  }
 0x322   :  { %3300 = vmatpush1.bf16.msra.mxu1 %v19522_v25  ;;  %v19602_v25 = vld [vmem:[#allocation12 + $0x2ac] ss:$16 sps:$4 sm:$0xff]  }
 0x323   :  { %3301 = vmatprep.subr.bf16.mxu1 %v19530_v29  ;;  %3253 = vmatpush1.bf16.msra.mxu0 %v19525_v27  ;;  %v19605_v27 = vld [vmem:[#allocation12 + $0x4c] ss:$16 sps:$4 sm:$0xff]   ;;  %v19603_v29 = vld [vmem:[#allocation12 + $0x48] ss:$16 sps:$4 sm:$0xff]  }
 0x324   :  { %3254 = vmatprep.subr.bf16.mxu0 %v19533_v31  ;;  %v19606_v31 = vld [vmem:[#allocation12 + $0x2c8] ss:$16 sps:$4 sm:$0xff]  }
 0x326   :  { %3302 = vmatpush1.bf16.msra.mxu1 %v19528_v30  ;;  %v19608_v30 = vld [vmem:[#allocation12 + $0x2cc] ss:$16 sps:$4 sm:$0xff]  }
 0x327   :  { %3303 = vmatprep.subr.bf16.mxu1 %v19536_v33  ;;  %3255 = vmatpush1.bf16.msra.mxu0 %v19531_v32  ;;  %v19611_v32 = vld [vmem:[#allocation12 + $0x6c] ss:$16 sps:$4 sm:$0xff]   ;;  %v19609_v33 = vld [vmem:[#allocation12 + $0x68] ss:$16 sps:$4 sm:$0xff]  }
 0x328   :  { %3256 = vmatprep.subr.bf16.mxu0 %v19539_v35  ;;  %v19612_v35 = vld [vmem:[#allocation12 + $0x2e8] ss:$16 sps:$4 sm:$0xff]  }
 0x32a   :  { %3304 = vmatpush1.bf16.msra.mxu1 %v19534_v34  ;;  %v19614_v34 = vld [vmem:[#allocation12 + $0x2ec] ss:$16 sps:$4 sm:$0xff]  }
 0x32b   :  { %3305 = vmatprep.subr.bf16.mxu1 %v19542_v37  ;;  %3257 = vmatpush1.bf16.msra.mxu0 %v19537_v36  ;;  %v19617_v36 = vld [vmem:[#allocation12 + $0x8c] ss:$16 sps:$4 sm:$0xff]  }
 0x32c   :  { %3258 = vmatprep.subr.bf16.mxu0 %v19545_v42  ;;  %v19620_v37 = vld [vmem:[#allocation12 + $0x30c] ss:$16 sps:$4 sm:$0xff]  }
 0x32d   :  { %v19623_v42 = vld [vmem:[#allocation12 + $0xac] ss:$16 sps:$4 sm:$0xff]  }
 0x32e   :  { %3306 = vmatpush1.bf16.msra.mxu1 %v19540_v39  ;;  %v19618_v39 = vld [vmem:[#allocation12 + $0x308] ss:$16 sps:$4 sm:$0xff]  }
 0x32f   :  { %3307 = vmatprep.subr.bf16.mxu1 %v19548_v44  ;;  %3259 = vmatpush1.bf16.msra.mxu0 %v19543_v43  ;;  %v19621_v43 = vld [vmem:[#allocation12 + $0xa8] ss:$16 sps:$4 sm:$0xff]   ;;  %v19626_v44 = vld [vmem:[#allocation12 + $0x32c] ss:$16 sps:$4 sm:$0xff]  }
 0x330   :  { %3260 = vmatprep.subr.bf16.mxu0 %v19551_v46  ;;  %v19629_v46 = vld [vmem:[#allocation12 + $0xcc] ss:$16 sps:$4 sm:$0xff]  }
 0x332   :  { %3308 = vmatpush1.bf16.msra.mxu1 %v19546_v45  ;;  %v19624_v45 = vld [vmem:[#allocation12 + $0x328] ss:$16 sps:$4 sm:$0xff]  }
 0x333   :  { %3309 = vmatprep.subr.bf16.mxu1 %v19554_v48  ;;  %3261 = vmatpush1.bf16.msra.mxu0 %v19549_v47  ;;  %v19632_v47 = vld [vmem:[#allocation12 + $0x34c] ss:$16 sps:$4 sm:$0xff]   ;;  %v19627_v48 = vld [vmem:[#allocation12 + $0xc8] ss:$16 sps:$4 sm:$0xff]  }
 0x334   :  { %3262 = vmatprep.subr.bf16.mxu0 %v19557_v50  ;;  %v19635_v50 = vld [vmem:[#allocation12 + $0xec] ss:$16 sps:$4 sm:$0xff]  }
 0x336   :  { %3310 = vmatpush1.bf16.msra.mxu1 %v19552_v49  ;;  %v19630_v49 = vld [vmem:[#allocation12 + $0x348] ss:$16 sps:$4 sm:$0xff]  }
 0x337   :  { %3311 = vmatprep.subr.bf16.mxu1 %v19560_v52  ;;  %3263 = vmatpush1.bf16.msra.mxu0 %v19555_v51  ;;  %v19633_v51 = vld [vmem:[#allocation12 + $0xe8] ss:$16 sps:$4 sm:$0xff]   ;;  %v19638_v52 = vld [vmem:[#allocation12 + $0x36c] ss:$16 sps:$4 sm:$0xff]  }
 0x338   :  { %3264 = vmatprep.subr.bf16.mxu0 %v19563_v56  ;;  %v19641_v56 = vld [vmem:[#allocation12 + $0x10c] ss:$16 sps:$4 sm:$0xff]  }
 0x33a   :  { %3312 = vmatpush1.bf16.msra.mxu1 %v19558_v53  ;;  %v19636_v53 = vld [vmem:[#allocation12 + $0x368] ss:$16 sps:$4 sm:$0xff]  }
 0x33b   :  { %3313 = vmatprep.subr.bf16.mxu1 %v19566_v58  ;;  %3265 = vmatpush1.bf16.msra.mxu0 %v19561_v57  ;;  %v19639_v57 = vld [vmem:[#allocation12 + $0x108] ss:$16 sps:$4 sm:$0xff]   ;;  %v19644_v58 = vld [vmem:[#allocation12 + $0x38c] ss:$16 sps:$4 sm:$0xff]  }
 0x33c   :  { %3266 = vmatprep.subr.bf16.mxu0 %v19569_v60  ;;  %v19647_v60 = vld [vmem:[#allocation12 + $0x12c] ss:$16 sps:$4 sm:$0xff]  }
 0x33e   :  { %3314 = vmatpush1.bf16.msra.mxu1 %v19564_v59  ;;  %v19642_v59 = vld [vmem:[#allocation12 + $0x388] ss:$16 sps:$4 sm:$0xff]  }
 0x33f   :  { %3365 = vmatprep.subr.bf16.mxu1 %v19572_v63  ;;  %3267 = vmatpush1.bf16.msra.mxu0 %v19567_v61  ;;  %v19645_v61 = vld [vmem:[#allocation12 + $0x128] ss:$16 sps:$4 sm:$0xff]  }
 0x340   :  { %3268 = vmatprep.subr.bf16.mxu0 %v19575_v3  ;;  %v19648_v63 = vld [vmem:[#allocation12 + $0x3a8] ss:$16 sps:$4 sm:$0xff]  }
 0x341   :  { %3316 = vmatmul.mubr.bf16.vlgmr.msra.gmra.mrb[16].mxu1 %v22414_v5  ;;  %v19651_v3 = vld [vmem:[#allocation12 + $0x148] ss:$16 sps:$4 sm:$0xff]  }
 0x342   :  { %3366 = vmatpush1.bf16.msra.mxu1 %v19570_v2  ;;  %3397 = vmatprep.mubr.bf16.mxu1 %v22406_v54  ;;  %v19594_v54 = vld [vmem:[#allocation12 + $0x288] ss:$16 sps:$4 sm:$0xff]   ;;  %v19653_v2 = vld [vmem:[#allocation12 + $0x14c] ss:$16 sps:$4 sm:$0xff]  }
 0x343   :  { %3367 = vmatprep.subr.bf16.mxu1 %v19578_v4  ;;  %3269 = vmatpush1.bf16.msra.mxu0 %v19573_v28  ;;  %v19656_v28 = vld [vmem:[#allocation12 + $0x3cc] ss:$16 sps:$4 sm:$0xff]   ;;  %v19654_v4 = vld [vmem:[#allocation12 + $0x3c8] ss:$16 sps:$4 sm:$0xff]  }
 0x344   :  { %3270 = vmatprep.subr.bf16.mxu0 %v19581_v7  ;;  %v19657_v7 = vld [vmem:[#allocation12 + $0x168] ss:$16 sps:$4 sm:$0xff]  }
 0x346   :  { %3368 = vmatpush1.bf16.msra.mxu1 %v19576_v6  ;;  %v19659_v6 = vld [vmem:[#allocation12 + $0x16c] ss:$16 sps:$4 sm:$0xff]  }
 0x347   :  { %3369 = vmatprep.subr.bf16.mxu1 %v19584_v11  ;;  %3271 = vmatpush1.bf16.msra.mxu0 %v19579_v10  ;;  %v19662_v10 = vld [vmem:[#allocation12 + $0x3ec] ss:$16 sps:$4 sm:$0xff]   ;;  %v3409_v11 = vld [vmem:[#allocation3 + $0x18] sm:$0xfc] }
 0x348   :  { %3272 = vmatprep.subr.bf16.mxu0 %v19587_v13  ;;  %v19660_v13 = vld [vmem:[#allocation12 + $0x3e8] ss:$16 sps:$4 sm:$0xff]  }
 0x34a   :  { %3370 = vmatpush1.bf16.msra.mxu1 %v19582_v12  ;;  %v3413_v12 = vld [vmem:[#allocation3 + $0x38] sm:$0x3] }
 0x34b   :  { %3371 = vmatprep.subr.bf16.mxu1 %v19590_v17  ;;  %3273 = vmatpush1.bf16.msra.mxu0 %v19585_v14  ;;  %v19665_v14 = vld [vmem:[#allocation12 + $0x18c] ss:$16 sps:$4 sm:$0xff]   ;;  %v19663_v17 = vld [vmem:[#allocation12 + $0x188] ss:$16 sps:$4 sm:$0xff]  }
 0x34c   :  { %3324 = vmatprep.subr.bf16.mxu0 %v19593_v20  ;;  %v3417_v20 = vpack.c.bf16 %v3413_v12, %v3409_v11  ;;  %v19720_v11 = vld [vmem:[#allocation12 + $0xb20] ss:$16 sps:$4 sm:$0xff]   ;;  %v19725_v12 = vld [vmem:[#allocation12 + $0x8c4] ss:$16 sps:$4 sm:$0xff]  }
 0x34e   :  { %3372 = vmatpush1.bf16.msra.mxu1 %v19588_v18  ;;  %3275 = vmatmul.mubr.bf16.vlgmr.msra.gmra.mrb[20].mxu0 %v22418_v23  ;;  %v19668_v18 = vld [vmem:[#allocation12 + $0xa04] ss:$16 sps:$4 sm:$0xff]  }
 0x34f   :  { %3373 = vmatprep.subr.bf16.mxu1 %v19596_v55  ;;  %3325 = vmatpush1.bf16.msra.mxu0 %v19591_v21  ;;  %v19671_v21 = vld [vmem:[#allocation12 + $0x1ac] ss:$16 sps:$4 sm:$0xff]   ;;  %v19669_v55 = vld [vmem:[#allocation12 + $0x1a8] ss:$16 sps:$4 sm:$0xff]  }
 0x350   :  { %3356 = vmatprep.mubr.bf16.mxu0 %v22410_v9  ;;  %3326 = vmatprep.subr.bf16.mxu0 %v19599_v22  ;;  %v19615_v9 = vld [vmem:[#allocation12 + $0x88] ss:$16 sps:$4 sm:$0xff]   ;;  %v22422_v22 = vrot.slane %v3417_v20, 1  ;;  %v19731_v20 = vld [vmem:[#allocation12 + $0x8e4] ss:$16 sps:$4 sm:$0xff]  }
 0x352   :  { %3374 = vmatpush1.bf16.msra.mxu1 %v19594_v54  ;;  %v19674_v54 = vld [vmem:[#allocation12 + $0xa24] ss:$16 sps:$4 sm:$0xff]  }
 0x353   :  { %3375 = vmatprep.subr.bf16.mxu1 %v19602_v25  ;;  %3327 = vmatpush1.bf16.msra.mxu0 %v19597_v24  ;;  %v19672_v24 = vld [vmem:[#allocation12 + $0xa20] ss:$16 sps:$4 sm:$0xff]   ;;  %v19677_v25 = vld [vmem:[#allocation12 + $0x1cc] ss:$16 sps:$4 sm:$0xff]  }
 0x354   :  { %3328 = vmatprep.subr.bf16.mxu0 %v19605_v27  ;;  %v19680_v27 = vld [vmem:[#allocation12 + $0xa44] ss:$16 sps:$4 sm:$0xff]  }
 0x356   :  { %3376 = vmatpush1.bf16.msra.mxu1 %v19600_v26  ;;  %v19675_v26 = vld [vmem:[#allocation12 + $0x1c8] ss:$16 sps:$4 sm:$0xff]  }
 0x357   :  { %3377 = vmatprep.subr.bf16.mxu1 %v19608_v30  ;;  %3329 = vmatpush1.bf16.msra.mxu0 %v19603_v29  ;;  %v19678_v29 = vld [vmem:[#allocation12 + $0xa40] ss:$16 sps:$4 sm:$0xff]   ;;  %v19683_v30 = vld [vmem:[#allocation12 + $0x1ec] ss:$16 sps:$4 sm:$0xff]  }
 0x358   :  { %3330 = vmatprep.subr.bf16.mxu0 %v19611_v32  ;;  %v3411_v32 = vld [vmem:[#allocation3 + $0x28] sm:$0x3] }
 0x35a   :  { %3378 = vmatpush1.bf16.msra.mxu1 %v19606_v31  ;;  %v3407_v31 = vld [vmem:[#allocation3 + $0x8] sm:$0xfc] }
 0x35b   :  { %3379 = vmatprep.subr.bf16.mxu1 %v19614_v34  ;;  %3331 = vmatpush1.bf16.msra.mxu0 %v19609_v33  ;;  %v19681_v33 = vld [vmem:[#allocation12 + $0x1e8] ss:$16 sps:$4 sm:$0xff]   ;;  %v19686_v34 = vld [vmem:[#allocation12 + $0xa64] ss:$16 sps:$4 sm:$0xff]  }
 0x35c   :  { %3332 = vmatprep.subr.bf16.mxu0 %v19617_v36  ;;  %v19687_v36 = vld [vmem:[#allocation12 + $0x800] ss:$16 sps:$4 sm:$0xff]  }
 0x35e   :  { %3380 = vmatpush1.bf16.msra.mxu1 %v19612_v35  ;;  %v19689_v35 = vld [vmem:[#allocation12 + $0x804] ss:$16 sps:$4 sm:$0xff]  }
 0x35f   :  { %3381 = vmatprep.subr.bf16.mxu1 %v19620_v37  ;;  %3333 = vmatpush1.bf16.msra.mxu0 %v19615_v9  ;;  %v3415_v9 = vpack.c.bf16 %v3411_v32, %v3407_v31  ;;  %v19692_v37 = vld [vmem:[#allocation12 + $0xa84] ss:$16 sps:$4 sm:$0xff]   ;;  %v19732_v32 = vld [vmem:[#allocation12 + $0xb60] ss:$16 sps:$4 sm:$0xff]  }
 0x360   :  { %3334 = vmatprep.subr.bf16.mxu0 %v19623_v42  ;;  %v19695_v42 = vld [vmem:[#allocation12 + $0x824] ss:$16 sps:$4 sm:$0xff]  }
 0x362   :  { %3382 = vmatpush1.bf16.msra.mxu1 %v19618_v39  ;;  %v19690_v39 = vld [vmem:[#allocation12 + $0xa80] ss:$16 sps:$4 sm:$0xff]  }
 0x363   :  { %3383 = vmatprep.subr.bf16.mxu1 %v19626_v44  ;;  %3335 = vmatpush1.bf16.msra.mxu0 %v19621_v43  ;;  %v22426_v43 = vrot.slane %v3415_v9, 1  ;;  %v19693_v44 = vld [vmem:[#allocation12 + $0x820] ss:$16 sps:$4 sm:$0xff]  }
 0x364   :  { %3336 = vmatprep.subr.bf16.mxu0 %v19629_v46  ;;  %v19696_v46 = vld [vmem:[#allocation12 + $0xaa0] ss:$16 sps:$4 sm:$0xff]  }
 0x365   :  { %v19741_v9 = vld [vmem:[#allocation12 + $0x920] ss:$16 sps:$4 sm:$0xff]  }
 0x366   :  { %3384 = vmatpush1.bf16.msra.mxu1 %v19624_v45  ;;  %v19698_v45 = vld [vmem:[#allocation12 + $0xaa4] ss:$16 sps:$4 sm:$0xff]  }
 0x367   :  { %3385 = vmatprep.subr.bf16.mxu1 %v19632_v47  ;;  %3337 = vmatpush1.bf16.msra.mxu0 %v19627_v48  ;;  %v19701_v47 = vld [vmem:[#allocation12 + $0x844] ss:$16 sps:$4 sm:$0xff]   ;;  %v19699_v48 = vld [vmem:[#allocation12 + $0x840] ss:$16 sps:$4 sm:$0xff]  }
 0x368   :  { %3338 = vmatprep.subr.bf16.mxu0 %v19635_v50 }
 0x36a   :  { %3386 = vmatpush1.bf16.msra.mxu1 %v19630_v49  ;;  %v19704_v49 = vld [vmem:[#allocation12 + $0xac4] ss:$16 sps:$4 sm:$0xff]  }
 0x36b   :  { %3387 = vmatprep.subr.bf16.mxu1 %v19638_v52  ;;  %3339 = vmatpush1.bf16.msra.mxu0 %v19633_v51  ;;  %v19702_v51 = vld [vmem:[#allocation12 + $0xac0] ss:$16 sps:$4 sm:$0xff]   ;;  %v19707_v52 = vld [vmem:[#allocation12 + $0x864] ss:$16 sps:$4 sm:$0xff]  }
 0x36c   :  { %3340 = vmatprep.subr.bf16.mxu0 %v19641_v56  ;;  %v19705_v56 = vld [vmem:[#allocation12 + $0x860] ss:$16 sps:$4 sm:$0xff]  }
 0x36e   :  { %3388 = vmatpush1.bf16.msra.mxu1 %v19636_v53 }
 0x36f   :  { %3389 = vmatprep.subr.bf16.mxu1 %v19644_v58  ;;  %3341 = vmatpush1.bf16.msra.mxu0 %v19639_v57  ;;  %v19710_v57 = vld [vmem:[#allocation12 + $0xae4] ss:$16 sps:$4 sm:$0xff]  }
 0x370   :  { %3342 = vmatprep.subr.bf16.mxu0 %v19647_v60  ;;  %v19713_v60 = vld [vmem:[#allocation12 + $0x884] ss:$16 sps:$4 sm:$0xff]  }
 0x372   :  { %3390 = vmatpush1.bf16.msra.mxu1 %v19642_v59  ;;  %v19708_v59 = vld [vmem:[#allocation12 + $0xae0] ss:$16 sps:$4 sm:$0xff]  }
 0x373   :  { %3391 = vmatprep.subr.bf16.mxu1 %v19650_v62  ;;  %3343 = vmatpush1.bf16.msra.mxu0 %v19645_v61  ;;  %v19711_v61 = vld [vmem:[#allocation12 + $0x880] ss:$16 sps:$4 sm:$0xff]   ;;  %v19716_v62 = vld [vmem:[#allocation12 + $0xb04] ss:$16 sps:$4 sm:$0xff]  }
 0x374   :  { %3344 = vmatprep.subr.bf16.mxu0 %v19653_v2  ;;  %v19719_v2 = vld [vmem:[#allocation12 + $0x8a4] ss:$16 sps:$4 sm:$0xff]  }
 0x376   :  { %3392 = vmatpush1.bf16.msra.mxu1 %v19648_v63  ;;  %v19714_v63 = vld [vmem:[#allocation12 + $0xb00] ss:$16 sps:$4 sm:$0xff]  }
 0x377   :  { %3393 = vmatprep.subr.bf16.mxu1 %v19656_v28  ;;  %3345 = vmatpush1.bf16.msra.mxu0 %v19651_v3  ;;  %v19717_v3 = vld [vmem:[#allocation12 + $0x8a0] ss:$16 sps:$4 sm:$0xff]   ;;  %v19722_v28 = vld [vmem:[#allocation12 + $0xb24] ss:$16 sps:$4 sm:$0xff]  }
 0x378   :  { %3346 = vmatprep.subr.bf16.mxu0 %v19659_v6  ;;  %v3412_v6 = vld [vmem:[#allocation3 + $0x30] sm:$0x3] }
 0x37a   :  { %3394 = vmatpush1.bf16.msra.mxu1 %v19654_v4  ;;  %v3408_v4 = vld [vmem:[#allocation3 + $0x10] sm:$0xfc] }
 0x37b   :  { %3395 = vmatprep.subr.bf16.mxu1 %v19662_v10  ;;  %3347 = vmatpush1.bf16.msra.mxu0 %v19657_v7  ;;  %v3406_v7 = vld [vmem:[#allocation3] sm:$0xfc]  ;;  %v3410_v10 = vld [vmem:[#allocation3 + $0x20] sm:$0x3] }
 0x37c   :  { %3348 = vmatprep.subr.bf16.mxu0 %v19665_v14 }
 0x37e   :  { %3396 = vmatpush1.bf16.msra.mxu1 %v19660_v13  ;;  %v19728_v13 = vld [vmem:[#allocation12 + $0xb44] ss:$16 sps:$4 sm:$0xff]  }
 0x37f   :  { %4240 = vmatprep.subr.bf16.mxu1 %v19668_v18  ;;  %3349 = vmatpush1.bf16.msra.mxu0 %v19663_v17  ;;  %v19723_v17 = vld [vmem:[#allocation12 + $0x8c0] ss:$16 sps:$4 sm:$0xff]  }
 0x380   :  { %3350 = vmatprep.subr.bf16.mxu0 %v19671_v21  ;;  %v3416_v21 = vpack.c.bf16 %v3412_v6, %v3408_v4  ;;  %v19780_v4 = vld [vmem:[#allocation12 + $0xa68] ss:$16 sps:$4 sm:$0xff]   ;;  %v19785_v6 = vld [vmem:[#allocation12 + $0x80c] ss:$16 sps:$4 sm:$0xff]  }
 0x381   :  { %3398 = vmatmul.mubr.bf16.vlgmr.msra.gmra.mrb[20].mxu1 %v22414_v5  ;;  %v19684_v5 = vld [vmem:[#allocation12 + $0xa60] ss:$16 sps:$4 sm:$0xff]  }
 0x382   :  { %4241 = vmatpush1.bf16.msra.mxu1 %v19666_v19  ;;  %4272 = vmatprep.mubr.bf16.mxu1 %v22422_v22 }
 0x383   :  { %4242 = vmatprep.subr.bf16.mxu1 %v19674_v54  ;;  %3351 = vmatpush1.bf16.msra.mxu0 %v19669_v55  ;;  %v3414_v55 = vpack.c.bf16 %v3410_v10, %v3406_v7  ;;  %v19783_v7 = vld [vmem:[#allocation12 + $0x808] ss:$16 sps:$4 sm:$0xff]   ;;  %v19788_v10 = vld [vmem:[#allocation12 + $0xa8c] ss:$16 sps:$4 sm:$0xff]  }
 0x384   :  { %3352 = vmatprep.subr.bf16.mxu0 %v19677_v25 }
 0x385   :  { %v22436_v31 = vrot.slane %v3414_v55, 1 }
 0x386   :  { %4243 = vmatpush1.bf16.msra.mxu1 %v19672_v24 }
 0x387   :  { %4244 = vmatprep.subr.bf16.mxu1 %v19680_v27  ;;  %3353 = vmatpush1.bf16.msra.mxu0 %v19675_v26  ;;  %v19726_v26 = vld [vmem:[#allocation12 + $0xb40] ss:$16 sps:$4 sm:$0xff]  }
 0x388   :  { %3354 = vmatprep.subr.bf16.mxu0 %v19683_v30  ;;  %v19729_v27 = vld [vmem:[#allocation12 + $0x8e0] ss:$16 sps:$4 sm:$0xff]   ;;  %v22434_v30 = vrot.slane %v3416_v21, 1 }
 0x38a   :  { %4245 = vmatpush1.bf16.msra.mxu1 %v19678_v29  ;;  %v19734_v29 = vld [vmem:[#allocation12 + $0xb64] ss:$16 sps:$4 sm:$0xff]  }
 0x38b   :  { %4246 = vmatprep.subr.bf16.mxu1 %v19686_v34  ;;  %3355 = vmatpush1.bf16.msra.mxu0 %v19681_v33  ;;  %v19737_v33 = vld [vmem:[#allocation12 + $0x904] ss:$16 sps:$4 sm:$0xff]   ;;  %v19735_v34 = vld [vmem:[#allocation12 + $0x900] ss:$16 sps:$4 sm:$0xff]  }
 0x38c   :  { %4199 = vmatprep.subr.bf16.mxu0 %v19689_v35  ;;  %v19738_v35 = vld [vmem:[#allocation12 + $0xb80] ss:$16 sps:$4 sm:$0xff]  }
 0x38e   :  { %4247 = vmatpush1.bf16.msra.mxu1 %v19684_v5  ;;  %3357 = vmatmul.mubr.bf16.vlgmr.msra.gmra.mrb[24].mxu0 %v22418_v23  ;;  %v19740_v5 = vld [vmem:[#allocation12 + $0xb84] ss:$16 sps:$4 sm:$0xff]  }
 0x38f   :  { %4248 = vmatprep.subr.bf16.mxu1 %v19692_v37  ;;  %4200 = vmatpush1.bf16.msra.mxu0 %v19687_v36  ;;  %v19743_v36 = vld [vmem:[#allocation12 + $0x924] ss:$16 sps:$4 sm:$0xff]  }
 0x390   :  { %4231 = vmatprep.mubr.bf16.mxu0 %v22426_v43  ;;  %4201 = vmatprep.subr.bf16.mxu0 %v19695_v42  ;;  %v19746_v37 = vld [vmem:[#allocation12 + $0xba4] ss:$16 sps:$4 sm:$0xff]  }
 0x391   :  { %v19749_v42 = vld [vmem:[#allocation12 + $0x944] ss:$16 sps:$4 sm:$0xff]  }
 0x392   :  { %4249 = vmatpush1.bf16.msra.mxu1 %v19690_v39  ;;  %v19744_v39 = vld [vmem:[#allocation12 + $0xba0] ss:$16 sps:$4 sm:$0xff]  }
 0x393   :  { %4250 = vmatprep.subr.bf16.mxu1 %v19698_v45  ;;  %4202 = vmatpush1.bf16.msra.mxu0 %v19693_v44  ;;  %v19747_v44 = vld [vmem:[#allocation12 + $0x940] ss:$16 sps:$4 sm:$0xff]   ;;  %v19752_v45 = vld [vmem:[#allocation12 + $0xbc4] ss:$16 sps:$4 sm:$0xff]  }
 0x394   :  { %v2513_v50 = vpop.f32.mrb[8].mxu1  ;;  %4203 = vmatprep.subr.bf16.mxu0 %v19701_v47  ;;  %v19755_v47 = vld [vmem:[#allocation12 + $0x964] ss:$16 sps:$4 sm:$0xff]  }
 0x395   :  { %v2515_v53 = vpop.f32.mrb[9].mxu1 }
 0x396   :  { %4251 = vmatpush1.bf16.msra.mxu1 %v19696_v46  ;;  %v2517_v23 = vpop.f32.mrb[10].mxu1  ;;  %v19750_v46 = vld [vmem:[#allocation12 + $0xbc0] ss:$16 sps:$4 sm:$0xff]  }
 0x397   :  { %4252 = vmatprep.subr.bf16.mxu1 %v19704_v49  ;;  %v2518_v58 = vpop.f32.mrb[11].mxu1  ;;  %4204 = vmatpush1.bf16.msra.mxu0 %v19699_v48  ;;  %v19753_v48 = vld [vmem:[#allocation12 + $0x960] ss:$16 sps:$4 sm:$0xff]   ;;  %v19758_v49 = vld [vmem:[#allocation12 + $0xbe4] ss:$16 sps:$4 sm:$0xff]  }
 0x398   :  { %4205 = vmatprep.subr.bf16.mxu0 %v19707_v52  ;;  %v19759_v52 = vld [vmem:[#allocation12 + $0x980] ss:$16 sps:$4 sm:$0xff]   ;;  %v19762_v23 = vld [vmem:[#allocation12 + $0xa08] ss:$16 sps:$4 sm:$0xff]   ;;  %v19770_v58 = vld [vmem:[#allocation12 + $0xa2c] ss:$16 sps:$4 sm:$0xff]  }
 0x39a   :  { %4253 = vmatpush1.bf16.msra.mxu1 %v19702_v51  ;;  %v19761_v51 = vld [vmem:[#allocation12 + $0x984] ss:$16 sps:$4 sm:$0xff]  }
 0x39b   :  { %4254 = vmatprep.subr.bf16.mxu1 %v19710_v57  ;;  %4206 = vmatpush1.bf16.msra.mxu0 %v19705_v56  ;;  %v19767_v56 = vld [vmem:[#allocation12 + $0x9a4] ss:$16 sps:$4 sm:$0xff]   ;;  %v19765_v57 = vld [vmem:[#allocation12 + $0x9a0] ss:$16 sps:$4 sm:$0xff]  }
 0x39c   :  { %4207 = vmatprep.subr.bf16.mxu0 %v19713_v60  ;;  %v19773_v60 = vld [vmem:[#allocation12 + $0x9c4] ss:$16 sps:$4 sm:$0xff]  }
 0x39e   :  { %4255 = vmatpush1.bf16.msra.mxu1 %v19708_v59  ;;  %v19768_v59 = vld [vmem:[#allocation12 + $0xa28] ss:$16 sps:$4 sm:$0xff]  }
 0x39f   :  { %4256 = vmatprep.subr.bf16.mxu1 %v19716_v62  ;;  %4208 = vmatpush1.bf16.msra.mxu0 %v19711_v61  ;;  %v19771_v61 = vld [vmem:[#allocation12 + $0x9c0] ss:$16 sps:$4 sm:$0xff]   ;;  %v19776_v62 = vld [vmem:[#allocation12 + $0xa4c] ss:$16 sps:$4 sm:$0xff]  }
 0x3a0   :  { %4209 = vmatprep.subr.bf16.mxu0 %v19719_v2  ;;  %v19779_v2 = vld [vmem:[#allocation12 + $0x9e4] ss:$16 sps:$4 sm:$0xff]  }
 0x3a1   :  { %v2472_v14 = vpop.f32.mrb[12].mxu0 }
 0x3a2   :  { %4257 = vmatpush1.bf16.msra.mxu1 %v19714_v63  ;;  %v22430_v18 = vadd.f32 %v2513_v50, %v2472_v14  ;;  %v2474_v19 = vpop.f32.mrb[13].mxu0  ;;  %v19756_v50 = vld [vmem:[#allocation12 + $0xbe0] ss:$16 sps:$4 sm:$0xff]   ;;  %v19774_v63 = vld [vmem:[#allocation12 + $0xa48] ss:$16 sps:$4 sm:$0xff]  }
 0x3a3   :  { %4258 = vmatprep.subr.bf16.mxu1 %v19722_v28  ;;  %v22432_v54 = vadd.f32 %v2515_v53, %v2474_v19  ;;  %4210 = vmatpush1.bf16.msra.mxu0 %v19717_v3  ;;  %v2476_v24 = vpop.f32.mrb[14].mxu0  ;;  %v19764_v53 = vld [vmem:[#allocation12 + $0xa0c] ss:$16 sps:$4 sm:$0xff]   ;;  %v19777_v3 = vld [vmem:[#allocation12 + $0x9e0] ss:$16 sps:$4 sm:$0xff]  }
 0x3a4   :  { %v2477_v25 = vpop.f32.mrb[15].mxu0  ;;  %4211 = vmatprep.subr.bf16.mxu0 %v19725_v12  ;;  %v19782_v28 = vld [vmem:[#allocation12 + $0xa6c] ss:$16 sps:$4 sm:$0xff]   ;;  %v19789_v12 = vld [vmem:[#allocation12 + $0x828] ss:$16 sps:$4 sm:$0xff]  }
 0x3a5   :  { %v19792_v14 = vld [vmem:[#allocation12 + $0xaa8] ss:$16 sps:$4 sm:$0xff]   ;;  %v19803_v25 = vld [vmem:[#allocation12 + $0x86c] ss:$16 sps:$4 sm:$0xff]  }
 0x3a6   :  { %4259 = vmatpush1.bf16.msra.mxu1 %v19720_v11  ;;  %v19791_v11 = vld [vmem:[#allocation12 + $0x82c] ss:$16 sps:$4 sm:$0xff]   ;;  %v19795_v19 = vld [vmem:[#allocation12 + $0x848] ss:$16 sps:$4 sm:$0xff]  }
 0x3a7   :  { %4260 = vmatprep.subr.bf16.mxu1 %v19728_v13  ;;  %4212 = vmatpush1.bf16.msra.mxu0 %v19723_v17  ;;  %v19794_v13 = vld [vmem:[#allocation12 + $0xaac] ss:$16 sps:$4 sm:$0xff]   ;;  %v19798_v24 = vld [vmem:[#allocation12 + $0xac8] ss:$16 sps:$4 sm:$0xff]  }
 0x3a8   :  { %4213 = vmatprep.subr.bf16.mxu0 %v19731_v20  ;;  %v19797_v17 = vld [vmem:[#allocation12 + $0x84c] ss:$16 sps:$4 sm:$0xff]  }
 0x3a9   :  { %v19800_v20 = vld [vmem:[#allocation12 + $0xacc] ss:$16 sps:$4 sm:$0xff]  }
 0x3aa   :  { %4261 = vmatpush1.bf16.msra.mxu1 %v19726_v26 }
 0x3ab   :  { %4262 = vmatprep.subr.bf16.mxu1 %v19734_v29  ;;  %4214 = vmatpush1.bf16.msra.mxu0 %v19729_v27  ;;  %v19806_v29 = vld [vmem:[#allocation12 + $0xaec] ss:$16 sps:$4 sm:$0xff]  }
 0x3ac   :  { %4215 = vmatprep.subr.bf16.mxu0 %v19737_v33  ;;  %v19804_v33 = vld [vmem:[#allocation12 + $0xae8] ss:$16 sps:$4 sm:$0xff]  }
 0x3ae   :  { %4263 = vmatpush1.bf16.msra.mxu1 %v19732_v32  ;;  %v19809_v32 = vld [vmem:[#allocation12 + $0x88c] ss:$16 sps:$4 sm:$0xff]  }
 0x3af   :  { %4264 = vmatprep.subr.bf16.mxu1 %v19740_v5  ;;  %4216 = vmatpush1.bf16.msra.mxu0 %v19735_v34  ;;  %v19812_v34 = vld [vmem:[#allocation12 + $0xb0c] ss:$16 sps:$4 sm:$0xff]   ;;  %v19807_v5 = vld [vmem:[#allocation12 + $0x888] ss:$16 sps:$4 sm:$0xff]  }
 0x3b0   :  { %4217 = vmatprep.subr.bf16.mxu0 %v19743_v36  ;;  %v19810_v36 = vld [vmem:[#allocation12 + $0xb08] ss:$16 sps:$4 sm:$0xff]  }
 0x3b2   :  { %4265 = vmatpush1.bf16.msra.mxu1 %v19738_v35  ;;  %v19815_v35 = vld [vmem:[#allocation12 + $0x8ac] ss:$16 sps:$4 sm:$0xff]  }
 0x3b3   :  { %4266 = vmatprep.subr.bf16.mxu1 %v19746_v37  ;;  %4218 = vmatpush1.bf16.msra.mxu0 %v19741_v9  ;;  %v19818_v9 = vld [vmem:[#allocation12 + $0xb2c] ss:$16 sps:$4 sm:$0xff]   ;;  %v19813_v37 = vld [vmem:[#allocation12 + $0x8a8] ss:$16 sps:$4 sm:$0xff]  }
 0x3b4   :  { %4219 = vmatprep.subr.bf16.mxu0 %v19749_v42 }
 0x3b6   :  { %4267 = vmatpush1.bf16.msra.mxu1 %v19744_v39  ;;  %v19821_v39 = vld [vmem:[#allocation12 + $0x8cc] ss:$16 sps:$4 sm:$0xff]  }
 0x3b7   :  { %4268 = vmatprep.subr.bf16.mxu1 %v19752_v45  ;;  %4220 = vmatpush1.bf16.msra.mxu0 %v19747_v44  ;;  %v19816_v44 = vld [vmem:[#allocation12 + $0xb28] ss:$16 sps:$4 sm:$0xff]  }
 0x3b8   :  { %4221 = vmatprep.subr.bf16.mxu0 %v19755_v47  ;;  %v19824_v47 = vld [vmem:[#allocation12 + $0xb4c] ss:$16 sps:$4 sm:$0xff]  }
 0x3ba   :  { %4269 = vmatpush1.bf16.msra.mxu1 %v19750_v46 }
 0x3bb   :  { %4270 = vmatprep.subr.bf16.mxu1 %v19758_v49  ;;  %4222 = vmatpush1.bf16.msra.mxu0 %v19753_v48 }
 0x3bc   :  { %4223 = vmatprep.subr.bf16.mxu0 %v19761_v51 }
 0x3be   :  { %4271 = vmatpush1.bf16.msra.mxu1 %v19756_v50  ;;  %v19819_v50 = vld [vmem:[#allocation12 + $0x8c8] ss:$16 sps:$4 sm:$0xff]  }
 0x3bf   :  { %4322 = vmatprep.subr.bf16.mxu1 %v19764_v53  ;;  %4224 = vmatpush1.bf16.msra.mxu0 %v19759_v52  ;;  %v19827_v52 = vld [vmem:[#allocation12 + $0x8ec] ss:$16 sps:$4 sm:$0xff]   ;;  %v19822_v53 = vld [vmem:[#allocation12 + $0xb48] ss:$16 sps:$4 sm:$0xff]  }
 0x3c0   :  { %4225 = vmatprep.subr.bf16.mxu0 %v19767_v56  ;;  %v19825_v56 = vld [vmem:[#allocation12 + $0x8e8] ss:$16 sps:$4 sm:$0xff]  }
 0x3c1   :  { %4273 = vmatmul.mubr.bf16.vlgmr.msra.gmra.mrb[24].mxu1 %v22434_v30 }
 0x3c2   :  { %4323 = vmatpush1.bf16.msra.mxu1 %v19762_v23  ;;  %4354 = vmatprep.mubr.bf16.mxu1 %v22422_v22  ;;  %v19786_v22 = vld [vmem:[#allocation12 + $0xa88] ss:$16 sps:$4 sm:$0xff]   ;;  %v19830_v23 = vld [vmem:[#allocation12 + $0xb6c] ss:$16 sps:$4 sm:$0xff]  }
 0x3c3   :  { %4324 = vmatprep.subr.bf16.mxu1 %v19770_v58  ;;  %4226 = vmatpush1.bf16.msra.mxu0 %v19765_v57  ;;  %v19833_v57 = vld [vmem:[#allocation12 + $0x90c] ss:$16 sps:$4 sm:$0xff]   ;;  %v19828_v58 = vld [vmem:[#allocation12 + $0xb68] ss:$16 sps:$4 sm:$0xff]  }
 0x3c4   :  { %4227 = vmatprep.subr.bf16.mxu0 %v19773_v60  ;;  %v19831_v60 = vld [vmem:[#allocation12 + $0x908] ss:$16 sps:$4 sm:$0xff]  }
 0x3c6   :  { %4325 = vmatpush1.bf16.msra.mxu1 %v19768_v59  ;;  %v19836_v59 = vld [vmem:[#allocation12 + $0xb8c] ss:$16 sps:$4 sm:$0xff]  }
 0x3c7   :  { %4326 = vmatprep.subr.bf16.mxu1 %v19776_v62  ;;  %4228 = vmatpush1.bf16.msra.mxu0 %v19771_v61  ;;  %v19839_v61 = vld [vmem:[#allocation12 + $0x92c] ss:$16 sps:$4 sm:$0xff]   ;;  %v19834_v62 = vld [vmem:[#allocation12 + $0xb88] ss:$16 sps:$4 sm:$0xff]  }
 0x3c8   :  { %4229 = vmatprep.subr.bf16.mxu0 %v19779_v2  ;;  %v19837_v2 = vld [vmem:[#allocation12 + $0x928] ss:$16 sps:$4 sm:$0xff]  }
 0x3ca   :  { %4327 = vmatpush1.bf16.msra.mxu1 %v19774_v63  ;;  %v19842_v63 = vld [vmem:[#allocation12 + $0xbac] ss:$16 sps:$4 sm:$0xff]  }
 0x3cb   :  { %4328 = vmatprep.subr.bf16.mxu1 %v19782_v28  ;;  %4230 = vmatpush1.bf16.msra.mxu0 %v19777_v3  ;;  %v19845_v3 = vld [vmem:[#allocation12 + $0x94c] ss:$16 sps:$4 sm:$0xff]   ;;  %v4370_v28 = vld [vmem:[#allocation3 + $0x18] sm:$0xf8] }
 0x3cc   :  { %4281 = vmatprep.subr.bf16.mxu0 %v19785_v6  ;;  %v19840_v6 = vld [vmem:[#allocation12 + $0xba8] ss:$16 sps:$4 sm:$0xff]  }
 0x3ce   :  { %4329 = vmatpush1.bf16.msra.mxu1 %v19780_v4  ;;  %4232 = vmatmul.mubr.bf16.vlgmr.msra.gmra.mrb[28].mxu0 %v22436_v31  ;;  %v4374_v4 = vld [vmem:[#allocation3 + $0x38] sm:$0x7] }
 0x3cf   :  { %4330 = vmatprep.subr.bf16.mxu1 %v19788_v10  ;;  %4282 = vmatpush1.bf16.msra.mxu0 %v19783_v7  ;;  %v19848_v7 = vld [vmem:[#allocation12 + $0xbcc] ss:$16 sps:$4 sm:$0xff]   ;;  %v19843_v10 = vld [vmem:[#allocation12 + $0x948] ss:$16 sps:$4 sm:$0xff]  }
 0x3d0   :  { %4313 = vmatprep.mubr.bf16.mxu0 %v22426_v43  ;;  %4283 = vmatprep.subr.bf16.mxu0 %v19791_v11  ;;  %v19801_v43 = vld [vmem:[#allocation12 + $0x868] ss:$16 sps:$4 sm:$0xff]   ;;  %v19851_v11 = vld [vmem:[#allocation12 + $0x96c] ss:$16 sps:$4 sm:$0xff]  }
 0x3d2   :  { %4331 = vmatpush1.bf16.msra.mxu1 %v19786_v22  ;;  %v4378_v22 = vpack.c.bf16 %v4374_v4, %v4370_v28  ;;  %v19891_v28 = vld [vmem:[#allocation12 + $0xc40] ss:$16 sps:$4 sm:$0xff]  }
 0x3d3   :  { %4332 = vmatprep.subr.bf16.mxu1 %v19794_v13  ;;  %4284 = vmatpush1.bf16.msra.mxu0 %v19789_v12  ;;  %v19846_v12 = vld [vmem:[#allocation12 + $0xbc8] ss:$16 sps:$4 sm:$0xff]   ;;  %v19854_v13 = vld [vmem:[#allocation12 + $0xbec] ss:$16 sps:$4 sm:$0xff]  }
 0x3d4   :  { %v2595_v21 = vpop.f32.mrb[12].mxu1  ;;  %4285 = vmatprep.subr.bf16.mxu0 %v19797_v17  ;;  %v4533_v17 = vshrl.u32 %v4378_v22, 16 }
 0x3d5   :  { %v2597_v55 = vpop.f32.mrb[13].mxu1 }
 0x3d6   :  { %v2599_v26 = vpop.f32.mrb[14].mxu1  ;;  %4333 = vmatpush1.bf16.msra.mxu1 %v19792_v14  ;;  %v19849_v14 = vld [vmem:[#allocation12 + $0x968] ss:$16 sps:$4 sm:$0xff]  }
 0x3d7   :  { %v2600_v27 = vpop.f32.mrb[15].mxu1  ;;  %4334 = vmatprep.subr.bf16.mxu1 %v19800_v20  ;;  %4286 = vmatpush1.bf16.msra.mxu0 %v19795_v19  ;;  %v4536_v19 = vshll.u32 %v4378_v22, 16  ;;  %v19857_v20 = vld [vmem:[#allocation12 + $0x98c] ss:$16 sps:$4 sm:$0xff]   ;;  %v19902_v22 = vld [vmem:[#allocation12 + $0xee4] ss:$16 sps:$4 sm:$0xff]  }
 0x3d8   :  { %4287 = vmatprep.subr.bf16.mxu0 %v19803_v25  ;;  %v4535_v25 = vrot.slane %v4533_v17, 1  ;;  %v19863_v27 = vld [vmem:[#allocation12 + $0x9ac] ss:$16 sps:$4 sm:$0xff]   ;;  %v19903_v17 = vld [vmem:[#allocation12 + $0xc80] ss:$16 sps:$4 sm:$0xff]  }
 0x3d9   :  { %v4538_v26 = vrot.slane %v4536_v19, 2  ;;  %v19911_v19 = vld [vmem:[#allocation12 + $0xca4] ss:$16 sps:$4 sm:$0xff]  }
 0x3da   :  { %4335 = vmatpush1.bf16.msra.mxu1 %v19798_v24  ;;  %v19855_v24 = vld [vmem:[#allocation12 + $0x988] ss:$16 sps:$4 sm:$0xff]  }
 0x3db   :  { %4336 = vmatprep.subr.bf16.mxu1 %v19806_v29  ;;  %4288 = vmatpush1.bf16.msra.mxu0 %v19801_v43  ;;  %v19858_v29 = vld [vmem:[#allocation12 + $0xe00] ss:$16 sps:$4 sm:$0xff]   ;;  %v19866_v43 = vld [vmem:[#allocation12 + $0xe24] ss:$16 sps:$4 sm:$0xff]  }
 0x3dc   :  { %4289 = vmatprep.subr.bf16.mxu0 %v19809_v32  ;;  %v4368_v32 = vld [vmem:[#allocation3 + $0x8] sm:$0xf8] }
 0x3de   :  { %4337 = vmatpush1.bf16.msra.mxu1 %v19804_v33  ;;  %v4372_v33 = vld [vmem:[#allocation3 + $0x28] sm:$0x7] }
 0x3df   :  { %4338 = vmatprep.subr.bf16.mxu1 %v19812_v34  ;;  %4290 = vmatpush1.bf16.msra.mxu0 %v19807_v5  ;;  %v22446_v34 = vor.u32 %v4538_v26, %v4535_v25  ;;  %v19861_v5 = vld [vmem:[#allocation12 + $0x9a8] ss:$16 sps:$4 sm:$0xff]   ;;  %v19912_v26 = vld [vmem:[#allocation12 + $0xf20] ss:$16 sps:$4 sm:$0xff]  }
 0x3e0   :  { %4291 = vmatprep.subr.bf16.mxu0 %v19815_v35  ;;  %v19869_v35 = vld [vmem:[#allocation12 + $0x9cc] ss:$16 sps:$4 sm:$0xff]  }
 0x3e1   :  { %v2554_v42 = vpop.f32.mrb[16].mxu0 }
 0x3e2   :  { %4339 = vmatpush1.bf16.msra.mxu1 %v19810_v36  ;;  %v22442_v45 = vadd.f32 %v2595_v21, %v2554_v42  ;;  %v2556_v46 = vpop.f32.mrb[17].mxu0  ;;  %v19852_v21 = vld [vmem:[#allocation12 + $0xbe8] ss:$16 sps:$4 sm:$0xff]   ;;  %v19864_v36 = vld [vmem:[#allocation12 + $0xe20] ss:$16 sps:$4 sm:$0xff]  }
 0x3e3   :  { %4340 = vmatprep.subr.bf16.mxu1 %v19818_v9  ;;  %v22444_v48 = vadd.f32 %v2597_v55, %v2556_v46  ;;  %v2558_v49 = vpop.f32.mrb[18].mxu0  ;;  %4292 = vmatpush1.bf16.msra.mxu0 %v19813_v37  ;;  %v19860_v55 = vld [vmem:[#allocation12 + $0xe04] ss:$16 sps:$4 sm:$0xff]   ;;  %v4376_v9 = vpack.c.bf16 %v4372_v33, %v4368_v32  ;;  %v19875_v42 = vld [vmem:[#allocation12 + $0x9ec] ss:$16 sps:$4 sm:$0xff]  }
 0x3e4   :  { %v2559_v51 = vpop.f32.mrb[19].mxu0  ;;  %4293 = vmatprep.subr.bf16.mxu0 %v19821_v39  ;;  %v19872_v37 = vld [vmem:[#allocation12 + $0xe44] ss:$16 sps:$4 sm:$0xff]   ;;  %v19867_v39 = vld [vmem:[#allocation12 + $0x9c8] ss:$16 sps:$4 sm:$0xff]  }
 0x3e5   :  { %v4517_v46 = vshrl.u32 %v4376_v9, 16  ;;  %v19878_v49 = vld [vmem:[#allocation12 + $0xe64] ss:$16 sps:$4 sm:$0xff]   ;;  %v19876_v51 = vld [vmem:[#allocation12 + $0xe60] ss:$16 sps:$4 sm:$0xff]  }
 0x3e6   :  { %4341 = vmatpush1.bf16.msra.mxu1 %v19816_v44  ;;  %v19870_v44 = vld [vmem:[#allocation12 + $0xe40] ss:$16 sps:$4 sm:$0xff]  }
 0x3e7   :  { %4342 = vmatprep.subr.bf16.mxu1 %v19824_v47  ;;  %4294 = vmatpush1.bf16.msra.mxu0 %v19819_v50  ;;  %v4520_v47 = vshll.u32 %v4376_v9, 16  ;;  %v19881_v50 = vld [vmem:[#allocation12 + $0xc04] ss:$16 sps:$4 sm:$0xff]  }
 0x3e8   :  { %4295 = vmatprep.subr.bf16.mxu0 %v19827_v52  ;;  %v4519_v52 = vrot.slane %v4517_v46, 1  ;;  %v19923_v9 = vld [vmem:[#allocation12 + $0xce4] ss:$16 sps:$4 sm:$0xff]  }
 0x3e9   :  { %v19932_v46 = vld [vmem:[#allocation12 + $0xf84] ss:$16 sps:$4 sm:$0xff]  }
 0x3ea   :  { %4343 = vmatpush1.bf16.msra.mxu1 %v19822_v53  ;;  %v4522_v53 = vrot.slane %v4520_v47, 2  ;;  %v19927_v47 = vld [vmem:[#allocation12 + $0xd00] ss:$16 sps:$4 sm:$0xff]  }
 0x3eb   :  { %4344 = vmatprep.subr.bf16.mxu1 %v19830_v23  ;;  %4296 = vmatpush1.bf16.msra.mxu0 %v19825_v56  ;;  %v19884_v23 = vld [vmem:[#allocation12 + $0xe84] ss:$16 sps:$4 sm:$0xff]   ;;  %v19879_v56 = vld [vmem:[#allocation12 + $0xc00] ss:$16 sps:$4 sm:$0xff]  }
 0x3ec   :  { %4297 = vmatprep.subr.bf16.mxu0 %v19833_v57  ;;  %v19887_v57 = vld [vmem:[#allocation12 + $0xc24] ss:$16 sps:$4 sm:$0xff]  }
 0x3ee   :  { %4345 = vmatpush1.bf16.msra.mxu1 %v19828_v58  ;;  %v22450_v58 = vor.u32 %v4522_v53, %v4519_v52  ;;  %v4369_v52 = vld [vmem:[#allocation3 + $0x10] sm:$0xf8]  ;;  %v4373_v53 = vld [vmem:[#allocation3 + $0x30] sm:$0x7] }
 0x3ef   :  { %4346 = vmatprep.subr.bf16.mxu1 %v19836_v59  ;;  %4298 = vmatpush1.bf16.msra.mxu0 %v19831_v60  ;;  %v19882_v59 = vld [vmem:[#allocation12 + $0xe80] ss:$16 sps:$4 sm:$0xff]   ;;  %v19890_v60 = vld [vmem:[#allocation12 + $0xea4] ss:$16 sps:$4 sm:$0xff]  }
 0x3f0   :  { %4299 = vmatprep.subr.bf16.mxu0 %v19839_v61  ;;  %v19885_v61 = vld [vmem:[#allocation12 + $0xc20] ss:$16 sps:$4 sm:$0xff]  }
 0x3f2   :  { %4347 = vmatpush1.bf16.msra.mxu1 %v19834_v62  ;;  %v19893_v62 = vld [vmem:[#allocation12 + $0xc44] ss:$16 sps:$4 sm:$0xff]  }
 0x3f3   :  { %4348 = vmatprep.subr.bf16.mxu1 %v19842_v63  ;;  %4300 = vmatpush1.bf16.msra.mxu0 %v19837_v2  ;;  %v19888_v63 = vld [vmem:[#allocation12 + $0xea0] ss:$16 sps:$4 sm:$0xff]   ;;  %v19896_v2 = vld [vmem:[#allocation12 + $0xec4] ss:$16 sps:$4 sm:$0xff]  }
 0x3f4   :  { %4301 = vmatprep.subr.bf16.mxu0 %v19845_v3 }
 0x3f6   :  { %4349 = vmatpush1.bf16.msra.mxu1 %v19840_v6  ;;  %v19899_v6 = vld [vmem:[#allocation12 + $0xc64] ss:$16 sps:$4 sm:$0xff]  }
 0x3f7   :  { %4350 = vmatprep.subr.bf16.mxu1 %v19848_v7  ;;  %4302 = vmatpush1.bf16.msra.mxu0 %v19843_v10 }
 0x3f8   :  { %4303 = vmatprep.subr.bf16.mxu0 %v19851_v11  ;;  %v19897_v11 = vld [vmem:[#allocation12 + $0xc60] ss:$16 sps:$4 sm:$0xff]  }
 0x3fa   :  { %4351 = vmatpush1.bf16.msra.mxu1 %v19846_v12  ;;  %v19905_v12 = vld [vmem:[#allocation12 + $0xc84] ss:$16 sps:$4 sm:$0xff]  }
 0x3fb   :  { %4352 = vmatprep.subr.bf16.mxu1 %v19854_v13  ;;  %4304 = vmatpush1.bf16.msra.mxu0 %v19849_v14  ;;  %v19900_v13 = vld [vmem:[#allocation12 + $0xee0] ss:$16 sps:$4 sm:$0xff]   ;;  %v19908_v14 = vld [vmem:[#allocation12 + $0xf04] ss:$16 sps:$4 sm:$0xff]  }
 0x3fc   :  { %4305 = vmatprep.subr.bf16.mxu0 %v19857_v20  ;;  %v19906_v20 = vld [vmem:[#allocation12 + $0xf00] ss:$16 sps:$4 sm:$0xff]  }
 0x3fe   :  { %4353 = vmatpush1.bf16.msra.mxu1 %v19852_v21  ;;  %v19914_v21 = vld [vmem:[#allocation12 + $0xf24] ss:$16 sps:$4 sm:$0xff]  }
 0x3ff   :  { %5225 = vmatprep.subr.bf16.mxu1 %v19860_v55  ;;  %4306 = vmatpush1.bf16.msra.mxu0 %v19855_v24  ;;  %v19909_v55 = vld [vmem:[#allocation12 + $0xca0] ss:$16 sps:$4 sm:$0xff]   ;;  %v19917_v24 = vld [vmem:[#allocation12 + $0xcc4] ss:$16 sps:$4 sm:$0xff]  }
 0x400   :  { %4307 = vmatprep.subr.bf16.mxu0 %v19863_v27 }
 0x401   :  { %4355 = vmatmul.mubr.bf16.vlgmr.msra.gmra.mrb[28].mxu1 %v22434_v30  ;;  %v19873_v30 = vld [vmem:[#allocation12 + $0x9e8] ss:$16 sps:$4 sm:$0xff]  }
 0x402   :  { %5226 = vmatpush1.bf16.msra.mxu1 %v19858_v29  ;;  %5257 = vmatprep.mubr.bf16.mxu1 %v22446_v34 }
 0x403   :  { %5227 = vmatprep.subr.bf16.mxu1 %v19866_v43  ;;  %4308 = vmatpush1.bf16.msra.mxu0 %v19861_v5  ;;  %v19920_v43 = vld [vmem:[#allocation12 + $0xf44] ss:$16 sps:$4 sm:$0xff]   ;;  %v19915_v5 = vld [vmem:[#allocation12 + $0xcc0] ss:$16 sps:$4 sm:$0xff]  }
 0x404   :  { %4309 = vmatprep.subr.bf16.mxu0 %v19869_v35 }
 0x406   :  { %5228 = vmatpush1.bf16.msra.mxu1 %v19864_v36 }
 0x407   :  { %5229 = vmatprep.subr.bf16.mxu1 %v19872_v37  ;;  %4310 = vmatpush1.bf16.msra.mxu0 %v19867_v39  ;;  %v19918_v39 = vld [vmem:[#allocation12 + $0xf40] ss:$16 sps:$4 sm:$0xff]  }
 0x408   :  { %4311 = vmatprep.subr.bf16.mxu0 %v19875_v42  ;;  %v19926_v42 = vld [vmem:[#allocation12 + $0xf64] ss:$16 sps:$4 sm:$0xff]  }
 0x40a   :  { %5230 = vmatpush1.bf16.msra.mxu1 %v19870_v44  ;;  %v19929_v44 = vld [vmem:[#allocation12 + $0xd04] ss:$16 sps:$4 sm:$0xff]  }
 0x40b   :  { %5231 = vmatprep.subr.bf16.mxu1 %v19878_v49  ;;  %4312 = vmatpush1.bf16.msra.mxu0 %v19873_v30  ;;  %v19935_v49 = vld [vmem:[#allocation12 + $0xd24] ss:$16 sps:$4 sm:$0xff]   ;;  %v19930_v30 = vld [vmem:[#allocation12 + $0xf80] ss:$16 sps:$4 sm:$0xff]  }
 0x40c   :  { %5184 = vmatprep.subr.bf16.mxu0 %v19881_v50  ;;  %v19938_v50 = vld [vmem:[#allocation12 + $0xfa4] ss:$16 sps:$4 sm:$0xff]  }
 0x40e   :  { %5232 = vmatpush1.bf16.msra.mxu1 %v19876_v51  ;;  %4314 = vmatmul.mubr.bf16.vlgmr.msra.gmra.mrb[32].mxu0 %v22436_v31  ;;  %v19894_v31 = vld [vmem:[#allocation12 + $0xec0] ss:$16 sps:$4 sm:$0xff]  }
 0x40f   :  { %5233 = vmatprep.subr.bf16.mxu1 %v19884_v23  ;;  %5185 = vmatpush1.bf16.msra.mxu0 %v19879_v56  ;;  %v19933_v51 = vld [vmem:[#allocation12 + $0xd20] ss:$16 sps:$4 sm:$0xff]   ;;  %v19941_v23 = vld [vmem:[#allocation12 + $0xd44] ss:$16 sps:$4 sm:$0xff]  }
 0x410   :  { %5216 = vmatprep.mubr.bf16.mxu0 %v22450_v58  ;;  %5186 = vmatprep.subr.bf16.mxu0 %v19887_v57  ;;  %v19936_v56 = vld [vmem:[#allocation12 + $0xfa0] ss:$16 sps:$4 sm:$0xff]   ;;  %v19944_v57 = vld [vmem:[#allocation12 + $0xfc4] ss:$16 sps:$4 sm:$0xff]  }
 0x412   :  { %5234 = vmatpush1.bf16.msra.mxu1 %v19882_v59  ;;  %v4377_v59 = vpack.c.bf16 %v4373_v53, %v4369_v52  ;;  %v19987_v53 = vld [vmem:[#allocation12 + $0xc48] ss:$16 sps:$4 sm:$0xff]  }
 0x413   :  { %5235 = vmatprep.subr.bf16.mxu1 %v19890_v60  ;;  %5187 = vmatpush1.bf16.msra.mxu0 %v19885_v61  ;;  %v19939_v60 = vld [vmem:[#allocation12 + $0xd40] ss:$16 sps:$4 sm:$0xff]   ;;  %v19947_v61 = vld [vmem:[#allocation12 + $0xd64] ss:$16 sps:$4 sm:$0xff]  }
 0x414   :  { %v3317_v3 = vpop.f32.mrb[16].mxu1  ;;  %5188 = vmatprep.subr.bf16.mxu0 %v19893_v62  ;;  %v19942_v62 = vld [vmem:[#allocation12 + $0xfc0] ss:$16 sps:$4 sm:$0xff]  }
 0x415   :  { %v3319_v4 = vpop.f32.mrb[17].mxu1 }
 0x416   :  { %v3321_v7 = vpop.f32.mrb[18].mxu1  ;;  %5236 = vmatpush1.bf16.msra.mxu1 %v19888_v63  ;;  %v19950_v63 = vld [vmem:[#allocation12 + $0xfe4] ss:$16 sps:$4 sm:$0xff]  }
 0x417   :  { %v3322_v10 = vpop.f32.mrb[19].mxu1  ;;  %5237 = vmatprep.subr.bf16.mxu1 %v19896_v2  ;;  %5189 = vmatpush1.bf16.msra.mxu0 %v19891_v28  ;;  %v4525_v2 = vshrl.u32 %v4377_v59, 16  ;;  %v19945_v28 = vld [vmem:[#allocation12 + $0xd60] ss:$16 sps:$4 sm:$0xff]  }
 0x418   :  { %5190 = vmatprep.subr.bf16.mxu0 %v19899_v6  ;;  %v19948_v6 = vld [vmem:[#allocation12 + $0xfe0] ss:$16 sps:$4 sm:$0xff]   ;;  %v19956_v10 = vld [vmem:[#allocation12 + $0xe0c] ss:$16 sps:$4 sm:$0xff]  }
 0x419   :  { %v4527_v7 = vrot.slane %v4525_v2, 1  ;;  %v20004_v2 = vld [vmem:[#allocation12 + $0xf0c] ss:$16 sps:$4 sm:$0xff]  }
 0x41a   :  { %5238 = vmatpush1.bf16.msra.mxu1 %v19894_v31 }
 0x41b   :  { %5239 = vmatprep.subr.bf16.mxu1 %v19902_v22  ;;  %5191 = vmatpush1.bf16.msra.mxu0 %v19897_v11  ;;  %v19951_v22 = vld [vmem:[#allocation12 + $0xd80] ss:$16 sps:$4 sm:$0xff]   ;;  %v19959_v11 = vld [vmem:[#allocation12 + $0xda4] ss:$16 sps:$4 sm:$0xff]  }
 0x41c   :  { %5192 = vmatprep.subr.bf16.mxu0 %v19905_v12  ;;  %v19954_v12 = vld [vmem:[#allocation12 + $0xe08] ss:$16 sps:$4 sm:$0xff]  }
 0x41e   :  { %5240 = vmatpush1.bf16.msra.mxu1 %v19900_v13  ;;  %v4367_v13 = vld [vmem:[#allocation3] sm:$0xf8] }
 0x41f   :  { %5241 = vmatprep.subr.bf16.mxu1 %v19908_v14  ;;  %5193 = vmatpush1.bf16.msra.mxu0 %v19903_v17  ;;  %v4371_v14 = vld [vmem:[#allocation3 + $0x20] sm:$0x7] }
 0x420   :  { %5194 = vmatprep.subr.bf16.mxu0 %v19911_v19  ;;  %v19962_v19 = vld [vmem:[#allocation12 + $0xe2c] ss:$16 sps:$4 sm:$0xff]  }
 0x421   :  { %v3276_v25 = vpop.f32.mrb[20].mxu0 }
 0x422   :  { %5242 = vmatpush1.bf16.msra.mxu1 %v19906_v20  ;;  %v3277_v27 = vadd.f32 %v3276_v25, %v22430_v18  ;;  %v3278_v29 = vpop.f32.mrb[21].mxu0  ;;  %v19921_v18 = vld [vmem:[#allocation12 + $0xce0] ss:$16 sps:$4 sm:$0xff]   ;;  %v19968_v25 = vld [vmem:[#allocation12 + $0xe4c] ss:$16 sps:$4 sm:$0xff]  }
 0x423   :  { %5243 = vmatprep.subr.bf16.mxu1 %v19914_v21  ;;  %v3279_v32 = vadd.f32 %v3278_v29, %v22432_v54  ;;  %v3280_v33 = vpop.f32.mrb[22].mxu0  ;;  %5195 = vmatpush1.bf16.msra.mxu0 %v19909_v55  ;;  %v19924_v54 = vld [vmem:[#allocation12 + $0xf60] ss:$16 sps:$4 sm:$0xff]   ;;  %v19965_v21 = vld [vmem:[#allocation12 + $0xdc4] ss:$16 sps:$4 sm:$0xff]   ;;  %v4375_v55 = vpack.c.bf16 %v4371_v14, %v4367_v13 }
 0x424   :  { %v22456_v35 = vadd.f32 %v3317_v3, %v3277_v27  ;;  %v3281_v36 = vpop.f32.mrb[23].mxu0  ;;  %5196 = vmatprep.subr.bf16.mxu0 %v19917_v24  ;;  %v4528_v3 = vshll.u32 %v4377_v59, 16  ;;  %v19957_v20 = vld [vmem:[#allocation12 + $0xda0] ss:$16 sps:$4 sm:$0xff]   ;;  %v19960_v24 = vld [vmem:[#allocation12 + $0xe28] ss:$16 sps:$4 sm:$0xff]  }
 0x425   :  { %v22458_v37 = vadd.f32 %v3319_v4, %v3279_v32  ;;  %v19953_v4 = vld [vmem:[#allocation12 + $0xd84] ss:$16 sps:$4 sm:$0xff]   ;;  %v4509_v29 = vshrl.u32 %v4375_v55, 16  ;;  %v19966_v32 = vld [vmem:[#allocation12 + $0xe48] ss:$16 sps:$4 sm:$0xff]  }
 0x426   :  { %5244 = vmatpush1.bf16.msra.mxu1 %v19912_v26  ;;  %v4530_v31 = vrot.slane %v4528_v3, 2  ;;  %v19963_v26 = vld [vmem:[#allocation12 + $0xdc0] ss:$16 sps:$4 sm:$0xff]   ;;  %v19971_v27 = vld [vmem:[#allocation12 + $0xde4] ss:$16 sps:$4 sm:$0xff]  }
 0x427   :  { %5245 = vmatprep.subr.bf16.mxu1 %v19920_v43  ;;  %5197 = vmatpush1.bf16.msra.mxu0 %v19915_v5  ;;  %v4512_v43 = vshll.u32 %v4375_v55, 16  ;;  %v19974_v33 = vld [vmem:[#allocation12 + $0xe6c] ss:$16 sps:$4 sm:$0xff]   ;;  %v19969_v5 = vld [vmem:[#allocation12 + $0xde0] ss:$16 sps:$4 sm:$0xff]   ;;  %v4511_v36 = vrot.slane %v4509_v29, 1 }
 0x428   :  { %5198 = vmatprep.subr.bf16.mxu0 %v19923_v9  ;;  %v22460_v17 = vor.u32 %v4530_v31, %v4527_v7  ;;  %v19990_v59 = vld [vmem:[#allocation12 + $0xec8] ss:$16 sps:$4 sm:$0xff]   ;;  %v20013_v31 = vld [vmem:[#allocation12 + $0xccc] ss:$16 sps:$4 sm:$0xff]  }
 0x429   :  { %v4514_v9 = vrot.slane %v4512_v43, 2  ;;  %v19999_v3 = vld [vmem:[#allocation12 + $0xc88] ss:$16 sps:$4 sm:$0xff]   ;;  %v20016_v13 = vld [vmem:[#allocation12 + $0xf4c] ss:$16 sps:$4 sm:$0xff]  }
 0x42a   :  { %5246 = vmatpush1.bf16.msra.mxu1 %v19918_v39  ;;  %v19977_v39 = vld [vmem:[#allocation12 + $0xc0c] ss:$16 sps:$4 sm:$0xff]   ;;  %v20005_v7 = vld [vmem:[#allocation12 + $0xca8] ss:$16 sps:$4 sm:$0xff]  }
 0x42b   :  { %5247 = vmatprep.subr.bf16.mxu1 %v19926_v42  ;;  %5199 = vmatpush1.bf16.msra.mxu0 %v19921_v18  ;;  %v19980_v42 = vld [vmem:[#allocation12 + $0xe8c] ss:$16 sps:$4 sm:$0xff]   ;;  %v19975_v18 = vld [vmem:[#allocation12 + $0xc08] ss:$16 sps:$4 sm:$0xff]  }
 0x42c   :  { %5200 = vmatprep.subr.bf16.mxu0 %v19929_v44  ;;  %v22464_v44 = vor.u32 %v4514_v9, %v4511_v36  ;;  %v20025_v29 = vld [vmem:[#allocation12 + $0xd0c] ss:$16 sps:$4 sm:$0xff]   ;;  %v20029_v9 = vld [vmem:[#allocation12 + $0xd28] ss:$16 sps:$4 sm:$0xff]  }
 0x42d   :  { %v20028_v43 = vld [vmem:[#allocation12 + $0xf8c] ss:$16 sps:$4 sm:$0xff]  }
 0x42e   :  { %5248 = vmatpush1.bf16.msra.mxu1 %v19924_v54  ;;  %v19983_v54 = vld [vmem:[#allocation12 + $0xc2c] ss:$16 sps:$4 sm:$0xff]  }
 0x42f   :  { %5249 = vmatprep.subr.bf16.mxu1 %v19932_v46  ;;  %5201 = vmatpush1.bf16.msra.mxu0 %v19927_v47  ;;  %v19978_v46 = vld [vmem:[#allocation12 + $0xe88] ss:$16 sps:$4 sm:$0xff]   ;;  %v19986_v47 = vld [vmem:[#allocation12 + $0xeac] ss:$16 sps:$4 sm:$0xff]  }
 0x430   :  { %5202 = vmatprep.subr.bf16.mxu0 %v19935_v49  ;;  %v19981_v49 = vld [vmem:[#allocation12 + $0xc28] ss:$16 sps:$4 sm:$0xff]   ;;  %v20034_v36 = vld [vmem:[#allocation12 + $0xfac] ss:$16 sps:$4 sm:$0xff]  }
 0x432   :  { %5250 = vmatpush1.bf16.msra.mxu1 %v19930_v30  ;;  %v19989_v30 = vld [vmem:[#allocation12 + $0xc4c] ss:$16 sps:$4 sm:$0xff]  }
 0x433   :  { %5251 = vmatprep.subr.bf16.mxu1 %v19938_v50  ;;  %5203 = vmatpush1.bf16.msra.mxu0 %v19933_v51  ;;  %v19984_v50 = vld [vmem:[#allocation12 + $0xea8] ss:$16 sps:$4 sm:$0xff]   ;;  %v19992_v51 = vld [vmem:[#allocation12 + $0xecc] ss:$16 sps:$4 sm:$0xff]  }
 0x434   :  { %5204 = vmatprep.subr.bf16.mxu0 %v19941_v23 }
 0x436   :  { %5252 = vmatpush1.bf16.msra.mxu1 %v19936_v56  ;;  %v19995_v56 = vld [vmem:[#allocation12 + $0xc6c] ss:$16 sps:$4 sm:$0xff]  }
 0x437   :  { %5253 = vmatprep.subr.bf16.mxu1 %v19944_v57  ;;  %5205 = vmatpush1.bf16.msra.mxu0 %v19939_v60 }
 0x438   :  { %5206 = vmatprep.subr.bf16.mxu0 %v19947_v61  ;;  %v19998_v61 = vld [vmem:[#allocation12 + $0xeec] ss:$16 sps:$4 sm:$0xff]  }
 0x43a   :  { %5254 = vmatpush1.bf16.msra.mxu1 %v19942_v62  ;;  %v20001_v62 = vld [vmem:[#allocation12 + $0xc8c] ss:$16 sps:$4 sm:$0xff]  }
 0x43b   :  { %5255 = vmatprep.subr.bf16.mxu1 %v19950_v63  ;;  %5207 = vmatpush1.bf16.msra.mxu0 %v19945_v28  ;;  %v19996_v63 = vld [vmem:[#allocation12 + $0xee8] ss:$16 sps:$4 sm:$0xff]   ;;  %v20007_v28 = vld [vmem:[#allocation12 + $0xcac] ss:$16 sps:$4 sm:$0xff]  }
 0x43c   :  { %5208 = vmatprep.subr.bf16.mxu0 %v19953_v4  ;;  %v20002_v4 = vld [vmem:[#allocation12 + $0xf08] ss:$16 sps:$4 sm:$0xff]  }
 0x43e   :  { %5256 = vmatpush1.bf16.msra.mxu1 %v19948_v6  ;;  %v20010_v6 = vld [vmem:[#allocation12 + $0xf2c] ss:$16 sps:$4 sm:$0xff]  }
 0x43f   :  { %5307 = vmatprep.subr.bf16.mxu1 %v19956_v10  ;;  %5209 = vmatpush1.bf16.msra.mxu0 %v19951_v22  ;;  %v20008_v22 = vld [vmem:[#allocation12 + $0xf28] ss:$16 sps:$4 sm:$0xff]  }
 0x440   :  { %5210 = vmatprep.subr.bf16.mxu0 %v19959_v11 }
 0x441   :  { %5258 = vmatmul.mubr.bf16.vlgmr.msra.gmra.mrb[32].mxu1 %v22460_v17 }
 0x442   :  { %5308 = vmatpush1.bf16.msra.mxu1 %v19954_v12  ;;  %5339 = vmatprep.mubr.bf16.mxu1 %v22446_v34  ;;  %v19972_v34 = vld [vmem:[#allocation12 + $0xe68] ss:$16 sps:$4 sm:$0xff]  }
 0x443   :  { %5309 = vmatprep.subr.bf16.mxu1 %v19962_v19  ;;  %5211 = vmatpush1.bf16.msra.mxu0 %v19957_v20  ;;  %v20011_v20 = vld [vmem:[#allocation12 + $0xcc8] ss:$16 sps:$4 sm:$0xff]  }
 0x444   :  { %5212 = vmatprep.subr.bf16.mxu0 %v19965_v21 }
 0x446   :  { %5310 = vmatpush1.bf16.msra.mxu1 %v19960_v24  ;;  %v20019_v24 = vld [vmem:[#allocation12 + $0xcec] ss:$16 sps:$4 sm:$0xff]  }
 0x447   :  { %5311 = vmatprep.subr.bf16.mxu1 %v19968_v25  ;;  %5213 = vmatpush1.bf16.msra.mxu0 %v19963_v26  ;;  %v20014_v26 = vld [vmem:[#allocation12 + $0xf48] ss:$16 sps:$4 sm:$0xff]  }
 0x448   :  { %5214 = vmatprep.subr.bf16.mxu0 %v19971_v27  ;;  %v20022_v27 = vld [vmem:[#allocation12 + $0xf6c] ss:$16 sps:$4 sm:$0xff]  }
 0x44a   :  { %5312 = vmatpush1.bf16.msra.mxu1 %v19966_v32  ;;  %v20023_v32 = vld [vmem:[#allocation12 + $0xd08] ss:$16 sps:$4 sm:$0xff]  }
 0x44b   :  { %5313 = vmatprep.subr.bf16.mxu1 %v19974_v33  ;;  %5215 = vmatpush1.bf16.msra.mxu0 %v19969_v5  ;;  %v20031_v33 = vld [vmem:[#allocation12 + $0xd2c] ss:$16 sps:$4 sm:$0xff]   ;;  %v20026_v5 = vld [vmem:[#allocation12 + $0xf88] ss:$16 sps:$4 sm:$0xff]  }
 0x44c   :  { %5266 = vmatprep.subr.bf16.mxu0 %v19977_v39  ;;  %v20037_v39 = vld [vmem:[#allocation12 + $0xd4c] ss:$16 sps:$4 sm:$0xff]  }
 0x44e   :  { %5314 = vmatpush1.bf16.msra.mxu1 %v19972_v34  ;;  %5217 = vmatmul.mubr.bf16.vlgmr.msra.gmra.mrb[36].mxu0 %v22464_v44  ;;  %v20032_v34 = vld [vmem:[#allocation12 + $0xfa8] ss:$16 sps:$4 sm:$0xff]  }
 0x44f   :  { %5315 = vmatprep.subr.bf16.mxu1 %v19980_v42  ;;  %5267 = vmatpush1.bf16.msra.mxu0 %v19975_v18  ;;  %v20040_v42 = vld [vmem:[#allocation12 + $0xfcc] ss:$16 sps:$4 sm:$0xff]   ;;  %v20035_v18 = vld [vmem:[#allocation12 + $0xd48] ss:$16 sps:$4 sm:$0xff]  }
 0x450   :  { %5298 = vmatprep.mubr.bf16.mxu0 %v22450_v58  ;;  %5268 = vmatprep.subr.bf16.mxu0 %v19983_v54  ;;  %v19993_v58 = vld [vmem:[#allocation12 + $0xc68] ss:$16 sps:$4 sm:$0xff]   ;;  %v20043_v54 = vld [vmem:[#allocation12 + $0xd6c] ss:$16 sps:$4 sm:$0xff]  }
 0x452   :  { %5316 = vmatpush1.bf16.msra.mxu1 %v19978_v46  ;;  %v20038_v46 = vld [vmem:[#allocation12 + $0xfc8] ss:$16 sps:$4 sm:$0xff]  }
 0x453   :  { %5317 = vmatprep.subr.bf16.mxu1 %v19986_v47  ;;  %5269 = vmatpush1.bf16.msra.mxu0 %v19981_v49  ;;  %v20046_v47 = vld [vmem:[#allocation12 + $0xfec] ss:$16 sps:$4 sm:$0xff]   ;;  %v20041_v49 = vld [vmem:[#allocation12 + $0xd68] ss:$16 sps:$4 sm:$0xff]  }
 0x454   :  { %v3399_v52 = vpop.f32.mrb[20].mxu1  ;;  %5270 = vmatprep.subr.bf16.mxu0 %v19989_v30  ;;  %v20049_v30 = vld [vmem:[#allocation12 + $0xd8c] ss:$16 sps:$4 sm:$0xff]  }
 0x455   :  { %v3401_v23 = vpop.f32.mrb[21].mxu1 }
 0x456   :  { %v3403_v57 = vpop.f32.mrb[22].mxu1  ;;  %5318 = vmatpush1.bf16.msra.mxu1 %v19984_v50  ;;  %v5355_v50 = vld [vmem:[#allocation3 + $0x18] sm:$0xf0] }
 0x457   :  { %v3404_v60 = vpop.f32.mrb[23].mxu1  ;;  %5319 = vmatprep.subr.bf16.mxu1 %v19992_v51  ;;  %5271 = vmatpush1.bf16.msra.mxu0 %v19987_v53  ;;  %v5359_v51 = vld [vmem:[#allocation3 + $0x38] sm:$0xf]  ;;  %v20055_v57 = vld [vmem:[#allocation12 + $0xdac] ss:$16 sps:$4 sm:$0xff]  }
 0x458   :  { %5272 = vmatprep.subr.bf16.mxu0 %v19995_v56  ;;  %v20052_v53 = vld [vmem:[#allocation12 + $0x1204] ss:$16 sps:$4 sm:$0xff]   ;;  %v5363_v56 = vpack.c.bf16 %v5359_v51, %v5355_v50  ;;  %v20104_v51 = vld [vmem:[#allocation12 + $0x1320] ss:$16 sps:$4 sm:$0xff]  }
 0x459   :  { %v20058_v60 = vld [vmem:[#allocation12 + $0x1224] ss:$16 sps:$4 sm:$0xff]  }
 0x45a   :  { %5320 = vmatpush1.bf16.msra.mxu1 %v19990_v59  ;;  %v20050_v59 = vld [vmem:[#allocation12 + $0x1200] ss:$16 sps:$4 sm:$0xff]  }
 0x45b   :  { %5321 = vmatprep.subr.bf16.mxu1 %v19998_v61  ;;  %5273 = vmatpush1.bf16.msra.mxu0 %v19993_v58  ;;  %v22474_v61 = vrot.slane %v5363_v56, 2  ;;  %v20053_v58 = vld [vmem:[#allocation12 + $0xda8] ss:$16 sps:$4 sm:$0xff]  }
 0x45c   :  { %5274 = vmatprep.subr.bf16.mxu0 %v20001_v62  ;;  %v20061_v62 = vld [vmem:[#allocation12 + $0xdcc] ss:$16 sps:$4 sm:$0xff]  }
 0x45e   :  { %5322 = vmatpush1.bf16.msra.mxu1 %v19996_v63  ;;  %v20056_v63 = vld [vmem:[#allocation12 + $0x1220] ss:$16 sps:$4 sm:$0xff]  }
 0x45f   :  { %5323 = vmatprep.subr.bf16.mxu1 %v20004_v2  ;;  %5275 = vmatpush1.bf16.msra.mxu0 %v19999_v3  ;;  %v20064_v2 = vld [vmem:[#allocation12 + $0x1244] ss:$16 sps:$4 sm:$0xff]   ;;  %v20059_v3 = vld [vmem:[#allocation12 + $0xdc8] ss:$16 sps:$4 sm:$0xff]  }
 0x460   :  { %5276 = vmatprep.subr.bf16.mxu0 %v20007_v28  ;;  %v20067_v28 = vld [vmem:[#allocation12 + $0xdec] ss:$16 sps:$4 sm:$0xff]  }
 0x461   :  { %v3358_v10 = vpop.f32.mrb[24].mxu0 }
 0x462   :  { %5324 = vmatpush1.bf16.msra.mxu1 %v20002_v4  ;;  %v3359_v11 = vadd.f32 %v3358_v10, %v22442_v45  ;;  %v3360_v12 = vpop.f32.mrb[25].mxu0  ;;  %v20017_v45 = vld [vmem:[#allocation12 + $0xce8] ss:$16 sps:$4 sm:$0xff]   ;;  %v20062_v4 = vld [vmem:[#allocation12 + $0x1240] ss:$16 sps:$4 sm:$0xff]  }
 0x463   :  { %5325 = vmatprep.subr.bf16.mxu1 %v20010_v6  ;;  %v3361_v14 = vadd.f32 %v3360_v12, %v22444_v48  ;;  %v3362_v19 = vpop.f32.mrb[26].mxu0  ;;  %5277 = vmatpush1.bf16.msra.mxu0 %v20005_v7  ;;  %v20020_v48 = vld [vmem:[#allocation12 + $0xf68] ss:$16 sps:$4 sm:$0xff]   ;;  %v20070_v6 = vld [vmem:[#allocation12 + $0x1264] ss:$16 sps:$4 sm:$0xff]  }
 0x464   :  { %v22470_v21 = vadd.f32 %v3399_v52, %v3359_v11  ;;  %v3363_v55 = vpop.f32.mrb[27].mxu0  ;;  %5278 = vmatprep.subr.bf16.mxu0 %v20013_v31  ;;  %v20044_v52 = vld [vmem:[#allocation12 + $0xfe8] ss:$16 sps:$4 sm:$0xff]   ;;  %v5357_v31 = vld [vmem:[#allocation3 + $0x28] sm:$0xf] }
 0x465   :  { %v22472_v25 = vadd.f32 %v3401_v23, %v3361_v14  ;;  %v20047_v23 = vld [vmem:[#allocation12 + $0xd88] ss:$16 sps:$4 sm:$0xff]   ;;  %v20073_v10 = vld [vmem:[#allocation12 + $0x1004] ss:$16 sps:$4 sm:$0xff]  }
 0x466   :  { %5326 = vmatpush1.bf16.msra.mxu1 %v20008_v22  ;;  %v5353_v7 = vld [vmem:[#allocation3 + $0x8] sm:$0xf0]  ;;  %v20068_v22 = vld [vmem:[#allocation12 + $0x1260] ss:$16 sps:$4 sm:$0xff]   ;;  %v20076_v12 = vld [vmem:[#allocation12 + $0x1284] ss:$16 sps:$4 sm:$0xff]  }
 0x467   :  { %5327 = vmatprep.subr.bf16.mxu1 %v20016_v13  ;;  %5279 = vmatpush1.bf16.msra.mxu0 %v20011_v20  ;;  %v5361_v11 = vpack.c.bf16 %v5357_v31, %v5353_v7  ;;  %v20071_v13 = vld [vmem:[#allocation12 + $0x1000] ss:$16 sps:$4 sm:$0xff]   ;;  %v20079_v14 = vld [vmem:[#allocation12 + $0x1024] ss:$16 sps:$4 sm:$0xff]  }
 0x468   :  { %5280 = vmatprep.subr.bf16.mxu0 %v20019_v24  ;;  %v20074_v20 = vld [vmem:[#allocation12 + $0x1280] ss:$16 sps:$4 sm:$0xff]   ;;  %v20082_v55 = vld [vmem:[#allocation12 + $0x12a4] ss:$16 sps:$4 sm:$0xff]  }
 0x469   :  { %v22478_v19 = vrot.slane %v5361_v11, 2  ;;  %v20077_v24 = vld [vmem:[#allocation12 + $0x1020] ss:$16 sps:$4 sm:$0xff]   ;;  %v20124_v7 = vld [vmem:[#allocation12 + $0x1384] ss:$16 sps:$4 sm:$0xff]  }
 0x46a   :  { %5328 = vmatpush1.bf16.msra.mxu1 %v20014_v26  ;;  %v20085_v26 = vld [vmem:[#allocation12 + $0x1044] ss:$16 sps:$4 sm:$0xff]   ;;  %v20128_v11 = vld [vmem:[#allocation12 + $0x13a0] ss:$16 sps:$4 sm:$0xff]  }
 0x46b   :  { %5329 = vmatprep.subr.bf16.mxu1 %v20022_v27  ;;  %5281 = vmatpush1.bf16.msra.mxu0 %v20017_v45  ;;  %v20080_v27 = vld [vmem:[#allocation12 + $0x12a0] ss:$16 sps:$4 sm:$0xff]   ;;  %v20088_v45 = vld [vmem:[#allocation12 + $0x12c4] ss:$16 sps:$4 sm:$0xff]  }
 0x46c   :  { %5282 = vmatprep.subr.bf16.mxu0 %v20025_v29  ;;  %v20127_v31 = vld [vmem:[#allocation12 + $0x1124] ss:$16 sps:$4 sm:$0xff]  }
 0x46e   :  { %5330 = vmatpush1.bf16.msra.mxu1 %v20020_v48  ;;  %v20083_v48 = vld [vmem:[#allocation12 + $0x1040] ss:$16 sps:$4 sm:$0xff]  }
 0x46f   :  { %5331 = vmatprep.subr.bf16.mxu1 %v20028_v43  ;;  %5283 = vmatpush1.bf16.msra.mxu0 %v20023_v32  ;;  %v20091_v32 = vld [vmem:[#allocation12 + $0x1064] ss:$16 sps:$4 sm:$0xff]  }
 0x470   :  { %5284 = vmatprep.subr.bf16.mxu0 %v20031_v33 }
 0x472   :  { %5332 = vmatpush1.bf16.msra.mxu1 %v20026_v5 }
 0x473   :  { %5333 = vmatprep.subr.bf16.mxu1 %v20034_v36  ;;  %5285 = vmatpush1.bf16.msra.mxu0 %v20029_v9  ;;  %v20094_v36 = vld [vmem:[#allocation12 + $0x12e4] ss:$16 sps:$4 sm:$0xff]   ;;  %v20089_v9 = vld [vmem:[#allocation12 + $0x1060] ss:$16 sps:$4 sm:$0xff]  }
 0x474   :  { %5286 = vmatprep.subr.bf16.mxu0 %v20037_v39  ;;  %v20097_v39 = vld [vmem:[#allocation12 + $0x1084] ss:$16 sps:$4 sm:$0xff]  }
 0x476   :  { %5334 = vmatpush1.bf16.msra.mxu1 %v20032_v34  ;;  %v20092_v34 = vld [vmem:[#allocation12 + $0x12e0] ss:$16 sps:$4 sm:$0xff]  }
 0x477   :  { %5335 = vmatprep.subr.bf16.mxu1 %v20040_v42  ;;  %5287 = vmatpush1.bf16.msra.mxu0 %v20035_v18  ;;  %v20100_v42 = vld [vmem:[#allocation12 + $0x1304] ss:$16 sps:$4 sm:$0xff]   ;;  %v20095_v18 = vld [vmem:[#allocation12 + $0x1080] ss:$16 sps:$4 sm:$0xff]  }
 0x478   :  { %5288 = vmatprep.subr.bf16.mxu0 %v20043_v54  ;;  %v20103_v54 = vld [vmem:[#allocation12 + $0x10a4] ss:$16 sps:$4 sm:$0xff]  }
 0x47a   :  { %5336 = vmatpush1.bf16.msra.mxu1 %v20038_v46  ;;  %v20098_v46 = vld [vmem:[#allocation12 + $0x1300] ss:$16 sps:$4 sm:$0xff]  }
 0x47b   :  { %5337 = vmatprep.subr.bf16.mxu1 %v20046_v47  ;;  %5289 = vmatpush1.bf16.msra.mxu0 %v20041_v49  ;;  %v20106_v47 = vld [vmem:[#allocation12 + $0x1324] ss:$16 sps:$4 sm:$0xff]   ;;  %v20101_v49 = vld [vmem:[#allocation12 + $0x10a0] ss:$16 sps:$4 sm:$0xff]  }
 0x47c   :  { %5290 = vmatprep.subr.bf16.mxu0 %v20049_v30  ;;  %v20109_v30 = vld [vmem:[#allocation12 + $0x10c4] ss:$16 sps:$4 sm:$0xff]  }
 0x47e   :  { %5338 = vmatpush1.bf16.msra.mxu1 %v20044_v52 }
 0x47f   :  { %6186 = vmatprep.subr.bf16.mxu1 %v20052_v53  ;;  %5291 = vmatpush1.bf16.msra.mxu0 %v20047_v23  ;;  %v20112_v23 = vld [vmem:[#allocation12 + $0x1344] ss:$16 sps:$4 sm:$0xff]  }
 0x480   :  { %5292 = vmatprep.subr.bf16.mxu0 %v20055_v57 }
 0x481   :  { %5340 = vmatmul.mubr.bf16.vlgmr.msra.gmra.mrb[36].mxu1 %v22460_v17  ;;  %v20065_v17 = vld [vmem:[#allocation12 + $0xde8] ss:$16 sps:$4 sm:$0xff]  }
 0x482   :  { %6187 = vmatpush1.bf16.msra.mxu1 %v20050_v59  ;;  %6218 = vmatprep.mubr.bf16.mxu1 %v22474_v61  ;;  %v20107_v59 = vld [vmem:[#allocation12 + $0x10c0] ss:$16 sps:$4 sm:$0xff]  }
 0x483   :  { %6188 = vmatprep.subr.bf16.mxu1 %v20058_v60  ;;  %5293 = vmatpush1.bf16.msra.mxu0 %v20053_v58 }
 0x484   :  { %5294 = vmatprep.subr.bf16.mxu0 %v20061_v62  ;;  %v20115_v62 = vld [vmem:[#allocation12 + $0x10e4] ss:$16 sps:$4 sm:$0xff]  }
 0x486   :  { %6189 = vmatpush1.bf16.msra.mxu1 %v20056_v63 }
 0x487   :  { %6190 = vmatprep.subr.bf16.mxu1 %v20064_v2  ;;  %5295 = vmatpush1.bf16.msra.mxu0 %v20059_v3  ;;  %v20110_v2 = vld [vmem:[#allocation12 + $0x1340] ss:$16 sps:$4 sm:$0xff]   ;;  %v20118_v3 = vld [vmem:[#allocation12 + $0x1364] ss:$16 sps:$4 sm:$0xff]  }
 0x488   :  { %5296 = vmatprep.subr.bf16.mxu0 %v20067_v28  ;;  %v20113_v28 = vld [vmem:[#allocation12 + $0x10e0] ss:$16 sps:$4 sm:$0xff]  }
 0x48a   :  { %6191 = vmatpush1.bf16.msra.mxu1 %v20062_v4  ;;  %v20121_v4 = vld [vmem:[#allocation12 + $0x1104] ss:$16 sps:$4 sm:$0xff]  }
 0x48b   :  { %6192 = vmatprep.subr.bf16.mxu1 %v20070_v6  ;;  %5297 = vmatpush1.bf16.msra.mxu0 %v20065_v17  ;;  %v20116_v6 = vld [vmem:[#allocation12 + $0x1360] ss:$16 sps:$4 sm:$0xff]  }
 0x48c   :  { %6145 = vmatprep.subr.bf16.mxu0 %v20073_v10  ;;  %v20122_v17 = vld [vmem:[#allocation12 + $0x1380] ss:$16 sps:$4 sm:$0xff]  }
 0x48d   :  { %v20125_v10 = vld [vmem:[#allocation12 + $0x1120] ss:$16 sps:$4 sm:$0xff]  }
 0x48e   :  { %6193 = vmatpush1.bf16.msra.mxu1 %v20068_v22  ;;  %5299 = vmatmul.mubr.bf16.vlgmr.msra.gmra.mrb[40].mxu0 %v22464_v44  ;;  %v20086_v44 = vld [vmem:[#allocation12 + $0x12c0] ss:$16 sps:$4 sm:$0xff]   ;;  %v20133_v22 = vld [vmem:[#allocation12 + $0x1144] ss:$16 sps:$4 sm:$0xff]  }
 0x48f   :  { %6194 = vmatprep.subr.bf16.mxu1 %v20076_v12  ;;  %6146 = vmatpush1.bf16.msra.mxu0 %v20071_v13  ;;  %v20136_v12 = vld [vmem:[#allocation12 + $0x13c4] ss:$16 sps:$4 sm:$0xff]   ;;  %v20131_v13 = vld [vmem:[#allocation12 + $0x1140] ss:$16 sps:$4 sm:$0xff]  }
 0x490   :  { %6177 = vmatprep.mubr.bf16.mxu0 %v22478_v19  ;;  %6147 = vmatprep.subr.bf16.mxu0 %v20079_v14  ;;  %v20139_v14 = vld [vmem:[#allocation12 + $0x1164] ss:$16 sps:$4 sm:$0xff]  }
 0x492   :  { %6195 = vmatpush1.bf16.msra.mxu1 %v20074_v20  ;;  %v20134_v20 = vld [vmem:[#allocation12 + $0x13c0] ss:$16 sps:$4 sm:$0xff]  }
 0x493   :  { %6196 = vmatprep.subr.bf16.mxu1 %v20082_v55  ;;  %6148 = vmatpush1.bf16.msra.mxu0 %v20077_v24  ;;  %v20142_v55 = vld [vmem:[#allocation12 + $0x13e4] ss:$16 sps:$4 sm:$0xff]   ;;  %v20137_v24 = vld [vmem:[#allocation12 + $0x1160] ss:$16 sps:$4 sm:$0xff]  }
 0x494   :  { %v4274_v29 = vpop.f32.mrb[24].mxu1  ;;  %6149 = vmatprep.subr.bf16.mxu0 %v20085_v26  ;;  %v5354_v26 = vld [vmem:[#allocation3 + $0x10] sm:$0xf0] }
 0x495   :  { %v4276_v43 = vpop.f32.mrb[25].mxu1 }
 0x496   :  { %v4278_v33 = vpop.f32.mrb[26].mxu1  ;;  %6197 = vmatpush1.bf16.msra.mxu1 %v20080_v27  ;;  %v5358_v27 = vld [vmem:[#allocation3 + $0x30] sm:$0xf] }
 0x497   :  { %v4279_v5 = vpop.f32.mrb[27].mxu1  ;;  %6198 = vmatprep.subr.bf16.mxu1 %v20088_v45  ;;  %6150 = vmatpush1.bf16.msra.mxu0 %v20083_v48  ;;  %v20145_v45 = vld [vmem:[#allocation12 + $0x1184] ss:$16 sps:$4 sm:$0xff]   ;;  %v5362_v48 = vpack.c.bf16 %v5358_v27, %v5354_v26  ;;  %v20205_v26 = vld [vmem:[#allocation12 + $0x10cc] ss:$16 sps:$4 sm:$0xff]  }
 0x498   :  { %6151 = vmatprep.subr.bf16.mxu0 %v20091_v32  ;;  %v20143_v32 = vld [vmem:[#allocation12 + $0x1180] ss:$16 sps:$4 sm:$0xff]   ;;  %v20151_v33 = vld [vmem:[#allocation12 + $0x11a4] ss:$16 sps:$4 sm:$0xff]  }
 0x499   :  { %v22488_v5 = vrot.slane %v5362_v48, 2 }
 0x49a   :  { %6199 = vmatpush1.bf16.msra.mxu1 %v20086_v44  ;;  %v20146_v44 = vld [vmem:[#allocation12 + $0x1208] ss:$16 sps:$4 sm:$0xff]  }
 0x49b   :  { %6200 = vmatprep.subr.bf16.mxu1 %v20094_v36  ;;  %6152 = vmatpush1.bf16.msra.mxu0 %v20089_v9  ;;  %v20154_v36 = vld [vmem:[#allocation12 + $0x122c] ss:$16 sps:$4 sm:$0xff]   ;;  %v20149_v9 = vld [vmem:[#allocation12 + $0x11a0] ss:$16 sps:$4 sm:$0xff]  }
 0x49c   :  { %6153 = vmatprep.subr.bf16.mxu0 %v20097_v39  ;;  %v20157_v39 = vld [vmem:[#allocation12 + $0x11c4] ss:$16 sps:$4 sm:$0xff]  }
 0x49e   :  { %6201 = vmatpush1.bf16.msra.mxu1 %v20092_v34  ;;  %v20152_v34 = vld [vmem:[#allocation12 + $0x1228] ss:$16 sps:$4 sm:$0xff]  }
 0x49f   :  { %6202 = vmatprep.subr.bf16.mxu1 %v20100_v42  ;;  %6154 = vmatpush1.bf16.msra.mxu0 %v20095_v18  ;;  %v20160_v42 = vld [vmem:[#allocation12 + $0x124c] ss:$16 sps:$4 sm:$0xff]   ;;  %v20155_v18 = vld [vmem:[#allocation12 + $0x11c0] ss:$16 sps:$4 sm:$0xff]  }
 0x4a0   :  { %6155 = vmatprep.subr.bf16.mxu0 %v20103_v54  ;;  %v20163_v54 = vld [vmem:[#allocation12 + $0x11e4] ss:$16 sps:$4 sm:$0xff]  }
 0x4a1   :  { %v4233_v50 = vpop.f32.mrb[28].mxu0 }
 0x4a2   :  { %6203 = vmatpush1.bf16.msra.mxu1 %v20098_v46  ;;  %v4275_v52 = vadd.f32 %v4274_v29, %v4233_v50  ;;  %v4235_v53 = vpop.f32.mrb[29].mxu0  ;;  %v20140_v29 = vld [vmem:[#allocation12 + $0x13e0] ss:$16 sps:$4 sm:$0xff]   ;;  %v20158_v46 = vld [vmem:[#allocation12 + $0x1248] ss:$16 sps:$4 sm:$0xff]  }
 0x4a3   :  { %6204 = vmatprep.subr.bf16.mxu1 %v20106_v47  ;;  %v4277_v56 = vadd.f32 %v4276_v43, %v4235_v53  ;;  %v4237_v57 = vpop.f32.mrb[30].mxu0  ;;  %6156 = vmatpush1.bf16.msra.mxu0 %v20101_v49  ;;  %v20148_v43 = vld [vmem:[#allocation12 + $0x120c] ss:$16 sps:$4 sm:$0xff]   ;;  %v5352_v47 = vld [vmem:[#allocation3] sm:$0xf0] }
 0x4a4   :  { %v22483_v60 = vadd.f32 %v4275_v52, %v22456_v35  ;;  %v4238_v58 = vpop.f32.mrb[31].mxu0  ;;  %6157 = vmatprep.subr.bf16.mxu0 %v20109_v30  ;;  %v20119_v35 = vld [vmem:[#allocation12 + $0x1100] ss:$16 sps:$4 sm:$0xff]   ;;  %v5356_v49 = vld [vmem:[#allocation3 + $0x20] sm:$0xf] }
 0x4a5   :  { %v22486_v63 = vadd.f32 %v4277_v56, %v22458_v37  ;;  %v20130_v37 = vld [vmem:[#allocation12 + $0x13a4] ss:$16 sps:$4 sm:$0xff]   ;;  %v20166_v30 = vld [vmem:[#allocation12 + $0x126c] ss:$16 sps:$4 sm:$0xff]   ;;  %v20161_v50 = vld [vmem:[#allocation12 + $0x11e0] ss:$16 sps:$4 sm:$0xff]  }
 0x4a6   :  { %6205 = vmatpush1.bf16.msra.mxu1 %v20104_v51  ;;  %v5360_v51 = vpack.c.bf16 %v5356_v49, %v5352_v47  ;;  %v20169_v52 = vld [vmem:[#allocation12 + $0x100c] ss:$16 sps:$4 sm:$0xff]   ;;  %v20212_v47 = vld [vmem:[#allocation12 + $0x1368] ss:$16 sps:$4 sm:$0xff]  }
 0x4a7   :  { %6206 = vmatprep.subr.bf16.mxu1 %v20112_v23  ;;  %6158 = vmatpush1.bf16.msra.mxu0 %v20107_v59  ;;  %v20172_v53 = vld [vmem:[#allocation12 + $0x128c] ss:$16 sps:$4 sm:$0xff]   ;;  %v20167_v23 = vld [vmem:[#allocation12 + $0x1008] ss:$16 sps:$4 sm:$0xff]  }
 0x4a8   :  { %6159 = vmatprep.subr.bf16.mxu0 %v20115_v62  ;;  %v22492_v56 = vrot.slane %v5360_v51, 2  ;;  %v20175_v57 = vld [vmem:[#allocation12 + $0x102c] ss:$16 sps:$4 sm:$0xff]   ;;  %v20170_v59 = vld [vmem:[#allocation12 + $0x1288] ss:$16 sps:$4 sm:$0xff]  }
 0x4a9   :  { %v20178_v58 = vld [vmem:[#allocation12 + $0x12ac] ss:$16 sps:$4 sm:$0xff]   ;;  %v20173_v62 = vld [vmem:[#allocation12 + $0x1028] ss:$16 sps:$4 sm:$0xff]  }
 0x4aa   :  { %6207 = vmatpush1.bf16.msra.mxu1 %v20110_v2  ;;  %v20181_v2 = vld [vmem:[#allocation12 + $0x104c] ss:$16 sps:$4 sm:$0xff]   ;;  %v20221_v51 = vld [vmem:[#allocation12 + $0x1128] ss:$16 sps:$4 sm:$0xff]  }
 0x4ab   :  { %6208 = vmatprep.subr.bf16.mxu1 %v20118_v3  ;;  %6160 = vmatpush1.bf16.msra.mxu0 %v20113_v28  ;;  %v20176_v3 = vld [vmem:[#allocation12 + $0x12a8] ss:$16 sps:$4 sm:$0xff]   ;;  %v20184_v28 = vld [vmem:[#allocation12 + $0x12cc] ss:$16 sps:$4 sm:$0xff]  }
 0x4ac   :  { %6161 = vmatprep.subr.bf16.mxu0 %v20121_v4  ;;  %v20220_v49 = vld [vmem:[#allocation12 + $0x138c] ss:$16 sps:$4 sm:$0xff]  }
 0x4ae   :  { %6209 = vmatpush1.bf16.msra.mxu1 %v20116_v6  ;;  %v20179_v6 = vld [vmem:[#allocation12 + $0x1048] ss:$16 sps:$4 sm:$0xff]  }
 0x4af   :  { %6210 = vmatprep.subr.bf16.mxu1 %v20124_v7  ;;  %6162 = vmatpush1.bf16.msra.mxu0 %v20119_v35  ;;  %v20187_v35 = vld [vmem:[#allocation12 + $0x106c] ss:$16 sps:$4 sm:$0xff]  }
 0x4b0   :  { %6163 = vmatprep.subr.bf16.mxu0 %v20127_v31 }
 0x4b2   :  { %6211 = vmatpush1.bf16.msra.mxu1 %v20122_v17  ;;  %v20182_v17 = vld [vmem:[#allocation12 + $0x12c8] ss:$16 sps:$4 sm:$0xff]  }
 0x4b3   :  { %6212 = vmatprep.subr.bf16.mxu1 %v20130_v37  ;;  %6164 = vmatpush1.bf16.msra.mxu0 %v20125_v10  ;;  %v20190_v10 = vld [vmem:[#allocation12 + $0x12ec] ss:$16 sps:$4 sm:$0xff]  }
 0x4b4   :  { %6165 = vmatprep.subr.bf16.mxu0 %v20133_v22  ;;  %v20193_v22 = vld [vmem:[#allocation12 + $0x108c] ss:$16 sps:$4 sm:$0xff]  }
 0x4b6   :  { %6213 = vmatpush1.bf16.msra.mxu1 %v20128_v11  ;;  %v20188_v11 = vld [vmem:[#allocation12 + $0x12e8] ss:$16 sps:$4 sm:$0xff]  }
 0x4b7   :  { %6214 = vmatprep.subr.bf16.mxu1 %v20136_v12  ;;  %6166 = vmatpush1.bf16.msra.mxu0 %v20131_v13  ;;  %v20196_v12 = vld [vmem:[#allocation12 + $0x130c] ss:$16 sps:$4 sm:$0xff]   ;;  %v20191_v13 = vld [vmem:[#allocation12 + $0x1088] ss:$16 sps:$4 sm:$0xff]  }
 0x4b8   :  { %6167 = vmatprep.subr.bf16.mxu0 %v20139_v14  ;;  %v20199_v14 = vld [vmem:[#allocation12 + $0x10ac] ss:$16 sps:$4 sm:$0xff]  }
 0x4ba   :  { %6215 = vmatpush1.bf16.msra.mxu1 %v20134_v20  ;;  %v20194_v20 = vld [vmem:[#allocation12 + $0x1308] ss:$16 sps:$4 sm:$0xff]  }
 0x4bb   :  { %6216 = vmatprep.subr.bf16.mxu1 %v20142_v55  ;;  %6168 = vmatpush1.bf16.msra.mxu0 %v20137_v24  ;;  %v20202_v55 = vld [vmem:[#allocation12 + $0x132c] ss:$16 sps:$4 sm:$0xff]   ;;  %v20197_v24 = vld [vmem:[#allocation12 + $0x10a8] ss:$16 sps:$4 sm:$0xff]  }
 0x4bc   :  { %6169 = vmatprep.subr.bf16.mxu0 %v20145_v45  ;;  %v20200_v45 = vld [vmem:[#allocation12 + $0x1328] ss:$16 sps:$4 sm:$0xff]  }
 0x4be   :  { %6217 = vmatpush1.bf16.msra.mxu1 %v20140_v29 }
 0x4bf   :  { %6268 = vmatprep.subr.bf16.mxu1 %v20148_v43  ;;  %6170 = vmatpush1.bf16.msra.mxu0 %v20143_v32  ;;  %v20208_v43 = vld [vmem:[#allocation12 + $0x134c] ss:$16 sps:$4 sm:$0xff]  }
 0x4c0   :  { %6171 = vmatprep.subr.bf16.mxu0 %v20151_v33 }
 0x4c1   :  { %6219 = vmatmul.mubr.bf16.vlgmr.msra.gmra.mrb[40].mxu1 %v22488_v5 }
 0x4c2   :  { %6269 = vmatpush1.bf16.msra.mxu1 %v20146_v44  ;;  %6300 = vmatprep.mubr.bf16.mxu1 %v22474_v61  ;;  %v20164_v61 = vld [vmem:[#allocation12 + $0x1268] ss:$16 sps:$4 sm:$0xff]  }
 0x4c3   :  { %6270 = vmatprep.subr.bf16.mxu1 %v20154_v36  ;;  %6172 = vmatpush1.bf16.msra.mxu0 %v20149_v9  ;;  %v20203_v44 = vld [vmem:[#allocation12 + $0x10c8] ss:$16 sps:$4 sm:$0xff]  }
 0x4c4   :  { %6173 = vmatprep.subr.bf16.mxu0 %v20157_v39  ;;  %v20211_v39 = vld [vmem:[#allocation12 + $0x10ec] ss:$16 sps:$4 sm:$0xff]  }
 0x4c6   :  { %6271 = vmatpush1.bf16.msra.mxu1 %v20152_v34 }
 0x4c7   :  { %6272 = vmatprep.subr.bf16.mxu1 %v20160_v42  ;;  %6174 = vmatpush1.bf16.msra.mxu0 %v20155_v18  ;;  %v20206_v42 = vld [vmem:[#allocation12 + $0x1348] ss:$16 sps:$4 sm:$0xff]   ;;  %v20214_v18 = vld [vmem:[#allocation12 + $0x136c] ss:$16 sps:$4 sm:$0xff]  }
 0x4c8   :  { %6175 = vmatprep.subr.bf16.mxu0 %v20163_v54  ;;  %v20209_v54 = vld [vmem:[#allocation12 + $0x10e8] ss:$16 sps:$4 sm:$0xff]  }
 0x4ca   :  { %6273 = vmatpush1.bf16.msra.mxu1 %v20158_v46  ;;  %v20217_v46 = vld [vmem:[#allocation12 + $0x110c] ss:$16 sps:$4 sm:$0xff]  }
 0x4cb   :  { %6274 = vmatprep.subr.bf16.mxu1 %v20166_v30  ;;  %6176 = vmatpush1.bf16.msra.mxu0 %v20161_v50  ;;  %v20223_v30 = vld [vmem:[#allocation12 + $0x112c] ss:$16 sps:$4 sm:$0xff]   ;;  %v20218_v50 = vld [vmem:[#allocation12 + $0x1388] ss:$16 sps:$4 sm:$0xff]  }
 0x4cc   :  { %6227 = vmatprep.subr.bf16.mxu0 %v20169_v52  ;;  %v20229_v52 = vld [vmem:[#allocation12 + $0x114c] ss:$16 sps:$4 sm:$0xff]  }
 0x4ce   :  { %6275 = vmatpush1.bf16.msra.mxu1 %v20164_v61  ;;  %6178 = vmatmul.mubr.bf16.vlgmr.msra.gmra.mrb[44].mxu0 %v22492_v56  ;;  %v20224_v61 = vld [vmem:[#allocation12 + $0x13a8] ss:$16 sps:$4 sm:$0xff]  }
 0x4cf   :  { %6276 = vmatprep.subr.bf16.mxu1 %v20172_v53  ;;  %6228 = vmatpush1.bf16.msra.mxu0 %v20167_v23  ;;  %v20232_v53 = vld [vmem:[#allocation12 + $0x13cc] ss:$16 sps:$4 sm:$0xff]   ;;  %v20227_v23 = vld [vmem:[#allocation12 + $0x1148] ss:$16 sps:$4 sm:$0xff]  }
 0x4d0   :  { %6259 = vmatprep.mubr.bf16.mxu0 %v22478_v19  ;;  %6229 = vmatprep.subr.bf16.mxu0 %v20175_v57  ;;  %v20185_v19 = vld [vmem:[#allocation12 + $0x1068] ss:$16 sps:$4 sm:$0xff]   ;;  %v20235_v57 = vld [vmem:[#allocation12 + $0x116c] ss:$16 sps:$4 sm:$0xff]  }
 0x4d2   :  { %6277 = vmatpush1.bf16.msra.mxu1 %v20170_v59  ;;  %v20230_v59 = vld [vmem:[#allocation12 + $0x13c8] ss:$16 sps:$4 sm:$0xff]  }
 0x4d3   :  { %6278 = vmatprep.subr.bf16.mxu1 %v20178_v58  ;;  %6230 = vmatpush1.bf16.msra.mxu0 %v20173_v62  ;;  %v20238_v58 = vld [vmem:[#allocation12 + $0x13ec] ss:$16 sps:$4 sm:$0xff]   ;;  %v20233_v62 = vld [vmem:[#allocation12 + $0x1168] ss:$16 sps:$4 sm:$0xff]  }
 0x4d4   :  { %v4356_v4 = vpop.f32.mrb[28].mxu1  ;;  %6231 = vmatprep.subr.bf16.mxu0 %v20181_v2  ;;  %v20241_v2 = vld [vmem:[#allocation12 + $0x118c] ss:$16 sps:$4 sm:$0xff]  }
 0x4d5   :  { %v4358_v7 = vpop.f32.mrb[29].mxu1 }
 0x4d6   :  { %v4360_v31 = vpop.f32.mrb[30].mxu1  ;;  %6279 = vmatpush1.bf16.msra.mxu1 %v20176_v3  ;;  %v20236_v3 = vld [vmem:[#allocation12 + $0x13e8] ss:$16 sps:$4 sm:$0xff]  }
 0x4d7   :  { %v4361_v37 = vpop.f32.mrb[31].mxu1  ;;  %6280 = vmatprep.subr.bf16.mxu1 %v20184_v28  ;;  %6232 = vmatpush1.bf16.msra.mxu0 %v20179_v6  ;;  %v20239_v28 = vld [vmem:[#allocation12 + $0x1188] ss:$16 sps:$4 sm:$0xff]   ;;  %v20250_v31 = vld [vmem:[#allocation12 + $0x11ec] ss:$16 sps:$4 sm:$0xff]  }
 0x4d8   :  { %6233 = vmatprep.subr.bf16.mxu0 %v20187_v35  ;;  %v20242_v6 = vld [vmem:[#allocation12 + $0x11a8] ss:$16 sps:$4 sm:$0xff]  }
 0x4d9   :  { %v20245_v35 = vld [vmem:[#allocation12 + $0x11c8] ss:$16 sps:$4 sm:$0xff]  }
 0x4da   :  { %6281 = vmatpush1.bf16.msra.mxu1 %v20182_v17  ;;  %v20248_v17 = vld [vmem:[#allocation12 + $0x11e8] ss:$16 sps:$4 sm:$0xff]  }
 0x4db   :  { %6282 = vmatprep.subr.bf16.mxu1 %v20190_v10  ;;  %6234 = vmatpush1.bf16.msra.mxu0 %v20185_v19 }
 0x4dc   :  { %6235 = vmatprep.subr.bf16.mxu0 %v20193_v22 }
 0x4de   :  { %6283 = vmatpush1.bf16.msra.mxu1 %v20188_v11 }
 0x4df   :  { %6284 = vmatprep.subr.bf16.mxu1 %v20196_v12  ;;  %6236 = vmatpush1.bf16.msra.mxu0 %v20191_v13 }
 0x4e0   :  { %6237 = vmatprep.subr.bf16.mxu0 %v20199_v14 }
 0x4e1   :  { %v4315_v27 = vpop.f32.mrb[32].mxu0 }
 0x4e2   :  { %6285 = vmatpush1.bf16.msra.mxu1 %v20194_v20  ;;  %v4357_v29 = vadd.f32 %v4356_v4, %v4315_v27  ;;  %v4317_v48 = vpop.f32.mrb[33].mxu0  ;;  %v20244_v4 = vld [vmem:[#allocation12 + $0x11ac] ss:$16 sps:$4 sm:$0xff]  }
 0x4e3   :  { %6286 = vmatprep.subr.bf16.mxu1 %v20202_v55  ;;  %v4359_v32 = vadd.f32 %v4358_v7, %v4317_v48  ;;  %v4319_v33 = vpop.f32.mrb[34].mxu0  ;;  %6238 = vmatpush1.bf16.msra.mxu0 %v20197_v24  ;;  %v20247_v7 = vld [vmem:[#allocation12 + $0x11cc] ss:$16 sps:$4 sm:$0xff]  }
 0x4e4   :  { %v22497_v36 = vadd.f32 %v4357_v29, %v22470_v21  ;;  %v4320_v9 = vpop.f32.mrb[35].mxu0  ;;  %6239 = vmatprep.subr.bf16.mxu0 %v20205_v26  ;;  %v20215_v21 = vld [vmem:[#allocation12 + $0x1108] ss:$16 sps:$4 sm:$0xff]  }
 0x4e5   :  { %v22500_v34 = vadd.f32 %v4359_v32, %v22472_v25  ;;  %v20226_v25 = vld [vmem:[#allocation12 + $0x13ac] ss:$16 sps:$4 sm:$0xff]  }
 0x4e6   :  { %6287 = vmatpush1.bf16.msra.mxu1 %v20200_v45 }
 0x4e7   :  { %6288 = vmatprep.subr.bf16.mxu1 %v20208_v43  ;;  %6240 = vmatpush1.bf16.msra.mxu0 %v20203_v44 }
 0x4e8   :  { %6241 = vmatprep.subr.bf16.mxu0 %v20211_v39 }
 0x4ea   :  { %6289 = vmatpush1.bf16.msra.mxu1 %v20206_v42 }
 0x4eb   :  { %6290 = vmatprep.subr.bf16.mxu1 %v20214_v18  ;;  %6242 = vmatpush1.bf16.msra.mxu0 %v20209_v54  ;;  %v22514_v54 = vld [vmem:[#allocation14] sm:$0xf] }
 0x4ec   :  { %6243 = vmatprep.subr.bf16.mxu0 %v20217_v46 }
 0x4ee   :  { %6291 = vmatpush1.bf16.msra.mxu1 %v20212_v47 }
 0x4ef   :  { %6292 = vmatprep.subr.bf16.mxu1 %v20220_v49  ;;  %6244 = vmatpush1.bf16.msra.mxu0 %v20215_v21  ;;  %v6318_v49 = vrot.slane %v22514_v54, %v22385_v38 }
 0x4f0   :  { %6245 = vmatprep.subr.bf16.mxu0 %v20223_v30 }
 0x4f2   :  { %6293 = vmatpush1.bf16.msra.mxu1 %v20218_v50 }
 0x4f3   :  { %6294 = vmatprep.subr.bf16.mxu1 %v20226_v25  ;;  %6246 = vmatpush1.bf16.msra.mxu0 %v20221_v51 }
 0x4f4   :  { %6247 = vmatprep.subr.bf16.mxu0 %v20229_v52 }
 0x4f6   :  { %6295 = vmatpush1.bf16.msra.mxu1 %v20224_v61 }
 0x4f7   :  { %6296 = vmatprep.subr.bf16.mxu1 %v20232_v53  ;;  %6248 = vmatpush1.bf16.msra.mxu0 %v20227_v23  ;;  %v20253_v23 = vld [vmem:[#allocation15 + $0x204] ss:$8 sps:$4 sm:$0xff]  }
 0x4f8   :  { %6249 = vmatprep.subr.bf16.mxu0 %v20235_v57 }
 0x4fa   :  { %6297 = vmatpush1.bf16.msra.mxu1 %v20230_v59  ;;  %v20251_v59 = vld [vmem:[#allocation15 + $0x200] ss:$8 sps:$4 sm:$0xff]  }
 0x4fb   :  { %6298 = vmatprep.subr.bf16.mxu1 %v20238_v58  ;;  %6250 = vmatpush1.bf16.msra.mxu0 %v20233_v62  ;;  %v20256_v58 = vld [vmem:[#allocation15 + $0x214] ss:$8 sps:$4 sm:$0xff]   ;;  %v20254_v62 = vld [vmem:[#allocation15 + $0x210] ss:$8 sps:$4 sm:$0xff]  }
 0x4fc   :  { %6251 = vmatprep.subr.bf16.mxu0 %v20241_v2  ;;  %v20259_v2 = vld [vmem:[#allocation15 + $0x224] ss:$8 sps:$4 sm:$0xff]  }
 0x4fe   :  { %6299 = vmatpush1.bf16.msra.mxu1 %v20236_v3  ;;  %v20257_v3 = vld [vmem:[#allocation15 + $0x220] ss:$8 sps:$4 sm:$0xff]  }
 0x4ff   :  { %6252 = vmatpush1.bf16.msra.mxu0 %v20239_v28  ;;  %v20262_v28 = vld [vmem:[#allocation15 + $0x234] ss:$8 sps:$4 sm:$0xff]  }
 0x500   :  { %6253 = vmatprep.subr.bf16.mxu0 %v20244_v4  ;;  %v20260_v4 = vld [vmem:[#allocation15 + $0x230] ss:$8 sps:$4 sm:$0xff]  }
 0x501   :  { %6301 = vmatmul.mubr.bf16.vlgmr.msra.gmra.mrb[44].mxu1 %v22488_v5 }
 0x502   :  { %6481 = vmatprep.mubr.f32.mxu1 %v22160_v1 }
 0x503   :  { %6254 = vmatpush1.bf16.msra.mxu0 %v20242_v6  ;;  %v20265_v6 = vld [vmem:[#allocation15 + $0x244] ss:$8 sps:$4 sm:$0xff]  }
 0x504   :  { %6255 = vmatprep.subr.bf16.mxu0 %v20247_v7  ;;  %v20263_v7 = vld [vmem:[#allocation15 + $0x240] ss:$8 sps:$4 sm:$0xff]  }
 0x507   :  { %6256 = vmatpush1.bf16.msra.mxu0 %v20245_v35  ;;  %v20268_v35 = vld [vmem:[#allocation15 + $0x254] ss:$8 sps:$4 sm:$0xff]  }
 0x508   :  { %6257 = vmatprep.subr.bf16.mxu0 %v20250_v31  ;;  %v20266_v31 = vld [vmem:[#allocation15 + $0x250] ss:$8 sps:$4 sm:$0xff]  }
 0x50b   :  { %6258 = vmatpush1.bf16.msra.mxu0 %v20248_v17  ;;  %v20271_v17 = vld [vmem:[#allocation15 + $0x264] ss:$8 sps:$4 sm:$0xff]  }
 0x50e   :  { %6260 = vmatmul.mubr.bf16.vlgmr.msra.gmra.mrb[48].mxu0 %v22492_v56 }
 0x50f   :  { %6410 = vmatprep.mubr.f32.mxu0 %v22160_v1 }
 0x514   :  { %v5259_v37 = vpop.f32.mrb[32].mxu1 }
 0x515   :  { %v5261_v10 = vpop.f32.mrb[33].mxu1 }
 0x516   :  { %v5263_v19 = vpop.f32.mrb[34].mxu1 }
 0x517   :  { %v5264_v5 = vpop.f32.mrb[35].mxu1  ;;  %v20272_v19 = vld [vmem:[#allocation15 + $0x270] ss:$8 sps:$4 sm:$0xff]  }
 0x518   :  { %v20277_v5 = vld [vmem:[#allocation15 + $0x284] ss:$8 sps:$4 sm:$0xff]  }
 0x521   :  { %v5218_v22 = vpop.f32.mrb[36].mxu0 }
 0x522   :  { %v5260_v11 = vadd.f32 %v5259_v37, %v5218_v22  ;;  %v5220_v12 = vpop.f32.mrb[37].mxu0  ;;  %v20269_v37 = vld [vmem:[#allocation15 + $0x260] ss:$8 sps:$4 sm:$0xff]  }
 0x523   :  { %v5262_v13 = vadd.f32 %v5261_v10, %v5220_v12  ;;  %v5222_v14 = vpop.f32.mrb[38].mxu0  ;;  %v20274_v10 = vld [vmem:[#allocation15 + $0x274] ss:$8 sps:$4 sm:$0xff]   ;;  %v20275_v22 = vld [vmem:[#allocation15 + $0x280] ss:$8 sps:$4 sm:$0xff]  }
 0x524   :  { %v5348_v20 = vadd.f32 %v5260_v11, %v22483_v60  ;;  %v5223_v55 = vpop.f32.mrb[39].mxu0  ;;  %v20280_v11 = vld [vmem:[#allocation15 + $0x294] ss:$8 sps:$4 sm:$0xff]   ;;  %v20278_v12 = vld [vmem:[#allocation15 + $0x290] ss:$8 sps:$4 sm:$0xff]  }
 0x525   :  { %v5349_v24 = vadd.f32 %v5262_v13, %v22486_v63  ;;  %v20283_v13 = vld [vmem:[#allocation15 + $0x2a4] ss:$8 sps:$4 sm:$0xff]   ;;  %v20281_v14 = vld [vmem:[#allocation15 + $0x2a0] ss:$8 sps:$4 sm:$0xff]  }
 0x554   :  { %v5341_v26 = vpop.f32.mrb[36].mxu1 }
 0x555   :  { %v5343_v27 = vpop.f32.mrb[37].mxu1 }
 0x556   :  { %v5345_v45 = vpop.f32.mrb[38].mxu1 }
 0x557   :  { %v5346_v56 = vpop.f32.mrb[39].mxu1 }
 0x558   :  { %v6326_v56 = vrot.slane %v22514_v54, %v22375_v15 }
 0x561   :  { %v5300_v29 = vpop.f32.mrb[40].mxu0 }
 0x562   :  { %v5342_v48 = vadd.f32 %v5341_v26, %v5300_v29  ;;  %v5302_v43 = vpop.f32.mrb[41].mxu0 }
 0x563   :  { %v5344_v32 = vadd.f32 %v5343_v27, %v5302_v43  ;;  %v5304_v33 = vpop.f32.mrb[42].mxu0 }
 0x564   :  { %v22509_v44 = vadd.f32 %v5342_v48, %v22497_v36  ;;  %v5305_v9 = vpop.f32.mrb[43].mxu0  ;;  %v6322_v36 = vrot.slane %v22514_v54, %v22387_v40 }
 0x565   :  { %v22512_v39 = vadd.f32 %v5344_v32, %v22500_v34  ;;  %v6330_v32 = vrot.slane %v22514_v54, %v22377_v16  ;;  %v20287_v54 = vld [vmem:[#allocation15 + $0x2c0] ss:$8 sps:$4 sm:$0xff]  }
 0x594   :  { %v6220_v60 = vpop.f32.mrb[40].mxu1 }
 0x595   :  { %v6222_v42 = vpop.f32.mrb[41].mxu1 }
 0x596   :  { %v6224_v18 = vpop.f32.mrb[42].mxu1 }
 0x597   :  { %v6225_v63 = vpop.f32.mrb[43].mxu1 }
 0x5a1   :  { %v6179_v46 = vpop.f32.mrb[44].mxu0 }
 0x5a2   :  { %v6221_v47 = vadd.f32 %v6220_v60, %v6179_v46  ;;  %v6181_v21 = vpop.f32.mrb[45].mxu0 }
 0x5a3   :  { %v6223_v30 = vadd.f32 %v6222_v42, %v6181_v21  ;;  %v6183_v50 = vpop.f32.mrb[46].mxu0  ;;  %v20289_v21 = vld [vmem:[#allocation15 + $0x2c4] ss:$8 sps:$4 sm:$0xff]  }
 0x5a4   :  { %v6309_v25 = vadd.f32 %v6221_v47, %v5348_v20  ;;  %v6184_v34 = vpop.f32.mrb[47].mxu0  ;;  %v20284_v47 = vld [vmem:[#allocation15 + $0x2b0] ss:$8 sps:$4 sm:$0xff]   ;;  %v20293_v50 = vld [vmem:[#allocation15 + $0x2e0] ss:$8 sps:$4 sm:$0xff]  }
 0x5a5   :  { %v6310_v51 = vadd.f32 %v6223_v30, %v5349_v24  ;;  %v20290_v30 = vld [vmem:[#allocation15 + $0x2d0] ss:$8 sps:$4 sm:$0xff]   ;;  %v20299_v34 = vld [vmem:[#allocation15 + $0x300] ss:$8 sps:$4 sm:$0xff]  }
 0x5a6   :  { %v6335_v52 = vadd.f32 %v6318_v49, %v6309_v25  ;;  %v20286_v49 = vld [vmem:[#allocation15 + $0x2b4] ss:$8 sps:$4 sm:$0xff]   ;;  %v20296_v25 = vld [vmem:[#allocation15 + $0x2f0] ss:$8 sps:$4 sm:$0xff]  }
 0x5a7   :  { %v6336_v61 = vadd.f32 %v6322_v36, %v6310_v51  ;;  %v20298_v36 = vld [vmem:[#allocation15 + $0x2f4] ss:$8 sps:$4 sm:$0xff]   ;;  %v20301_v51 = vld [vmem:[#allocation15 + $0x304] ss:$8 sps:$4 sm:$0xff]  }
 0x5a8   :  { %v6339_v57 = vmax.f32 %v6335_v52, 0.0  ;;  %v20304_v52 = vld [vmem:[#allocation15 + $0x4] ss:$8 sps:$4 sm:$0xff]  }
 0x5a9   :  { %v6340_v53 = vmax.f32 %v6336_v61, 0.0  ;;  %v20307_v61 = vld [vmem:[#allocation15 + $0x314] ss:$8 sps:$4 sm:$0xff]  }
 0x5ab   :  { %6346 = vmatprep.subr.mxu0 %v6340_v53  ;;  %v20305_v53 = vld [vmem:[#allocation15 + $0x310] ss:$8 sps:$4 sm:$0xff]  }
 0x5ac   :  { %6347 = vmatpush1.msra.mxu0 %v6339_v57  ;;  %v20311_v57 = vld [vmem:[#allocation15 + $0x320] ss:$8 sps:$4 sm:$0xff]  }
 0x5ad   :  { %17634 = vmatmul.mubr.msk.f32.vlgmr.msra.gmra.mrb[10].mxu0 %vm6343_vm5, %v22392_v41  ;;  %7001 = vmatprep.subr.bf16.mxu0 %v20253_v23  ;;  %v20313_v23 = vld [vmem:[#allocation15 + $0x324] ss:$8 sps:$4 sm:$0xff]  }
 0x5ae   :  { %7002 = vmatpush1.bf16.msra.mxu0 %v20251_v59  ;;  %v20319_v59 = vld [vmem:[#allocation15 + $0x334] ss:$8 sps:$4 sm:$0xff]  }
 0x5af   :  { %7003 = vmatprep.subr.bf16.mxu0 %v20256_v58  ;;  %v20317_v58 = vld [vmem:[#allocation15 + $0x330] ss:$8 sps:$4 sm:$0xff]  }
 0x5b2   :  { %7004 = vmatpush1.bf16.msra.mxu0 %v20254_v62  ;;  %v20325_v62 = vld [vmem:[#allocation15 + $0x344] ss:$8 sps:$4 sm:$0xff]  }
 0x5b3   :  { %7005 = vmatprep.subr.bf16.mxu0 %v20259_v2  ;;  %v20323_v2 = vld [vmem:[#allocation15 + $0x340] ss:$8 sps:$4 sm:$0xff]  }
 0x5b6   :  { %7006 = vmatpush1.bf16.msra.mxu0 %v20257_v3  ;;  %v20331_v3 = vld [vmem:[#allocation15 + $0x354] ss:$8 sps:$4 sm:$0xff]  }
 0x5b7   :  { %7007 = vmatprep.subr.bf16.mxu0 %v20262_v28  ;;  %v20329_v28 = vld [vmem:[#allocation15 + $0x350] ss:$8 sps:$4 sm:$0xff]  }
 0x5ba   :  { %7008 = vmatpush1.bf16.msra.mxu0 %v20260_v4  ;;  %v20337_v4 = vld [vmem:[#allocation15 + $0x364] ss:$8 sps:$4 sm:$0xff]  }
 0x5bb   :  { %7009 = vmatprep.subr.bf16.mxu0 %v20265_v6  ;;  %v20335_v6 = vld [vmem:[#allocation15 + $0x360] ss:$8 sps:$4 sm:$0xff]  }
 0x5be   :  { %7010 = vmatpush1.bf16.msra.mxu0 %v20263_v7  ;;  %v20343_v7 = vld [vmem:[#allocation15 + $0x374] ss:$8 sps:$4 sm:$0xff]  }
 0x5bf   :  { %7011 = vmatprep.subr.bf16.mxu0 %v20268_v35  ;;  %v20341_v35 = vld [vmem:[#allocation15 + $0x370] ss:$8 sps:$4 sm:$0xff]  }
 0x5c2   :  { %7012 = vmatpush1.bf16.msra.mxu0 %v20266_v31  ;;  %v20349_v31 = vld [vmem:[#allocation15 + $0x384] ss:$8 sps:$4 sm:$0xff]  }
 0x5c3   :  { %7013 = vmatprep.subr.bf16.mxu0 %v20271_v17  ;;  %v20347_v17 = vld [vmem:[#allocation15 + $0x380] ss:$8 sps:$4 sm:$0xff]  }
 0x5c6   :  { %7014 = vmatpush1.bf16.msra.mxu0 %v20269_v37  ;;  %v20355_v37 = vld [vmem:[#allocation15 + $0x394] ss:$8 sps:$4 sm:$0xff]  }
 0x5c7   :  { %7015 = vmatprep.subr.bf16.mxu0 %v20274_v10  ;;  %v20353_v10 = vld [vmem:[#allocation15 + $0x390] ss:$8 sps:$4 sm:$0xff]  }
 0x5ca   :  { %7016 = vmatpush1.bf16.msra.mxu0 %v20272_v19  ;;  %v20361_v19 = vld [vmem:[#allocation15 + $0x3a4] ss:$8 sps:$4 sm:$0xff]  }
 0x5cb   :  { %7017 = vmatprep.subr.bf16.mxu0 %v20277_v5  ;;  %v20359_v5 = vld [vmem:[#allocation15 + $0x3a0] ss:$8 sps:$4 sm:$0xff]  }
 0x5ce   :  { %7018 = vmatpush1.bf16.msra.mxu0 %v20275_v22  ;;  %v20365_v22 = vld [vmem:[#allocation15 + $0x3b0] ss:$8 sps:$4 sm:$0xff]  }
 0x5cf   :  { %7019 = vmatprep.subr.bf16.mxu0 %v20280_v11  ;;  %v20367_v11 = vld [vmem:[#allocation15 + $0x3b4] ss:$8 sps:$4 sm:$0xff]  }
 0x5d2   :  { %7020 = vmatpush1.bf16.msra.mxu0 %v20278_v12  ;;  %v20373_v12 = vld [vmem:[#allocation15 + $0x3c4] ss:$8 sps:$4 sm:$0xff]  }
 0x5d3   :  { %7021 = vmatprep.subr.bf16.mxu0 %v20283_v13  ;;  %v20371_v13 = vld [vmem:[#allocation15 + $0x3c0] ss:$8 sps:$4 sm:$0xff]  }
 0x5d4   :  { %v6302_v20 = vpop.f32.mrb[44].mxu1 }
 0x5d5   :  { %v6304_v55 = vpop.f32.mrb[45].mxu1 }
 0x5d6   :  { %v6306_v24 = vpop.f32.mrb[46].mxu1  ;;  %7022 = vmatpush1.bf16.msra.mxu0 %v20281_v14  ;;  %v20379_v14 = vld [vmem:[#allocation15 + $0x3d4] ss:$8 sps:$4 sm:$0xff]  }
 0x5d7   :  { %v6307_v26 = vpop.f32.mrb[47].mxu1  ;;  %7023 = vmatprep.subr.bf16.mxu0 %v20286_v49  ;;  %v20383_v24 = vld [vmem:[#allocation15 + $0x3e0] ss:$8 sps:$4 sm:$0xff]  }
 0x5d8   :  { %v20391_v26 = vld [vmem:[#allocation15 + $0x3f4] ss:$8 sps:$4 sm:$0xff]  }
 0x5da   :  { %7024 = vmatpush1.bf16.msra.mxu0 %v20284_v47 }
 0x5db   :  { %7025 = vmatprep.subr.bf16.mxu0 %v20289_v21 }
 0x5de   :  { %7026 = vmatpush1.bf16.msra.mxu0 %v20287_v54 }
 0x5e1   :  { %v6261_v27 = vpop.f32.mrb[48].mxu0 }
 0x5e2   :  { %v6303_v45 = vadd.f32 %v6302_v20, %v6261_v27  ;;  %v6263_v29 = vpop.f32.mrb[49].mxu0  ;;  %v20377_v20 = vld [vmem:[#allocation15 + $0x3d0] ss:$8 sps:$4 sm:$0xff]  }
 0x5e3   :  { %v6305_v48 = vadd.f32 %v6304_v55, %v6263_v29  ;;  %v6265_v43 = vpop.f32.mrb[50].mxu0  ;;  %v20385_v55 = vld [vmem:[#allocation15 + $0x3e4] ss:$8 sps:$4 sm:$0xff]   ;;  %v20389_v27 = vld [vmem:[#allocation15 + $0x3f0] ss:$8 sps:$4 sm:$0xff]  }
 0x5e4   :  { %v6311_v33 = vadd.f32 %v6303_v45, %v22509_v44  ;;  %v6266_v9 = vpop.f32.mrb[51].mxu0  ;;  %v20292_v44 = vld [vmem:[#allocation15 + $0x2d4] ss:$8 sps:$4 sm:$0xff]   ;;  %v20397_v45 = vld [vmem:[#allocation15 + $0x104] ss:$8 sps:$4 sm:$0xff]  }
 0x5e5   :  { %v6312_v60 = vadd.f32 %v6305_v48, %v22512_v39  ;;  %7027 = vmatprep.subr.bf16.mxu0 %v20292_v44  ;;  %v20295_v39 = vld [vmem:[#allocation15 + $0x2e4] ss:$8 sps:$4 sm:$0xff]  }
 0x5e6   :  { %v6337_v42 = vadd.f32 %v6326_v56, %v6311_v33  ;;  %7028 = vmatpush1.bf16.msra.mxu0 %v20290_v30  ;;  %v20302_v30 = vld [vmem:[#allocation15] ss:$8 sps:$4 sm:$0xff]  }
 0x5e7   :  { %v6338_v18 = vadd.f32 %v6330_v32, %v6312_v60  ;;  %7029 = vmatprep.subr.bf16.mxu0 %v20295_v39 }
 0x5e8   :  { %v6341_v46 = vmax.f32 %v6337_v42, 0.0 }
 0x5e9   :  { %v6342_v63 = vmax.f32 %v6338_v18, 0.0 }
 0x5ea   :  { %7030 = vmatpush1.bf16.msra.mxu0 %v20293_v50  ;;  %v20310_v50 = vld [vmem:[#allocation15 + $0x14] ss:$8 sps:$4 sm:$0xff]  }
 0x5eb   :  { %6417 = vmatprep.subr.mxu1 %v6342_v63  ;;  %7031 = vmatprep.subr.bf16.mxu0 %v20298_v36  ;;  %v20308_v36 = vld [vmem:[#allocation15 + $0x10] ss:$8 sps:$4 sm:$0xff]  }
 0x5ec   :  { %6418 = vmatpush1.msra.mxu1 %v6341_v46 }
 0x5ed   :  { %17635 = vmatmul.mubr.msk.f32.vlgmr.msra.gmra.mrb[6].mxu1 %vm6343_vm5, %v22392_v41  ;;  %7042 = vmatprep.subr.bf16.mxu1 %v20301_v51  ;;  %v20322_v51 = vld [vmem:[#allocation15 + $0x34] ss:$8 sps:$4 sm:$0xff]  }
 0x5ee   :  { %7032 = vmatpush1.bf16.msra.mxu0 %v20296_v25  ;;  %7043 = vmatpush1.bf16.msra.mxu1 %v20299_v34  ;;  %v20316_v25 = vld [vmem:[#allocation15 + $0x24] ss:$8 sps:$4 sm:$0xff]   ;;  %v20314_v34 = vld [vmem:[#allocation15 + $0x20] ss:$8 sps:$4 sm:$0xff]  }
 0x5ef   :  { %7403 = vmatprep.subr.bf16.mxu0 %v20304_v52  ;;  %7044 = vmatprep.subr.bf16.mxu1 %v20307_v61  ;;  %v20320_v52 = vld [vmem:[#allocation15 + $0x30] ss:$8 sps:$4 sm:$0xff]   ;;  %v20328_v61 = vld [vmem:[#allocation15 + $0x44] ss:$8 sps:$4 sm:$0xff]  }
 0x5f2   :  { %7045 = vmatpush1.bf16.msra.mxu1 %v20305_v53  ;;  %v20326_v53 = vld [vmem:[#allocation15 + $0x40] ss:$8 sps:$4 sm:$0xff]  }
 0x5f3   :  { %7046 = vmatprep.subr.bf16.mxu1 %v20313_v23  ;;  %v20334_v23 = vld [vmem:[#allocation15 + $0x54] ss:$8 sps:$4 sm:$0xff]  }
 0x5f6   :  { %7047 = vmatpush1.bf16.msra.mxu1 %v20311_v57  ;;  %v20332_v57 = vld [vmem:[#allocation15 + $0x50] ss:$8 sps:$4 sm:$0xff]  }
 0x5f7   :  { %7048 = vmatprep.subr.bf16.mxu1 %v20319_v59  ;;  %v20340_v59 = vld [vmem:[#allocation15 + $0x64] ss:$8 sps:$4 sm:$0xff]  }
 0x5fa   :  { %7049 = vmatpush1.bf16.msra.mxu1 %v20317_v58  ;;  %v20338_v58 = vld [vmem:[#allocation15 + $0x60] ss:$8 sps:$4 sm:$0xff]  }
 0x5fb   :  { %7050 = vmatprep.subr.bf16.mxu1 %v20325_v62  ;;  %v20346_v62 = vld [vmem:[#allocation15 + $0x74] ss:$8 sps:$4 sm:$0xff]  }
 0x5fe   :  { %7051 = vmatpush1.bf16.msra.mxu1 %v20323_v2  ;;  %v20344_v2 = vld [vmem:[#allocation15 + $0x70] ss:$8 sps:$4 sm:$0xff]  }
 0x5ff   :  { %7052 = vmatprep.subr.bf16.mxu1 %v20331_v3  ;;  %v20352_v3 = vld [vmem:[#allocation15 + $0x84] ss:$8 sps:$4 sm:$0xff]  }
 0x602   :  { %7053 = vmatpush1.bf16.msra.mxu1 %v20329_v28  ;;  %v20350_v28 = vld [vmem:[#allocation15 + $0x80] ss:$8 sps:$4 sm:$0xff]  }
 0x603   :  { %7054 = vmatprep.subr.bf16.mxu1 %v20337_v4  ;;  %v20358_v4 = vld [vmem:[#allocation15 + $0x94] ss:$8 sps:$4 sm:$0xff]  }
 0x606   :  { %7055 = vmatpush1.bf16.msra.mxu1 %v20335_v6  ;;  %v20356_v6 = vld [vmem:[#allocation15 + $0x90] ss:$8 sps:$4 sm:$0xff]  }
 0x607   :  { %7056 = vmatprep.subr.bf16.mxu1 %v20343_v7  ;;  %v20364_v7 = vld [vmem:[#allocation15 + $0xa4] ss:$8 sps:$4 sm:$0xff]  }
 0x60a   :  { %7057 = vmatpush1.bf16.msra.mxu1 %v20341_v35  ;;  %v20362_v35 = vld [vmem:[#allocation15 + $0xa0] ss:$8 sps:$4 sm:$0xff]  }
 0x60b   :  { %7058 = vmatprep.subr.bf16.mxu1 %v20349_v31  ;;  %v20370_v31 = vld [vmem:[#allocation15 + $0xb4] ss:$8 sps:$4 sm:$0xff]  }
 0x60e   :  { %7059 = vmatpush1.bf16.msra.mxu1 %v20347_v17  ;;  %v20368_v17 = vld [vmem:[#allocation15 + $0xb0] ss:$8 sps:$4 sm:$0xff]  }
 0x60f   :  { %7060 = vmatprep.subr.bf16.mxu1 %v20355_v37  ;;  %v20376_v37 = vld [vmem:[#allocation15 + $0xc4] ss:$8 sps:$4 sm:$0xff]  }
 0x612   :  { %7061 = vmatpush1.bf16.msra.mxu1 %v20353_v10 }
 0x613   :  { %7062 = vmatprep.subr.bf16.mxu1 %v20361_v19 }
 0x616   :  { %7063 = vmatpush1.bf16.msra.mxu1 %v20359_v5 }
 0x617   :  { %7064 = vmatprep.subr.bf16.mxu1 %v20367_v11  ;;  %v20374_v11 = vld [vmem:[#allocation15 + $0xc0] ss:$8 sps:$4 sm:$0xff]  }
 0x61a   :  { %7065 = vmatpush1.bf16.msra.mxu1 %v20365_v22 }
 0x61b   :  { %7066 = vmatprep.subr.bf16.mxu1 %v20373_v12  ;;  %v20382_v12 = vld [vmem:[#allocation15 + $0xd4] ss:$8 sps:$4 sm:$0xff]  }
 0x61e   :  { %7067 = vmatpush1.bf16.msra.mxu1 %v20371_v13  ;;  %v20380_v13 = vld [vmem:[#allocation15 + $0xd0] ss:$8 sps:$4 sm:$0xff]  }
 0x61f   :  { %7068 = vmatprep.subr.bf16.mxu1 %v20379_v14  ;;  %v20388_v14 = vld [vmem:[#allocation15 + $0xe4] ss:$8 sps:$4 sm:$0xff]  }
 0x622   :  { %7069 = vmatpush1.bf16.msra.mxu1 %v20377_v20  ;;  %v20386_v20 = vld [vmem:[#allocation15 + $0xe0] ss:$8 sps:$4 sm:$0xff]  }
 0x623   :  { %7070 = vmatprep.subr.bf16.mxu1 %v20385_v55 }
 0x626   :  { %7071 = vmatpush1.bf16.msra.mxu1 %v20383_v24  ;;  %v20394_v24 = vld [vmem:[#allocation15 + $0xf4] ss:$8 sps:$4 sm:$0xff]  }
 0x627   :  { %7072 = vmatprep.subr.bf16.mxu1 %v20391_v26 }
 0x62a   :  { %7073 = vmatpush1.bf16.msra.mxu1 %v20389_v27 }
 0x62b   :  { %7444 = vmatprep.subr.bf16.mxu1 %v20397_v45 }
 0x680   :  { %v6412_v56 = vpop.f32.mrb[10].mxu0 }
 0x681   :  { %v6492_v29 = vrot.slane %v6412_v56, 7  ;;  %v6414_v48 = vpop.f32.mrb[11].mxu0 }
 0x682   :  { %v6493_v43 = vrot.slane %v6414_v48, 7 }
 0x683   :  { %6500 = vst [vmem:[#allocation4] sm:$0x1e] %v6492_v29  ;;  %v20392_v29 = vld [vmem:[#allocation15 + $0xf0] ss:$8 sps:$4 sm:$0xff]  }
 0x684   :  { %6501 = vst [vmem:[#allocation4 + $0x8] sm:$0x1e] %v6493_v43 }
 0x68a   :  { %v6576_v32 = vld [vmem:[#allocation4] sm:$0x1e] }
 0x68b   :  { %v6577_v33 = vld [vmem:[#allocation4 + $0x8] sm:$0x1e]  ;;  %v6580_v9 = vpack.c.bf16 %v6576_v32, %v6576_v32  ;;  %v20400_v32 = vld [vmem:[#allocation15 + $0x404] ss:$8 sps:$4 sm:$0xff]  }
 0x68c   :  { %v6581_v60 = vpack.c.bf16 %v6577_v33, %v6577_v33  ;;  %v6505_v49 = vld [vmem:[#allocation4 + $0x8] sm:$0xf] }
 0x68d   :  { %v6650_v42 = vshrl.u32 %v6580_v9, 16  ;;  %v6652_v18 = vshll.u32 %v6580_v9, 16  ;;  %v6509_v39 = vpack.c.bf16 %v6505_v49, %v6505_v49  ;;  %v7486_v43 = vld [vmem:[#allocation4 + $0x8] sm:$0x3c]  ;;  %v20398_v49 = vld [vmem:[#allocation15 + $0x400] ss:$8 sps:$4 sm:$0xff]  }
 0x68e   :  { %v6657_v63 = vshrl.u32 %v6581_v60, 16  ;;  %v6659_v46 = vshll.u32 %v6581_v60, 16 }
 0x68f   :  { %v6654_v47 = vrot.slane %v6652_v18, 1 }
 0x690   :  { %v6661_v21 = vrot.slane %v6659_v46, 1 }
 0x691   :  { %v6655_v54 = vor.u32 %v6654_v47, %v6650_v42  ;;  %v6504_v42 = vld [vmem:[#allocation4] sm:$0xf] }
 0x692   :  { %v6662_v44 = vor.u32 %v6661_v21, %v6657_v63  ;;  %v7490_v63 = vpack.c.bf16 %v7486_v43, %v7486_v43  ;;  %v20395_v47 = vld [vmem:[#allocation15 + $0x100] ss:$8 sps:$4 sm:$0xff]   ;;  %v20463_v43 = vld [vmem:[#allocation15 + $0x1b4] ss:$8 sps:$4 sm:$0xff]  }
 0x694   :  { %7033 = vmatprep.mubr.bf16.mxu0 %v6662_v44 }
 0x695   :  { %7034 = vmatmul.mubr.bf16.vlgmr.msra.gmra.mrb[52].mxu0 %v6655_v54  ;;  %v6508_v54 = vpack.c.bf16 %v6504_v42, %v6504_v42  ;;  %v20472_v42 = vld [vmem:[#allocation15 + $0x4c4] ss:$8 sps:$4 sm:$0xff]  }
 0x696   :  { %7404 = vmatpush1.bf16.msra.mxu0 %v20302_v30  ;;  %7435 = vmatprep.mubr.bf16.mxu0 %v6509_v39  ;;  %v20403_v30 = vld [vmem:[#allocation15 + $0x114] ss:$8 sps:$4 sm:$0xff]  }
 0x697   :  { %7405 = vmatprep.subr.bf16.mxu0 %v20310_v50  ;;  %v20406_v39 = vld [vmem:[#allocation15 + $0x414] ss:$8 sps:$4 sm:$0xff]   ;;  %v7563_v50 = vrot.slane %v7490_v63, 1  ;;  %v20470_v63 = vld [vmem:[#allocation15 + $0x4c0] ss:$8 sps:$4 sm:$0xff]  }
 0x69a   :  { %7406 = vmatpush1.bf16.msra.mxu0 %v20308_v36 }
 0x69b   :  { %7407 = vmatprep.subr.bf16.mxu0 %v20316_v25  ;;  %v20401_v25 = vld [vmem:[#allocation15 + $0x110] ss:$8 sps:$4 sm:$0xff]  }
 0x69e   :  { %7408 = vmatpush1.bf16.msra.mxu0 %v20314_v34  ;;  %v20404_v34 = vld [vmem:[#allocation15 + $0x410] ss:$8 sps:$4 sm:$0xff]  }
 0x69f   :  { %7409 = vmatprep.subr.bf16.mxu0 %v20322_v51  ;;  %v20409_v51 = vld [vmem:[#allocation15 + $0x124] ss:$8 sps:$4 sm:$0xff]  }
 0x6a2   :  { %7410 = vmatpush1.bf16.msra.mxu0 %v20320_v52  ;;  %v20412_v52 = vld [vmem:[#allocation15 + $0x424] ss:$8 sps:$4 sm:$0xff]  }
 0x6a3   :  { %7411 = vmatprep.subr.bf16.mxu0 %v20328_v61  ;;  %v20407_v61 = vld [vmem:[#allocation15 + $0x120] ss:$8 sps:$4 sm:$0xff]  }
 0x6a6   :  { %7412 = vmatpush1.bf16.msra.mxu0 %v20326_v53  ;;  %v20410_v53 = vld [vmem:[#allocation15 + $0x420] ss:$8 sps:$4 sm:$0xff]  }
 0x6a7   :  { %7413 = vmatprep.subr.bf16.mxu0 %v20334_v23  ;;  %v20415_v23 = vld [vmem:[#allocation15 + $0x134] ss:$8 sps:$4 sm:$0xff]  }
 0x6aa   :  { %7414 = vmatpush1.bf16.msra.mxu0 %v20332_v57  ;;  %v20418_v57 = vld [vmem:[#allocation15 + $0x434] ss:$8 sps:$4 sm:$0xff]  }
 0x6ab   :  { %7415 = vmatprep.subr.bf16.mxu0 %v20340_v59  ;;  %v20413_v59 = vld [vmem:[#allocation15 + $0x130] ss:$8 sps:$4 sm:$0xff]  }
 0x6ae   :  { %7416 = vmatpush1.bf16.msra.mxu0 %v20338_v58  ;;  %v20416_v58 = vld [vmem:[#allocation15 + $0x430] ss:$8 sps:$4 sm:$0xff]  }
 0x6af   :  { %7417 = vmatprep.subr.bf16.mxu0 %v20346_v62  ;;  %v20421_v62 = vld [vmem:[#allocation15 + $0x144] ss:$8 sps:$4 sm:$0xff]  }
 0x6b2   :  { %7418 = vmatpush1.bf16.msra.mxu0 %v20344_v2  ;;  %v20424_v2 = vld [vmem:[#allocation15 + $0x444] ss:$8 sps:$4 sm:$0xff]  }
 0x6b3   :  { %7419 = vmatprep.subr.bf16.mxu0 %v20352_v3  ;;  %v20419_v3 = vld [vmem:[#allocation15 + $0x140] ss:$8 sps:$4 sm:$0xff]  }
 0x6b6   :  { %7420 = vmatpush1.bf16.msra.mxu0 %v20350_v28  ;;  %v20422_v28 = vld [vmem:[#allocation15 + $0x440] ss:$8 sps:$4 sm:$0xff]  }
 0x6b7   :  { %7421 = vmatprep.subr.bf16.mxu0 %v20358_v4  ;;  %v20427_v4 = vld [vmem:[#allocation15 + $0x154] ss:$8 sps:$4 sm:$0xff]  }
 0x6ba   :  { %7422 = vmatpush1.bf16.msra.mxu0 %v20356_v6  ;;  %v20430_v6 = vld [vmem:[#allocation15 + $0x454] ss:$8 sps:$4 sm:$0xff]  }
 0x6bb   :  { %7423 = vmatprep.subr.bf16.mxu0 %v20364_v7  ;;  %v20425_v7 = vld [vmem:[#allocation15 + $0x150] ss:$8 sps:$4 sm:$0xff]  }
 0x6be   :  { %7424 = vmatpush1.bf16.msra.mxu0 %v20362_v35  ;;  %v20428_v35 = vld [vmem:[#allocation15 + $0x450] ss:$8 sps:$4 sm:$0xff]  }
 0x6bf   :  { %7425 = vmatprep.subr.bf16.mxu0 %v20370_v31  ;;  %v20433_v31 = vld [vmem:[#allocation15 + $0x164] ss:$8 sps:$4 sm:$0xff]  }
 0x6c0   :  { %v6483_v10 = vpop.f32.mrb[6].mxu1 }
 0x6c1   :  { %v6494_v19 = vrot.slane %v6483_v10, 7  ;;  %v6485_v5 = vpop.f32.mrb[7].mxu1  ;;  %v20434_v10 = vld [vmem:[#allocation15 + $0x460] ss:$8 sps:$4 sm:$0xff]  }
 0x6c2   :  { %v6495_v22 = vrot.slane %v6485_v5, 7  ;;  %7426 = vmatpush1.bf16.msra.mxu0 %v20368_v17  ;;  %v20436_v17 = vld [vmem:[#allocation15 + $0x464] ss:$8 sps:$4 sm:$0xff]   ;;  %v20442_v5 = vld [vmem:[#allocation15 + $0x474] ss:$8 sps:$4 sm:$0xff]  }
 0x6c3   :  { %6502 = vst [vmem:[#allocation4 + $0x10] sm:$0x1e] %v6494_v19  ;;  %7427 = vmatprep.subr.bf16.mxu0 %v20376_v37  ;;  %v20431_v37 = vld [vmem:[#allocation15 + $0x160] ss:$8 sps:$4 sm:$0xff]   ;;  %v20439_v19 = vld [vmem:[#allocation15 + $0x174] ss:$8 sps:$4 sm:$0xff]  }
 0x6c4   :  { %6503 = vst [vmem:[#allocation4 + $0x18] sm:$0x1e] %v6495_v22  ;;  %v20437_v22 = vld [vmem:[#allocation15 + $0x170] ss:$8 sps:$4 sm:$0xff]  }
 0x6c6   :  { %7428 = vmatpush1.bf16.msra.mxu0 %v20374_v11  ;;  %v20440_v11 = vld [vmem:[#allocation15 + $0x470] ss:$8 sps:$4 sm:$0xff]  }
 0x6c7   :  { %7429 = vmatprep.subr.bf16.mxu0 %v20382_v12  ;;  %v20445_v12 = vld [vmem:[#allocation15 + $0x184] ss:$8 sps:$4 sm:$0xff]  }
 0x6ca   :  { %7430 = vmatpush1.bf16.msra.mxu0 %v20380_v13  ;;  %v6578_v55 = vld [vmem:[#allocation4 + $0x10] sm:$0x1e]  ;;  %v20448_v13 = vld [vmem:[#allocation15 + $0x484] ss:$8 sps:$4 sm:$0xff]  }
 0x6cb   :  { %7431 = vmatprep.subr.bf16.mxu0 %v20388_v14  ;;  %v6579_v26 = vld [vmem:[#allocation4 + $0x18] sm:$0x1e]  ;;  %v6582_v27 = vpack.c.bf16 %v6578_v55, %v6578_v55  ;;  %v20451_v55 = vld [vmem:[#allocation15 + $0x194] ss:$8 sps:$4 sm:$0xff]  }
 0x6cc   :  { %v6583_v45 = vpack.c.bf16 %v6579_v26, %v6579_v26  ;;  %v6507_v21 = vld [vmem:[#allocation4 + $0x18] sm:$0xf]  ;;  %v20449_v26 = vld [vmem:[#allocation15 + $0x190] ss:$8 sps:$4 sm:$0xff]  }
 0x6cd   :  { %v6666_v56 = vshll.u32 %v6582_v27, 16  ;;  %v6664_v18 = vshrl.u32 %v6582_v27, 16  ;;  %v6511_v36 = vpack.c.bf16 %v6507_v21, %v6507_v21  ;;  %v20443_v14 = vld [vmem:[#allocation15 + $0x180] ss:$8 sps:$4 sm:$0xff]   ;;  %v20452_v27 = vld [vmem:[#allocation15 + $0x490] ss:$8 sps:$4 sm:$0xff]  }
 0x6ce   :  { %7432 = vmatpush1.bf16.msra.mxu0 %v20386_v20  ;;  %v6673_v48 = vshll.u32 %v6583_v45, 16  ;;  %v6671_v9 = vshrl.u32 %v6583_v45, 16  ;;  %v20446_v20 = vld [vmem:[#allocation15 + $0x480] ss:$8 sps:$4 sm:$0xff]   ;;  %v20457_v45 = vld [vmem:[#allocation15 + $0x1a4] ss:$8 sps:$4 sm:$0xff]  }
 0x6cf   :  { %7433 = vmatprep.subr.bf16.mxu0 %v20394_v24  ;;  %v6668_v33 = vrot.slane %v6666_v56, 1  ;;  %v20454_v24 = vld [vmem:[#allocation15 + $0x494] ss:$8 sps:$4 sm:$0xff]   ;;  %v20460_v56 = vld [vmem:[#allocation15 + $0x4a4] ss:$8 sps:$4 sm:$0xff]  }
 0x6d0   :  { %v6675_v60 = vrot.slane %v6673_v48, 1  ;;  %v20458_v48 = vld [vmem:[#allocation15 + $0x4a0] ss:$8 sps:$4 sm:$0xff]   ;;  %v20476_v21 = vld [vmem:[#allocation15 + $0x4d0] ss:$8 sps:$4 sm:$0xff]  }
 0x6d1   :  { %v6669_v44 = vor.u32 %v6668_v33, %v6664_v18  ;;  %v20461_v33 = vld [vmem:[#allocation15 + $0x1b0] ss:$8 sps:$4 sm:$0xff]   ;;  %v20467_v18 = vld [vmem:[#allocation15 + $0x1c0] ss:$8 sps:$4 sm:$0xff]  }
 0x6d2   :  { %7434 = vmatpush1.bf16.msra.mxu0 %v20392_v29  ;;  %v6676_v46 = vor.u32 %v6675_v60, %v6671_v9  ;;  %v20455_v29 = vld [vmem:[#allocation15 + $0x1a0] ss:$8 sps:$4 sm:$0xff]   ;;  %v20464_v9 = vld [vmem:[#allocation15 + $0x4b0] ss:$8 sps:$4 sm:$0xff]   ;;  %v20469_v60 = vld [vmem:[#allocation15 + $0x1c4] ss:$8 sps:$4 sm:$0xff]  }
 0x6d3   :  { %7890 = vmatprep.subr.bf16.mxu0 %v20400_v32  ;;  %v20466_v32 = vld [vmem:[#allocation15 + $0x4b4] ss:$8 sps:$4 sm:$0xff]  }
 0x6d4   :  { %7074 = vmatprep.mubr.bf16.mxu1 %v6676_v46  ;;  %v20475_v46 = vld [vmem:[#allocation15 + $0x1d4] ss:$8 sps:$4 sm:$0xff]  }
 0x6d5   :  { %7436 = vmatmul.mubr.bf16.vlgmr.msra.gmra.mrb[56].mxu0 %v6508_v54  ;;  %7075 = vmatmul.mubr.bf16.vlgmr.msra.gmra.mrb[48].mxu1 %v6669_v44  ;;  %v20481_v54 = vld [vmem:[#allocation15 + $0x1e4] ss:$8 sps:$4 sm:$0xff]  }
 0x6d6   :  { %7445 = vmatpush1.bf16.msra.mxu1 %v20395_v47  ;;  %7891 = vmatpush1.bf16.msra.mxu0 %v20398_v49  ;;  %v20478_v47 = vld [vmem:[#allocation15 + $0x4d4] ss:$8 sps:$4 sm:$0xff]   ;;  %v20473_v49 = vld [vmem:[#allocation15 + $0x1d0] ss:$8 sps:$4 sm:$0xff]   ;;  %v20484_v44 = vld [vmem:[#allocation15 + $0x4e4] ss:$8 sps:$4 sm:$0xff]  }
 0x6d7   :  { %7922 = vmatprep.mubr.bf16.mxu0 %v7563_v50  ;;  %7476 = vmatprep.mubr.bf16.mxu1 %v6511_v36  ;;  %v20487_v50 = vld [vmem:[#allocation15 + $0x1f4] ss:$8 sps:$4 sm:$0xff]  }
 0x6d8   :  { %7446 = vmatprep.subr.bf16.mxu1 %v20403_v30  ;;  %7892 = vmatprep.subr.bf16.mxu0 %v20406_v39  ;;  %v20479_v30 = vld [vmem:[#allocation15 + $0x1e0] ss:$8 sps:$4 sm:$0xff]   ;;  %v20490_v36 = vld [vmem:[#allocation15 + $0x4f4] ss:$8 sps:$4 sm:$0xff]  }
 0x6d9   :  { %v20482_v39 = vld [vmem:[#allocation15 + $0x4e0] ss:$8 sps:$4 sm:$0xff]  }
 0x6da   :  { %7447 = vmatpush1.bf16.msra.mxu1 %v20401_v25  ;;  %7893 = vmatpush1.bf16.msra.mxu0 %v20404_v34  ;;  %v7485_v25 = vld [vmem:[#allocation4] sm:$0x3c]  ;;  %v7488_v34 = vld [vmem:[#allocation4 + $0x18] sm:$0x3c] }
 0x6db   :  { %7448 = vmatprep.subr.bf16.mxu1 %v20409_v51  ;;  %7894 = vmatprep.subr.bf16.mxu0 %v20412_v52  ;;  %v20485_v51 = vld [vmem:[#allocation15 + $0x1f0] ss:$8 sps:$4 sm:$0xff]  }
 0x6dc   :  { %v20488_v52 = vld [vmem:[#allocation15 + $0x4f0] ss:$8 sps:$4 sm:$0xff]  }
 0x6de   :  { %7449 = vmatpush1.bf16.msra.mxu1 %v20407_v61  ;;  %7895 = vmatpush1.bf16.msra.mxu0 %v20410_v53  ;;  %v7489_v61 = vpack.c.bf16 %v7485_v25, %v7485_v25  ;;  %v20493_v53 = vld [vmem:[#allocation15 + $0x504] ss:$8 sps:$4 sm:$0xff]  }
 0x6df   :  { %7450 = vmatprep.subr.bf16.mxu1 %v20415_v23  ;;  %7896 = vmatprep.subr.bf16.mxu0 %v20418_v57  ;;  %v6506_v23 = vld [vmem:[#allocation4 + $0x10] sm:$0xf]  ;;  %v7492_v57 = vpack.c.bf16 %v7488_v34, %v7488_v34 }
 0x6e2   :  { %7451 = vmatpush1.bf16.msra.mxu1 %v20413_v59  ;;  %7897 = vmatpush1.bf16.msra.mxu0 %v20416_v58  ;;  %v20491_v59 = vld [vmem:[#allocation15 + $0x500] ss:$8 sps:$4 sm:$0xff]   ;;  %v6510_v58 = vpack.c.bf16 %v6506_v23, %v6506_v23 }
 0x6e3   :  { %7452 = vmatprep.subr.bf16.mxu1 %v20421_v62  ;;  %7898 = vmatprep.subr.bf16.mxu0 %v20424_v2  ;;  %v7562_v62 = vrot.slane %v7489_v61, 1  ;;  %v20496_v2 = vld [vmem:[#allocation15 + $0x514] ss:$8 sps:$4 sm:$0xff]  }
 0x6e6   :  { %7453 = vmatpush1.bf16.msra.mxu1 %v20419_v3  ;;  %7899 = vmatpush1.bf16.msra.mxu0 %v20422_v28  ;;  %v7565_v3 = vrot.slane %v7492_v57, 1  ;;  %v20494_v28 = vld [vmem:[#allocation15 + $0x510] ss:$8 sps:$4 sm:$0xff]  }
 0x6e7   :  { %7454 = vmatprep.subr.bf16.mxu1 %v20427_v4  ;;  %7900 = vmatprep.subr.bf16.mxu0 %v20430_v6  ;;  %v20499_v4 = vld [vmem:[#allocation15 + $0x524] ss:$8 sps:$4 sm:$0xff]   ;;  %v20497_v6 = vld [vmem:[#allocation15 + $0x520] ss:$8 sps:$4 sm:$0xff]  }
 0x6ea   :  { %7455 = vmatpush1.bf16.msra.mxu1 %v20425_v7  ;;  %7901 = vmatpush1.bf16.msra.mxu0 %v20428_v35  ;;  %v20502_v7 = vld [vmem:[#allocation15 + $0x534] ss:$8 sps:$4 sm:$0xff]   ;;  %v20500_v35 = vld [vmem:[#allocation15 + $0x530] ss:$8 sps:$4 sm:$0xff]  }
 0x6eb   :  { %7456 = vmatprep.subr.bf16.mxu1 %v20433_v31  ;;  %7902 = vmatprep.subr.bf16.mxu0 %v20436_v17  ;;  %v20505_v31 = vld [vmem:[#allocation15 + $0x544] ss:$8 sps:$4 sm:$0xff]   ;;  %v20503_v17 = vld [vmem:[#allocation15 + $0x540] ss:$8 sps:$4 sm:$0xff]  }
 0x6ee   :  { %7457 = vmatpush1.bf16.msra.mxu1 %v20431_v37  ;;  %7903 = vmatpush1.bf16.msra.mxu0 %v20434_v10  ;;  %v20508_v37 = vld [vmem:[#allocation15 + $0x554] ss:$8 sps:$4 sm:$0xff]   ;;  %v20506_v10 = vld [vmem:[#allocation15 + $0x550] ss:$8 sps:$4 sm:$0xff]  }
 0x6ef   :  { %7458 = vmatprep.subr.bf16.mxu1 %v20439_v19  ;;  %7904 = vmatprep.subr.bf16.mxu0 %v20442_v5  ;;  %v20511_v19 = vld [vmem:[#allocation15 + $0x564] ss:$8 sps:$4 sm:$0xff]   ;;  %v20509_v5 = vld [vmem:[#allocation15 + $0x560] ss:$8 sps:$4 sm:$0xff]  }
 0x6f2   :  { %7459 = vmatpush1.bf16.msra.mxu1 %v20437_v22  ;;  %7905 = vmatpush1.bf16.msra.mxu0 %v20440_v11  ;;  %v20514_v22 = vld [vmem:[#allocation15 + $0x574] ss:$8 sps:$4 sm:$0xff]   ;;  %v20512_v11 = vld [vmem:[#allocation15 + $0x570] ss:$8 sps:$4 sm:$0xff]  }
 0x6f3   :  { %7460 = vmatprep.subr.bf16.mxu1 %v20445_v12  ;;  %7906 = vmatprep.subr.bf16.mxu0 %v20448_v13  ;;  %v20517_v12 = vld [vmem:[#allocation15 + $0x584] ss:$8 sps:$4 sm:$0xff]   ;;  %v20515_v13 = vld [vmem:[#allocation15 + $0x580] ss:$8 sps:$4 sm:$0xff]  }
 0x6f6   :  { %7461 = vmatpush1.bf16.msra.mxu1 %v20443_v14  ;;  %7907 = vmatpush1.bf16.msra.mxu0 %v20446_v20  ;;  %v20520_v14 = vld [vmem:[#allocation15 + $0x594] ss:$8 sps:$4 sm:$0xff]   ;;  %v20518_v20 = vld [vmem:[#allocation15 + $0x590] ss:$8 sps:$4 sm:$0xff]  }
 0x6f7   :  { %7462 = vmatprep.subr.bf16.mxu1 %v20451_v55  ;;  %7908 = vmatprep.subr.bf16.mxu0 %v20454_v24  ;;  %v20523_v55 = vld [vmem:[#allocation15 + $0x5a4] ss:$8 sps:$4 sm:$0xff]   ;;  %v20521_v24 = vld [vmem:[#allocation15 + $0x5a0] ss:$8 sps:$4 sm:$0xff]  }
 0x6fa   :  { %7463 = vmatpush1.bf16.msra.mxu1 %v20449_v26  ;;  %7909 = vmatpush1.bf16.msra.mxu0 %v20452_v27  ;;  %v20526_v26 = vld [vmem:[#allocation15 + $0x5b4] ss:$8 sps:$4 sm:$0xff]   ;;  %v20524_v27 = vld [vmem:[#allocation15 + $0x5b0] ss:$8 sps:$4 sm:$0xff]  }
 0x6fb   :  { %7464 = vmatprep.subr.bf16.mxu1 %v20457_v45  ;;  %7910 = vmatprep.subr.bf16.mxu0 %v20460_v56  ;;  %v20529_v45 = vld [vmem:[#allocation15 + $0x5c4] ss:$8 sps:$4 sm:$0xff]   ;;  %v20527_v56 = vld [vmem:[#allocation15 + $0x5c0] ss:$8 sps:$4 sm:$0xff]  }
 0x6fe   :  { %7465 = vmatpush1.bf16.msra.mxu1 %v20455_v29  ;;  %7911 = vmatpush1.bf16.msra.mxu0 %v20458_v48  ;;  %v20532_v29 = vld [vmem:[#allocation15 + $0x5d4] ss:$8 sps:$4 sm:$0xff]   ;;  %v20530_v48 = vld [vmem:[#allocation15 + $0x5d0] ss:$8 sps:$4 sm:$0xff]  }
 0x6ff   :  { %7466 = vmatprep.subr.bf16.mxu1 %v20463_v43  ;;  %7912 = vmatprep.subr.bf16.mxu0 %v20466_v32  ;;  %v20535_v43 = vld [vmem:[#allocation15 + $0x5e4] ss:$8 sps:$4 sm:$0xff]   ;;  %v20533_v32 = vld [vmem:[#allocation15 + $0x5e0] ss:$8 sps:$4 sm:$0xff]  }
 0x702   :  { %7467 = vmatpush1.bf16.msra.mxu1 %v20461_v33  ;;  %7913 = vmatpush1.bf16.msra.mxu0 %v20464_v9  ;;  %v20538_v33 = vld [vmem:[#allocation15 + $0x5f4] ss:$8 sps:$4 sm:$0xff]  }
 0x703   :  { %7468 = vmatprep.subr.bf16.mxu1 %v20469_v60  ;;  %7914 = vmatprep.subr.bf16.mxu0 %v20472_v42  ;;  %v7487_v9 = vld [vmem:[#allocation4 + $0x10] sm:$0x3c] }
 0x704   :  { %v20536_v60 = vld [vmem:[#allocation15 + $0x5f0] ss:$8 sps:$4 sm:$0xff]   ;;  %v7491_v42 = vpack.c.bf16 %v7487_v9, %v7487_v9 }
 0x706   :  { %7469 = vmatpush1.bf16.msra.mxu1 %v20467_v18  ;;  %7915 = vmatpush1.bf16.msra.mxu0 %v20470_v63  ;;  %v7564_v18 = vrot.slane %v7491_v42, 1 }
 0x707   :  { %7470 = vmatprep.subr.bf16.mxu1 %v20475_v46  ;;  %7916 = vmatprep.subr.bf16.mxu0 %v20478_v47 }
 0x70a   :  { %7471 = vmatpush1.bf16.msra.mxu1 %v20473_v49  ;;  %7917 = vmatpush1.bf16.msra.mxu0 %v20476_v21  ;;  %v20539_v21 = vld [vmem:[%s23058_s7 + $0x40] sm:$0xff]  }
 0x70b   :  { %7472 = vmatprep.subr.bf16.mxu1 %v20481_v54  ;;  %7918 = vmatprep.subr.bf16.mxu0 %v20484_v44  ;;  %v20540_v54 = vld [vmem:[%s23058_s7] sm:$0xff]   ;;  %v20541_v44 = vld [vmem:[%s23058_s7 + $0x48] sm:$0xff]  }
 0x70e   :  { %7473 = vmatpush1.bf16.msra.mxu1 %v20479_v30  ;;  %7919 = vmatpush1.bf16.msra.mxu0 %v20482_v39  ;;  %v20542_v30 = vld [vmem:[%s23058_s7 + $0xc0] sm:$0xff]  }
 0x70f   :  { %7474 = vmatprep.subr.bf16.mxu1 %v20487_v50  ;;  %7920 = vmatprep.subr.bf16.mxu0 %v20490_v36  ;;  %v20544_v39 = vld [vmem:[%s23058_s7 + $0x80] sm:$0xff]   ;;  %v20543_v50 = vld [vmem:[%s23058_s7 + $0x8] sm:$0xff]  }
 0x712   :  { %7475 = vmatpush1.bf16.msra.mxu1 %v20485_v51  ;;  %7921 = vmatpush1.bf16.msra.mxu0 %v20488_v52 }
 0x713   :  { %7931 = vmatprep.subr.bf16.mxu1 %v20493_v53  ;;  %18944 = vmatprep.subr.bf16.mxu0 %v20542_v30 }
 0x715   :  { %7477 = vmatmul.mubr.bf16.vlgmr.msra.gmra.mrb[52].mxu1 %v6510_v58  ;;  %7923 = vmatmul.mubr.bf16.vlgmr.msra.gmra.mrb[60].mxu0 %v7562_v62 }
 0x716   :  { %7932 = vmatpush1.bf16.msra.mxu1 %v20491_v59  ;;  %7963 = vmatprep.mubr.bf16.mxu1 %v7565_v3  ;;  %v20546_v3 = vld [vmem:[%s23058_s7 + $0xc8] sm:$0xff]  }
 0x717   :  { %7933 = vmatprep.subr.bf16.mxu1 %v20496_v2  ;;  %18945 = vmatpush3.bf16.msra.mxu0 %v20544_v39  ;;  %v20545_v2 = vld [vmem:[%s23058_s7 + $0x50] sm:$0xff]  }
 0x718   :  { %18946 = vmatprep.subr.bf16.mxu0 %v20546_v3 }
 0x71a   :  { %7934 = vmatpush1.bf16.msra.mxu1 %v20494_v28  ;;  %v20547_v28 = vld [vmem:[%s23058_s7 + $0x10] sm:$0xff]  }
 0x71b   :  { %7935 = vmatprep.subr.bf16.mxu1 %v20499_v4  ;;  %v20548_v4 = vld [vmem:[%s23058_s7 + $0x88] sm:$0xff]  }
 0x71c   :  { %18947 = vmatpush3.bf16.msra.mxu0 %v20548_v4 }
 0x71e   :  { %7936 = vmatpush1.bf16.msra.mxu1 %v20497_v6  ;;  %v20549_v6 = vld [vmem:[%s23058_s7 + $0x58] sm:$0xff]  }
 0x71f   :  { %7937 = vmatprep.subr.bf16.mxu1 %v20502_v7  ;;  %v20550_v7 = vld [vmem:[%s23058_s7 + $0xd0] sm:$0xff]  }
 0x720   :  { %18948 = vmatprep.subr.bf16.mxu0 %v20550_v7 }
 0x722   :  { %7938 = vmatpush1.bf16.msra.mxu1 %v20500_v35  ;;  %v20551_v35 = vld [vmem:[%s23058_s7 + $0x18] sm:$0xff]  }
 0x723   :  { %7939 = vmatprep.subr.bf16.mxu1 %v20505_v31  ;;  %v20552_v31 = vld [vmem:[%s23058_s7 + $0x90] sm:$0xff]  }
 0x724   :  { %18949 = vmatpush3.bf16.msra.mxu0 %v20552_v31 }
 0x726   :  { %7940 = vmatpush1.bf16.msra.mxu1 %v20503_v17  ;;  %v20553_v17 = vld [vmem:[%s23058_s7 + $0x60] sm:$0xff]  }
 0x727   :  { %7941 = vmatprep.subr.bf16.mxu1 %v20508_v37  ;;  %v20554_v37 = vld [vmem:[%s23058_s7 + $0xd8] sm:$0xff]  }
 0x728   :  { %18950 = vmatprep.subr.bf16.mxu0 %v20554_v37 }
 0x72a   :  { %7942 = vmatpush1.bf16.msra.mxu1 %v20506_v10  ;;  %v20556_v10 = vld [vmem:[%s23058_s7 + $0x98] sm:$0xff]  }
 0x72b   :  { %7943 = vmatprep.subr.bf16.mxu1 %v20511_v19  ;;  %v20557_v19 = vld [vmem:[%s23058_s7 + $0x68] sm:$0xff]   ;;  %18951 = vmatpush3.bf16.msra.mxu0 %v20556_v10 }
 0x72e   :  { %7944 = vmatpush1.bf16.msra.mxu1 %v20509_v5  ;;  %v20558_v5 = vld [vmem:[%s23058_s7 + $0xe0] sm:$0xff]  }
 0x72f   :  { %7945 = vmatprep.subr.bf16.mxu1 %v20514_v22  ;;  %v20559_v22 = vld [vmem:[%s23058_s7 + $0x28] sm:$0xff]   ;;  %18952 = vmatprep.subr.bf16.mxu0 %v20558_v5  ;;  %v20580_v5 = vld [vmem:[#allocation9 + $0x2c] ss:$16 sps:$4 sm:$0xff]  }
 0x732   :  { %7946 = vmatpush1.bf16.msra.mxu1 %v20512_v11  ;;  %v20560_v11 = vld [vmem:[%s23058_s7 + $0xa0] sm:$0xff]  }
 0x733   :  { %7947 = vmatprep.subr.bf16.mxu1 %v20517_v12  ;;  %v20561_v12 = vld [vmem:[%s23058_s7 + $0x70] sm:$0xff]   ;;  %18953 = vmatpush3.bf16.msra.mxu0 %v20560_v11 }
 0x736   :  { %7948 = vmatpush1.bf16.msra.mxu1 %v20515_v13  ;;  %v20562_v13 = vld [vmem:[%s23058_s7 + $0xe8] sm:$0xff]  }
 0x737   :  { %7949 = vmatprep.subr.bf16.mxu1 %v20520_v14  ;;  %v20563_v14 = vld [vmem:[%s23058_s7 + $0x30] sm:$0xff]   ;;  %18954 = vmatprep.subr.bf16.mxu0 %v20562_v13 }
 0x73a   :  { %7950 = vmatpush1.bf16.msra.mxu1 %v20518_v20  ;;  %v20564_v20 = vld [vmem:[%s23058_s7 + $0xa8] sm:$0xff]  }
 0x73b   :  { %7951 = vmatprep.subr.bf16.mxu1 %v20523_v55  ;;  %v20565_v55 = vld [vmem:[%s23058_s7 + $0x78] sm:$0xff]   ;;  %18955 = vmatpush3.bf16.msra.mxu0 %v20564_v20 }
 0x73e   :  { %7952 = vmatpush1.bf16.msra.mxu1 %v20521_v24  ;;  %v20566_v24 = vld [vmem:[%s23058_s7 + $0xf0] sm:$0xff]  }
 0x73f   :  { %7953 = vmatprep.subr.bf16.mxu1 %v20526_v26  ;;  %v20567_v26 = vld [vmem:[%s23058_s7 + $0x38] sm:$0xff]   ;;  %18956 = vmatprep.subr.bf16.mxu0 %v20566_v24 }
 0x742   :  { %7954 = vmatpush1.bf16.msra.mxu1 %v20524_v27  ;;  %v20568_v27 = vld [vmem:[%s23058_s7 + $0xb0] sm:$0xff]  }
 0x743   :  { %7955 = vmatprep.subr.bf16.mxu1 %v20529_v45  ;;  %v20573_v45 = vld [vmem:[#allocation9 + $0x24] ss:$16 sps:$4 sm:$0xff]   ;;  %18957 = vmatpush3.bf16.msra.mxu0 %v20568_v27  ;;  %v20575_v27 = vld [vmem:[%s23058_s7 + $0x100] sm:$0xff]  }
 0x746   :  { %7956 = vmatpush1.bf16.msra.mxu1 %v20527_v56  ;;  %v20569_v56 = vld [vmem:[%s23058_s7 + $0xf8] sm:$0xff]  }
 0x747   :  { %7957 = vmatprep.subr.bf16.mxu1 %v20532_v29  ;;  %v8556_v29 = vld [vmem:[#allocation6 + $0x10] sm:$0xff]  ;;  %18958 = vmatprep.subr.bf16.mxu0 %v20569_v56 }
 0x748   :  { %8558 = vst.msk [vmem:[#allocation2 + $0x4] sm:$0xff] %vm175_vm1, %v8556_v29  ;;  %v20576_v29 = vld [vmem:[%s23058_s7 + $0x148] sm:$0xff]  }
 0x74a   :  { %7958 = vmatpush1.bf16.msra.mxu1 %v20530_v48  ;;  %v8557_v48 = vld [vmem:[#allocation6 + $0x18] sm:$0xff] }
 0x74b   :  { %7959 = vmatprep.subr.bf16.mxu1 %v20535_v43  ;;  %8559 = vst.msk [vmem:[#allocation2 + $0xc] sm:$0xff] %vm175_vm1, %v8557_v48  ;;  %v20570_v43 = vld [vmem:[%s23058_s7 + $0xb8] sm:$0xff]  }
 0x74c   :  { %18959 = vmatpush3.bf16.msra.mxu0 %v20570_v43  ;;  %v20578_v43 = vld [vmem:[#allocation9 + $0x28] ss:$16 sps:$4 sm:$0xff]  }
 0x74e   :  { %7960 = vmatpush1.bf16.msra.mxu1 %v20533_v32  ;;  %v20574_v32 = vld [vmem:[%s23058_s7 + $0x140] sm:$0xff]  }
 0x74f   :  { %7961 = vmatprep.subr.bf16.mxu1 %v20538_v33  ;;  %18988 = vmatprep.subr.bf16.mxu0 %v20574_v32  ;;  %v8567_v20 = vld [vmem:[#allocation2 + $0x1] sm:$0xff]  ;;  %v20587_v32 = vld [vmem:[#allocation9 + $0x4] ss:$16 sps:$4 sm:$0xff]  }
 0x752   :  { %7962 = vmatpush1.bf16.msra.mxu1 %v20536_v60 }
 0x753   :  { %18966 = vmatprep.subr.bf16.mxu1 %v20539_v21 }
 0x755   :  { %7964 = vmatmul.mubr.bf16.vlgmr.msra.gmra.mrb[56].mxu1 %v7564_v18 }
 0x756   :  { %18967 = vmatpush3.bf16.msra.mxu1 %v20540_v54  ;;  %v7974_v54 = vld [vmem:[#allocation17] sm:$0x3] }
 0x757   :  { %18968 = vmatprep.subr.bf16.mxu1 %v20541_v44  ;;  %v7979_v39 = vrot.slane %v7974_v54, %v22385_v38 }
 0x75a   :  { %18969 = vmatpush3.bf16.msra.mxu1 %v20543_v50 }
 0x75b   :  { %18970 = vmatprep.subr.bf16.mxu1 %v20545_v2 }
 0x75e   :  { %18971 = vmatpush3.bf16.msra.mxu1 %v20547_v28 }
 0x75f   :  { %18972 = vmatprep.subr.bf16.mxu1 %v20549_v6 }
 0x762   :  { %18973 = vmatpush3.bf16.msra.mxu1 %v20551_v35 }
 0x763   :  { %18974 = vmatprep.subr.bf16.mxu1 %v20553_v17  ;;  %v20571_v17 = vld [vmem:[#allocation9 + $0x20] ss:$16 sps:$4 sm:$0xff]  }
 0x766   :  { %18975 = vmatpush3.bf16.msra.mxu1 %v20555_v8 }
 0x767   :  { %18976 = vmatprep.subr.bf16.mxu1 %v20557_v19 }
 0x768   :  { %v7035_v63 = vpop.f32.mrb[52].mxu0 }
 0x769   :  { %v7037_v46 = vpop.f32.mrb[53].mxu0 }
 0x76a   :  { %v7039_v47 = vpop.f32.mrb[54].mxu0  ;;  %18977 = vmatpush3.bf16.msra.mxu1 %v20559_v22 }
 0x76b   :  { %v7040_v49 = vpop.f32.mrb[55].mxu0  ;;  %18978 = vmatprep.subr.bf16.mxu1 %v20561_v12 }
 0x76e   :  { %18979 = vmatpush3.bf16.msra.mxu1 %v20563_v14 }
 0x76f   :  { %18980 = vmatprep.subr.bf16.mxu1 %v20565_v55  ;;  %v8568_v55 = vld [vmem:[#allocation2 + $0x9] sm:$0xff] }
 0x770   :  { %v8569_v56 = vpack.c.bf16 %v8568_v55, %v8567_v20  ;;  %v9164_v20 = vld [vmem:[#allocation2 + $0x5] sm:$0xff]  ;;  %v9165_v55 = vld [vmem:[#allocation2 + $0xd] sm:$0xff] }
 0x772   :  { %18981 = vmatpush3.bf16.msra.mxu1 %v20567_v26 }
 0x773   :  { %8597 = vmatprep.subr.bf16.mxu1 %v20573_v45 }
 0x7a8   :  { %v7437_v36 = vpop.f32.mrb[56].mxu0  ;;  %v7076_v25 = vpop.f32.mrb[48].mxu1 }
 0x7a9   :  { %v7077_v34 = vadd.f32 %v7076_v25, %v7035_v63  ;;  %v7439_v51 = vpop.f32.mrb[57].mxu0  ;;  %v7078_v52 = vpop.f32.mrb[49].mxu1  ;;  %v7983_v25 = vrot.slane %v7974_v54, %v22387_v40  ;;  %v20589_v54 = vld [vmem:[%s23058_s7 + $0x120] sm:$0xff]  }
 0x7aa   :  { %v7079_v61 = vadd.f32 %v7078_v52, %v7037_v46  ;;  %v7441_v53 = vpop.f32.mrb[58].mxu0  ;;  %v7080_v23 = vpop.f32.mrb[50].mxu1 }
 0x7ab   :  { %v7442_v57 = vpop.f32.mrb[59].mxu0  ;;  %v7081_v59 = vpop.f32.mrb[51].mxu1  ;;  %v22551_v58 = vadd.f32 %v7437_v36, %v7077_v34 }
 0x7ac   :  { %v22553_v62 = vadd.f32 %v7439_v51, %v7079_v61 }
 0x7e8   :  { %v7478_v33 = vpop.f32.mrb[52].mxu1  ;;  %v7924_v9 = vpop.f32.mrb[60].mxu0 }
 0x7e9   :  { %v7479_v60 = vadd.f32 %v7478_v33, %v22551_v58  ;;  %v7480_v42 = vpop.f32.mrb[53].mxu1  ;;  %v7926_v18 = vpop.f32.mrb[61].mxu0  ;;  %v20577_v33 = vld [vmem:[%s23058_s7 + $0x108] sm:$0xff]  }
 0x7ea   :  { %v7481_v63 = vadd.f32 %v7480_v42, %v22553_v62  ;;  %v7482_v46 = vpop.f32.mrb[54].mxu1  ;;  %v7928_v47 = vpop.f32.mrb[62].mxu0  ;;  %v20583_v42 = vld [vmem:[%s23058_s7 + $0x158] sm:$0xff]  }
 0x7eb   :  { %v7483_v49 = vpop.f32.mrb[55].mxu1  ;;  %v7929_v21 = vpop.f32.mrb[63].mxu0  ;;  %v20584_v46 = vld [vmem:[%s23058_s7 + $0x118] sm:$0xff]   ;;  %v20588_v47 = vld [vmem:[%s23058_s7 + $0x160] sm:$0xff]  }
 0x7ec   :  { %v8560_v49 = vld [vmem:[#allocation2] sm:$0xff]  ;;  %v22674_v21 = vld [vmem:[#allocation2 + $0x8] sm:$0xff] }
 0x828   :  { %v7965_v44 = vpop.f32.mrb[56].mxu1 }
 0x829   :  { %v7966_v30 = vadd.f32 %v7965_v44, %v7924_v9  ;;  %v7967_v50 = vpop.f32.mrb[57].mxu1  ;;  %v20581_v9 = vld [vmem:[%s23058_s7 + $0x150] sm:$0xff]   ;;  %v8562_v44 = vpack.c.bf16 %v22674_v21, %v8560_v49  ;;  %v20635_v49 = vld [vmem:[#allocation9 + $0x100] ss:$16 sps:$4 sm:$0xff]  }
 0x82a   :  { %v7968_v36 = vadd.f32 %v7967_v50, %v7926_v18  ;;  %v7969_v34 = vpop.f32.mrb[58].mxu1  ;;  %v20585_v18 = vld [vmem:[#allocation9] ss:$16 sps:$4 sm:$0xff]   ;;  %v20601_v50 = vld [vmem:[#allocation9 + $0x44] ss:$16 sps:$4 sm:$0xff]  }
 0x82b   :  { %v7972_v51 = vadd.f32 %v7966_v30, %v7479_v60  ;;  %v7970_v52 = vpop.f32.mrb[59].mxu1  ;;  %v20582_v60 = vld [vmem:[%s23058_s7 + $0x110] sm:$0xff]   ;;  %v20590_v30 = vld [vmem:[%s23058_s7 + $0x168] sm:$0xff]  }
 0x82c   :  { %v7973_v61 = vadd.f32 %v7968_v36, %v7481_v63  ;;  %v20594_v63 = vld [vmem:[#allocation9 + $0xc] ss:$16 sps:$4 sm:$0xff]   ;;  %v20591_v36 = vld [vmem:[%s23058_s7 + $0x128] sm:$0xff]  }
 0x82d   :  { %v7986_v53 = vadd.f32 %v7979_v39, %v7972_v51  ;;  %v20592_v39 = vld [vmem:[#allocation9 + $0x8] ss:$16 sps:$4 sm:$0xff]   ;;  %v20597_v51 = vld [vmem:[%s23058_s7 + $0x178] sm:$0xff]  }
 0x82e   :  { %v7987_v23 = vadd.f32 %v7983_v25, %v7973_v61  ;;  %v20595_v25 = vld [vmem:[%s23058_s7 + $0x170] sm:$0xff]   ;;  %v20599_v52 = vld [vmem:[#allocation9 + $0x40] ss:$16 sps:$4 sm:$0xff]  }
 0x82f   :  { %vm7988_vm8 = vcmp.ge.f32.partialorder %v7986_v53, 0.0  ;;  %v7990_v57 = vmul.f32 0.01, %v7986_v53  ;;  %v20596_v34 = vld [vmem:[%s23058_s7 + $0x130] sm:$0xff]  }
 0x830   :  { %vm7989_vm9 = vcmp.ge.f32.partialorder %v7987_v23, 0.0  ;;  %v7991_v59 = vmul.f32 0.01, %v7987_v23 }
 0x831   :  { %v7992_v58 = vsel %vm7988_vm8, %v7986_v53, %v7990_v57  ;;  %v20604_v53 = vld [vmem:[#allocation9 + $0x4c] ss:$16 sps:$4 sm:$0xff]  }
 0x832   :  { %v7996_v62 = vrot.slane %v7992_v58, 7  ;;  %v7993_v2 = vsel %vm7989_vm9, %v7987_v23, %v7991_v59  ;;  %v20598_v23 = vld [vmem:[%s23058_s7 + $0x138] sm:$0xff]   ;;  %v8792_v59 = vld [vmem:[#allocation2 + $0x2] sm:$0xff]  ;;  %v8793_v58 = vld [vmem:[#allocation2 + $0xa] sm:$0xff] }
 0x833   :  { %v7997_v3 = vrot.slane %v7993_v2, 7  ;;  %v8794_v2 = vpack.c.bf16 %v8793_v58, %v8792_v59  ;;  %v20646_v58 = vld [vmem:[#allocation12 + $0x40c] ss:$16 sps:$4 sm:$0xff]  }
 0x834   :  { %8000 = vst [vmem:[#allocation5] sm:$0x1e] %v7996_v62 }
 0x835   :  { %8001 = vst [vmem:[#allocation5 + $0x8] sm:$0x1e] %v7997_v3  ;;  %v20602_v3 = vld [vmem:[#allocation9 + $0x48] ss:$16 sps:$4 sm:$0xff]  }
 0x83b   :  { %v8002_v28 = vld [vmem:[#allocation5] sm:$0xf] }
 0x83c   :  { %v8038_v4 = vld [vmem:[#allocation5] sm:$0x1e]  ;;  %v8003_v6 = vld [vmem:[#allocation5 + $0x8] sm:$0xf]  ;;  %v8004_v8 = vpack.c.bf16 %v8002_v28, %v8002_v28 }
 0x83d   :  { %v8039_v7 = vld [vmem:[#allocation5 + $0x8] sm:$0x1e]  ;;  %v8040_v35 = vpack.c.bf16 %v8038_v4, %v8038_v4  ;;  %v8005_v31 = vpack.c.bf16 %v8003_v6, %v8003_v6  ;;  %v8363_v61 = vld [vmem:[#allocation5] sm:$0x3c] }
 0x83e   :  { %v8041_v37 = vpack.c.bf16 %v8039_v7, %v8039_v7  ;;  %v8364_v19 = vld [vmem:[#allocation5 + $0x8] sm:$0x3c]  ;;  %v8365_v57 = vpack.c.bf16 %v8363_v61, %v8363_v61  ;;  %v20607_v28 = vld [vmem:[#allocation9 + $0x64] ss:$16 sps:$4 sm:$0xff]   ;;  %v20605_v4 = vld [vmem:[#allocation9 + $0x60] ss:$16 sps:$4 sm:$0xff]  }
 0x83f   :  { %v8078_v10 = vshll.u32 %v8040_v35, 16  ;;  %8355 = vmatprep.mubr.bf16.mxu1 %v8005_v31  ;;  %v8366_v14 = vpack.c.bf16 %v8364_v19, %v8364_v19  ;;  %v8076_v24 = vshrl.u32 %v8040_v35, 16  ;;  %v20610_v6 = vld [vmem:[#allocation9 + $0x6c] ss:$16 sps:$4 sm:$0xff]   ;;  %v8917_v35 = vld [vmem:[#allocation2 + $0xb] sm:$0xff] }
 0x840   :  { %v8085_v22 = vshll.u32 %v8041_v37, 16  ;;  %8356 = vmatmul.mubr.bf16.vlgmr.msra.gmra.mrb[60].mxu1 %v8004_v8  ;;  %v8083_v12 = vshrl.u32 %v8041_v37, 16  ;;  %v8402_v62 = vrot.slane %v8365_v57, 1  ;;  %v8916_v7 = vld [vmem:[#allocation2 + $0x3] sm:$0xff]  ;;  %v20613_v37 = vld [vmem:[#allocation9 + $0x84] ss:$16 sps:$4 sm:$0xff]  }
 0x841   :  { %v8080_v11 = vrot.slane %v8078_v10, 1  ;;  %8598 = vmatpush1.bf16.msra.mxu1 %v20571_v17  ;;  %8629 = vmatprep.mubr.bf16.mxu1 %v22159_v0  ;;  %v8403_v48 = vrot.slane %v8366_v14, 1  ;;  %v8918_v31 = vpack.c.bf16 %v8917_v35, %v8916_v7  ;;  %v20608_v17 = vld [vmem:[#allocation9 + $0x68] ss:$16 sps:$4 sm:$0xff]   ;;  %v20611_v8 = vld [vmem:[#allocation9 + $0x80] ss:$16 sps:$4 sm:$0xff]  }
 0x842   :  { %v8087_v13 = vrot.slane %v8085_v22, 1  ;;  %8640 = vmatprep.subr.bf16.mxu1 %v20580_v5  ;;  %v20616_v10 = vld [vmem:[#allocation9 + $0x8c] ss:$16 sps:$4 sm:$0xff]   ;;  %v9041_v5 = vld [vmem:[#allocation2 + $0xc] sm:$0xff]  ;;  %v20664_v35 = vld [vmem:[#allocation12 + $0x46c] ss:$16 sps:$4 sm:$0xff]  }
 0x843   :  { %v8081_v45 = vor.u32 %v8080_v11, %v8076_v24  ;;  %v9040_v19 = vld [vmem:[#allocation2 + $0x4] sm:$0xff]  ;;  %v20614_v11 = vld [vmem:[#allocation9 + $0x88] ss:$16 sps:$4 sm:$0xff]   ;;  %v9166_v24 = vpack.c.bf16 %v9165_v55, %v9164_v20 }
 0x844   :  { %v8088_v26 = vor.u32 %v8087_v13, %v8083_v12  ;;  %v9042_v22 = vpack.c.bf16 %v9041_v5, %v9040_v19  ;;  %v20619_v12 = vld [vmem:[#allocation9 + $0xa4] ss:$16 sps:$4 sm:$0xff]   ;;  %v20617_v13 = vld [vmem:[#allocation9 + $0xa0] ss:$16 sps:$4 sm:$0xff]   ;;  %v20622_v14 = vld [vmem:[#allocation9 + $0xac] ss:$16 sps:$4 sm:$0xff]  }
 0x845   :  { %v20670_v19 = vld [vmem:[#allocation12 + $0x48c] ss:$16 sps:$4 sm:$0xff]   ;;  %v20680_v20 = vld [vmem:[#allocation12 + $0x4c8] ss:$16 sps:$4 sm:$0xff]  }
 0x846   :  { %8219 = vmatprep.mubr.bf16.mxu0 %v8088_v26  ;;  %v20620_v26 = vld [vmem:[#allocation9 + $0xa8] ss:$16 sps:$4 sm:$0xff]   ;;  %v20688_v55 = vld [vmem:[#allocation12 + $0x4ec] ss:$16 sps:$4 sm:$0xff]  }
 0x847   :  { %8220 = vmatmul.mubr.bf16.vlgmr.msra.gmra.mrb[64].mxu0 %v8081_v45  ;;  %v20623_v45 = vld [vmem:[#allocation9 + $0xc0] ss:$16 sps:$4 sm:$0xff]  }
 0x848   :  { %18989 = vmatpush3.bf16.msra.mxu0 %v20575_v27  ;;  %8534 = vmatprep.mubr.bf16.mxu0 %v8403_v48  ;;  %v20625_v27 = vld [vmem:[#allocation9 + $0xc4] ss:$16 sps:$4 sm:$0xff]  }
 0x849   :  { %17945 = vmatmul.mubr.msk.bf16.vlgmr.msra.gmra.mrb[64].mxu1 %vm175_vm1, %v8569_v56  ;;  %18990 = vmatprep.subr.bf16.mxu0 %v20576_v29  ;;  %v9288_v29 = vld [vmem:[#allocation2 + $0x6] sm:$0xff]  ;;  %v9289_v48 = vld [vmem:[#allocation2 + $0xe] sm:$0xff] }
 0x84a   :  { %8641 = vmatpush1.bf16.msra.mxu1 %v20578_v43  ;;  %8672 = vmatprep.mubr.bf16.mxu1 %v22159_v0  ;;  %v9290_v43 = vpack.c.bf16 %v9289_v48, %v9288_v29  ;;  %v20706_v29 = vld [vmem:[#allocation12 + $0x54c] ss:$16 sps:$4 sm:$0xff]   ;;  %v20704_v48 = vld [vmem:[#allocation12 + $0x548] ss:$16 sps:$4 sm:$0xff]  }
 0x84b   :  { %8706 = vmatprep.subr.bf16.mxu1 %v20587_v32  ;;  %v20626_v32 = vld [vmem:[#allocation9 + $0xc8] ss:$16 sps:$4 sm:$0xff]  }
 0x84c   :  { %18991 = vmatpush3.bf16.msra.mxu0 %v20577_v33  ;;  %v20631_v33 = vld [vmem:[#allocation9 + $0xe4] ss:$16 sps:$4 sm:$0xff]  }
 0x84d   :  { %18992 = vmatprep.subr.bf16.mxu0 %v20581_v9  ;;  %v20629_v9 = vld [vmem:[#allocation9 + $0xe0] ss:$16 sps:$4 sm:$0xff]  }
 0x850   :  { %18993 = vmatpush3.bf16.msra.mxu0 %v20582_v60  ;;  %v20634_v60 = vld [vmem:[#allocation9 + $0xec] ss:$16 sps:$4 sm:$0xff]  }
 0x851   :  { %17946 = vmatmul.mubr.msk.bf16.vlgmr.msra.gmra.mrb[68].mxu1 %vm175_vm1, %v8569_v56  ;;  %18994 = vmatprep.subr.bf16.mxu0 %v20583_v42  ;;  %v20628_v56 = vld [vmem:[#allocation9 + $0xcc] ss:$16 sps:$4 sm:$0xff]  }
 0x852   :  { %8707 = vmatpush1.bf16.msra.mxu1 %v20585_v18  ;;  %8738 = vmatprep.mubr.bf16.mxu1 %v22159_v0  ;;  %v9412_v42 = vld [vmem:[#allocation2 + $0x7] sm:$0xff]  ;;  %v9413_v18 = vld [vmem:[#allocation2 + $0xf] sm:$0xff] }
 0x853   :  { %8749 = vmatprep.subr.bf16.mxu1 %v20594_v63  ;;  %v9414_v63 = vpack.c.bf16 %v9413_v18, %v9412_v42 }
 0x854   :  { %18995 = vmatpush3.bf16.msra.mxu0 %v20584_v46  ;;  %v20632_v46 = vld [vmem:[#allocation9 + $0xe8] ss:$16 sps:$4 sm:$0xff]  }
 0x855   :  { %18996 = vmatprep.subr.bf16.mxu0 %v20588_v47  ;;  %v20637_v47 = vld [vmem:[#allocation9 + $0x104] ss:$16 sps:$4 sm:$0xff]  }
 0x858   :  { %18997 = vmatpush3.bf16.msra.mxu0 %v20589_v54  ;;  %v20640_v54 = vld [vmem:[#allocation9 + $0x10c] ss:$16 sps:$4 sm:$0xff]  }
 0x859   :  { %17951 = vmatmul.mubr.msk.bf16.vlgmr.msra.gmra.mrb[64].mxu1 %vm175_vm1, %v8562_v44  ;;  %18998 = vmatprep.subr.bf16.mxu0 %v20590_v30 }
 0x85a   :  { %8750 = vmatpush1.bf16.msra.mxu1 %v20592_v39  ;;  %8781 = vmatprep.mubr.bf16.mxu1 %v22159_v0  ;;  %v20638_v39 = vld [vmem:[#allocation9 + $0x108] ss:$16 sps:$4 sm:$0xff]  }
 0x85b   :  { %8822 = vmatprep.subr.bf16.mxu1 %v20601_v50 }
 0x85c   :  { %18999 = vmatpush3.bf16.msra.mxu0 %v20591_v36 }
 0x85d   :  { %19000 = vmatprep.subr.bf16.mxu0 %v20595_v25 }
 0x860   :  { %19001 = vmatpush3.bf16.msra.mxu0 %v20596_v34 }
 0x861   :  { %17952 = vmatmul.mubr.msk.bf16.vlgmr.msra.gmra.mrb[68].mxu1 %vm175_vm1, %v8562_v44  ;;  %19002 = vmatprep.subr.bf16.mxu0 %v20597_v51  ;;  %v9537_v44 = vld [vmem:[#allocation2 + $0x10] sm:$0xff] }
 0x862   :  { %8823 = vmatpush1.bf16.msra.mxu1 %v20599_v52  ;;  %8854 = vmatprep.mubr.bf16.mxu1 %v22159_v0  ;;  %v9538_v30 = vpack.c.bf16 %v9537_v44, %v22674_v21  ;;  %v20644_v21 = vld [vmem:[#allocation12 + $0x408] ss:$16 sps:$4 sm:$0xff]  }
 0x863   :  { %8865 = vmatprep.subr.bf16.mxu1 %v20604_v53 }
 0x864   :  { %19003 = vmatpush3.bf16.msra.mxu0 %v20598_v23 }
 0x867   :  { %8535 = vmatmul.mubr.bf16.vlgmr.msra.gmra.mrb[68].mxu0 %v8402_v62  ;;  %v20652_v62 = vld [vmem:[#allocation12 + $0x42c] ss:$16 sps:$4 sm:$0xff]  }
 0x868   :  { %9762 = vmatprep.mubr.f32.mxu0 %v22160_v1 }
 0x869   :  { %17957 = vmatmul.mubr.msk.bf16.vlgmr.msra.gmra.mrb[64].mxu1 %vm175_vm1, %v8794_v2 }
 0x86a   :  { %8866 = vmatpush1.bf16.msra.mxu1 %v20602_v3  ;;  %8897 = vmatprep.mubr.bf16.mxu1 %v22159_v0 }
 0x86b   :  { %8946 = vmatprep.subr.bf16.mxu1 %v20607_v28  ;;  %v20656_v28 = vld [vmem:[#allocation12 + $0x448] ss:$16 sps:$4 sm:$0xff]  }
 0x871   :  { %17958 = vmatmul.mubr.msk.bf16.vlgmr.msra.gmra.mrb[68].mxu1 %vm175_vm1, %v8794_v2  ;;  %v20650_v2 = vld [vmem:[#allocation12 + $0x428] ss:$16 sps:$4 sm:$0xff]  }
 0x872   :  { %8947 = vmatpush1.bf16.msra.mxu1 %v20605_v4  ;;  %8978 = vmatprep.mubr.bf16.mxu1 %v22159_v0 }
 0x873   :  { %8989 = vmatprep.subr.bf16.mxu1 %v20610_v6 }
 0x879   :  { %17963 = vmatmul.mubr.msk.bf16.vlgmr.msra.gmra.mrb[64].mxu1 %vm175_vm1, %v8918_v31 }
 0x87a   :  { %8990 = vmatpush1.bf16.msra.mxu1 %v20608_v17  ;;  %9021 = vmatprep.mubr.bf16.mxu1 %v22159_v0 }
 0x87b   :  { %9070 = vmatprep.subr.bf16.mxu1 %v20613_v37 }
 0x881   :  { %17964 = vmatmul.mubr.msk.bf16.vlgmr.msra.gmra.mrb[68].mxu1 %vm175_vm1, %v8918_v31  ;;  %v17940_v31 = vld [vmem:[#allocation18] ss:$0 sm:$0xff] }
 0x882   :  { %9071 = vmatpush1.bf16.msra.mxu1 %v20611_v8  ;;  %9102 = vmatprep.mubr.bf16.mxu1 %v22159_v0  ;;  %v20662_v8 = vld [vmem:[#allocation12 + $0x468] ss:$16 sps:$4 sm:$0xff]  }
 0x883   :  { %9113 = vmatprep.subr.bf16.mxu1 %v20616_v10 }
 0x889   :  { %17969 = vmatmul.mubr.msk.bf16.vlgmr.msra.gmra.mrb[64].mxu1 %vm175_vm1, %v9042_v22 }
 0x88a   :  { %9114 = vmatpush1.bf16.msra.mxu1 %v20614_v11  ;;  %9145 = vmatprep.mubr.bf16.mxu1 %v22159_v0 }
 0x88b   :  { %9194 = vmatprep.subr.bf16.mxu1 %v20619_v12  ;;  %v20676_v12 = vld [vmem:[#allocation12 + $0x4ac] ss:$16 sps:$4 sm:$0xff]  }
 0x891   :  { %17970 = vmatmul.mubr.msk.bf16.vlgmr.msra.gmra.mrb[68].mxu1 %vm175_vm1, %v9042_v22  ;;  %v20668_v22 = vld [vmem:[#allocation12 + $0x488] ss:$16 sps:$4 sm:$0xff]  }
 0x892   :  { %9195 = vmatpush1.bf16.msra.mxu1 %v20617_v13  ;;  %9226 = vmatprep.mubr.bf16.mxu1 %v22159_v0  ;;  %v20674_v13 = vld [vmem:[#allocation12 + $0x4a8] ss:$16 sps:$4 sm:$0xff]  }
 0x893   :  { %9237 = vmatprep.subr.bf16.mxu1 %v20622_v14  ;;  %v20682_v14 = vld [vmem:[#allocation12 + $0x4cc] ss:$16 sps:$4 sm:$0xff]  }
 0x899   :  { %17975 = vmatmul.mubr.msk.bf16.vlgmr.msra.gmra.mrb[64].mxu1 %vm175_vm1, %v9166_v24 }
 0x89a   :  { %9238 = vmatpush1.bf16.msra.mxu1 %v20620_v26  ;;  %9269 = vmatprep.mubr.bf16.mxu1 %v22159_v0  ;;  %v20694_v26 = vld [vmem:[#allocation12 + $0x50c] ss:$16 sps:$4 sm:$0xff]  }
 0x89b   :  { %9318 = vmatprep.subr.bf16.mxu1 %v20625_v27  ;;  %v20692_v27 = vld [vmem:[#allocation12 + $0x508] ss:$16 sps:$4 sm:$0xff]  }
 0x8a1   :  { %17976 = vmatmul.mubr.msk.bf16.vlgmr.msra.gmra.mrb[68].mxu1 %vm175_vm1, %v9166_v24  ;;  %v20686_v24 = vld [vmem:[#allocation12 + $0x4e8] ss:$16 sps:$4 sm:$0xff]  }
 0x8a2   :  { %9319 = vmatpush1.bf16.msra.mxu1 %v20623_v45  ;;  %9350 = vmatprep.mubr.bf16.mxu1 %v22159_v0  ;;  %v20700_v45 = vld [vmem:[#allocation12 + $0x52c] ss:$16 sps:$4 sm:$0xff]  }
 0x8a3   :  { %9361 = vmatprep.subr.bf16.mxu1 %v20628_v56  ;;  %v20698_v56 = vld [vmem:[#allocation12 + $0x528] ss:$16 sps:$4 sm:$0xff]  }
 0x8a9   :  { %17981 = vmatmul.mubr.msk.bf16.vlgmr.msra.gmra.mrb[64].mxu1 %vm175_vm1, %v9290_v43 }
 0x8aa   :  { %9362 = vmatpush1.bf16.msra.mxu1 %v20626_v32  ;;  %9393 = vmatprep.mubr.bf16.mxu1 %v22159_v0 }
 0x8ab   :  { %9442 = vmatprep.subr.bf16.mxu1 %v20631_v33 }
 0x8b1   :  { %17982 = vmatmul.mubr.msk.bf16.vlgmr.msra.gmra.mrb[68].mxu1 %vm175_vm1, %v9290_v43  ;;  %v9660_v43 = vld [vmem:[#allocation11] sm:$0xf] }
 0x8b2   :  { %9443 = vmatpush1.bf16.msra.mxu1 %v20629_v9  ;;  %9474 = vmatprep.mubr.bf16.mxu1 %v22159_v0  ;;  %v9665_v32 = vrot.slane %v9660_v43, %v22385_v38  ;;  %v9669_v33 = vrot.slane %v9660_v43, %v22387_v40 }
 0x8b3   :  { %9485 = vmatprep.subr.bf16.mxu1 %v20634_v60 }
 0x8b9   :  { %17987 = vmatmul.mubr.msk.bf16.vlgmr.msra.gmra.mrb[64].mxu1 %vm175_vm1, %v9414_v63 }
 0x8ba   :  { %9486 = vmatpush1.bf16.msra.mxu1 %v20632_v46  ;;  %9517 = vmatprep.mubr.bf16.mxu1 %v22159_v0 }
 0x8bb   :  { %9566 = vmatprep.subr.bf16.mxu1 %v20637_v47 }
 0x8c1   :  { %17988 = vmatmul.mubr.msk.bf16.vlgmr.msra.gmra.mrb[68].mxu1 %vm175_vm1, %v9414_v63 }
 0x8c2   :  { %9567 = vmatpush1.bf16.msra.mxu1 %v20635_v49  ;;  %9598 = vmatprep.mubr.bf16.mxu1 %v22159_v0 }
 0x8c3   :  { %9609 = vmatprep.subr.bf16.mxu1 %v20640_v54 }
 0x8c9   :  { %17993 = vmatmul.mubr.msk.bf16.vlgmr.msra.gmra.mrb[64].mxu1 %vm175_vm1, %v9538_v30 }
 0x8ca   :  { %9610 = vmatpush1.bf16.msra.mxu1 %v20638_v39  ;;  %9641 = vmatprep.mubr.bf16.mxu1 %v22159_v0  ;;  %v20658_v0 = vld [vmem:[#allocation12 + $0x44c] ss:$16 sps:$4 sm:$0xff]  }
 0x8cb   :  { %10890 = vmatprep.subr.bf16.mxu1 %v20646_v58 }
 0x8d1   :  { %17994 = vmatmul.mubr.msk.bf16.vlgmr.msra.gmra.mrb[68].mxu1 %vm175_vm1, %v9538_v30  ;;  %v9673_v30 = vrot.slane %v9660_v43, %v22375_v15 }
 0x8d2   :  { %10891 = vmatpush1.bf16.msra.mxu1 %v20644_v21 }
 0x8d3   :  { %10892 = vmatprep.subr.bf16.mxu1 %v20652_v62 }
 0x8d6   :  { %10893 = vmatpush1.bf16.msra.mxu1 %v20650_v2 }
 0x8d7   :  { %10894 = vmatprep.subr.bf16.mxu1 %v20658_v0 }
 0x8da   :  { %10895 = vmatpush1.bf16.msra.mxu1 %v20656_v28 }
 0x8db   :  { %10896 = vmatprep.subr.bf16.mxu1 %v20664_v35  ;;  %v20647_v35 = vld [vmem:[#allocation12 + $0x420] ss:$16 sps:$4 sm:$0xff]  }
 0x8de   :  { %10897 = vmatpush1.bf16.msra.mxu1 %v20662_v8  ;;  %v20659_v8 = vld [vmem:[#allocation12 + $0x460] ss:$16 sps:$4 sm:$0xff]  }
 0x8df   :  { %10898 = vmatprep.subr.bf16.mxu1 %v20670_v19  ;;  %v20665_v19 = vld [vmem:[#allocation12 + $0x480] ss:$16 sps:$4 sm:$0xff]  }
 0x8e2   :  { %10899 = vmatpush1.bf16.msra.mxu1 %v20668_v22  ;;  %v20671_v22 = vld [vmem:[#allocation12 + $0x4a0] ss:$16 sps:$4 sm:$0xff]  }
 0x8e3   :  { %10900 = vmatprep.subr.bf16.mxu1 %v20676_v12  ;;  %v20677_v12 = vld [vmem:[#allocation12 + $0x4c0] ss:$16 sps:$4 sm:$0xff]  }
 0x8e6   :  { %10901 = vmatpush1.bf16.msra.mxu1 %v20674_v13  ;;  %v20685_v13 = vld [vmem:[#allocation12 + $0x4e4] ss:$16 sps:$4 sm:$0xff]  }
 0x8e7   :  { %10902 = vmatprep.subr.bf16.mxu1 %v20682_v14  ;;  %v20683_v14 = vld [vmem:[#allocation12 + $0x4e0] ss:$16 sps:$4 sm:$0xff]  }
 0x8ea   :  { %10903 = vmatpush1.bf16.msra.mxu1 %v20680_v20  ;;  %v20691_v20 = vld [vmem:[#allocation12 + $0x504] ss:$16 sps:$4 sm:$0xff]  }
 0x8eb   :  { %10904 = vmatprep.subr.bf16.mxu1 %v20688_v55  ;;  %v20689_v55 = vld [vmem:[#allocation12 + $0x500] ss:$16 sps:$4 sm:$0xff]  }
 0x8ee   :  { %10905 = vmatpush1.bf16.msra.mxu1 %v20686_v24  ;;  %v20697_v24 = vld [vmem:[#allocation12 + $0x524] ss:$16 sps:$4 sm:$0xff]  }
 0x8ef   :  { %10906 = vmatprep.subr.bf16.mxu1 %v20694_v26  ;;  %v20695_v26 = vld [vmem:[#allocation12 + $0x520] ss:$16 sps:$4 sm:$0xff]  }
 0x8f2   :  { %10907 = vmatpush1.bf16.msra.mxu1 %v20692_v27  ;;  %v20703_v27 = vld [vmem:[#allocation12 + $0x544] ss:$16 sps:$4 sm:$0xff]  }
 0x8f3   :  { %10908 = vmatprep.subr.bf16.mxu1 %v20700_v45  ;;  %v20701_v45 = vld [vmem:[#allocation12 + $0x540] ss:$16 sps:$4 sm:$0xff]  }
 0x8f6   :  { %10909 = vmatpush1.bf16.msra.mxu1 %v20698_v56  ;;  %v20707_v56 = vld [vmem:[#allocation12 + $0x560] ss:$16 sps:$4 sm:$0xff]  }
 0x8f7   :  { %10910 = vmatprep.subr.bf16.mxu1 %v20706_v29  ;;  %v20709_v29 = vld [vmem:[#allocation12 + $0x564] ss:$16 sps:$4 sm:$0xff]  }
 0x8fa   :  { %10911 = vmatpush1.bf16.msra.mxu1 %v20704_v48  ;;  %v20710_v48 = vld [vmem:[#allocation12 + $0x568] ss:$16 sps:$4 sm:$0xff]  }
 0x913   :  { %v18982_v50 = vpop.f32.mrb[60].mxu1 }
 0x914   :  { %v18983_v36 = vpop.f32.mrb[61].mxu1 }
 0x915   :  { %v18984_v25 = vadd.f32 %v18983_v36, %v18982_v50  ;;  %v18985_v34 = vpop.f32.mrb[62].mxu1  ;;  %v9677_v36 = vrot.slane %v9660_v43, %v22377_v16  ;;  %v20712_v43 = vld [vmem:[#allocation12 + $0x56c] ss:$16 sps:$4 sm:$0xff]  }
 0x916   :  { %v18986_v51 = vpop.f32.mrb[63].mxu1  ;;  %10912 = vmatprep.subr.bf16.mxu1 %v20712_v43  ;;  %v20752_v43 = vld [vmem:[#allocation12 + $0x40] ss:$16 sps:$4 sm:$0xff]  }
 0x917   :  { %10913 = vmatpush1.bf16.msra.mxu1 %v20710_v48  ;;  %v20749_v48 = vld [vmem:[#allocation12 + $0x640] ss:$16 sps:$4 sm:$0xff]  }
 0x91a   :  { %v18960_v52 = vpop.f32.mrb[64].mxu0 }
 0x91b   :  { %v18961_v61 = vpop.f32.mrb[65].mxu0 }
 0x91c   :  { %v18962_v53 = vadd.f32 %v18961_v61, %v18960_v52  ;;  %v18963_v23 = vpop.f32.mrb[66].mxu0 }
 0x91d   :  { %v18964_v57 = vpop.f32.mrb[67].mxu0 }
 0x91e   :  { %v8358_v59 = vadd.f32 %v18984_v25, %v18962_v53 }
 0x93a   :  { %v19004_v3 = vpop.f32.mrb[68].mxu0 }
 0x93b   :  { %v19005_v4 = vpop.f32.mrb[69].mxu0 }
 0x93c   :  { %v19006_v6 = vadd.f32 %v19005_v4, %v19004_v3  ;;  %v19007_v7 = vpop.f32.mrb[70].mxu0  ;;  %v20643_v4 = vld [vmem:[#allocation12 + $0x404] ss:$16 sps:$4 sm:$0xff]  }
 0x93d   :  { %v19008_v17 = vpop.f32.mrb[71].mxu0  ;;  %v20649_v7 = vld [vmem:[#allocation12 + $0x424] ss:$16 sps:$4 sm:$0xff]  }
 0x93e   :  { %v8542_v37 = vadd.f32 %v19006_v6, %v8358_v59  ;;  %v20641_v6 = vld [vmem:[#allocation12 + $0x400] ss:$16 sps:$4 sm:$0xff]  }
 0x93f   :  { %v20653_v17 = vld [vmem:[#allocation12 + $0x440] ss:$16 sps:$4 sm:$0xff]  }
 0x940   :  { %v8550_v10 = vadd.f32 %v17940_v31, %v8542_v37  ;;  %v20655_v31 = vld [vmem:[#allocation12 + $0x444] ss:$16 sps:$4 sm:$0xff]  }
 0x941   :  { %v20661_v37 = vld [vmem:[#allocation12 + $0x464] ss:$16 sps:$4 sm:$0xff]  }
 0x942   :  { %vm8551_vm10 = vcmp.ge.f32.partialorder %v8550_v10, 0.0  ;;  %v8552_v5 = vmul.f32 0.01, %v8550_v10 }
 0x944   :  { %v8553_v11 = vsel %vm8551_vm10, %v8550_v10, %v8552_v5  ;;  %v20667_v10 = vld [vmem:[#allocation12 + $0x484] ss:$16 sps:$4 sm:$0xff]  }
 0x945   :  { %8554 = vst.msk [vmem:[#allocation20] sm:$0xf] %vm135_vm0, %v8553_v11  ;;  %v20673_v5 = vld [vmem:[#allocation12 + $0x4a4] ss:$16 sps:$4 sm:$0xff]  }
 0x946   :  { %v20679_v11 = vld [vmem:[#allocation12 + $0x4c4] ss:$16 sps:$4 sm:$0xff]  }
 0x99c   :  { %v9600_v9 = vpop.f32.mrb[64].mxu1 }
 0x99d   :  { %v9682_v60 = vadd.f32 %v9665_v32, %v9600_v9  ;;  %v9602_v42 = vpop.f32.mrb[65].mxu1  ;;  %v20713_v9 = vld [vmem:[#allocation12 + $0x580] ss:$16 sps:$4 sm:$0xff]  }
 0x99e   :  { %v9683_v18 = vadd.f32 %v9669_v33, %v9602_v42  ;;  %v9604_v63 = vpop.f32.mrb[66].mxu1  ;;  %v20721_v42 = vld [vmem:[#allocation12 + $0x5a4] ss:$16 sps:$4 sm:$0xff]  }
 0x99f   :  { %v9686_v46 = vadd.f32 %v9665_v32, %v9604_v63  ;;  %v9606_v47 = vpop.f32.mrb[67].mxu1  ;;  %v9690_v54 = vmax.f32 %v9682_v60, 0.0  ;;  %v20715_v32 = vld [vmem:[#allocation12 + $0x584] ss:$16 sps:$4 sm:$0xff]   ;;  %v20716_v60 = vld [vmem:[#allocation12 + $0x588] ss:$16 sps:$4 sm:$0xff]  }
 0x9a0   :  { %v9687_v49 = vadd.f32 %v9669_v33, %v9606_v47  ;;  %v9691_v39 = vmax.f32 %v9683_v18, 0.0  ;;  %v20718_v33 = vld [vmem:[#allocation12 + $0x58c] ss:$16 sps:$4 sm:$0xff]   ;;  %v20719_v63 = vld [vmem:[#allocation12 + $0x5a0] ss:$16 sps:$4 sm:$0xff]  }
 0x9a1   :  { %v9694_v44 = vmax.f32 %v9686_v46, 0.0  ;;  %10914 = vmatprep.subr.bf16.mxu1 %v20718_v33  ;;  %v20724_v18 = vld [vmem:[#allocation12 + $0x5ac] ss:$16 sps:$4 sm:$0xff]   ;;  %v20722_v46 = vld [vmem:[#allocation12 + $0x5a8] ss:$16 sps:$4 sm:$0xff]  }
 0x9a2   :  { %v9695_v50 = vmax.f32 %v9687_v49, 0.0  ;;  %10915 = vmatpush1.bf16.msra.mxu1 %v20716_v60  ;;  %v20727_v47 = vld [vmem:[#allocation12 + $0x5c4] ss:$16 sps:$4 sm:$0xff]   ;;  %v20730_v49 = vld [vmem:[#allocation12 + $0x5cc] ss:$16 sps:$4 sm:$0xff]  }
 0x9a3   :  { %v19086_v25 = vpack.c.bf16 %v9694_v44, %v9690_v54  ;;  %10916 = vmatprep.subr.bf16.mxu1 %v20724_v18  ;;  %v20725_v54 = vld [vmem:[#allocation12 + $0x5c0] ss:$16 sps:$4 sm:$0xff]   ;;  %v20728_v44 = vld [vmem:[#allocation12 + $0x5c8] ss:$16 sps:$4 sm:$0xff]   ;;  %v20757_v33 = vld [vmem:[#allocation12 + $0x664] ss:$16 sps:$4 sm:$0xff]  }
 0x9a4   :  { %v19084_v34 = vpack.c.bf16 %v9695_v50, %v9691_v39  ;;  %v9643_v51 = vpop.f32.mrb[68].mxu1  ;;  %v20736_v39 = vld [vmem:[#allocation12 + $0x5ec] ss:$16 sps:$4 sm:$0xff]   ;;  %v20731_v50 = vld [vmem:[#allocation12 + $0x5e0] ss:$16 sps:$4 sm:$0xff]  }
 0x9a5   :  { %v9684_v52 = vadd.f32 %v9673_v30, %v9643_v51  ;;  %v9645_v61 = vpop.f32.mrb[69].mxu1  ;;  %v20755_v60 = vld [vmem:[#allocation12 + $0x660] ss:$16 sps:$4 sm:$0xff]   ;;  %v20763_v18 = vld [vmem:[#allocation12 + $0x684] ss:$16 sps:$4 sm:$0xff]  }
 0x9a6   :  { %v9685_v53 = vadd.f32 %v9677_v36, %v9645_v61  ;;  %v9647_v23 = vpop.f32.mrb[70].mxu1  ;;  %19085 = vmatprep.subr.bf16.mxu0 %v19084_v34  ;;  %10917 = vmatpush1.bf16.msra.mxu1 %v20722_v46  ;;  %v20742_v34 = vld [vmem:[#allocation12 + $0x4] ss:$16 sps:$4 sm:$0xff]   ;;  %v20761_v46 = vld [vmem:[#allocation12 + $0x680] ss:$16 sps:$4 sm:$0xff]  }
 0x9a7   :  { %v9688_v57 = vadd.f32 %v9673_v30, %v9647_v23  ;;  %v9649_v59 = vpop.f32.mrb[71].mxu1  ;;  %19087 = vmatpush1.bf16.msra.mxu0 %v19086_v25  ;;  %v9692_v58 = vmax.f32 %v9684_v52, 0.0  ;;  %v20733_v30 = vld [vmem:[#allocation12 + $0x5e4] ss:$16 sps:$4 sm:$0xff]   ;;  %10918 = vmatprep.subr.bf16.mxu1 %v20730_v49 }
 0x9a8   :  { %v9689_v21 = vadd.f32 %v9677_v36, %v9649_v59  ;;  %v9693_v2 = vmax.f32 %v9685_v53, 0.0  ;;  %v20734_v36 = vld [vmem:[#allocation12 + $0x5e8] ss:$16 sps:$4 sm:$0xff]   ;;  %v20739_v25 = vld [vmem:[#allocation12 + $0x604] ss:$16 sps:$4 sm:$0xff]  }
 0x9a9   :  { %v9696_v62 = vmax.f32 %v9688_v57, 0.0  ;;  %v20769_v49 = vld [vmem:[#allocation12 + $0x6a4] ss:$16 sps:$4 sm:$0xff]  }
 0x9aa   :  { %v9697_v0 = vmax.f32 %v9689_v21, 0.0  ;;  %17995 = vmatmul.mubr.msk.f32.vlgmr.msra.gmra.mrb[72].mxu0 %vm175_vm1, %v22392_v41  ;;  %10919 = vmatpush1.bf16.msra.mxu1 %v20728_v44  ;;  %v20767_v44 = vld [vmem:[#allocation12 + $0x6a0] ss:$16 sps:$4 sm:$0xff]  }
 0x9ab   :  { %v19090_v3 = vpack.c.bf16 %v9696_v62, %v9692_v58  ;;  %9833 = vmatprep.mubr.f32.mxu0 %v22160_v1  ;;  %10920 = vmatprep.subr.bf16.mxu1 %v20736_v39  ;;  %v20775_v39 = vld [vmem:[#allocation12 + $0x6c4] ss:$16 sps:$4 sm:$0xff]  }
 0x9ac   :  { %v19088_v28 = vpack.c.bf16 %v9697_v0, %v9693_v2 }
 0x9ae   :  { %19089 = vmatprep.subr.bf16.mxu0 %v19088_v28  ;;  %10921 = vmatpush1.bf16.msra.mxu1 %v20734_v36  ;;  %v20773_v36 = vld [vmem:[#allocation12 + $0x6c0] ss:$16 sps:$4 sm:$0xff]  }
 0x9af   :  { %19091 = vmatpush1.bf16.msra.mxu0 %v19090_v3  ;;  %11612 = vmatprep.subr.bf16.mxu1 %v20742_v34  ;;  %v20781_v34 = vld [vmem:[#allocation12 + $0x6e4] ss:$16 sps:$4 sm:$0xff]  }
 0x9b0   :  { %10808 = vmatprep.subr.bf16.mxu0 %v20643_v4 }
 0x9b2   :  { %17996 = vmatmul.mubr.msk.f32.vlgmr.msra.gmra.mrb[74].mxu0 %vm175_vm1, %v22392_v41 }
 0x9b3   :  { %10809 = vmatpush1.bf16.msra.mxu0 %v20641_v6 }
 0x9b4   :  { %10810 = vmatprep.subr.bf16.mxu0 %v20649_v7 }
 0x9b7   :  { %10811 = vmatpush1.bf16.msra.mxu0 %v20647_v35 }
 0x9b8   :  { %10812 = vmatprep.subr.bf16.mxu0 %v20655_v31 }
 0x9bb   :  { %10813 = vmatpush1.bf16.msra.mxu0 %v20653_v17 }
 0x9bc   :  { %10814 = vmatprep.subr.bf16.mxu0 %v20661_v37 }
 0x9bf   :  { %10815 = vmatpush1.bf16.msra.mxu0 %v20659_v8  ;;  %v20737_v8 = vld [vmem:[#allocation12 + $0x600] ss:$16 sps:$4 sm:$0xff]  }
 0x9c0   :  { %10816 = vmatprep.subr.bf16.mxu0 %v20667_v10  ;;  %v20740_v10 = vld [vmem:[#allocation12] ss:$16 sps:$4 sm:$0xff]  }
 0x9c3   :  { %10817 = vmatpush1.bf16.msra.mxu0 %v20665_v19 }
 0x9c4   :  { %10818 = vmatprep.subr.bf16.mxu0 %v20673_v5 }
 0x9c7   :  { %10819 = vmatpush1.bf16.msra.mxu0 %v20671_v22  ;;  %v20745_v22 = vld [vmem:[#allocation12 + $0x624] ss:$16 sps:$4 sm:$0xff]  }
 0x9c8   :  { %10820 = vmatprep.subr.bf16.mxu0 %v20679_v11 }
 0x9cb   :  { %10821 = vmatpush1.bf16.msra.mxu0 %v20677_v12 }
 0x9cc   :  { %10822 = vmatprep.subr.bf16.mxu0 %v20685_v13  ;;  %v20748_v13 = vld [vmem:[#allocation12 + $0x24] ss:$16 sps:$4 sm:$0xff]  }
 0x9cf   :  { %10823 = vmatpush1.bf16.msra.mxu0 %v20683_v14 }
 0x9d0   :  { %10824 = vmatprep.subr.bf16.mxu0 %v20691_v20 }
 0x9d3   :  { %10825 = vmatpush1.bf16.msra.mxu0 %v20689_v55  ;;  %v20743_v55 = vld [vmem:[#allocation12 + $0x620] ss:$16 sps:$4 sm:$0xff]  }
 0x9d4   :  { %10826 = vmatprep.subr.bf16.mxu0 %v20697_v24  ;;  %v20746_v24 = vld [vmem:[#allocation12 + $0x20] ss:$16 sps:$4 sm:$0xff]  }
 0x9d7   :  { %10827 = vmatpush1.bf16.msra.mxu0 %v20695_v26 }
 0x9d8   :  { %10828 = vmatprep.subr.bf16.mxu0 %v20703_v27 }
 0x9db   :  { %10829 = vmatpush1.bf16.msra.mxu0 %v20701_v45  ;;  %v20751_v45 = vld [vmem:[#allocation12 + $0x644] ss:$16 sps:$4 sm:$0xff]  }
 0x9dc   :  { %10830 = vmatprep.subr.bf16.mxu0 %v20709_v29 }
 0x9df   :  { %10831 = vmatpush1.bf16.msra.mxu0 %v20707_v56  ;;  %v20754_v56 = vld [vmem:[#allocation12 + $0x44] ss:$16 sps:$4 sm:$0xff]  }
 0x9e0   :  { %10832 = vmatprep.subr.bf16.mxu0 %v20715_v32 }
 0x9e3   :  { %10833 = vmatpush1.bf16.msra.mxu0 %v20713_v9  ;;  %v20760_v9 = vld [vmem:[#allocation12 + $0x64] ss:$16 sps:$4 sm:$0xff]  }
 0x9e4   :  { %10834 = vmatprep.subr.bf16.mxu0 %v20721_v42  ;;  %v20758_v42 = vld [vmem:[#allocation12 + $0x60] ss:$16 sps:$4 sm:$0xff]  }
 0x9e7   :  { %10835 = vmatpush1.bf16.msra.mxu0 %v20719_v63  ;;  %v20766_v63 = vld [vmem:[#allocation12 + $0x84] ss:$16 sps:$4 sm:$0xff]  }
 0x9e8   :  { %10836 = vmatprep.subr.bf16.mxu0 %v20727_v47  ;;  %v20764_v47 = vld [vmem:[#allocation12 + $0x80] ss:$16 sps:$4 sm:$0xff]  }
 0x9eb   :  { %10837 = vmatpush1.bf16.msra.mxu0 %v20725_v54  ;;  %v20772_v54 = vld [vmem:[#allocation12 + $0xa4] ss:$16 sps:$4 sm:$0xff]  }
 0x9ec   :  { %10838 = vmatprep.subr.bf16.mxu0 %v20733_v30  ;;  %v20770_v30 = vld [vmem:[#allocation12 + $0xa0] ss:$16 sps:$4 sm:$0xff]  }
 0x9ef   :  { %10839 = vmatpush1.bf16.msra.mxu0 %v20731_v50  ;;  %v20778_v50 = vld [vmem:[#allocation12 + $0xc4] ss:$16 sps:$4 sm:$0xff]  }
 0x9f0   :  { %10849 = vmatprep.subr.bf16.mxu0 %v20739_v25  ;;  %v20776_v25 = vld [vmem:[#allocation12 + $0xc0] ss:$16 sps:$4 sm:$0xff]  }
 0xa7d   :  { %v9764_v51 = vpop.f32.mrb[72].mxu0 }
 0xa7e   :  { %v9844_v52 = vrot.slane %v9764_v51, 6  ;;  %v9766_v61 = vpop.f32.mrb[73].mxu0  ;;  %v20784_v51 = vld [vmem:[#allocation12 + $0xe4] ss:$16 sps:$4 sm:$0xff]  }
 0xa7f   :  { %v9845_v53 = vrot.slane %v9766_v61, 6  ;;  %v20782_v61 = vld [vmem:[#allocation12 + $0xe0] ss:$16 sps:$4 sm:$0xff]  }
 0xa80   :  { %9852 = vst [vmem:[#allocation3] sm:$0xfc] %v9844_v52  ;;  %9856 = vst [vmem:[#allocation3 + $0x20] sm:$0x3] %v9844_v52  ;;  %v20779_v52 = vld [vmem:[#allocation12 + $0x6e0] ss:$16 sps:$4 sm:$0xff]  }
 0xa81   :  { %9853 = vst [vmem:[#allocation3 + $0x8] sm:$0xfc] %v9845_v53  ;;  %9857 = vst [vmem:[#allocation3 + $0x28] sm:$0x3] %v9845_v53  ;;  %v20787_v53 = vld [vmem:[#allocation12 + $0x704] ss:$16 sps:$4 sm:$0xff]  }
 0xa85   :  { %v9835_v23 = vpop.f32.mrb[74].mxu0 }
 0xa86   :  { %v9846_v57 = vrot.slane %v9835_v23, 6  ;;  %v9837_v59 = vpop.f32.mrb[75].mxu0  ;;  %v20790_v23 = vld [vmem:[#allocation12 + $0x104] ss:$16 sps:$4 sm:$0xff]  }
 0xa87   :  { %v9996_v21 = vld [vmem:[#allocation3] sm:$0xfe]  ;;  %v10000_v58 = vld [vmem:[#allocation3 + $0x20] sm:$0x1]  ;;  %v9847_v62 = vrot.slane %v9837_v59, 6 }
 0xa88   :  { %v9997_v2 = vld [vmem:[#allocation3 + $0x8] sm:$0xfe]  ;;  %v10001_v0 = vld [vmem:[#allocation3 + $0x28] sm:$0x1]  ;;  %v10004_v3 = vpack.c.bf16 %v10000_v58, %v9996_v21  ;;  %9854 = vst [vmem:[#allocation3 + $0x10] sm:$0xfc] %v9846_v57 }
 0xa89   :  { %9858 = vst [vmem:[#allocation3 + $0x30] sm:$0x3] %v9846_v57  ;;  %v10005_v28 = vpack.c.bf16 %v10001_v0, %v9997_v2  ;;  %9855 = vst [vmem:[#allocation3 + $0x18] sm:$0xfc] %v9847_v62  ;;  %v9861_v19 = vld [vmem:[#allocation3 + $0x8] sm:$0xff] }
 0xa8a   :  { %9859 = vst [vmem:[#allocation3 + $0x38] sm:$0x3] %v9847_v62  ;;  %v10139_v4 = vshll.u32 %v10004_v3, 16  ;;  %v10137_v17 = vshrl.u32 %v10004_v3, 16  ;;  %v22741_v20 = vpack.c.bf16 %v9861_v19, %v9861_v19  ;;  %v20785_v57 = vld [vmem:[#allocation12 + $0x700] ss:$16 sps:$4 sm:$0xff]  }
 0xa8b   :  { %v10146_v6 = vshll.u32 %v10005_v28, 16  ;;  %v10144_v35 = vshrl.u32 %v10005_v28, 16  ;;  %v20788_v59 = vld [vmem:[#allocation12 + $0x100] ss:$16 sps:$4 sm:$0xff]   ;;  %v20793_v21 = vld [vmem:[#allocation12 + $0x724] ss:$16 sps:$4 sm:$0xff]  }
 0xa8c   :  { %v10141_v7 = vrot.slane %v10139_v4, 1  ;;  %v20796_v58 = vld [vmem:[#allocation12 + $0x124] ss:$16 sps:$4 sm:$0xff]   ;;  %v20791_v62 = vld [vmem:[#allocation12 + $0x720] ss:$16 sps:$4 sm:$0xff]  }
 0xa8d   :  { %v10148_v31 = vrot.slane %v10146_v6, 1  ;;  %v20794_v2 = vld [vmem:[#allocation12 + $0x120] ss:$16 sps:$4 sm:$0xff]   ;;  %v20799_v0 = vld [vmem:[#allocation12 + $0x744] ss:$16 sps:$4 sm:$0xff]  }
 0xa8e   :  { %v10142_v5 = vor.u32 %v10141_v7, %v10137_v17  ;;  %v20802_v3 = vld [vmem:[#allocation12 + $0x144] ss:$16 sps:$4 sm:$0xff]   ;;  %v20797_v28 = vld [vmem:[#allocation12 + $0x740] ss:$16 sps:$4 sm:$0xff]  }
 0xa8f   :  { %v10149_v37 = vor.u32 %v10148_v31, %v10144_v35  ;;  %v20800_v4 = vld [vmem:[#allocation12 + $0x140] ss:$16 sps:$4 sm:$0xff]   ;;  %v20805_v6 = vld [vmem:[#allocation12 + $0x764] ss:$16 sps:$4 sm:$0xff]  }
 0xa90   :  { %v9999_v11 = vld [vmem:[#allocation3 + $0x18] sm:$0xfe]  ;;  %v20803_v35 = vld [vmem:[#allocation12 + $0x760] ss:$16 sps:$4 sm:$0xff]  }
 0xa91   :  { %v10003_v12 = vld [vmem:[#allocation3 + $0x38] sm:$0x1]  ;;  %10840 = vmatprep.mubr.bf16.mxu0 %v10149_v37  ;;  %10922 = vmatprep.mubr.bf16.mxu1 %v10149_v37  ;;  %v20806_v31 = vld [vmem:[#allocation12 + $0x160] ss:$16 sps:$4 sm:$0xff]  }
 0xa92   :  { %v10007_v14 = vpack.c.bf16 %v10003_v12, %v9999_v11  ;;  %10841 = vmatmul.mubr.bf16.vlgmr.msra.gmra.mrb[76].mxu0 %v10142_v5  ;;  %10923 = vmatmul.mubr.bf16.vlgmr.msra.gmra.mrb[72].mxu1 %v10142_v5  ;;  %v20808_v7 = vld [vmem:[#allocation12 + $0x164] ss:$16 sps:$4 sm:$0xff]   ;;  %v10002_v11 = vld [vmem:[#allocation3 + $0x30] sm:$0x1]  ;;  %v20815_v12 = vld [vmem:[#allocation12 + $0x7a0] ss:$16 sps:$4 sm:$0xff]  }
 0xa93   :  { %10850 = vmatpush1.bf16.msra.mxu0 %v20737_v8  ;;  %11613 = vmatpush1.bf16.msra.mxu1 %v20740_v10  ;;  %v20811_v17 = vld [vmem:[#allocation12 + $0x784] ss:$16 sps:$4 sm:$0xff]   ;;  %v20809_v8 = vld [vmem:[#allocation12 + $0x780] ss:$16 sps:$4 sm:$0xff]  }
 0xa94   :  { %v10158_v26 = vshrl.u32 %v10007_v14, 16  ;;  %v10160_v27 = vshll.u32 %v10007_v14, 16  ;;  %11644 = vmatprep.mubr.bf16.mxu1 %v22741_v20  ;;  %10851 = vmatprep.subr.bf16.mxu0 %v20745_v22  ;;  %v20814_v37 = vld [vmem:[#allocation12 + $0x184] ss:$16 sps:$4 sm:$0xff]   ;;  %v20812_v10 = vld [vmem:[#allocation12 + $0x180] ss:$16 sps:$4 sm:$0xff]  }
 0xa95   :  { %11614 = vmatprep.subr.bf16.mxu1 %v20748_v13  ;;  %v20817_v19 = vld [vmem:[#allocation12 + $0x7a4] ss:$16 sps:$4 sm:$0xff]   ;;  %v9998_v22 = vld [vmem:[#allocation3 + $0x10] sm:$0xfe] }
 0xa96   :  { %v10162_v29 = vrot.slane %v10160_v27, 1  ;;  %v20820_v5 = vld [vmem:[#allocation12 + $0x1a4] ss:$16 sps:$4 sm:$0xff]   ;;  %v20818_v13 = vld [vmem:[#allocation12 + $0x1a0] ss:$16 sps:$4 sm:$0xff]  }
 0xa97   :  { %10852 = vmatpush1.bf16.msra.mxu0 %v20743_v55  ;;  %11615 = vmatpush1.bf16.msra.mxu1 %v20746_v24  ;;  %v20823_v14 = vld [vmem:[#allocation12 + $0x7c4] ss:$16 sps:$4 sm:$0xff]   ;;  %v10006_v24 = vpack.c.bf16 %v10002_v11, %v9998_v22  ;;  %v20824_v27 = vld [vmem:[#allocation12 + $0x1c0] ss:$16 sps:$4 sm:$0xff]   ;;  %v20890_v22 = vld [vmem:[#allocation12 + $0x128] ss:$16 sps:$4 sm:$0xff]  }
 0xa98   :  { %v22744_v32 = vor.u32 %v10162_v29, %v10158_v26  ;;  %10853 = vmatprep.subr.bf16.mxu0 %v20751_v45  ;;  %11616 = vmatprep.subr.bf16.mxu1 %v20754_v56  ;;  %v20826_v55 = vld [vmem:[#allocation12 + $0x1c4] ss:$16 sps:$4 sm:$0xff]   ;;  %v20821_v26 = vld [vmem:[#allocation12 + $0x7c0] ss:$16 sps:$4 sm:$0xff]   ;;  %v20895_v11 = vld [vmem:[#allocation12 + $0x74c] ss:$16 sps:$4 sm:$0xff]  }
 0xa99   :  { %v20829_v45 = vld [vmem:[#allocation12 + $0x7e4] ss:$16 sps:$4 sm:$0xff]   ;;  %v10153_v29 = vshll.u32 %v10006_v24, 16 }
 0xa9a   :  { %10881 = vmatprep.mubr.bf16.mxu0 %v22744_v32  ;;  %v20832_v56 = vld [vmem:[#allocation12 + $0x1e4] ss:$16 sps:$4 sm:$0xff]  }
 0xa9b   :  { %10854 = vmatpush1.bf16.msra.mxu0 %v20749_v48  ;;  %11617 = vmatpush1.bf16.msra.mxu1 %v20752_v43  ;;  %v20827_v48 = vld [vmem:[#allocation12 + $0x7e0] ss:$16 sps:$4 sm:$0xff]  }
 0xa9c   :  { %10855 = vmatprep.subr.bf16.mxu0 %v20757_v33  ;;  %11618 = vmatprep.subr.bf16.mxu1 %v20760_v9  ;;  %v20830_v43 = vld [vmem:[#allocation12 + $0x1e0] ss:$16 sps:$4 sm:$0xff]   ;;  %v10151_v33 = vshrl.u32 %v10006_v24, 16  ;;  %v10155_v9 = vrot.slane %v10153_v29, 1  ;;  %v20904_v24 = vld [vmem:[#allocation12 + $0x16c] ss:$16 sps:$4 sm:$0xff]  }
 0xa9d   :  { %v20905_v29 = vld [vmem:[#allocation12 + $0x788] ss:$16 sps:$4 sm:$0xff]  }
 0xa9f   :  { %10856 = vmatpush1.bf16.msra.mxu0 %v20755_v60  ;;  %11619 = vmatpush1.bf16.msra.mxu1 %v20758_v42  ;;  %v20835_v60 = vld [vmem:[#allocation12 + $0x60c] ss:$16 sps:$4 sm:$0xff]  }
 0xaa0   :  { %10857 = vmatprep.subr.bf16.mxu0 %v20763_v18  ;;  %11620 = vmatprep.subr.bf16.mxu1 %v20766_v63  ;;  %v20838_v42 = vld [vmem:[#allocation12 + $0xc] ss:$16 sps:$4 sm:$0xff]   ;;  %v20833_v63 = vld [vmem:[#allocation12 + $0x608] ss:$16 sps:$4 sm:$0xff]  }
 0xaa1   :  { %v9860_v18 = vld [vmem:[#allocation3] sm:$0xff] }
 0xaa3   :  { %10858 = vmatpush1.bf16.msra.mxu0 %v20761_v46  ;;  %11621 = vmatpush1.bf16.msra.mxu1 %v20764_v47  ;;  %v22747_v46 = vor.u32 %v10155_v9, %v10151_v33  ;;  %v22749_v47 = vpack.c.bf16 %v9860_v18, %v9860_v18  ;;  %v20916_v33 = vld [vmem:[#allocation12 + $0x1ac] ss:$16 sps:$4 sm:$0xff]   ;;  %v20911_v9 = vld [vmem:[#allocation12 + $0x7a8] ss:$16 sps:$4 sm:$0xff]  }
 0xaa4   :  { %10859 = vmatprep.subr.bf16.mxu0 %v20769_v49  ;;  %11622 = vmatprep.subr.bf16.mxu1 %v20772_v54  ;;  %v20836_v49 = vld [vmem:[#allocation12 + $0x8] ss:$16 sps:$4 sm:$0xff]   ;;  %v20841_v54 = vld [vmem:[#allocation12 + $0x62c] ss:$16 sps:$4 sm:$0xff]  }
 0xaa5   :  { %v20922_v18 = vld [vmem:[#allocation12 + $0x1cc] ss:$16 sps:$4 sm:$0xff]  }
 0xaa7   :  { %10860 = vmatpush1.bf16.msra.mxu0 %v20767_v44  ;;  %11623 = vmatpush1.bf16.msra.mxu1 %v20770_v30  ;;  %v20844_v44 = vld [vmem:[#allocation12 + $0x2c] ss:$16 sps:$4 sm:$0xff]   ;;  %v20839_v30 = vld [vmem:[#allocation12 + $0x628] ss:$16 sps:$4 sm:$0xff]  }
 0xaa8   :  { %10861 = vmatprep.subr.bf16.mxu0 %v20775_v39  ;;  %11624 = vmatprep.subr.bf16.mxu1 %v20778_v50  ;;  %v20842_v39 = vld [vmem:[#allocation12 + $0x28] ss:$16 sps:$4 sm:$0xff]   ;;  %v20847_v50 = vld [vmem:[#allocation12 + $0x64c] ss:$16 sps:$4 sm:$0xff]  }
 0xaab   :  { %10862 = vmatpush1.bf16.msra.mxu0 %v20773_v36  ;;  %11625 = vmatpush1.bf16.msra.mxu1 %v20776_v25  ;;  %v20850_v36 = vld [vmem:[#allocation12 + $0x4c] ss:$16 sps:$4 sm:$0xff]   ;;  %v20845_v25 = vld [vmem:[#allocation12 + $0x648] ss:$16 sps:$4 sm:$0xff]  }
 0xaac   :  { %10863 = vmatprep.subr.bf16.mxu0 %v20781_v34  ;;  %11626 = vmatprep.subr.bf16.mxu1 %v20784_v51  ;;  %v20848_v34 = vld [vmem:[#allocation12 + $0x48] ss:$16 sps:$4 sm:$0xff]   ;;  %v20853_v51 = vld [vmem:[#allocation12 + $0x66c] ss:$16 sps:$4 sm:$0xff]  }
 0xaaf   :  { %10864 = vmatpush1.bf16.msra.mxu0 %v20779_v52  ;;  %11627 = vmatpush1.bf16.msra.mxu1 %v20782_v61  ;;  %v20856_v52 = vld [vmem:[#allocation12 + $0x6c] ss:$16 sps:$4 sm:$0xff]   ;;  %v20851_v61 = vld [vmem:[#allocation12 + $0x668] ss:$16 sps:$4 sm:$0xff]  }
 0xab0   :  { %10865 = vmatprep.subr.bf16.mxu0 %v20787_v53  ;;  %11628 = vmatprep.subr.bf16.mxu1 %v20790_v23  ;;  %v20859_v53 = vld [vmem:[#allocation12 + $0x68c] ss:$16 sps:$4 sm:$0xff]   ;;  %v20857_v23 = vld [vmem:[#allocation12 + $0x688] ss:$16 sps:$4 sm:$0xff]  }
 0xab3   :  { %10866 = vmatpush1.bf16.msra.mxu0 %v20785_v57  ;;  %11629 = vmatpush1.bf16.msra.mxu1 %v20788_v59  ;;  %v20860_v57 = vld [vmem:[#allocation12 + $0x88] ss:$16 sps:$4 sm:$0xff]   ;;  %v20865_v59 = vld [vmem:[#allocation12 + $0x6ac] ss:$16 sps:$4 sm:$0xff]  }
 0xab4   :  { %10867 = vmatprep.subr.bf16.mxu0 %v20793_v21  ;;  %11630 = vmatprep.subr.bf16.mxu1 %v20796_v58  ;;  %v20868_v21 = vld [vmem:[#allocation12 + $0xac] ss:$16 sps:$4 sm:$0xff]   ;;  %v20863_v58 = vld [vmem:[#allocation12 + $0x6a8] ss:$16 sps:$4 sm:$0xff]  }
 0xab7   :  { %10868 = vmatpush1.bf16.msra.mxu0 %v20791_v62  ;;  %11631 = vmatpush1.bf16.msra.mxu1 %v20794_v2  ;;  %v20866_v62 = vld [vmem:[#allocation12 + $0xa8] ss:$16 sps:$4 sm:$0xff]   ;;  %v20871_v2 = vld [vmem:[#allocation12 + $0x6cc] ss:$16 sps:$4 sm:$0xff]  }
 0xab8   :  { %10869 = vmatprep.subr.bf16.mxu0 %v20799_v0  ;;  %11632 = vmatprep.subr.bf16.mxu1 %v20802_v3  ;;  %v20874_v0 = vld [vmem:[#allocation12 + $0xcc] ss:$16 sps:$4 sm:$0xff]   ;;  %v20869_v3 = vld [vmem:[#allocation12 + $0x6c8] ss:$16 sps:$4 sm:$0xff]  }
 0xabb   :  { %10870 = vmatpush1.bf16.msra.mxu0 %v20797_v28  ;;  %11633 = vmatpush1.bf16.msra.mxu1 %v20800_v4  ;;  %v20872_v28 = vld [vmem:[#allocation12 + $0xc8] ss:$16 sps:$4 sm:$0xff]   ;;  %v20877_v4 = vld [vmem:[#allocation12 + $0x6ec] ss:$16 sps:$4 sm:$0xff]  }
 0xabc   :  { %10871 = vmatprep.subr.bf16.mxu0 %v20805_v6  ;;  %11634 = vmatprep.subr.bf16.mxu1 %v20808_v7  ;;  %v20880_v6 = vld [vmem:[#allocation12 + $0xec] ss:$16 sps:$4 sm:$0xff]   ;;  %v20875_v7 = vld [vmem:[#allocation12 + $0x6e8] ss:$16 sps:$4 sm:$0xff]  }
 0xabf   :  { %10872 = vmatpush1.bf16.msra.mxu0 %v20803_v35  ;;  %11635 = vmatpush1.bf16.msra.mxu1 %v20806_v31  ;;  %v20878_v35 = vld [vmem:[#allocation12 + $0xe8] ss:$16 sps:$4 sm:$0xff]   ;;  %v20883_v31 = vld [vmem:[#allocation12 + $0x70c] ss:$16 sps:$4 sm:$0xff]  }
 0xac0   :  { %10873 = vmatprep.subr.bf16.mxu0 %v20811_v17  ;;  %11636 = vmatprep.subr.bf16.mxu1 %v20814_v37  ;;  %v20886_v17 = vld [vmem:[#allocation12 + $0x10c] ss:$16 sps:$4 sm:$0xff]   ;;  %v20881_v37 = vld [vmem:[#allocation12 + $0x708] ss:$16 sps:$4 sm:$0xff]  }
 0xac3   :  { %10874 = vmatpush1.bf16.msra.mxu0 %v20809_v8  ;;  %11637 = vmatpush1.bf16.msra.mxu1 %v20812_v10  ;;  %v20884_v8 = vld [vmem:[#allocation12 + $0x108] ss:$16 sps:$4 sm:$0xff]   ;;  %v20889_v10 = vld [vmem:[#allocation12 + $0x72c] ss:$16 sps:$4 sm:$0xff]  }
 0xac4   :  { %10875 = vmatprep.subr.bf16.mxu0 %v20817_v19  ;;  %11638 = vmatprep.subr.bf16.mxu1 %v20820_v5  ;;  %v20892_v19 = vld [vmem:[#allocation12 + $0x12c] ss:$16 sps:$4 sm:$0xff]   ;;  %v20887_v5 = vld [vmem:[#allocation12 + $0x728] ss:$16 sps:$4 sm:$0xff]  }
 0xac7   :  { %10876 = vmatpush1.bf16.msra.mxu0 %v20815_v12  ;;  %11639 = vmatpush1.bf16.msra.mxu1 %v20818_v13  ;;  %v20898_v12 = vld [vmem:[#allocation12 + $0x14c] ss:$16 sps:$4 sm:$0xff]   ;;  %v20893_v13 = vld [vmem:[#allocation12 + $0x748] ss:$16 sps:$4 sm:$0xff]  }
 0xac8   :  { %10877 = vmatprep.subr.bf16.mxu0 %v20823_v14  ;;  %11640 = vmatprep.subr.bf16.mxu1 %v20826_v55  ;;  %v20896_v14 = vld [vmem:[#allocation12 + $0x148] ss:$16 sps:$4 sm:$0xff]   ;;  %v20901_v55 = vld [vmem:[#allocation12 + $0x76c] ss:$16 sps:$4 sm:$0xff]  }
 0xacb   :  { %10878 = vmatpush1.bf16.msra.mxu0 %v20821_v26  ;;  %11641 = vmatpush1.bf16.msra.mxu1 %v20824_v27  ;;  %v20899_v26 = vld [vmem:[#allocation12 + $0x768] ss:$16 sps:$4 sm:$0xff]  }
 0xacc   :  { %10879 = vmatprep.subr.bf16.mxu0 %v20829_v45  ;;  %11642 = vmatprep.subr.bf16.mxu1 %v20832_v56  ;;  %v20902_v27 = vld [vmem:[#allocation12 + $0x168] ss:$16 sps:$4 sm:$0xff]   ;;  %v20907_v45 = vld [vmem:[#allocation12 + $0x78c] ss:$16 sps:$4 sm:$0xff]  }
 0xacd   :  { %v20910_v56 = vld [vmem:[#allocation12 + $0x18c] ss:$16 sps:$4 sm:$0xff]  }
 0xacf   :  { %10880 = vmatpush1.bf16.msra.mxu0 %v20827_v48  ;;  %11643 = vmatpush1.bf16.msra.mxu1 %v20830_v43  ;;  %v20908_v48 = vld [vmem:[#allocation12 + $0x188] ss:$16 sps:$4 sm:$0xff]   ;;  %v20913_v43 = vld [vmem:[#allocation12 + $0x7ac] ss:$16 sps:$4 sm:$0xff]  }
 0xad0   :  { %10931 = vmatprep.subr.bf16.mxu0 %v20835_v60  ;;  %11694 = vmatprep.subr.bf16.mxu1 %v20838_v42  ;;  %v20914_v60 = vld [vmem:[#allocation12 + $0x1a8] ss:$16 sps:$4 sm:$0xff]   ;;  %v20919_v42 = vld [vmem:[#allocation12 + $0x7cc] ss:$16 sps:$4 sm:$0xff]  }
 0xad2   :  { %10882 = vmatmul.mubr.bf16.vlgmr.msra.gmra.mrb[80].mxu0 %v22747_v46  ;;  %11645 = vmatmul.mubr.bf16.vlgmr.msra.gmra.mrb[76].mxu1 %v22749_v47 }
 0xad3   :  { %10932 = vmatpush1.bf16.msra.mxu0 %v20833_v63  ;;  %10963 = vmatprep.mubr.bf16.mxu0 %v22744_v32  ;;  %v20854_v32 = vld [vmem:[#allocation12 + $0x68] ss:$16 sps:$4 sm:$0xff]  }
 0xad4   :  { %11695 = vmatpush1.bf16.msra.mxu1 %v20836_v49  ;;  %11726 = vmatprep.mubr.bf16.mxu1 %v22741_v20  ;;  %v20862_v20 = vld [vmem:[#allocation12 + $0x8c] ss:$16 sps:$4 sm:$0xff]   ;;  %v20917_v63 = vld [vmem:[#allocation12 + $0x7c8] ss:$16 sps:$4 sm:$0xff]  }
 0xad5   :  { %10933 = vmatprep.subr.bf16.mxu0 %v20841_v54  ;;  %11696 = vmatprep.subr.bf16.mxu1 %v20844_v44  ;;  %v20920_v49 = vld [vmem:[#allocation12 + $0x1c8] ss:$16 sps:$4 sm:$0xff]   ;;  %v20925_v54 = vld [vmem:[#allocation12 + $0x7ec] ss:$16 sps:$4 sm:$0xff]  }
 0xad6   :  { %v20928_v44 = vld [vmem:[#allocation12 + $0x1ec] ss:$16 sps:$4 sm:$0xff]  }
 0xad7   :  { %10934 = vmatpush1.bf16.msra.mxu0 %v20839_v30  ;;  %v20923_v30 = vld [vmem:[#allocation12 + $0x7e8] ss:$16 sps:$4 sm:$0xff]  }
 0xad8   :  { %11697 = vmatpush1.bf16.msra.mxu1 %v20842_v39  ;;  %10935 = vmatprep.subr.bf16.mxu0 %v20847_v50  ;;  %v11777_v39 = vld [vmem:[#allocation3 + $0x8] sm:$0xfc] }
 0xad9   :  { %11698 = vmatprep.subr.bf16.mxu1 %v20850_v36  ;;  %v20926_v50 = vld [vmem:[#allocation12 + $0x1e8] ss:$16 sps:$4 sm:$0xff]   ;;  %v20931_v36 = vld [vmem:[#allocation12 + $0x204] ss:$16 sps:$4 sm:$0xff]  }
 0xadb   :  { %10936 = vmatpush1.bf16.msra.mxu0 %v20845_v25  ;;  %v11781_v25 = vld [vmem:[#allocation3 + $0x28] sm:$0x3] }
 0xadc   :  { %11699 = vmatpush1.bf16.msra.mxu1 %v20848_v34  ;;  %10937 = vmatprep.subr.bf16.mxu0 %v20853_v51  ;;  %v20934_v34 = vld [vmem:[#allocation12 + $0x804] ss:$16 sps:$4 sm:$0xff]   ;;  %v20929_v51 = vld [vmem:[#allocation12 + $0x200] ss:$16 sps:$4 sm:$0xff]  }
 0xadd   :  { %11700 = vmatprep.subr.bf16.mxu1 %v20856_v52  ;;  %v9863_v52 = vld [vmem:[#allocation3 + $0x18] sm:$0xff] }
 0xadf   :  { %10938 = vmatpush1.bf16.msra.mxu0 %v20851_v61  ;;  %v11785_v61 = vpack.c.bf16 %v11781_v25, %v11777_v39  ;;  %v21004_v39 = vld [vmem:[#allocation12 + $0x980] ss:$16 sps:$4 sm:$0xff]  }
 0xae0   :  { %11701 = vmatpush1.bf16.msra.mxu1 %v20854_v32  ;;  %10939 = vmatprep.subr.bf16.mxu0 %v20859_v53  ;;  %v20932_v32 = vld [vmem:[#allocation12 + $0x800] ss:$16 sps:$4 sm:$0xff]   ;;  %v20937_v53 = vld [vmem:[#allocation12 + $0x224] ss:$16 sps:$4 sm:$0xff]  }
 0xae1   :  { %11702 = vmatprep.subr.bf16.mxu1 %v20862_v20  ;;  %v22756_v20 = vpack.c.bf16 %v9863_v52, %v9863_v52  ;;  %v21007_v25 = vld [vmem:[#allocation12 + $0x3a0] ss:$16 sps:$4 sm:$0xff]   ;;  %v21018_v52 = vld [vmem:[#allocation12 + $0x9c4] ss:$16 sps:$4 sm:$0xff]  }
 0xae3   :  { %10940 = vmatpush1.bf16.msra.mxu0 %v20857_v23  ;;  %v20940_v23 = vld [vmem:[#allocation12 + $0x824] ss:$16 sps:$4 sm:$0xff]  }
 0xae4   :  { %11703 = vmatpush1.bf16.msra.mxu1 %v20860_v57  ;;  %10941 = vmatprep.subr.bf16.mxu0 %v20865_v59  ;;  %v22759_v57 = vrot.slane %v11785_v61, 1  ;;  %v20935_v59 = vld [vmem:[#allocation12 + $0x220] ss:$16 sps:$4 sm:$0xff]  }
 0xae5   :  { %11704 = vmatprep.subr.bf16.mxu1 %v20868_v21  ;;  %v20938_v21 = vld [vmem:[#allocation12 + $0x820] ss:$16 sps:$4 sm:$0xff]  }
 0xae6   :  { %v21013_v61 = vld [vmem:[#allocation12 + $0x3c0] ss:$16 sps:$4 sm:$0xff]  }
 0xae7   :  { %10942 = vmatpush1.bf16.msra.mxu0 %v20863_v58  ;;  %v20943_v58 = vld [vmem:[#allocation12 + $0x244] ss:$16 sps:$4 sm:$0xff]  }
 0xae8   :  { %11705 = vmatpush1.bf16.msra.mxu1 %v20866_v62  ;;  %10943 = vmatprep.subr.bf16.mxu0 %v20871_v2  ;;  %v20946_v62 = vld [vmem:[#allocation12 + $0x844] ss:$16 sps:$4 sm:$0xff]   ;;  %v20944_v2 = vld [vmem:[#allocation12 + $0x840] ss:$16 sps:$4 sm:$0xff]  }
 0xae9   :  { %11706 = vmatprep.subr.bf16.mxu1 %v20874_v0  ;;  %v20952_v0 = vld [vmem:[#allocation12 + $0x864] ss:$16 sps:$4 sm:$0xff]  }
 0xaeb   :  { %10944 = vmatpush1.bf16.msra.mxu0 %v20869_v3  ;;  %v20947_v3 = vld [vmem:[#allocation12 + $0x260] ss:$16 sps:$4 sm:$0xff]  }
 0xaec   :  { %11707 = vmatpush1.bf16.msra.mxu1 %v20872_v28  ;;  %10945 = vmatprep.subr.bf16.mxu0 %v20877_v4  ;;  %v20950_v28 = vld [vmem:[#allocation12 + $0x860] ss:$16 sps:$4 sm:$0xff]   ;;  %v20955_v4 = vld [vmem:[#allocation12 + $0x284] ss:$16 sps:$4 sm:$0xff]  }
 0xaed   :  { %11708 = vmatprep.subr.bf16.mxu1 %v20880_v6  ;;  %v20958_v6 = vld [vmem:[#allocation12 + $0x884] ss:$16 sps:$4 sm:$0xff]  }
 0xaef   :  { %10946 = vmatpush1.bf16.msra.mxu0 %v20875_v7  ;;  %v20953_v7 = vld [vmem:[#allocation12 + $0x280] ss:$16 sps:$4 sm:$0xff]  }
 0xaf0   :  { %11709 = vmatpush1.bf16.msra.mxu1 %v20878_v35  ;;  %10947 = vmatprep.subr.bf16.mxu0 %v20883_v31  ;;  %v20956_v35 = vld [vmem:[#allocation12 + $0x880] ss:$16 sps:$4 sm:$0xff]   ;;  %v20961_v31 = vld [vmem:[#allocation12 + $0x2a4] ss:$16 sps:$4 sm:$0xff]  }
 0xaf1   :  { %11710 = vmatprep.subr.bf16.mxu1 %v20886_v17  ;;  %v20964_v17 = vld [vmem:[#allocation12 + $0x8a4] ss:$16 sps:$4 sm:$0xff]  }
 0xaf3   :  { %10948 = vmatpush1.bf16.msra.mxu0 %v20881_v37  ;;  %v20959_v37 = vld [vmem:[#allocation12 + $0x2a0] ss:$16 sps:$4 sm:$0xff]  }
 0xaf4   :  { %11711 = vmatpush1.bf16.msra.mxu1 %v20884_v8  ;;  %10949 = vmatprep.subr.bf16.mxu0 %v20889_v10  ;;  %v20962_v8 = vld [vmem:[#allocation12 + $0x8a0] ss:$16 sps:$4 sm:$0xff]   ;;  %v20967_v10 = vld [vmem:[#allocation12 + $0x2c4] ss:$16 sps:$4 sm:$0xff]  }
 0xaf5   :  { %11712 = vmatprep.subr.bf16.mxu1 %v20892_v19  ;;  %v20970_v19 = vld [vmem:[#allocation12 + $0x8c4] ss:$16 sps:$4 sm:$0xff]  }
 0xaf7   :  { %10950 = vmatpush1.bf16.msra.mxu0 %v20887_v5  ;;  %v20965_v5 = vld [vmem:[#allocation12 + $0x2c0] ss:$16 sps:$4 sm:$0xff]  }
 0xaf8   :  { %11713 = vmatpush1.bf16.msra.mxu1 %v20890_v22  ;;  %10951 = vmatprep.subr.bf16.mxu0 %v20895_v11  ;;  %v20968_v22 = vld [vmem:[#allocation12 + $0x8c0] ss:$16 sps:$4 sm:$0xff]   ;;  %v20973_v11 = vld [vmem:[#allocation12 + $0x2e4] ss:$16 sps:$4 sm:$0xff]  }
 0xaf9   :  { %11714 = vmatprep.subr.bf16.mxu1 %v20898_v12  ;;  %v20976_v12 = vld [vmem:[#allocation12 + $0x8e4] ss:$16 sps:$4 sm:$0xff]  }
 0xafb   :  { %10952 = vmatpush1.bf16.msra.mxu0 %v20893_v13  ;;  %v20971_v13 = vld [vmem:[#allocation12 + $0x2e0] ss:$16 sps:$4 sm:$0xff]  }
 0xafc   :  { %11715 = vmatpush1.bf16.msra.mxu1 %v20896_v14  ;;  %10953 = vmatprep.subr.bf16.mxu0 %v20901_v55  ;;  %v20974_v14 = vld [vmem:[#allocation12 + $0x8e0] ss:$16 sps:$4 sm:$0xff]   ;;  %v20979_v55 = vld [vmem:[#allocation12 + $0x304] ss:$16 sps:$4 sm:$0xff]  }
 0xafd   :  { %11716 = vmatprep.subr.bf16.mxu1 %v20904_v24  ;;  %v20982_v24 = vld [vmem:[#allocation12 + $0x904] ss:$16 sps:$4 sm:$0xff]  }
 0xaff   :  { %10954 = vmatpush1.bf16.msra.mxu0 %v20899_v26  ;;  %v20977_v26 = vld [vmem:[#allocation12 + $0x300] ss:$16 sps:$4 sm:$0xff]  }
 0xb00   :  { %11717 = vmatpush1.bf16.msra.mxu1 %v20902_v27  ;;  %10955 = vmatprep.subr.bf16.mxu0 %v20907_v45  ;;  %v20980_v27 = vld [vmem:[#allocation12 + $0x900] ss:$16 sps:$4 sm:$0xff]   ;;  %v20985_v45 = vld [vmem:[#allocation12 + $0x324] ss:$16 sps:$4 sm:$0xff]  }
 0xb01   :  { %11718 = vmatprep.subr.bf16.mxu1 %v20910_v56  ;;  %v20988_v56 = vld [vmem:[#allocation12 + $0x924] ss:$16 sps:$4 sm:$0xff]  }
 0xb03   :  { %10956 = vmatpush1.bf16.msra.mxu0 %v20905_v29  ;;  %v20983_v29 = vld [vmem:[#allocation12 + $0x320] ss:$16 sps:$4 sm:$0xff]  }
 0xb04   :  { %11719 = vmatpush1.bf16.msra.mxu1 %v20908_v48  ;;  %10957 = vmatprep.subr.bf16.mxu0 %v20913_v43  ;;  %v20986_v48 = vld [vmem:[#allocation12 + $0x920] ss:$16 sps:$4 sm:$0xff]   ;;  %v20991_v43 = vld [vmem:[#allocation12 + $0x344] ss:$16 sps:$4 sm:$0xff]  }
 0xb05   :  { %11720 = vmatprep.subr.bf16.mxu1 %v20916_v33  ;;  %v20994_v33 = vld [vmem:[#allocation12 + $0x944] ss:$16 sps:$4 sm:$0xff]  }
 0xb07   :  { %10958 = vmatpush1.bf16.msra.mxu0 %v20911_v9  ;;  %v20989_v9 = vld [vmem:[#allocation12 + $0x340] ss:$16 sps:$4 sm:$0xff]  }
 0xb08   :  { %11721 = vmatpush1.bf16.msra.mxu1 %v20914_v60  ;;  %10959 = vmatprep.subr.bf16.mxu0 %v20919_v42  ;;  %v20992_v60 = vld [vmem:[#allocation12 + $0x940] ss:$16 sps:$4 sm:$0xff]   ;;  %v20997_v42 = vld [vmem:[#allocation12 + $0x364] ss:$16 sps:$4 sm:$0xff]  }
 0xb09   :  { %11722 = vmatprep.subr.bf16.mxu1 %v20922_v18  ;;  %v21000_v18 = vld [vmem:[#allocation12 + $0x964] ss:$16 sps:$4 sm:$0xff]  }
 0xb0b   :  { %10960 = vmatpush1.bf16.msra.mxu0 %v20917_v63  ;;  %v20995_v63 = vld [vmem:[#allocation12 + $0x360] ss:$16 sps:$4 sm:$0xff]  }
 0xb0c   :  { %11723 = vmatpush1.bf16.msra.mxu1 %v20920_v49  ;;  %10961 = vmatprep.subr.bf16.mxu0 %v20925_v54  ;;  %v20998_v49 = vld [vmem:[#allocation12 + $0x960] ss:$16 sps:$4 sm:$0xff]   ;;  %v21003_v54 = vld [vmem:[#allocation12 + $0x384] ss:$16 sps:$4 sm:$0xff]  }
 0xb0d   :  { %11724 = vmatprep.subr.bf16.mxu1 %v20928_v44  ;;  %v21006_v44 = vld [vmem:[#allocation12 + $0x984] ss:$16 sps:$4 sm:$0xff]  }
 0xb0f   :  { %10962 = vmatpush1.bf16.msra.mxu0 %v20923_v30  ;;  %v21001_v30 = vld [vmem:[#allocation12 + $0x380] ss:$16 sps:$4 sm:$0xff]  }
 0xb10   :  { %11725 = vmatpush1.bf16.msra.mxu1 %v20926_v50  ;;  %11653 = vmatprep.subr.bf16.mxu0 %v20931_v36  ;;  %v21009_v50 = vld [vmem:[#allocation12 + $0x3a4] ss:$16 sps:$4 sm:$0xff]  }
 0xb11   :  { %12568 = vmatprep.subr.bf16.mxu1 %v20934_v34  ;;  %v21012_v36 = vld [vmem:[#allocation12 + $0x9a4] ss:$16 sps:$4 sm:$0xff]   ;;  %v21010_v34 = vld [vmem:[#allocation12 + $0x9a0] ss:$16 sps:$4 sm:$0xff]  }
 0xb12   :  { %10964 = vmatmul.mubr.bf16.vlgmr.msra.gmra.mrb[84].mxu0 %v22747_v46  ;;  %v20941_v46 = vld [vmem:[#allocation12 + $0x240] ss:$16 sps:$4 sm:$0xff]  }
 0xb13   :  { %11727 = vmatmul.mubr.bf16.vlgmr.msra.gmra.mrb[80].mxu1 %v22749_v47  ;;  %11654 = vmatpush1.bf16.msra.mxu0 %v20929_v51  ;;  %v20949_v47 = vld [vmem:[#allocation12 + $0x264] ss:$16 sps:$4 sm:$0xff]  }
 0xb14   :  { %11685 = vmatprep.mubr.bf16.mxu0 %v22756_v20  ;;  %12569 = vmatpush1.bf16.msra.mxu1 %v20932_v32  ;;  %v21015_v51 = vld [vmem:[#allocation12 + $0x3c4] ss:$16 sps:$4 sm:$0xff]   ;;  %v21016_v32 = vld [vmem:[#allocation12 + $0x9c0] ss:$16 sps:$4 sm:$0xff]  }
 0xb15   :  { %12600 = vmatprep.mubr.bf16.mxu1 %v22759_v57  ;;  %11655 = vmatprep.subr.bf16.mxu0 %v20937_v53  ;;  %v21021_v53 = vld [vmem:[#allocation12 + $0x3e4] ss:$16 sps:$4 sm:$0xff]  }
 0xb16   :  { %12570 = vmatprep.subr.bf16.mxu1 %v20940_v23  ;;  %v21024_v23 = vld [vmem:[#allocation12 + $0x9e4] ss:$16 sps:$4 sm:$0xff]  }
 0xb17   :  { %11656 = vmatpush1.bf16.msra.mxu0 %v20935_v59  ;;  %v11776_v59 = vld [vmem:[#allocation3] sm:$0xfc] }
 0xb18   :  { %12571 = vmatpush1.bf16.msra.mxu1 %v20938_v21  ;;  %11657 = vmatprep.subr.bf16.mxu0 %v20943_v58  ;;  %v11780_v21 = vld [vmem:[#allocation3 + $0x20] sm:$0x3]  ;;  %v21019_v58 = vld [vmem:[#allocation12 + $0x3e0] ss:$16 sps:$4 sm:$0xff]  }
 0xb19   :  { %12572 = vmatprep.subr.bf16.mxu1 %v20946_v62  ;;  %v21022_v62 = vld [vmem:[#allocation12 + $0x9e0] ss:$16 sps:$4 sm:$0xff]  }
 0xb1b   :  { %11658 = vmatpush1.bf16.msra.mxu0 %v20941_v46  ;;  %v21027_v46 = vld [vmem:[#allocation12 + $0x20c] ss:$16 sps:$4 sm:$0xff]  }
 0xb1c   :  { %12573 = vmatpush1.bf16.msra.mxu1 %v20944_v2  ;;  %11659 = vmatprep.subr.bf16.mxu0 %v20949_v47  ;;  %v9862_v2 = vld [vmem:[#allocation3 + $0x10] sm:$0xff]  ;;  %v11784_v47 = vpack.c.bf16 %v11780_v21, %v11776_v59  ;;  %v21085_v59 = vld [vmem:[#allocation12 + $0x348] ss:$16 sps:$4 sm:$0xff]  }
 0xb1d   :  { %12574 = vmatprep.subr.bf16.mxu1 %v20952_v0  ;;  %v21030_v0 = vld [vmem:[#allocation12 + $0x80c] ss:$16 sps:$4 sm:$0xff]   ;;  %v21088_v21 = vld [vmem:[#allocation12 + $0x948] ss:$16 sps:$4 sm:$0xff]  }
 0xb1f   :  { %11660 = vmatpush1.bf16.msra.mxu0 %v20947_v3  ;;  %v21025_v3 = vld [vmem:[#allocation12 + $0x208] ss:$16 sps:$4 sm:$0xff]  }
 0xb20   :  { %12575 = vmatpush1.bf16.msra.mxu1 %v20950_v28  ;;  %11661 = vmatprep.subr.bf16.mxu0 %v20955_v4  ;;  %v22763_v28 = vpack.c.bf16 %v9862_v2, %v9862_v2  ;;  %v21028_v4 = vld [vmem:[#allocation12 + $0x808] ss:$16 sps:$4 sm:$0xff]  }
 0xb21   :  { %12576 = vmatprep.subr.bf16.mxu1 %v20958_v6  ;;  %v22765_v6 = vrot.slane %v11784_v47, 1  ;;  %v21094_v2 = vld [vmem:[#allocation12 + $0x968] ss:$16 sps:$4 sm:$0xff]   ;;  %v21099_v47 = vld [vmem:[#allocation12 + $0x38c] ss:$16 sps:$4 sm:$0xff]  }
 0xb23   :  { %11662 = vmatpush1.bf16.msra.mxu0 %v20953_v7  ;;  %v21033_v7 = vld [vmem:[#allocation12 + $0x22c] ss:$16 sps:$4 sm:$0xff]  }
 0xb24   :  { %12577 = vmatpush1.bf16.msra.mxu1 %v20956_v35  ;;  %11663 = vmatprep.subr.bf16.mxu0 %v20961_v31  ;;  %v21036_v35 = vld [vmem:[#allocation12 + $0x82c] ss:$16 sps:$4 sm:$0xff]   ;;  %v21031_v31 = vld [vmem:[#allocation12 + $0x228] ss:$16 sps:$4 sm:$0xff]  }
 0xb25   :  { %12578 = vmatprep.subr.bf16.mxu1 %v20964_v17  ;;  %v21034_v17 = vld [vmem:[#allocation12 + $0x828] ss:$16 sps:$4 sm:$0xff]  }
 0xb27   :  { %11664 = vmatpush1.bf16.msra.mxu0 %v20959_v37  ;;  %v21039_v37 = vld [vmem:[#allocation12 + $0x24c] ss:$16 sps:$4 sm:$0xff]  }
 0xb28   :  { %12579 = vmatpush1.bf16.msra.mxu1 %v20962_v8  ;;  %11665 = vmatprep.subr.bf16.mxu0 %v20967_v10  ;;  %v21042_v8 = vld [vmem:[#allocation12 + $0x84c] ss:$16 sps:$4 sm:$0xff]   ;;  %v21037_v10 = vld [vmem:[#allocation12 + $0x248] ss:$16 sps:$4 sm:$0xff]  }
 0xb29   :  { %12580 = vmatprep.subr.bf16.mxu1 %v20970_v19  ;;  %v21040_v19 = vld [vmem:[#allocation12 + $0x848] ss:$16 sps:$4 sm:$0xff]  }
 0xb2b   :  { %11666 = vmatpush1.bf16.msra.mxu0 %v20965_v5  ;;  %v21045_v5 = vld [vmem:[#allocation12 + $0x26c] ss:$16 sps:$4 sm:$0xff]  }
 0xb2c   :  { %12581 = vmatpush1.bf16.msra.mxu1 %v20968_v22  ;;  %11667 = vmatprep.subr.bf16.mxu0 %v20973_v11  ;;  %v21048_v22 = vld [vmem:[#allocation12 + $0x86c] ss:$16 sps:$4 sm:$0xff]   ;;  %v21043_v11 = vld [vmem:[#allocation12 + $0x268] ss:$16 sps:$4 sm:$0xff]  }
 0xb2d   :  { %12582 = vmatprep.subr.bf16.mxu1 %v20976_v12  ;;  %v21051_v12 = vld [vmem:[#allocation12 + $0x28c] ss:$16 sps:$4 sm:$0xff]  }
 0xb2f   :  { %11668 = vmatpush1.bf16.msra.mxu0 %v20971_v13  ;;  %v21054_v13 = vld [vmem:[#allocation12 + $0x88c] ss:$16 sps:$4 sm:$0xff]  }
 0xb30   :  { %12583 = vmatpush1.bf16.msra.mxu1 %v20974_v14  ;;  %11669 = vmatprep.subr.bf16.mxu0 %v20979_v55  ;;  %v21052_v14 = vld [vmem:[#allocation12 + $0x888] ss:$16 sps:$4 sm:$0xff]   ;;  %v21057_v55 = vld [vmem:[#allocation12 + $0x2ac] ss:$16 sps:$4 sm:$0xff]  }
 0xb31   :  { %12584 = vmatprep.subr.bf16.mxu1 %v20982_v24  ;;  %v21060_v24 = vld [vmem:[#allocation12 + $0x8ac] ss:$16 sps:$4 sm:$0xff]  }
 0xb33   :  { %11670 = vmatpush1.bf16.msra.mxu0 %v20977_v26  ;;  %v21055_v26 = vld [vmem:[#allocation12 + $0x2a8] ss:$16 sps:$4 sm:$0xff]  }
 0xb34   :  { %12585 = vmatpush1.bf16.msra.mxu1 %v20980_v27  ;;  %11671 = vmatprep.subr.bf16.mxu0 %v20985_v45  ;;  %v21058_v27 = vld [vmem:[#allocation12 + $0x8a8] ss:$16 sps:$4 sm:$0xff]   ;;  %v21063_v45 = vld [vmem:[#allocation12 + $0x2cc] ss:$16 sps:$4 sm:$0xff]  }
 0xb35   :  { %12586 = vmatprep.subr.bf16.mxu1 %v20988_v56 }
 0xb37   :  { %11672 = vmatpush1.bf16.msra.mxu0 %v20983_v29 }
 0xb38   :  { %12587 = vmatpush1.bf16.msra.mxu1 %v20986_v48  ;;  %11673 = vmatprep.subr.bf16.mxu0 %v20991_v43  ;;  %v21066_v48 = vld [vmem:[#allocation12 + $0x8cc] ss:$16 sps:$4 sm:$0xff]  }
 0xb39   :  { %12588 = vmatprep.subr.bf16.mxu1 %v20994_v33 }
 0xb3b   :  { %11674 = vmatpush1.bf16.msra.mxu0 %v20989_v9 }
 0xb3c   :  { %12589 = vmatpush1.bf16.msra.mxu1 %v20992_v60  ;;  %11675 = vmatprep.subr.bf16.mxu0 %v20997_v42  ;;  %v21061_v42 = vld [vmem:[#allocation12 + $0x2c8] ss:$16 sps:$4 sm:$0xff]  }
 0xb3d   :  { %12590 = vmatprep.subr.bf16.mxu1 %v21000_v18 }
 0xb3f   :  { %11676 = vmatpush1.bf16.msra.mxu0 %v20995_v63 }
 0xb40   :  { %12591 = vmatpush1.bf16.msra.mxu1 %v20998_v49  ;;  %11677 = vmatprep.subr.bf16.mxu0 %v21003_v54  ;;  %v21064_v49 = vld [vmem:[#allocation12 + $0x8c8] ss:$16 sps:$4 sm:$0xff]   ;;  %v21069_v54 = vld [vmem:[#allocation12 + $0x2ec] ss:$16 sps:$4 sm:$0xff]  }
 0xb41   :  { %12592 = vmatprep.subr.bf16.mxu1 %v21006_v44  ;;  %v21072_v44 = vld [vmem:[#allocation12 + $0x8ec] ss:$16 sps:$4 sm:$0xff]  }
 0xb43   :  { %11678 = vmatpush1.bf16.msra.mxu0 %v21001_v30  ;;  %v21067_v30 = vld [vmem:[#allocation12 + $0x2e8] ss:$16 sps:$4 sm:$0xff]  }
 0xb44   :  { %12593 = vmatpush1.bf16.msra.mxu1 %v21004_v39  ;;  %11679 = vmatprep.subr.bf16.mxu0 %v21009_v50  ;;  %v21070_v39 = vld [vmem:[#allocation12 + $0x8e8] ss:$16 sps:$4 sm:$0xff]   ;;  %v21075_v50 = vld [vmem:[#allocation12 + $0x30c] ss:$16 sps:$4 sm:$0xff]  }
 0xb45   :  { %12594 = vmatprep.subr.bf16.mxu1 %v21012_v36  ;;  %v21078_v36 = vld [vmem:[#allocation12 + $0x90c] ss:$16 sps:$4 sm:$0xff]  }
 0xb47   :  { %11680 = vmatpush1.bf16.msra.mxu0 %v21007_v25  ;;  %v21073_v25 = vld [vmem:[#allocation12 + $0x308] ss:$16 sps:$4 sm:$0xff]  }
 0xb48   :  { %12595 = vmatpush1.bf16.msra.mxu1 %v21010_v34  ;;  %11681 = vmatprep.subr.bf16.mxu0 %v21015_v51  ;;  %v21076_v34 = vld [vmem:[#allocation12 + $0x908] ss:$16 sps:$4 sm:$0xff]   ;;  %v21081_v51 = vld [vmem:[#allocation12 + $0x32c] ss:$16 sps:$4 sm:$0xff]  }
 0xb49   :  { %12596 = vmatprep.subr.bf16.mxu1 %v21018_v52  ;;  %v21084_v52 = vld [vmem:[#allocation12 + $0x92c] ss:$16 sps:$4 sm:$0xff]  }
 0xb4b   :  { %11682 = vmatpush1.bf16.msra.mxu0 %v21013_v61  ;;  %v21079_v61 = vld [vmem:[#allocation12 + $0x328] ss:$16 sps:$4 sm:$0xff]  }
 0xb4c   :  { %12597 = vmatpush1.bf16.msra.mxu1 %v21016_v32  ;;  %11683 = vmatprep.subr.bf16.mxu0 %v21021_v53  ;;  %v21082_v32 = vld [vmem:[#allocation12 + $0x928] ss:$16 sps:$4 sm:$0xff]   ;;  %v21087_v53 = vld [vmem:[#allocation12 + $0x34c] ss:$16 sps:$4 sm:$0xff]  }
 0xb4d   :  { %12598 = vmatprep.subr.bf16.mxu1 %v21024_v23  ;;  %v21090_v23 = vld [vmem:[#allocation12 + $0x94c] ss:$16 sps:$4 sm:$0xff]  }
 0xb4f   :  { %11684 = vmatpush1.bf16.msra.mxu0 %v21019_v58  ;;  %v21093_v58 = vld [vmem:[#allocation12 + $0x36c] ss:$16 sps:$4 sm:$0xff]  }
 0xb50   :  { %12599 = vmatpush1.bf16.msra.mxu1 %v21022_v62  ;;  %11735 = vmatprep.subr.bf16.mxu0 %v21027_v46  ;;  %v21096_v62 = vld [vmem:[#allocation12 + $0x96c] ss:$16 sps:$4 sm:$0xff]   ;;  %v21091_v46 = vld [vmem:[#allocation12 + $0x368] ss:$16 sps:$4 sm:$0xff]  }
 0xb51   :  { %12650 = vmatprep.subr.bf16.mxu1 %v21030_v0  ;;  %v21102_v0 = vld [vmem:[#allocation12 + $0x98c] ss:$16 sps:$4 sm:$0xff]  }
 0xb52   :  { %11686 = vmatmul.mubr.bf16.vlgmr.msra.gmra.mrb[88].mxu0 %v22763_v28 }
 0xb53   :  { %12601 = vmatmul.mubr.bf16.vlgmr.msra.gmra.mrb[84].mxu1 %v22765_v6  ;;  %11736 = vmatpush1.bf16.msra.mxu0 %v21025_v3  ;;  %v21097_v3 = vld [vmem:[#allocation12 + $0x388] ss:$16 sps:$4 sm:$0xff]  }
 0xb54   :  { %11767 = vmatprep.mubr.bf16.mxu0 %v22756_v20  ;;  %12651 = vmatpush1.bf16.msra.mxu1 %v21028_v4  ;;  %v21046_v20 = vld [vmem:[#allocation12 + $0x868] ss:$16 sps:$4 sm:$0xff]  }
 0xb55   :  { %12682 = vmatprep.mubr.bf16.mxu1 %v22759_v57  ;;  %11737 = vmatprep.subr.bf16.mxu0 %v21033_v7  ;;  %v21049_v57 = vld [vmem:[#allocation12 + $0x288] ss:$16 sps:$4 sm:$0xff]   ;;  %v21105_v7 = vld [vmem:[#allocation12 + $0x3ac] ss:$16 sps:$4 sm:$0xff]  }
 0xb56   :  { %12652 = vmatprep.subr.bf16.mxu1 %v21036_v35  ;;  %v21100_v4 = vld [vmem:[#allocation12 + $0x988] ss:$16 sps:$4 sm:$0xff]   ;;  %v21108_v35 = vld [vmem:[#allocation12 + $0x9ac] ss:$16 sps:$4 sm:$0xff]  }
 0xb57   :  { %11738 = vmatpush1.bf16.msra.mxu0 %v21031_v31  ;;  %v21103_v31 = vld [vmem:[#allocation12 + $0x3a8] ss:$16 sps:$4 sm:$0xff]  }
 0xb58   :  { %12653 = vmatpush1.bf16.msra.mxu1 %v21034_v17  ;;  %11739 = vmatprep.subr.bf16.mxu0 %v21039_v37  ;;  %v12737_v17 = vld [vmem:[#allocation3 + $0x8] sm:$0xf8] }
 0xb59   :  { %12654 = vmatprep.subr.bf16.mxu1 %v21042_v8  ;;  %v21106_v37 = vld [vmem:[#allocation12 + $0x9a8] ss:$16 sps:$4 sm:$0xff]   ;;  %v21111_v8 = vld [vmem:[#allocation12 + $0x3cc] ss:$16 sps:$4 sm:$0xff]  }
 0xb5b   :  { %11740 = vmatpush1.bf16.msra.mxu0 %v21037_v10  ;;  %v12741_v10 = vld [vmem:[#allocation3 + $0x28] sm:$0x7] }
 0xb5c   :  { %12655 = vmatpush1.bf16.msra.mxu1 %v21040_v19  ;;  %11741 = vmatprep.subr.bf16.mxu0 %v21045_v5  ;;  %v21114_v19 = vld [vmem:[#allocation12 + $0x9cc] ss:$16 sps:$4 sm:$0xff]   ;;  %v21109_v5 = vld [vmem:[#allocation12 + $0x3c8] ss:$16 sps:$4 sm:$0xff]  }
 0xb5d   :  { %12656 = vmatprep.subr.bf16.mxu1 %v21048_v22  ;;  %v12745_v22 = vpack.c.bf16 %v12741_v10, %v12737_v17 }
 0xb5f   :  { %11742 = vmatpush1.bf16.msra.mxu0 %v21043_v11  ;;  %v21112_v11 = vld [vmem:[#allocation12 + $0x9c8] ss:$16 sps:$4 sm:$0xff]  }
 0xb60   :  { %12657 = vmatpush1.bf16.msra.mxu1 %v21046_v20  ;;  %11743 = vmatprep.subr.bf16.mxu0 %v21051_v12  ;;  %v21117_v20 = vld [vmem:[#allocation12 + $0x3ec] ss:$16 sps:$4 sm:$0xff]  }
 0xb61   :  { %12658 = vmatprep.subr.bf16.mxu1 %v21054_v13  ;;  %v21120_v12 = vld [vmem:[#allocation12 + $0x9ec] ss:$16 sps:$4 sm:$0xff]   ;;  %v11779_v13 = vld [vmem:[#allocation3 + $0x18] sm:$0xfc] }
 0xb63   :  { %11744 = vmatpush1.bf16.msra.mxu0 %v21049_v57  ;;  %v21115_v57 = vld [vmem:[#allocation12 + $0x3e8] ss:$16 sps:$4 sm:$0xff]  }
 0xb64   :  { %12659 = vmatpush1.bf16.msra.mxu1 %v21052_v14  ;;  %11745 = vmatprep.subr.bf16.mxu0 %v21057_v55  ;;  %v11783_v14 = vld [vmem:[#allocation3 + $0x38] sm:$0x3]  ;;  %v12885_v55 = vshrl.u32 %v12745_v22, 16 }
 0xb65   :  { %v22771_v56 = vpop.f32.mrb[76].mxu0  ;;  %v22773_v29 = vpop.f32.mrb[72].mxu1  ;;  %12660 = vmatprep.subr.bf16.mxu1 %v21060_v24  ;;  %v12888_v24 = vshll.u32 %v12745_v22, 16  ;;  %v21165_v22 = vld [vmem:[#allocation12 + $0xae4] ss:$16 sps:$4 sm:$0xff]  }
 0xb66   :  { %v22775_v43 = vpop.f32.mrb[77].mxu0  ;;  %v22777_v33 = vpop.f32.mrb[73].mxu1 }
 0xb67   :  { %11746 = vmatpush1.bf16.msra.mxu0 %v21055_v26  ;;  %v10846_v9 = vpop.f32.mrb[78].mxu0  ;;  %v10928_v60 = vpop.f32.mrb[74].mxu1  ;;  %v21118_v26 = vld [vmem:[#allocation12 + $0x9e8] ss:$16 sps:$4 sm:$0xff]  }
 0xb68   :  { %12661 = vmatpush1.bf16.msra.mxu1 %v21058_v27  ;;  %v10847_v18 = vpop.f32.mrb[79].mxu0  ;;  %v10929_v63 = vpop.f32.mrb[75].mxu1  ;;  %11747 = vmatprep.subr.bf16.mxu0 %v21063_v45  ;;  %v21123_v27 = vld [vmem:[#allocation12 + $0xa04] ss:$16 sps:$4 sm:$0xff]   ;;  %v21121_v9 = vld [vmem:[#allocation12 + $0xa00] ss:$16 sps:$4 sm:$0xff]  }
 0xb69   :  { %12662 = vmatprep.subr.bf16.mxu1 %v21066_v48  ;;  %v21126_v45 = vld [vmem:[#allocation12 + $0xc04] ss:$16 sps:$4 sm:$0xff]   ;;  %v11787_v48 = vpack.c.bf16 %v11783_v14, %v11779_v13  ;;  %v12887_v60 = vrot.slane %v12885_v55, 1  ;;  %v21124_v18 = vld [vmem:[#allocation12 + $0xc00] ss:$16 sps:$4 sm:$0xff]  }
 0xb6a   :  { %v21129_v63 = vld [vmem:[#allocation12 + $0xa24] ss:$16 sps:$4 sm:$0xff]   ;;  %v21172_v14 = vld [vmem:[#allocation12 + $0xd00] ss:$16 sps:$4 sm:$0xff]  }
 0xb6b   :  { %11748 = vmatpush1.bf16.msra.mxu0 %v21061_v42  ;;  %v12890_v42 = vrot.slane %v12888_v24, 2  ;;  %v21174_v13 = vld [vmem:[#allocation12 + $0xd04] ss:$16 sps:$4 sm:$0xff]  }
 0xb6c   :  { %12663 = vmatpush1.bf16.msra.mxu1 %v21064_v49  ;;  %11749 = vmatprep.subr.bf16.mxu0 %v21069_v54  ;;  %v22780_v49 = vrot.slane %v11787_v48, 1  ;;  %v21132_v54 = vld [vmem:[#allocation12 + $0xc24] ss:$16 sps:$4 sm:$0xff]  }
 0xb6d   :  { %12664 = vmatprep.subr.bf16.mxu1 %v21072_v44  ;;  %v22783_v44 = vor.u32 %v12890_v42, %v12887_v60  ;;  %v21177_v55 = vld [vmem:[#allocation12 + $0xb24] ss:$16 sps:$4 sm:$0xff]   ;;  %v21184_v60 = vld [vmem:[#allocation12 + $0xd40] ss:$16 sps:$4 sm:$0xff]  }
 0xb6e   :  { %v21180_v24 = vld [vmem:[#allocation12 + $0xd24] ss:$16 sps:$4 sm:$0xff]  }
 0xb6f   :  { %11750 = vmatpush1.bf16.msra.mxu0 %v21067_v30  ;;  %v21127_v30 = vld [vmem:[#allocation12 + $0xa20] ss:$16 sps:$4 sm:$0xff]   ;;  %v21186_v48 = vld [vmem:[#allocation12 + $0xd44] ss:$16 sps:$4 sm:$0xff]  }
 0xb70   :  { %12665 = vmatpush1.bf16.msra.mxu1 %v21070_v39  ;;  %11751 = vmatprep.subr.bf16.mxu0 %v21075_v50  ;;  %v21130_v39 = vld [vmem:[#allocation12 + $0xc20] ss:$16 sps:$4 sm:$0xff]   ;;  %v21135_v50 = vld [vmem:[#allocation12 + $0xa44] ss:$16 sps:$4 sm:$0xff]  }
 0xb71   :  { %12666 = vmatprep.subr.bf16.mxu1 %v21078_v36  ;;  %v21138_v36 = vld [vmem:[#allocation12 + $0xc44] ss:$16 sps:$4 sm:$0xff]  }
 0xb72   :  { %v21189_v42 = vld [vmem:[#allocation12 + $0xb64] ss:$16 sps:$4 sm:$0xff]  }
 0xb73   :  { %11752 = vmatpush1.bf16.msra.mxu0 %v21073_v25  ;;  %v21136_v25 = vld [vmem:[#allocation12 + $0xc40] ss:$16 sps:$4 sm:$0xff]  }
 0xb74   :  { %12667 = vmatpush1.bf16.msra.mxu1 %v21076_v34  ;;  %11753 = vmatprep.subr.bf16.mxu0 %v21081_v51  ;;  %v21144_v34 = vld [vmem:[#allocation12 + $0xc64] ss:$16 sps:$4 sm:$0xff]   ;;  %v21139_v51 = vld [vmem:[#allocation12 + $0xa60] ss:$16 sps:$4 sm:$0xff]  }
 0xb75   :  { %12668 = vmatprep.subr.bf16.mxu1 %v21084_v52  ;;  %v21142_v52 = vld [vmem:[#allocation12 + $0xc60] ss:$16 sps:$4 sm:$0xff]  }
 0xb77   :  { %11754 = vmatpush1.bf16.msra.mxu0 %v21079_v61  ;;  %v21147_v61 = vld [vmem:[#allocation12 + $0xa84] ss:$16 sps:$4 sm:$0xff]  }
 0xb78   :  { %12669 = vmatpush1.bf16.msra.mxu1 %v21082_v32  ;;  %11755 = vmatprep.subr.bf16.mxu0 %v21087_v53  ;;  %v21150_v32 = vld [vmem:[#allocation12 + $0xc84] ss:$16 sps:$4 sm:$0xff]   ;;  %v21145_v53 = vld [vmem:[#allocation12 + $0xa80] ss:$16 sps:$4 sm:$0xff]  }
 0xb79   :  { %12670 = vmatprep.subr.bf16.mxu1 %v21090_v23  ;;  %v21148_v23 = vld [vmem:[#allocation12 + $0xc80] ss:$16 sps:$4 sm:$0xff]  }
 0xb7b   :  { %11756 = vmatpush1.bf16.msra.mxu0 %v21085_v59  ;;  %v21153_v59 = vld [vmem:[#allocation12 + $0xaa4] ss:$16 sps:$4 sm:$0xff]  }
 0xb7c   :  { %12671 = vmatpush1.bf16.msra.mxu1 %v21088_v21  ;;  %11757 = vmatprep.subr.bf16.mxu0 %v21093_v58  ;;  %v21156_v21 = vld [vmem:[#allocation12 + $0xca4] ss:$16 sps:$4 sm:$0xff]   ;;  %v21151_v58 = vld [vmem:[#allocation12 + $0xaa0] ss:$16 sps:$4 sm:$0xff]  }
 0xb7d   :  { %12672 = vmatprep.subr.bf16.mxu1 %v21096_v62  ;;  %v21154_v62 = vld [vmem:[#allocation12 + $0xca0] ss:$16 sps:$4 sm:$0xff]  }
 0xb7f   :  { %11758 = vmatpush1.bf16.msra.mxu0 %v21091_v46  ;;  %v21159_v46 = vld [vmem:[#allocation12 + $0xac4] ss:$16 sps:$4 sm:$0xff]  }
 0xb80   :  { %12673 = vmatpush1.bf16.msra.mxu1 %v21094_v2  ;;  %11759 = vmatprep.subr.bf16.mxu0 %v21099_v47 }
 0xb81   :  { %12674 = vmatprep.subr.bf16.mxu1 %v21102_v0  ;;  %v21162_v0 = vld [vmem:[#allocation12 + $0xcc4] ss:$16 sps:$4 sm:$0xff]  }
 0xb83   :  { %11760 = vmatpush1.bf16.msra.mxu0 %v21097_v3 }
 0xb84   :  { %12675 = vmatpush1.bf16.msra.mxu1 %v21100_v4  ;;  %11761 = vmatprep.subr.bf16.mxu0 %v21105_v7 }
 0xb85   :  { %12676 = vmatprep.subr.bf16.mxu1 %v21108_v35 }
 0xb87   :  { %11762 = vmatpush1.bf16.msra.mxu0 %v21103_v31 }
 0xb88   :  { %12677 = vmatpush1.bf16.msra.mxu1 %v21106_v37  ;;  %11763 = vmatprep.subr.bf16.mxu0 %v21111_v8  ;;  %v21157_v37 = vld [vmem:[#allocation12 + $0xac0] ss:$16 sps:$4 sm:$0xff]  }
 0xb89   :  { %12678 = vmatprep.subr.bf16.mxu1 %v21114_v19 }
 0xb8b   :  { %11764 = vmatpush1.bf16.msra.mxu0 %v21109_v5  ;;  %v21160_v5 = vld [vmem:[#allocation12 + $0xcc0] ss:$16 sps:$4 sm:$0xff]  }
 0xb8c   :  { %12679 = vmatpush1.bf16.msra.mxu1 %v21112_v11  ;;  %11765 = vmatprep.subr.bf16.mxu0 %v21117_v20  ;;  %v21163_v20 = vld [vmem:[#allocation12 + $0xae0] ss:$16 sps:$4 sm:$0xff]  }
 0xb8d   :  { %12680 = vmatprep.subr.bf16.mxu1 %v21120_v12  ;;  %v21171_v12 = vld [vmem:[#allocation12 + $0xb04] ss:$16 sps:$4 sm:$0xff]  }
 0xb8f   :  { %11766 = vmatpush1.bf16.msra.mxu0 %v21115_v57  ;;  %v21169_v57 = vld [vmem:[#allocation12 + $0xb00] ss:$16 sps:$4 sm:$0xff]  }
 0xb90   :  { %12681 = vmatpush1.bf16.msra.mxu1 %v21118_v26  ;;  %12609 = vmatprep.subr.bf16.mxu0 %v21123_v27  ;;  %v21175_v26 = vld [vmem:[#allocation12 + $0xb20] ss:$16 sps:$4 sm:$0xff]  }
 0xb91   :  { %13552 = vmatprep.subr.bf16.mxu1 %v21126_v45  ;;  %v21178_v27 = vld [vmem:[#allocation12 + $0xd20] ss:$16 sps:$4 sm:$0xff]   ;;  %v21183_v45 = vld [vmem:[#allocation12 + $0xb44] ss:$16 sps:$4 sm:$0xff]  }
 0xb92   :  { %11768 = vmatmul.mubr.bf16.vlgmr.msra.gmra.mrb[92].mxu0 %v22763_v28  ;;  %v21133_v28 = vld [vmem:[#allocation12 + $0xa40] ss:$16 sps:$4 sm:$0xff]  }
 0xb93   :  { %12683 = vmatmul.mubr.bf16.vlgmr.msra.gmra.mrb[88].mxu1 %v22765_v6  ;;  %12610 = vmatpush1.bf16.msra.mxu0 %v21121_v9  ;;  %v21141_v6 = vld [vmem:[#allocation12 + $0xa64] ss:$16 sps:$4 sm:$0xff]   ;;  %v21181_v9 = vld [vmem:[#allocation12 + $0xb40] ss:$16 sps:$4 sm:$0xff]  }
 0xb94   :  { %12641 = vmatprep.mubr.bf16.mxu0 %v22780_v49  ;;  %13553 = vmatpush1.bf16.msra.mxu1 %v21124_v18  ;;  %v21192_v18 = vld [vmem:[#allocation12 + $0xd64] ss:$16 sps:$4 sm:$0xff]  }
 0xb95   :  { %13584 = vmatprep.mubr.bf16.mxu1 %v22783_v44  ;;  %12611 = vmatprep.subr.bf16.mxu0 %v21129_v63  ;;  %v21187_v63 = vld [vmem:[#allocation12 + $0xb60] ss:$16 sps:$4 sm:$0xff]  }
 0xb96   :  { %13554 = vmatprep.subr.bf16.mxu1 %v21132_v54  ;;  %v21190_v54 = vld [vmem:[#allocation12 + $0xd60] ss:$16 sps:$4 sm:$0xff]  }
 0xb97   :  { %12612 = vmatpush1.bf16.msra.mxu0 %v21127_v30  ;;  %v21195_v30 = vld [vmem:[#allocation12 + $0xb84] ss:$16 sps:$4 sm:$0xff]  }
 0xb98   :  { %13555 = vmatpush1.bf16.msra.mxu1 %v21130_v39  ;;  %12613 = vmatprep.subr.bf16.mxu0 %v21135_v50  ;;  %v21198_v39 = vld [vmem:[#allocation12 + $0xd84] ss:$16 sps:$4 sm:$0xff]   ;;  %v21193_v50 = vld [vmem:[#allocation12 + $0xb80] ss:$16 sps:$4 sm:$0xff]  }
 0xb99   :  { %13556 = vmatprep.subr.bf16.mxu1 %v21138_v36  ;;  %v21196_v36 = vld [vmem:[#allocation12 + $0xd80] ss:$16 sps:$4 sm:$0xff]  }
 0xb9b   :  { %12614 = vmatpush1.bf16.msra.mxu0 %v21133_v28  ;;  %v21201_v28 = vld [vmem:[#allocation12 + $0xba4] ss:$16 sps:$4 sm:$0xff]  }
 0xb9c   :  { %13557 = vmatpush1.bf16.msra.mxu1 %v21136_v25  ;;  %12615 = vmatprep.subr.bf16.mxu0 %v21141_v6  ;;  %v21204_v25 = vld [vmem:[#allocation12 + $0xda4] ss:$16 sps:$4 sm:$0xff]   ;;  %v12736_v6 = vld [vmem:[#allocation3] sm:$0xf8] }
 0xb9d   :  { %13558 = vmatprep.subr.bf16.mxu1 %v21144_v34  ;;  %v12740_v34 = vld [vmem:[#allocation3 + $0x20] sm:$0x7] }
 0xb9f   :  { %12616 = vmatpush1.bf16.msra.mxu0 %v21139_v51  ;;  %v21199_v51 = vld [vmem:[#allocation12 + $0xba0] ss:$16 sps:$4 sm:$0xff]  }
 0xba0   :  { %13559 = vmatpush1.bf16.msra.mxu1 %v21142_v52  ;;  %12617 = vmatprep.subr.bf16.mxu0 %v21147_v61  ;;  %v21202_v52 = vld [vmem:[#allocation12 + $0xda0] ss:$16 sps:$4 sm:$0xff]   ;;  %v21207_v61 = vld [vmem:[#allocation12 + $0xbc4] ss:$16 sps:$4 sm:$0xff]  }
 0xba1   :  { %13560 = vmatprep.subr.bf16.mxu1 %v21150_v32  ;;  %v21210_v32 = vld [vmem:[#allocation12 + $0xdc4] ss:$16 sps:$4 sm:$0xff]  }
 0xba3   :  { %12618 = vmatpush1.bf16.msra.mxu0 %v21145_v53  ;;  %v12744_v53 = vpack.c.bf16 %v12740_v34, %v12736_v6  ;;  %v21253_v34 = vld [vmem:[#allocation12 + $0xac8] ss:$16 sps:$4 sm:$0xff]  }
 0xba4   :  { %13561 = vmatpush1.bf16.msra.mxu1 %v21148_v23  ;;  %12619 = vmatprep.subr.bf16.mxu0 %v21153_v59  ;;  %v21205_v23 = vld [vmem:[#allocation12 + $0xbc0] ss:$16 sps:$4 sm:$0xff]  }
 0xba5   :  { %v10883_v2 = vpop.f32.mrb[80].mxu0  ;;  %v11646_v47 = vpop.f32.mrb[76].mxu1  ;;  %13562 = vmatprep.subr.bf16.mxu1 %v21156_v21  ;;  %v21208_v59 = vld [vmem:[#allocation12 + $0xdc0] ss:$16 sps:$4 sm:$0xff]   ;;  %v21213_v21 = vld [vmem:[#allocation12 + $0xbe4] ss:$16 sps:$4 sm:$0xff]  }
 0xba6   :  { %v10884_v3 = vadd.f32 %v10883_v2, %v22771_v56  ;;  %v10885_v4 = vpop.f32.mrb[81].mxu0  ;;  %v11648_v7 = vpop.f32.mrb[77].mxu1  ;;  %v21168_v56 = vld [vmem:[#allocation12 + $0xce4] ss:$16 sps:$4 sm:$0xff]   ;;  %v12877_v2 = vshrl.u32 %v12744_v53, 16 }
 0xba7   :  { %v10886_v35 = vadd.f32 %v10885_v4, %v22775_v43  ;;  %v10887_v31 = vpop.f32.mrb[82].mxu0  ;;  %v11650_v17 = vpop.f32.mrb[78].mxu1  ;;  %12620 = vmatpush1.bf16.msra.mxu0 %v21151_v58  ;;  %v21166_v43 = vld [vmem:[#allocation12 + $0xce0] ss:$16 sps:$4 sm:$0xff]  }
 0xba8   :  { %v22789_v8 = vadd.f32 %v11646_v47, %v10884_v3  ;;  %13563 = vmatpush1.bf16.msra.mxu1 %v21154_v62  ;;  %v10888_v10 = vpop.f32.mrb[83].mxu0  ;;  %v11651_v19 = vpop.f32.mrb[79].mxu1  ;;  %12621 = vmatprep.subr.bf16.mxu0 %v21159_v46  ;;  %v11778_v58 = vld [vmem:[#allocation3 + $0x10] sm:$0xfc]  ;;  %v21216_v62 = vld [vmem:[#allocation12 + $0xde4] ss:$16 sps:$4 sm:$0xff]  }
 0xba9   :  { %v22791_v11 = vadd.f32 %v11648_v7, %v10886_v35  ;;  %13564 = vmatprep.subr.bf16.mxu1 %v21162_v0  ;;  %v11782_v46 = vld [vmem:[#allocation3 + $0x30] sm:$0x3]  ;;  %v12880_v47 = vshll.u32 %v12744_v53, 16  ;;  %v21211_v0 = vld [vmem:[#allocation12 + $0xbe0] ss:$16 sps:$4 sm:$0xff]   ;;  %v12879_v35 = vrot.slane %v12877_v2, 1 }
 0xbaa   :  { %v21214_v3 = vld [vmem:[#allocation12 + $0xde0] ss:$16 sps:$4 sm:$0xff]   ;;  %v11786_v4 = vpack.c.bf16 %v11782_v46, %v11778_v58  ;;  %v21219_v7 = vld [vmem:[#allocation12 + $0xa0c] ss:$16 sps:$4 sm:$0xff]   ;;  %v21220_v19 = vld [vmem:[#allocation12 + $0xc08] ss:$16 sps:$4 sm:$0xff]  }
 0xbab   :  { %12622 = vmatpush1.bf16.msra.mxu0 %v21157_v37  ;;  %v12882_v31 = vrot.slane %v12880_v47, 2  ;;  %v21222_v17 = vld [vmem:[#allocation12 + $0xc0c] ss:$16 sps:$4 sm:$0xff]   ;;  %v21217_v37 = vld [vmem:[#allocation12 + $0xa08] ss:$16 sps:$4 sm:$0xff]  }
 0xbac   :  { %13565 = vmatpush1.bf16.msra.mxu1 %v21160_v5  ;;  %12623 = vmatprep.subr.bf16.mxu0 %v21165_v22  ;;  %v22793_v10 = vrot.slane %v11786_v4, 1  ;;  %v21225_v22 = vld [vmem:[#allocation12 + $0xa2c] ss:$16 sps:$4 sm:$0xff]   ;;  %v21265_v46 = vld [vmem:[#allocation12 + $0xb08] ss:$16 sps:$4 sm:$0xff]  }
 0xbad   :  { %13566 = vmatprep.subr.bf16.mxu1 %v21168_v56  ;;  %v22795_v5 = vor.u32 %v12882_v31, %v12879_v35  ;;  %v21228_v56 = vld [vmem:[#allocation12 + $0xc2c] ss:$16 sps:$4 sm:$0xff]   ;;  %v21268_v2 = vld [vmem:[#allocation12 + $0xd08] ss:$16 sps:$4 sm:$0xff]  }
 0xbae   :  { %v21261_v53 = vld [vmem:[#allocation12 + $0xaec] ss:$16 sps:$4 sm:$0xff]   ;;  %v21274_v4 = vld [vmem:[#allocation12 + $0xd28] ss:$16 sps:$4 sm:$0xff]  }
 0xbaf   :  { %12624 = vmatpush1.bf16.msra.mxu0 %v21163_v20  ;;  %v21223_v20 = vld [vmem:[#allocation12 + $0xa28] ss:$16 sps:$4 sm:$0xff]   ;;  %v21267_v58 = vld [vmem:[#allocation12 + $0xb0c] ss:$16 sps:$4 sm:$0xff]  }
 0xbb0   :  { %13567 = vmatpush1.bf16.msra.mxu1 %v21166_v43  ;;  %12625 = vmatprep.subr.bf16.mxu0 %v21171_v12  ;;  %v21226_v43 = vld [vmem:[#allocation12 + $0xc28] ss:$16 sps:$4 sm:$0xff]   ;;  %v21231_v12 = vld [vmem:[#allocation12 + $0xa4c] ss:$16 sps:$4 sm:$0xff]  }
 0xbb1   :  { %13568 = vmatprep.subr.bf16.mxu1 %v21174_v13  ;;  %v21234_v13 = vld [vmem:[#allocation12 + $0xc4c] ss:$16 sps:$4 sm:$0xff]   ;;  %v21277_v31 = vld [vmem:[#allocation12 + $0xb48] ss:$16 sps:$4 sm:$0xff]  }
 0xbb2   :  { %v21273_v47 = vld [vmem:[#allocation12 + $0xb2c] ss:$16 sps:$4 sm:$0xff]  }
 0xbb3   :  { %12626 = vmatpush1.bf16.msra.mxu0 %v21169_v57  ;;  %v21229_v57 = vld [vmem:[#allocation12 + $0xa48] ss:$16 sps:$4 sm:$0xff]   ;;  %v21282_v35 = vld [vmem:[#allocation12 + $0xd4c] ss:$16 sps:$4 sm:$0xff]  }
 0xbb4   :  { %13569 = vmatpush1.bf16.msra.mxu1 %v21172_v14  ;;  %12627 = vmatprep.subr.bf16.mxu0 %v21177_v55  ;;  %v21232_v14 = vld [vmem:[#allocation12 + $0xc48] ss:$16 sps:$4 sm:$0xff]   ;;  %v21237_v55 = vld [vmem:[#allocation12 + $0xa6c] ss:$16 sps:$4 sm:$0xff]  }
 0xbb5   :  { %13570 = vmatprep.subr.bf16.mxu1 %v21180_v24  ;;  %v21240_v24 = vld [vmem:[#allocation12 + $0xc6c] ss:$16 sps:$4 sm:$0xff]  }
 0xbb7   :  { %12628 = vmatpush1.bf16.msra.mxu0 %v21175_v26  ;;  %v21235_v26 = vld [vmem:[#allocation12 + $0xa68] ss:$16 sps:$4 sm:$0xff]  }
 0xbb8   :  { %13571 = vmatpush1.bf16.msra.mxu1 %v21178_v27  ;;  %12629 = vmatprep.subr.bf16.mxu0 %v21183_v45  ;;  %v21243_v27 = vld [vmem:[#allocation12 + $0xa8c] ss:$16 sps:$4 sm:$0xff]  }
 0xbb9   :  { %13572 = vmatprep.subr.bf16.mxu1 %v21186_v48  ;;  %v21246_v45 = vld [vmem:[#allocation12 + $0xc8c] ss:$16 sps:$4 sm:$0xff]   ;;  %v21244_v48 = vld [vmem:[#allocation12 + $0xc88] ss:$16 sps:$4 sm:$0xff]  }
 0xbbb   :  { %12630 = vmatpush1.bf16.msra.mxu0 %v21181_v9  ;;  %v21249_v9 = vld [vmem:[#allocation12 + $0xaac] ss:$16 sps:$4 sm:$0xff]  }
 0xbbc   :  { %13573 = vmatpush1.bf16.msra.mxu1 %v21184_v60  ;;  %12631 = vmatprep.subr.bf16.mxu0 %v21189_v42  ;;  %v21252_v60 = vld [vmem:[#allocation12 + $0xcac] ss:$16 sps:$4 sm:$0xff]   ;;  %v21247_v42 = vld [vmem:[#allocation12 + $0xaa8] ss:$16 sps:$4 sm:$0xff]  }
 0xbbd   :  { %13574 = vmatprep.subr.bf16.mxu1 %v21192_v18  ;;  %v21250_v18 = vld [vmem:[#allocation12 + $0xca8] ss:$16 sps:$4 sm:$0xff]  }
 0xbbf   :  { %12632 = vmatpush1.bf16.msra.mxu0 %v21187_v63  ;;  %v21255_v63 = vld [vmem:[#allocation12 + $0xacc] ss:$16 sps:$4 sm:$0xff]  }
 0xbc0   :  { %13575 = vmatpush1.bf16.msra.mxu1 %v21190_v54  ;;  %12633 = vmatprep.subr.bf16.mxu0 %v21195_v30  ;;  %v21258_v30 = vld [vmem:[#allocation12 + $0xccc] ss:$16 sps:$4 sm:$0xff]  }
 0xbc1   :  { %13576 = vmatprep.subr.bf16.mxu1 %v21198_v39 }
 0xbc3   :  { %12634 = vmatpush1.bf16.msra.mxu0 %v21193_v50 }
 0xbc4   :  { %13577 = vmatpush1.bf16.msra.mxu1 %v21196_v36  ;;  %12635 = vmatprep.subr.bf16.mxu0 %v21201_v28 }
 0xbc5   :  { %13578 = vmatprep.subr.bf16.mxu1 %v21204_v25 }
 0xbc7   :  { %12636 = vmatpush1.bf16.msra.mxu0 %v21199_v51 }
 0xbc8   :  { %13579 = vmatpush1.bf16.msra.mxu1 %v21202_v52  ;;  %12637 = vmatprep.subr.bf16.mxu0 %v21207_v61 }
 0xbc9   :  { %13580 = vmatprep.subr.bf16.mxu1 %v21210_v32  ;;  %v21256_v32 = vld [vmem:[#allocation12 + $0xcc8] ss:$16 sps:$4 sm:$0xff]  }
 0xbcb   :  { %12638 = vmatpush1.bf16.msra.mxu0 %v21205_v23 }
 0xbcc   :  { %13581 = vmatpush1.bf16.msra.mxu1 %v21208_v59  ;;  %12639 = vmatprep.subr.bf16.mxu0 %v21213_v21  ;;  %v21259_v21 = vld [vmem:[#allocation12 + $0xae8] ss:$16 sps:$4 sm:$0xff]  }
 0xbcd   :  { %13582 = vmatprep.subr.bf16.mxu1 %v21216_v62  ;;  %v21270_v62 = vld [vmem:[#allocation12 + $0xd0c] ss:$16 sps:$4 sm:$0xff]  }
 0xbcf   :  { %12640 = vmatpush1.bf16.msra.mxu0 %v21211_v0  ;;  %v21276_v0 = vld [vmem:[#allocation12 + $0xd2c] ss:$16 sps:$4 sm:$0xff]  }
 0xbd0   :  { %13583 = vmatpush1.bf16.msra.mxu1 %v21214_v3  ;;  %12691 = vmatprep.subr.bf16.mxu0 %v21219_v7  ;;  %v21271_v3 = vld [vmem:[#allocation12 + $0xb28] ss:$16 sps:$4 sm:$0xff]   ;;  %v21279_v7 = vld [vmem:[#allocation12 + $0xb4c] ss:$16 sps:$4 sm:$0xff]  }
 0xbd1   :  { %13634 = vmatprep.subr.bf16.mxu1 %v21222_v17  ;;  %v21280_v17 = vld [vmem:[#allocation12 + $0xd48] ss:$16 sps:$4 sm:$0xff]  }
 0xbd2   :  { %12642 = vmatmul.mubr.bf16.vlgmr.msra.gmra.mrb[96].mxu0 %v22793_v10 }
 0xbd3   :  { %13585 = vmatmul.mubr.bf16.vlgmr.msra.gmra.mrb[92].mxu1 %v22795_v5  ;;  %12692 = vmatpush1.bf16.msra.mxu0 %v21217_v37  ;;  %v21285_v37 = vld [vmem:[#allocation12 + $0xb6c] ss:$16 sps:$4 sm:$0xff]  }
 0xbd4   :  { %12723 = vmatprep.mubr.bf16.mxu0 %v22780_v49  ;;  %13635 = vmatpush1.bf16.msra.mxu1 %v21220_v19  ;;  %v21238_v49 = vld [vmem:[#allocation12 + $0xc68] ss:$16 sps:$4 sm:$0xff]   ;;  %v21288_v19 = vld [vmem:[#allocation12 + $0xd6c] ss:$16 sps:$4 sm:$0xff]  }
 0xbd5   :  { %13666 = vmatprep.mubr.bf16.mxu1 %v22783_v44  ;;  %12693 = vmatprep.subr.bf16.mxu0 %v21225_v22  ;;  %v21241_v44 = vld [vmem:[#allocation12 + $0xa88] ss:$16 sps:$4 sm:$0xff]  }
 0xbd6   :  { %13636 = vmatprep.subr.bf16.mxu1 %v21228_v56  ;;  %v21283_v22 = vld [vmem:[#allocation12 + $0xb68] ss:$16 sps:$4 sm:$0xff]  }
 0xbd7   :  { %12694 = vmatpush1.bf16.msra.mxu0 %v21223_v20  ;;  %v21286_v56 = vld [vmem:[#allocation12 + $0xd68] ss:$16 sps:$4 sm:$0xff]   ;;  %v21291_v20 = vld [vmem:[#allocation12 + $0xb8c] ss:$16 sps:$4 sm:$0xff]  }
 0xbd8   :  { %13637 = vmatpush1.bf16.msra.mxu1 %v21226_v43  ;;  %12695 = vmatprep.subr.bf16.mxu0 %v21231_v12  ;;  %v21294_v43 = vld [vmem:[#allocation12 + $0xd8c] ss:$16 sps:$4 sm:$0xff]   ;;  %v21289_v12 = vld [vmem:[#allocation12 + $0xb88] ss:$16 sps:$4 sm:$0xff]  }
 0xbd9   :  { %13638 = vmatprep.subr.bf16.mxu1 %v21234_v13  ;;  %v21292_v13 = vld [vmem:[#allocation12 + $0xd88] ss:$16 sps:$4 sm:$0xff]  }
 0xbdb   :  { %12696 = vmatpush1.bf16.msra.mxu0 %v21229_v57  ;;  %v21297_v57 = vld [vmem:[#allocation12 + $0xbac] ss:$16 sps:$4 sm:$0xff]  }
 0xbdc   :  { %13639 = vmatpush1.bf16.msra.mxu1 %v21232_v14  ;;  %12697 = vmatprep.subr.bf16.mxu0 %v21237_v55  ;;  %v21300_v14 = vld [vmem:[#allocation12 + $0xdac] ss:$16 sps:$4 sm:$0xff]   ;;  %v21295_v55 = vld [vmem:[#allocation12 + $0xba8] ss:$16 sps:$4 sm:$0xff]  }
 0xbdd   :  { %13640 = vmatprep.subr.bf16.mxu1 %v21240_v24  ;;  %v12739_v24 = vld [vmem:[#allocation3 + $0x18] sm:$0xf8] }
 0xbdf   :  { %12698 = vmatpush1.bf16.msra.mxu0 %v21235_v26  ;;  %v12743_v26 = vld [vmem:[#allocation3 + $0x38] sm:$0x7] }
 0xbe0   :  { %13641 = vmatpush1.bf16.msra.mxu1 %v21238_v49  ;;  %12699 = vmatprep.subr.bf16.mxu0 %v21243_v27  ;;  %v21298_v49 = vld [vmem:[#allocation12 + $0xda8] ss:$16 sps:$4 sm:$0xff]   ;;  %v21303_v27 = vld [vmem:[#allocation12 + $0xbcc] ss:$16 sps:$4 sm:$0xff]  }
 0xbe1   :  { %13642 = vmatprep.subr.bf16.mxu1 %v21246_v45  ;;  %v21306_v45 = vld [vmem:[#allocation12 + $0xdcc] ss:$16 sps:$4 sm:$0xff]  }
 0xbe3   :  { %12700 = vmatpush1.bf16.msra.mxu0 %v21241_v44  ;;  %v12747_v44 = vpack.c.bf16 %v12743_v26, %v12739_v24  ;;  %v21349_v24 = vld [vmem:[#allocation12 + $0xec0] ss:$16 sps:$4 sm:$0xff]  }
 0xbe4   :  { %13643 = vmatpush1.bf16.msra.mxu1 %v21244_v48  ;;  %12701 = vmatprep.subr.bf16.mxu0 %v21249_v9  ;;  %v21301_v48 = vld [vmem:[#allocation12 + $0xbc8] ss:$16 sps:$4 sm:$0xff]  }
 0xbe5   :  { %v10965_v54 = vpop.f32.mrb[84].mxu0  ;;  %13644 = vmatprep.subr.bf16.mxu1 %v21252_v60  ;;  %v21304_v9 = vld [vmem:[#allocation12 + $0xdc8] ss:$16 sps:$4 sm:$0xff]   ;;  %v21309_v60 = vld [vmem:[#allocation12 + $0xbec] ss:$16 sps:$4 sm:$0xff]  }
 0xbe6   :  { %v10966_v39 = vadd.f32 %v10965_v54, %v22773_v29  ;;  %v11728_v50 = vpop.f32.mrb[80].mxu1  ;;  %v10967_v36 = vpop.f32.mrb[85].mxu0  ;;  %v21264_v29 = vld [vmem:[#allocation12 + $0xcec] ss:$16 sps:$4 sm:$0xff]   ;;  %v21307_v54 = vld [vmem:[#allocation12 + $0xbe8] ss:$16 sps:$4 sm:$0xff]  }
 0xbe7   :  { %v10968_v28 = vadd.f32 %v10967_v36, %v22777_v33  ;;  %v11730_v25 = vpop.f32.mrb[81].mxu1  ;;  %v10969_v6 = vpop.f32.mrb[86].mxu0  ;;  %12702 = vmatpush1.bf16.msra.mxu0 %v21247_v42  ;;  %v21262_v33 = vld [vmem:[#allocation12 + $0xce8] ss:$16 sps:$4 sm:$0xff]   ;;  %v21312_v42 = vld [vmem:[#allocation12 + $0xdec] ss:$16 sps:$4 sm:$0xff]  }
 0xbe8   :  { %v22803_v51 = vadd.f32 %v11728_v50, %v10966_v39  ;;  %v11732_v52 = vpop.f32.mrb[82].mxu1  ;;  %13645 = vmatpush1.bf16.msra.mxu1 %v21250_v18  ;;  %v10970_v61 = vpop.f32.mrb[87].mxu0  ;;  %12703 = vmatprep.subr.bf16.mxu0 %v21255_v63  ;;  %v12901_v18 = vshrl.u32 %v12747_v44, 16  ;;  %v12904_v63 = vshll.u32 %v12747_v44, 16  ;;  %v21310_v39 = vld [vmem:[#allocation12 + $0xde8] ss:$16 sps:$4 sm:$0xff]  }
 0xbe9   :  { %v22805_v23 = vadd.f32 %v11730_v25, %v10968_v28  ;;  %v11733_v59 = vpop.f32.mrb[83].mxu1  ;;  %13646 = vmatprep.subr.bf16.mxu1 %v21258_v30  ;;  %v13721_v30 = vld [vmem:[#allocation3 + $0x8] sm:$0xf0]  ;;  %v21315_v50 = vld [vmem:[#allocation12 + $0xe04] ss:$16 sps:$4 sm:$0xff]  }
 0xbea   :  { %v13725_v36 = vld [vmem:[#allocation3 + $0x28] sm:$0xf]  ;;  %v12903_v25 = vrot.slane %v12901_v18, 1  ;;  %v12906_v6 = vrot.slane %v12904_v63, 2  ;;  %v21316_v61 = vld [vmem:[#allocation12 + $0x1000] ss:$16 sps:$4 sm:$0xff]  }
 0xbeb   :  { %12704 = vmatpush1.bf16.msra.mxu0 %v21253_v34  ;;  %v21318_v28 = vld [vmem:[#allocation12 + $0x1004] ss:$16 sps:$4 sm:$0xff]   ;;  %v21313_v34 = vld [vmem:[#allocation12 + $0xe00] ss:$16 sps:$4 sm:$0xff]   ;;  %v13729_v52 = vpack.c.bf16 %v13725_v36, %v13721_v30 }
 0xbec   :  { %13647 = vmatpush1.bf16.msra.mxu1 %v21256_v32  ;;  %12705 = vmatprep.subr.bf16.mxu0 %v21261_v53  ;;  %v21321_v32 = vld [vmem:[#allocation12 + $0xe24] ss:$16 sps:$4 sm:$0xff]   ;;  %v22808_v53 = vor.u32 %v12906_v6, %v12903_v25  ;;  %v21364_v18 = vld [vmem:[#allocation12 + $0x1100] ss:$16 sps:$4 sm:$0xff]  }
 0xbed   :  { %13648 = vmatprep.subr.bf16.mxu1 %v21264_v29  ;;  %v21324_v59 = vld [vmem:[#allocation12 + $0x1024] ss:$16 sps:$4 sm:$0xff]   ;;  %v22811_v29 = vrot.slane %v13729_v52, 2  ;;  %v21367_v30 = vld [vmem:[#allocation12 + $0xf20] ss:$16 sps:$4 sm:$0xff]  }
 0xbee   :  { %v21369_v63 = vld [vmem:[#allocation12 + $0xf24] ss:$16 sps:$4 sm:$0xff]   ;;  %v21376_v25 = vld [vmem:[#allocation12 + $0x1140] ss:$16 sps:$4 sm:$0xff]  }
 0xbef   :  { %12706 = vmatpush1.bf16.msra.mxu0 %v21259_v21  ;;  %v21319_v21 = vld [vmem:[#allocation12 + $0xe20] ss:$16 sps:$4 sm:$0xff]   ;;  %v21378_v36 = vld [vmem:[#allocation12 + $0x1144] ss:$16 sps:$4 sm:$0xff]  }
 0xbf0   :  { %13649 = vmatpush1.bf16.msra.mxu1 %v21262_v33  ;;  %12707 = vmatprep.subr.bf16.mxu0 %v21267_v58  ;;  %v21322_v33 = vld [vmem:[#allocation12 + $0x1020] ss:$16 sps:$4 sm:$0xff]   ;;  %v21327_v58 = vld [vmem:[#allocation12 + $0xe44] ss:$16 sps:$4 sm:$0xff]  }
 0xbf1   :  { %13650 = vmatprep.subr.bf16.mxu1 %v21270_v62  ;;  %v21330_v62 = vld [vmem:[#allocation12 + $0x1044] ss:$16 sps:$4 sm:$0xff]   ;;  %v21379_v52 = vld [vmem:[#allocation12 + $0xf60] ss:$16 sps:$4 sm:$0xff]  }
 0xbf2   :  { %v21381_v6 = vld [vmem:[#allocation12 + $0xf64] ss:$16 sps:$4 sm:$0xff]  }
 0xbf3   :  { %12708 = vmatpush1.bf16.msra.mxu0 %v21265_v46  ;;  %v21328_v46 = vld [vmem:[#allocation12 + $0x1040] ss:$16 sps:$4 sm:$0xff]  }
 0xbf4   :  { %13651 = vmatpush1.bf16.msra.mxu1 %v21268_v2  ;;  %12709 = vmatprep.subr.bf16.mxu0 %v21273_v47  ;;  %v21336_v2 = vld [vmem:[#allocation12 + $0x1064] ss:$16 sps:$4 sm:$0xff]   ;;  %v21331_v47 = vld [vmem:[#allocation12 + $0xe60] ss:$16 sps:$4 sm:$0xff]  }
 0xbf5   :  { %13652 = vmatprep.subr.bf16.mxu1 %v21276_v0  ;;  %v21334_v0 = vld [vmem:[#allocation12 + $0x1060] ss:$16 sps:$4 sm:$0xff]  }
 0xbf7   :  { %12710 = vmatpush1.bf16.msra.mxu0 %v21271_v3  ;;  %v21339_v3 = vld [vmem:[#allocation12 + $0xe84] ss:$16 sps:$4 sm:$0xff]  }
 0xbf8   :  { %13653 = vmatpush1.bf16.msra.mxu1 %v21274_v4  ;;  %12711 = vmatprep.subr.bf16.mxu0 %v21279_v7  ;;  %v21342_v4 = vld [vmem:[#allocation12 + $0x1084] ss:$16 sps:$4 sm:$0xff]   ;;  %v21337_v7 = vld [vmem:[#allocation12 + $0xe80] ss:$16 sps:$4 sm:$0xff]  }
 0xbf9   :  { %13654 = vmatprep.subr.bf16.mxu1 %v21282_v35  ;;  %v21340_v35 = vld [vmem:[#allocation12 + $0x1080] ss:$16 sps:$4 sm:$0xff]  }
 0xbfb   :  { %12712 = vmatpush1.bf16.msra.mxu0 %v21277_v31  ;;  %v21345_v31 = vld [vmem:[#allocation12 + $0xea4] ss:$16 sps:$4 sm:$0xff]  }
 0xbfc   :  { %13655 = vmatpush1.bf16.msra.mxu1 %v21280_v17  ;;  %12713 = vmatprep.subr.bf16.mxu0 %v21285_v37  ;;  %v21348_v17 = vld [vmem:[#allocation12 + $0x10a4] ss:$16 sps:$4 sm:$0xff]   ;;  %v21343_v37 = vld [vmem:[#allocation12 + $0xea0] ss:$16 sps:$4 sm:$0xff]  }
 0xbfd   :  { %13656 = vmatprep.subr.bf16.mxu1 %v21288_v19  ;;  %v21346_v19 = vld [vmem:[#allocation12 + $0x10a0] ss:$16 sps:$4 sm:$0xff]  }
 0xbff   :  { %12714 = vmatpush1.bf16.msra.mxu0 %v21283_v22  ;;  %v21351_v22 = vld [vmem:[#allocation12 + $0xec4] ss:$16 sps:$4 sm:$0xff]  }
 0xc00   :  { %13657 = vmatpush1.bf16.msra.mxu1 %v21286_v56  ;;  %12715 = vmatprep.subr.bf16.mxu0 %v21291_v20  ;;  %v21354_v20 = vld [vmem:[#allocation12 + $0x10c4] ss:$16 sps:$4 sm:$0xff]  }
 0xc01   :  { %13658 = vmatprep.subr.bf16.mxu1 %v21294_v43 }
 0xc03   :  { %12716 = vmatpush1.bf16.msra.mxu0 %v21289_v12 }
 0xc04   :  { %13659 = vmatpush1.bf16.msra.mxu1 %v21292_v13  ;;  %12717 = vmatprep.subr.bf16.mxu0 %v21297_v57 }
 0xc05   :  { %13660 = vmatprep.subr.bf16.mxu1 %v21300_v14 }
 0xc07   :  { %12718 = vmatpush1.bf16.msra.mxu0 %v21295_v55 }
 0xc08   :  { %13661 = vmatpush1.bf16.msra.mxu1 %v21298_v49  ;;  %12719 = vmatprep.subr.bf16.mxu0 %v21303_v27  ;;  %v21352_v27 = vld [vmem:[#allocation12 + $0x10c0] ss:$16 sps:$4 sm:$0xff]  }
 0xc09   :  { %13662 = vmatprep.subr.bf16.mxu1 %v21306_v45  ;;  %v21357_v45 = vld [vmem:[#allocation12 + $0xee4] ss:$16 sps:$4 sm:$0xff]  }
 0xc0b   :  { %12720 = vmatpush1.bf16.msra.mxu0 %v21301_v48  ;;  %v21355_v48 = vld [vmem:[#allocation12 + $0xee0] ss:$16 sps:$4 sm:$0xff]  }
 0xc0c   :  { %13663 = vmatpush1.bf16.msra.mxu1 %v21304_v9  ;;  %12721 = vmatprep.subr.bf16.mxu0 %v21309_v60  ;;  %v21363_v9 = vld [vmem:[#allocation12 + $0xf04] ss:$16 sps:$4 sm:$0xff]  }
 0xc0d   :  { %13664 = vmatprep.subr.bf16.mxu1 %v21312_v42  ;;  %v21366_v60 = vld [vmem:[#allocation12 + $0x1104] ss:$16 sps:$4 sm:$0xff]   ;;  %v21361_v42 = vld [vmem:[#allocation12 + $0xf00] ss:$16 sps:$4 sm:$0xff]  }
 0xc0f   :  { %12722 = vmatpush1.bf16.msra.mxu0 %v21307_v54  ;;  %v21372_v54 = vld [vmem:[#allocation12 + $0x1124] ss:$16 sps:$4 sm:$0xff]  }
 0xc10   :  { %13665 = vmatpush1.bf16.msra.mxu1 %v21310_v39  ;;  %13593 = vmatprep.subr.bf16.mxu0 %v21315_v50  ;;  %v21370_v39 = vld [vmem:[#allocation12 + $0x1120] ss:$16 sps:$4 sm:$0xff]   ;;  %v21375_v50 = vld [vmem:[#allocation12 + $0xf44] ss:$16 sps:$4 sm:$0xff]  }
 0xc11   :  { %14512 = vmatprep.subr.bf16.mxu1 %v21318_v28  ;;  %v21373_v28 = vld [vmem:[#allocation12 + $0xf40] ss:$16 sps:$4 sm:$0xff]  }
 0xc12   :  { %12724 = vmatmul.mubr.bf16.vlgmr.msra.gmra.mrb[100].mxu0 %v22793_v10  ;;  %v21325_v10 = vld [vmem:[#allocation12 + $0xe40] ss:$16 sps:$4 sm:$0xff]  }
 0xc13   :  { %13667 = vmatmul.mubr.bf16.vlgmr.msra.gmra.mrb[96].mxu1 %v22795_v5  ;;  %13594 = vmatpush1.bf16.msra.mxu0 %v21313_v34  ;;  %v21333_v5 = vld [vmem:[#allocation12 + $0xe64] ss:$16 sps:$4 sm:$0xff]  }
 0xc14   :  { %13625 = vmatprep.mubr.bf16.mxu0 %v22808_v53  ;;  %14513 = vmatpush1.bf16.msra.mxu1 %v21316_v61  ;;  %v21384_v34 = vld [vmem:[#allocation12 + $0x1164] ss:$16 sps:$4 sm:$0xff]   ;;  %v21382_v61 = vld [vmem:[#allocation12 + $0x1160] ss:$16 sps:$4 sm:$0xff]  }
 0xc15   :  { %14544 = vmatprep.mubr.bf16.mxu1 %v22811_v29  ;;  %13595 = vmatprep.subr.bf16.mxu0 %v21321_v32  ;;  %v21387_v32 = vld [vmem:[#allocation12 + $0xf84] ss:$16 sps:$4 sm:$0xff]  }
 0xc16   :  { %14514 = vmatprep.subr.bf16.mxu1 %v21324_v59  ;;  %v21390_v59 = vld [vmem:[#allocation12 + $0x1184] ss:$16 sps:$4 sm:$0xff]  }
 0xc17   :  { %13596 = vmatpush1.bf16.msra.mxu0 %v21319_v21  ;;  %v21385_v21 = vld [vmem:[#allocation12 + $0xf80] ss:$16 sps:$4 sm:$0xff]  }
 0xc18   :  { %14515 = vmatpush1.bf16.msra.mxu1 %v21322_v33  ;;  %13597 = vmatprep.subr.bf16.mxu0 %v21327_v58  ;;  %v21388_v33 = vld [vmem:[#allocation12 + $0x1180] ss:$16 sps:$4 sm:$0xff]   ;;  %v21393_v58 = vld [vmem:[#allocation12 + $0xfa4] ss:$16 sps:$4 sm:$0xff]  }
 0xc19   :  { %14516 = vmatprep.subr.bf16.mxu1 %v21330_v62  ;;  %v21396_v62 = vld [vmem:[#allocation12 + $0x11a4] ss:$16 sps:$4 sm:$0xff]  }
 0xc1b   :  { %13598 = vmatpush1.bf16.msra.mxu0 %v21325_v10  ;;  %v12738_v10 = vld [vmem:[#allocation3 + $0x10] sm:$0xf8] }
 0xc1c   :  { %14517 = vmatpush1.bf16.msra.mxu1 %v21328_v46  ;;  %13599 = vmatprep.subr.bf16.mxu0 %v21333_v5  ;;  %v12742_v46 = vld [vmem:[#allocation3 + $0x30] sm:$0x7]  ;;  %v21391_v5 = vld [vmem:[#allocation12 + $0xfa0] ss:$16 sps:$4 sm:$0xff]  }
 0xc1d   :  { %14518 = vmatprep.subr.bf16.mxu1 %v21336_v2  ;;  %v21394_v2 = vld [vmem:[#allocation12 + $0x11a0] ss:$16 sps:$4 sm:$0xff]  }
 0xc1f   :  { %13600 = vmatpush1.bf16.msra.mxu0 %v21331_v47  ;;  %v21399_v47 = vld [vmem:[#allocation12 + $0xfc4] ss:$16 sps:$4 sm:$0xff]  }
 0xc20   :  { %14519 = vmatpush1.bf16.msra.mxu1 %v21334_v0  ;;  %13601 = vmatprep.subr.bf16.mxu0 %v21339_v3  ;;  %v12746_v0 = vpack.c.bf16 %v12742_v46, %v12738_v10  ;;  %v21402_v3 = vld [vmem:[#allocation12 + $0x11c4] ss:$16 sps:$4 sm:$0xff]  }
 0xc21   :  { %14520 = vmatprep.subr.bf16.mxu1 %v21342_v4  ;;  %v21397_v4 = vld [vmem:[#allocation12 + $0xfc0] ss:$16 sps:$4 sm:$0xff]  }
 0xc23   :  { %13602 = vmatpush1.bf16.msra.mxu0 %v21337_v7  ;;  %v21400_v7 = vld [vmem:[#allocation12 + $0x11c0] ss:$16 sps:$4 sm:$0xff]  }
 0xc24   :  { %14521 = vmatpush1.bf16.msra.mxu1 %v21340_v35  ;;  %13603 = vmatprep.subr.bf16.mxu0 %v21345_v31  ;;  %v21405_v35 = vld [vmem:[#allocation12 + $0xfe4] ss:$16 sps:$4 sm:$0xff]   ;;  %v12893_v31 = vshrl.u32 %v12746_v0, 16 }
 0xc25   :  { %v11687_v56 = vpop.f32.mrb[88].mxu0  ;;  %14522 = vmatprep.subr.bf16.mxu1 %v21348_v17  ;;  %v12896_v17 = vshll.u32 %v12746_v0, 16 }
 0xc26   :  { %v22816_v43 = vadd.f32 %v11687_v56, %v22789_v8  ;;  %v22818_v12 = vpop.f32.mrb[84].mxu1  ;;  %v11689_v13 = vpop.f32.mrb[89].mxu0  ;;  %v21360_v8 = vld [vmem:[#allocation12 + $0x10e4] ss:$16 sps:$4 sm:$0xff]   ;;  %v21403_v56 = vld [vmem:[#allocation12 + $0xfe0] ss:$16 sps:$4 sm:$0xff]  }
 0xc27   :  { %v22821_v57 = vadd.f32 %v11689_v13, %v22791_v11  ;;  %v22823_v14 = vpop.f32.mrb[85].mxu1  ;;  %v11691_v55 = vpop.f32.mrb[90].mxu0  ;;  %13604 = vmatpush1.bf16.msra.mxu0 %v21343_v37  ;;  %v21358_v11 = vld [vmem:[#allocation12 + $0x10e0] ss:$16 sps:$4 sm:$0xff]   ;;  %v21408_v37 = vld [vmem:[#allocation12 + $0x11e4] ss:$16 sps:$4 sm:$0xff]  }
 0xc28   :  { %v12606_v26 = vpop.f32.mrb[86].mxu1  ;;  %14523 = vmatpush1.bf16.msra.mxu1 %v21346_v19  ;;  %v11692_v49 = vpop.f32.mrb[91].mxu0  ;;  %13605 = vmatprep.subr.bf16.mxu0 %v21351_v22  ;;  %v13720_v19 = vld [vmem:[#allocation3] sm:$0xf0]  ;;  %v13724_v22 = vld [vmem:[#allocation3 + $0x20] sm:$0xf] }
 0xc29   :  { %v12607_v44 = vpop.f32.mrb[87].mxu1  ;;  %14524 = vmatprep.subr.bf16.mxu1 %v21354_v20  ;;  %v21406_v20 = vld [vmem:[#allocation12 + $0x11e0] ss:$16 sps:$4 sm:$0xff]   ;;  %v12895_v13 = vrot.slane %v12893_v31, 1  ;;  %v12898_v55 = vrot.slane %v12896_v17, 2  ;;  %v13728_v26 = vpack.c.bf16 %v13724_v22, %v13720_v19 }
 0xc2a   :  { %v21414_v49 = vld [vmem:[#allocation12 + $0x100c] ss:$16 sps:$4 sm:$0xff]   ;;  %v21412_v44 = vld [vmem:[#allocation12 + $0x1008] ss:$16 sps:$4 sm:$0xff]  }
 0xc2b   :  { %13606 = vmatpush1.bf16.msra.mxu0 %v21349_v24  ;;  %v21411_v24 = vld [vmem:[#allocation12 + $0xe0c] ss:$16 sps:$4 sm:$0xff]   ;;  %v21460_v19 = vld [vmem:[#allocation12 + $0x1108] ss:$16 sps:$4 sm:$0xff]  }
 0xc2c   :  { %14525 = vmatpush1.bf16.msra.mxu1 %v21352_v27  ;;  %13607 = vmatprep.subr.bf16.mxu0 %v21357_v45  ;;  %v21409_v27 = vld [vmem:[#allocation12 + $0xe08] ss:$16 sps:$4 sm:$0xff]   ;;  %v22825_v45 = vor.u32 %v12898_v55, %v12895_v13  ;;  %v21459_v31 = vld [vmem:[#allocation12 + $0xf0c] ss:$16 sps:$4 sm:$0xff]  }
 0xc2d   :  { %14526 = vmatprep.subr.bf16.mxu1 %v21360_v8  ;;  %v22827_v8 = vrot.slane %v13728_v26, 2  ;;  %v21462_v17 = vld [vmem:[#allocation12 + $0x110c] ss:$16 sps:$4 sm:$0xff]   ;;  %v21466_v13 = vld [vmem:[#allocation12 + $0x1128] ss:$16 sps:$4 sm:$0xff]  }
 0xc2e   :  { %v21465_v22 = vld [vmem:[#allocation12 + $0xf2c] ss:$16 sps:$4 sm:$0xff]   ;;  %v21469_v26 = vld [vmem:[#allocation12 + $0xf48] ss:$16 sps:$4 sm:$0xff]  }
 0xc2f   :  { %13608 = vmatpush1.bf16.msra.mxu0 %v21355_v48  ;;  %v21417_v48 = vld [vmem:[#allocation12 + $0xe2c] ss:$16 sps:$4 sm:$0xff]  }
 0xc30   :  { %14527 = vmatpush1.bf16.msra.mxu1 %v21358_v11  ;;  %13609 = vmatprep.subr.bf16.mxu0 %v21363_v9  ;;  %v21420_v11 = vld [vmem:[#allocation12 + $0x102c] ss:$16 sps:$4 sm:$0xff]   ;;  %v21415_v9 = vld [vmem:[#allocation12 + $0xe28] ss:$16 sps:$4 sm:$0xff]  }
 0xc31   :  { %14528 = vmatprep.subr.bf16.mxu1 %v21366_v60  ;;  %v21418_v60 = vld [vmem:[#allocation12 + $0x1028] ss:$16 sps:$4 sm:$0xff]   ;;  %v21471_v55 = vld [vmem:[#allocation12 + $0xf4c] ss:$16 sps:$4 sm:$0xff]  }
 0xc33   :  { %13610 = vmatpush1.bf16.msra.mxu0 %v21361_v42  ;;  %v21423_v42 = vld [vmem:[#allocation12 + $0xe4c] ss:$16 sps:$4 sm:$0xff]  }
 0xc34   :  { %14529 = vmatpush1.bf16.msra.mxu1 %v21364_v18  ;;  %13611 = vmatprep.subr.bf16.mxu0 %v21369_v63  ;;  %v21426_v18 = vld [vmem:[#allocation12 + $0x104c] ss:$16 sps:$4 sm:$0xff]   ;;  %v21421_v63 = vld [vmem:[#allocation12 + $0xe48] ss:$16 sps:$4 sm:$0xff]  }
 0xc35   :  { %14530 = vmatprep.subr.bf16.mxu1 %v21372_v54  ;;  %v21424_v54 = vld [vmem:[#allocation12 + $0x1048] ss:$16 sps:$4 sm:$0xff]  }
 0xc37   :  { %13612 = vmatpush1.bf16.msra.mxu0 %v21367_v30  ;;  %v21429_v30 = vld [vmem:[#allocation12 + $0xe6c] ss:$16 sps:$4 sm:$0xff]  }
 0xc38   :  { %14531 = vmatpush1.bf16.msra.mxu1 %v21370_v39  ;;  %13613 = vmatprep.subr.bf16.mxu0 %v21375_v50  ;;  %v21432_v39 = vld [vmem:[#allocation12 + $0x106c] ss:$16 sps:$4 sm:$0xff]   ;;  %v21427_v50 = vld [vmem:[#allocation12 + $0xe68] ss:$16 sps:$4 sm:$0xff]  }
 0xc39   :  { %14532 = vmatprep.subr.bf16.mxu1 %v21378_v36  ;;  %v21435_v36 = vld [vmem:[#allocation12 + $0xe8c] ss:$16 sps:$4 sm:$0xff]  }
 0xc3b   :  { %13614 = vmatpush1.bf16.msra.mxu0 %v21373_v28  ;;  %v21438_v28 = vld [vmem:[#allocation12 + $0x108c] ss:$16 sps:$4 sm:$0xff]  }
 0xc3c   :  { %14533 = vmatpush1.bf16.msra.mxu1 %v21376_v25  ;;  %13615 = vmatprep.subr.bf16.mxu0 %v21381_v6  ;;  %v21436_v25 = vld [vmem:[#allocation12 + $0x1088] ss:$16 sps:$4 sm:$0xff]   ;;  %v21441_v6 = vld [vmem:[#allocation12 + $0xeac] ss:$16 sps:$4 sm:$0xff]  }
 0xc3d   :  { %14534 = vmatprep.subr.bf16.mxu1 %v21384_v34  ;;  %v21444_v34 = vld [vmem:[#allocation12 + $0x10ac] ss:$16 sps:$4 sm:$0xff]  }
 0xc3f   :  { %13616 = vmatpush1.bf16.msra.mxu0 %v21379_v52  ;;  %v21439_v52 = vld [vmem:[#allocation12 + $0xea8] ss:$16 sps:$4 sm:$0xff]  }
 0xc40   :  { %14535 = vmatpush1.bf16.msra.mxu1 %v21382_v61  ;;  %13617 = vmatprep.subr.bf16.mxu0 %v21387_v32  ;;  %v21442_v61 = vld [vmem:[#allocation12 + $0x10a8] ss:$16 sps:$4 sm:$0xff]   ;;  %v21447_v32 = vld [vmem:[#allocation12 + $0xecc] ss:$16 sps:$4 sm:$0xff]  }
 0xc41   :  { %14536 = vmatprep.subr.bf16.mxu1 %v21390_v59 }
 0xc43   :  { %13618 = vmatpush1.bf16.msra.mxu0 %v21385_v21  ;;  %v21450_v21 = vld [vmem:[#allocation12 + $0x10cc] ss:$16 sps:$4 sm:$0xff]  }
 0xc44   :  { %14537 = vmatpush1.bf16.msra.mxu1 %v21388_v33  ;;  %13619 = vmatprep.subr.bf16.mxu0 %v21393_v58 }
 0xc45   :  { %14538 = vmatprep.subr.bf16.mxu1 %v21396_v62 }
 0xc47   :  { %13620 = vmatpush1.bf16.msra.mxu0 %v21391_v5 }
 0xc48   :  { %14539 = vmatpush1.bf16.msra.mxu1 %v21394_v2  ;;  %13621 = vmatprep.subr.bf16.mxu0 %v21399_v47  ;;  %v21445_v2 = vld [vmem:[#allocation12 + $0xec8] ss:$16 sps:$4 sm:$0xff]  }
 0xc49   :  { %14540 = vmatprep.subr.bf16.mxu1 %v21402_v3  ;;  %v21448_v3 = vld [vmem:[#allocation12 + $0x10c8] ss:$16 sps:$4 sm:$0xff]  }
 0xc4b   :  { %13622 = vmatpush1.bf16.msra.mxu0 %v21397_v4  ;;  %v21453_v4 = vld [vmem:[#allocation12 + $0xeec] ss:$16 sps:$4 sm:$0xff]  }
 0xc4c   :  { %14541 = vmatpush1.bf16.msra.mxu1 %v21400_v7  ;;  %13623 = vmatprep.subr.bf16.mxu0 %v21405_v35  ;;  %v21451_v35 = vld [vmem:[#allocation12 + $0xee8] ss:$16 sps:$4 sm:$0xff]  }
 0xc4d   :  { %14542 = vmatprep.subr.bf16.mxu1 %v21408_v37  ;;  %v21457_v37 = vld [vmem:[#allocation12 + $0xf08] ss:$16 sps:$4 sm:$0xff]  }
 0xc4f   :  { %13624 = vmatpush1.bf16.msra.mxu0 %v21403_v56  ;;  %v21468_v56 = vld [vmem:[#allocation12 + $0x112c] ss:$16 sps:$4 sm:$0xff]  }
 0xc50   :  { %14543 = vmatpush1.bf16.msra.mxu1 %v21406_v20  ;;  %13675 = vmatprep.subr.bf16.mxu0 %v21411_v24  ;;  %v21463_v20 = vld [vmem:[#allocation12 + $0xf28] ss:$16 sps:$4 sm:$0xff]   ;;  %v21474_v24 = vld [vmem:[#allocation12 + $0x114c] ss:$16 sps:$4 sm:$0xff]  }
 0xc51   :  { %14594 = vmatprep.subr.bf16.mxu1 %v21414_v49  ;;  %v21472_v49 = vld [vmem:[#allocation12 + $0x1148] ss:$16 sps:$4 sm:$0xff]  }
 0xc52   :  { %13626 = vmatmul.mubr.bf16.vlgmr.msra.gmra.mrb[104].mxu0 %v22825_v45 }
 0xc53   :  { %14545 = vmatmul.mubr.bf16.vlgmr.msra.gmra.mrb[100].mxu1 %v22827_v8  ;;  %13676 = vmatpush1.bf16.msra.mxu0 %v21409_v27  ;;  %v21477_v27 = vld [vmem:[#allocation12 + $0xf6c] ss:$16 sps:$4 sm:$0xff]  }
 0xc54   :  { %13707 = vmatprep.mubr.bf16.mxu0 %v22808_v53  ;;  %14595 = vmatpush1.bf16.msra.mxu1 %v21412_v44  ;;  %v21430_v53 = vld [vmem:[#allocation12 + $0x1068] ss:$16 sps:$4 sm:$0xff]   ;;  %v21480_v44 = vld [vmem:[#allocation12 + $0x116c] ss:$16 sps:$4 sm:$0xff]  }
 0xc55   :  { %14626 = vmatprep.mubr.bf16.mxu1 %v22811_v29  ;;  %13677 = vmatprep.subr.bf16.mxu0 %v21417_v48  ;;  %v21433_v29 = vld [vmem:[#allocation12 + $0xe88] ss:$16 sps:$4 sm:$0xff]  }
 0xc56   :  { %14596 = vmatprep.subr.bf16.mxu1 %v21420_v11  ;;  %v21475_v48 = vld [vmem:[#allocation12 + $0xf68] ss:$16 sps:$4 sm:$0xff]  }
 0xc57   :  { %13678 = vmatpush1.bf16.msra.mxu0 %v21415_v9  ;;  %v21478_v11 = vld [vmem:[#allocation12 + $0x1168] ss:$16 sps:$4 sm:$0xff]   ;;  %v21483_v9 = vld [vmem:[#allocation12 + $0xf8c] ss:$16 sps:$4 sm:$0xff]  }
 0xc58   :  { %14597 = vmatpush1.bf16.msra.mxu1 %v21418_v60  ;;  %13679 = vmatprep.subr.bf16.mxu0 %v21423_v42  ;;  %v21486_v60 = vld [vmem:[#allocation12 + $0x118c] ss:$16 sps:$4 sm:$0xff]   ;;  %v21481_v42 = vld [vmem:[#allocation12 + $0xf88] ss:$16 sps:$4 sm:$0xff]  }
 0xc59   :  { %14598 = vmatprep.subr.bf16.mxu1 %v21426_v18  ;;  %v21484_v18 = vld [vmem:[#allocation12 + $0x1188] ss:$16 sps:$4 sm:$0xff]  }
 0xc5b   :  { %13680 = vmatpush1.bf16.msra.mxu0 %v21421_v63  ;;  %v21489_v63 = vld [vmem:[#allocation12 + $0xfac] ss:$16 sps:$4 sm:$0xff]  }
 0xc5c   :  { %14599 = vmatpush1.bf16.msra.mxu1 %v21424_v54  ;;  %13681 = vmatprep.subr.bf16.mxu0 %v21429_v30  ;;  %v21492_v54 = vld [vmem:[#allocation12 + $0x11ac] ss:$16 sps:$4 sm:$0xff]   ;;  %v21487_v30 = vld [vmem:[#allocation12 + $0xfa8] ss:$16 sps:$4 sm:$0xff]  }
 0xc5d   :  { %14600 = vmatprep.subr.bf16.mxu1 %v21432_v39  ;;  %v21490_v39 = vld [vmem:[#allocation12 + $0x11a8] ss:$16 sps:$4 sm:$0xff]  }
 0xc5f   :  { %13682 = vmatpush1.bf16.msra.mxu0 %v21427_v50  ;;  %v21495_v50 = vld [vmem:[#allocation12 + $0xfcc] ss:$16 sps:$4 sm:$0xff]  }
 0xc60   :  { %14601 = vmatpush1.bf16.msra.mxu1 %v21430_v53  ;;  %13683 = vmatprep.subr.bf16.mxu0 %v21435_v36  ;;  %v21498_v53 = vld [vmem:[#allocation12 + $0x11cc] ss:$16 sps:$4 sm:$0xff]   ;;  %v21493_v36 = vld [vmem:[#allocation12 + $0xfc8] ss:$16 sps:$4 sm:$0xff]  }
 0xc61   :  { %14602 = vmatprep.subr.bf16.mxu1 %v21438_v28  ;;  %v21496_v28 = vld [vmem:[#allocation12 + $0x11c8] ss:$16 sps:$4 sm:$0xff]  }
 0xc63   :  { %13684 = vmatpush1.bf16.msra.mxu0 %v21433_v29  ;;  %v21501_v29 = vld [vmem:[#allocation12 + $0xfec] ss:$16 sps:$4 sm:$0xff]  }
 0xc64   :  { %14603 = vmatpush1.bf16.msra.mxu1 %v21436_v25  ;;  %13685 = vmatprep.subr.bf16.mxu0 %v21441_v6  ;;  %v21504_v25 = vld [vmem:[#allocation12 + $0x11ec] ss:$16 sps:$4 sm:$0xff]   ;;  %v21499_v6 = vld [vmem:[#allocation12 + $0xfe8] ss:$16 sps:$4 sm:$0xff]  }
 0xc65   :  { %v11769_v59 = vpop.f32.mrb[92].mxu0  ;;  %14604 = vmatprep.subr.bf16.mxu1 %v21444_v34  ;;  %v13723_v34 = vld [vmem:[#allocation3 + $0x18] sm:$0xf0] }
 0xc66   :  { %v22834_v33 = vadd.f32 %v11769_v59, %v22803_v51  ;;  %v22836_v58 = vpop.f32.mrb[88].mxu1  ;;  %v11771_v62 = vpop.f32.mrb[93].mxu0  ;;  %v21456_v51 = vld [vmem:[#allocation12 + $0x10ec] ss:$16 sps:$4 sm:$0xff]  }
 0xc67   :  { %v22839_v10 = vadd.f32 %v11771_v62, %v22805_v23  ;;  %v22841_v46 = vpop.f32.mrb[89].mxu1  ;;  %v11773_v5 = vpop.f32.mrb[94].mxu0  ;;  %13686 = vmatpush1.bf16.msra.mxu0 %v21439_v52  ;;  %v21454_v23 = vld [vmem:[#allocation12 + $0x10e8] ss:$16 sps:$4 sm:$0xff]   ;;  %v13727_v52 = vld [vmem:[#allocation3 + $0x38] sm:$0xf] }
 0xc68   :  { %v12688_v47 = vpop.f32.mrb[90].mxu1  ;;  %14605 = vmatpush1.bf16.msra.mxu1 %v21442_v61  ;;  %v11774_v0 = vpop.f32.mrb[95].mxu0  ;;  %13687 = vmatprep.subr.bf16.mxu0 %v21447_v32  ;;  %v21502_v61 = vld [vmem:[#allocation12 + $0x11e8] ss:$16 sps:$4 sm:$0xff]   ;;  %v21507_v32 = vld [vmem:[#allocation12 + $0x1204] ss:$16 sps:$4 sm:$0xff]   ;;  %v13731_v59 = vpack.c.bf16 %v13727_v52, %v13723_v34 }
 0xc69   :  { %v12689_v7 = vpop.f32.mrb[91].mxu1  ;;  %14606 = vmatprep.subr.bf16.mxu1 %v21450_v21  ;;  %v21505_v21 = vld [vmem:[#allocation12 + $0x1200] ss:$16 sps:$4 sm:$0xff]   ;;  %v21510_v62 = vld [vmem:[#allocation12 + $0x1224] ss:$16 sps:$4 sm:$0xff]  }
 0xc6a   :  { %v22844_v5 = vrot.slane %v13731_v59, 2  ;;  %v21513_v47 = vld [vmem:[#allocation12 + $0x1244] ss:$16 sps:$4 sm:$0xff]   ;;  %v21511_v0 = vld [vmem:[#allocation12 + $0x1240] ss:$16 sps:$4 sm:$0xff]  }
 0xc6b   :  { %13688 = vmatpush1.bf16.msra.mxu0 %v21445_v2  ;;  %v21508_v2 = vld [vmem:[#allocation12 + $0x1220] ss:$16 sps:$4 sm:$0xff]   ;;  %v21558_v52 = vld [vmem:[#allocation12 + $0x122c] ss:$16 sps:$4 sm:$0xff]   ;;  %v21559_v59 = vld [vmem:[#allocation12 + $0x1248] ss:$16 sps:$4 sm:$0xff]  }
 0xc6c   :  { %14607 = vmatpush1.bf16.msra.mxu1 %v21448_v3  ;;  %13689 = vmatprep.subr.bf16.mxu0 %v21453_v4  ;;  %v21516_v3 = vld [vmem:[#allocation12 + $0x1264] ss:$16 sps:$4 sm:$0xff]   ;;  %v21514_v4 = vld [vmem:[#allocation12 + $0x1260] ss:$16 sps:$4 sm:$0xff]  }
 0xc6d   :  { %14608 = vmatprep.subr.bf16.mxu1 %v21456_v51  ;;  %v21517_v7 = vld [vmem:[#allocation12 + $0x1280] ss:$16 sps:$4 sm:$0xff]  }
 0xc6e   :  { %v21520_v51 = vld [vmem:[#allocation12 + $0x12a0] ss:$16 sps:$4 sm:$0xff]  }
 0xc6f   :  { %13690 = vmatpush1.bf16.msra.mxu0 %v21451_v35  ;;  %v21525_v35 = vld [vmem:[#allocation12 + $0x12c4] ss:$16 sps:$4 sm:$0xff]  }
 0xc70   :  { %14609 = vmatpush1.bf16.msra.mxu1 %v21454_v23  ;;  %13691 = vmatprep.subr.bf16.mxu0 %v21459_v31 }
 0xc71   :  { %14610 = vmatprep.subr.bf16.mxu1 %v21462_v17 }
 0xc73   :  { %13692 = vmatpush1.bf16.msra.mxu0 %v21457_v37 }
 0xc74   :  { %14611 = vmatpush1.bf16.msra.mxu1 %v21460_v19  ;;  %13693 = vmatprep.subr.bf16.mxu0 %v21465_v22 }
 0xc75   :  { %14612 = vmatprep.subr.bf16.mxu1 %v21468_v56 }
 0xc77   :  { %13694 = vmatpush1.bf16.msra.mxu0 %v21463_v20  ;;  %v21523_v20 = vld [vmem:[#allocation12 + $0x12c0] ss:$16 sps:$4 sm:$0xff]  }
 0xc78   :  { %14613 = vmatpush1.bf16.msra.mxu1 %v21466_v13  ;;  %13695 = vmatprep.subr.bf16.mxu0 %v21471_v55 }
 0xc79   :  { %14614 = vmatprep.subr.bf16.mxu1 %v21474_v24 }
 0xc7b   :  { %13696 = vmatpush1.bf16.msra.mxu0 %v21469_v26  ;;  %v21528_v26 = vld [vmem:[#allocation12 + $0x12e4] ss:$16 sps:$4 sm:$0xff]  }
 0xc7c   :  { %14615 = vmatpush1.bf16.msra.mxu1 %v21472_v49  ;;  %13697 = vmatprep.subr.bf16.mxu0 %v21477_v27  ;;  %v21526_v27 = vld [vmem:[#allocation12 + $0x12e0] ss:$16 sps:$4 sm:$0xff]  }
 0xc7d   :  { %14616 = vmatprep.subr.bf16.mxu1 %v21480_v44  ;;  %v21529_v44 = vld [vmem:[#allocation12 + $0x1300] ss:$16 sps:$4 sm:$0xff]  }
 0xc7f   :  { %13698 = vmatpush1.bf16.msra.mxu0 %v21475_v48  ;;  %v21534_v48 = vld [vmem:[#allocation12 + $0x1324] ss:$16 sps:$4 sm:$0xff]  }
 0xc80   :  { %14617 = vmatpush1.bf16.msra.mxu1 %v21478_v11  ;;  %13699 = vmatprep.subr.bf16.mxu0 %v21483_v9  ;;  %v21532_v11 = vld [vmem:[#allocation12 + $0x1320] ss:$16 sps:$4 sm:$0xff]  }
 0xc81   :  { %14618 = vmatprep.subr.bf16.mxu1 %v21486_v60  ;;  %v21535_v9 = vld [vmem:[#allocation12 + $0x1340] ss:$16 sps:$4 sm:$0xff]   ;;  %v21540_v60 = vld [vmem:[#allocation12 + $0x1364] ss:$16 sps:$4 sm:$0xff]  }
 0xc83   :  { %13700 = vmatpush1.bf16.msra.mxu0 %v21481_v42  ;;  %v21543_v42 = vld [vmem:[#allocation12 + $0x1384] ss:$16 sps:$4 sm:$0xff]  }
 0xc84   :  { %14619 = vmatpush1.bf16.msra.mxu1 %v21484_v18  ;;  %13701 = vmatprep.subr.bf16.mxu0 %v21489_v63  ;;  %v21541_v18 = vld [vmem:[#allocation12 + $0x1380] ss:$16 sps:$4 sm:$0xff]   ;;  %v21546_v63 = vld [vmem:[#allocation12 + $0x13a4] ss:$16 sps:$4 sm:$0xff]  }
 0xc85   :  { %14620 = vmatprep.subr.bf16.mxu1 %v21492_v54  ;;  %v21544_v54 = vld [vmem:[#allocation12 + $0x13a0] ss:$16 sps:$4 sm:$0xff]  }
 0xc87   :  { %13702 = vmatpush1.bf16.msra.mxu0 %v21487_v30  ;;  %v21549_v30 = vld [vmem:[#allocation12 + $0x13c4] ss:$16 sps:$4 sm:$0xff]  }
 0xc88   :  { %14621 = vmatpush1.bf16.msra.mxu1 %v21490_v39  ;;  %13703 = vmatprep.subr.bf16.mxu0 %v21495_v50  ;;  %v21547_v39 = vld [vmem:[#allocation12 + $0x13c0] ss:$16 sps:$4 sm:$0xff]   ;;  %v21552_v50 = vld [vmem:[#allocation12 + $0x13e4] ss:$16 sps:$4 sm:$0xff]  }
 0xc89   :  { %14622 = vmatprep.subr.bf16.mxu1 %v21498_v53  ;;  %v13722_v53 = vld [vmem:[#allocation3 + $0x10] sm:$0xf0] }
 0xc8b   :  { %13704 = vmatpush1.bf16.msra.mxu0 %v21493_v36  ;;  %v13726_v36 = vld [vmem:[#allocation3 + $0x30] sm:$0xf] }
 0xc8c   :  { %14623 = vmatpush1.bf16.msra.mxu1 %v21496_v28  ;;  %13705 = vmatprep.subr.bf16.mxu0 %v21501_v29  ;;  %v21550_v28 = vld [vmem:[#allocation12 + $0x13e0] ss:$16 sps:$4 sm:$0xff]   ;;  %v13730_v29 = vpack.c.bf16 %v13726_v36, %v13722_v53 }
 0xc8d   :  { %14624 = vmatprep.subr.bf16.mxu1 %v21504_v25  ;;  %v21555_v25 = vld [vmem:[#allocation12 + $0x120c] ss:$16 sps:$4 sm:$0xff]  }
 0xc8e   :  { %v22861_v34 = vrot.slane %v13730_v29, 2 }
 0xc8f   :  { %13706 = vmatpush1.bf16.msra.mxu0 %v21499_v6  ;;  %v21553_v6 = vld [vmem:[#allocation12 + $0x1208] ss:$16 sps:$4 sm:$0xff]  }
 0xc90   :  { %14625 = vmatpush1.bf16.msra.mxu1 %v21502_v61  ;;  %14553 = vmatprep.subr.bf16.mxu0 %v21507_v32  ;;  %v21556_v61 = vld [vmem:[#allocation12 + $0x1228] ss:$16 sps:$4 sm:$0xff]   ;;  %v21561_v32 = vld [vmem:[#allocation12 + $0x124c] ss:$16 sps:$4 sm:$0xff]  }
 0xc92   :  { %13708 = vmatmul.mubr.bf16.vlgmr.msra.gmra.mrb[108].mxu0 %v22825_v45  ;;  %v21519_v45 = vld [vmem:[#allocation12 + $0x1284] ss:$16 sps:$4 sm:$0xff]  }
 0xc93   :  { %14627 = vmatmul.mubr.bf16.vlgmr.msra.gmra.mrb[104].mxu1 %v22827_v8  ;;  %14554 = vmatpush1.bf16.msra.mxu0 %v21505_v21  ;;  %v21522_v8 = vld [vmem:[#allocation12 + $0x12a4] ss:$16 sps:$4 sm:$0xff]   ;;  %v21564_v21 = vld [vmem:[#allocation12 + $0x126c] ss:$16 sps:$4 sm:$0xff]  }
 0xc94   :  { %14585 = vmatprep.mubr.bf16.mxu0 %v22844_v5  ;;  %14555 = vmatprep.subr.bf16.mxu0 %v21510_v62  ;;  %v21562_v62 = vld [vmem:[#allocation12 + $0x1268] ss:$16 sps:$4 sm:$0xff]  }
 0xc95   :  { %14774 = vmatprep.mubr.f32.mxu1 %v22160_v1 }
 0xc97   :  { %14556 = vmatpush1.bf16.msra.mxu0 %v21508_v2  ;;  %v21567_v2 = vld [vmem:[#allocation12 + $0x128c] ss:$16 sps:$4 sm:$0xff]  }
 0xc98   :  { %14557 = vmatprep.subr.bf16.mxu0 %v21513_v47  ;;  %v21565_v47 = vld [vmem:[#allocation12 + $0x1288] ss:$16 sps:$4 sm:$0xff]  }
 0xc9b   :  { %14558 = vmatpush1.bf16.msra.mxu0 %v21511_v0  ;;  %v21570_v0 = vld [vmem:[#allocation12 + $0x12ac] ss:$16 sps:$4 sm:$0xff]  }
 0xc9c   :  { %14559 = vmatprep.subr.bf16.mxu0 %v21516_v3  ;;  %v21568_v3 = vld [vmem:[#allocation12 + $0x12a8] ss:$16 sps:$4 sm:$0xff]  }
 0xc9f   :  { %14560 = vmatpush1.bf16.msra.mxu0 %v21514_v4  ;;  %v21573_v4 = vld [vmem:[#allocation12 + $0x12cc] ss:$16 sps:$4 sm:$0xff]  }
 0xca0   :  { %14561 = vmatprep.subr.bf16.mxu0 %v21519_v45 }
 0xca3   :  { %14562 = vmatpush1.bf16.msra.mxu0 %v21517_v7 }
 0xca4   :  { %14563 = vmatprep.subr.bf16.mxu0 %v21522_v8 }
 0xca5   :  { %v12643_v23 = vpop.f32.mrb[96].mxu0 }
 0xca6   :  { %v12644_v31 = vadd.f32 %v12643_v23, %v22818_v12  ;;  %v22850_v17 = vpop.f32.mrb[92].mxu1  ;;  %v12645_v37 = vpop.f32.mrb[97].mxu0 }
 0xca7   :  { %v12646_v19 = vadd.f32 %v12645_v37, %v22823_v14  ;;  %v22853_v22 = vpop.f32.mrb[93].mxu1  ;;  %v12647_v56 = vpop.f32.mrb[98].mxu0  ;;  %14564 = vmatpush1.bf16.msra.mxu0 %v21520_v51  ;;  %v21531_v14 = vld [vmem:[#allocation12 + $0x1304] ss:$16 sps:$4 sm:$0xff]  }
 0xca8   :  { %v22856_v13 = vadd.f32 %v12644_v31, %v22816_v43  ;;  %v13590_v55 = vpop.f32.mrb[94].mxu1  ;;  %v12648_v24 = vpop.f32.mrb[99].mxu0  ;;  %14565 = vmatprep.subr.bf16.mxu0 %v21525_v35  ;;  %v21537_v43 = vld [vmem:[#allocation12 + $0x1344] ss:$16 sps:$4 sm:$0xff]   ;;  %v21571_v31 = vld [vmem:[#allocation12 + $0x12c8] ss:$16 sps:$4 sm:$0xff]  }
 0xca9   :  { %v22859_v49 = vadd.f32 %v12646_v19, %v22821_v57  ;;  %v13591_v12 = vpop.f32.mrb[95].mxu1  ;;  %v21538_v57 = vld [vmem:[#allocation12 + $0x1360] ss:$16 sps:$4 sm:$0xff]   ;;  %v21574_v24 = vld [vmem:[#allocation12 + $0x12e8] ss:$16 sps:$4 sm:$0xff]  }
 0xcaa   :  { %v21582_v12 = vld [vmem:[#allocation12 + $0x132c] ss:$16 sps:$4 sm:$0xff]  }
 0xcab   :  { %14566 = vmatpush1.bf16.msra.mxu0 %v21523_v20  ;;  %v21576_v20 = vld [vmem:[#allocation12 + $0x12ec] ss:$16 sps:$4 sm:$0xff]  }
 0xcac   :  { %14567 = vmatprep.subr.bf16.mxu0 %v21528_v26  ;;  %v21579_v26 = vld [vmem:[#allocation12 + $0x130c] ss:$16 sps:$4 sm:$0xff]  }
 0xcaf   :  { %14568 = vmatpush1.bf16.msra.mxu0 %v21526_v27  ;;  %v21580_v27 = vld [vmem:[#allocation12 + $0x1328] ss:$16 sps:$4 sm:$0xff]  }
 0xcb0   :  { %14569 = vmatprep.subr.bf16.mxu0 %v21531_v14  ;;  %v21583_v14 = vld [vmem:[#allocation12 + $0x1348] ss:$16 sps:$4 sm:$0xff]  }
 0xcb3   :  { %14570 = vmatpush1.bf16.msra.mxu0 %v21529_v44  ;;  %v21588_v44 = vld [vmem:[#allocation12 + $0x136c] ss:$16 sps:$4 sm:$0xff]  }
 0xcb4   :  { %14571 = vmatprep.subr.bf16.mxu0 %v21534_v48  ;;  %v21586_v48 = vld [vmem:[#allocation12 + $0x1368] ss:$16 sps:$4 sm:$0xff]  }
 0xcb7   :  { %14572 = vmatpush1.bf16.msra.mxu0 %v21532_v11  ;;  %v21589_v11 = vld [vmem:[#allocation12 + $0x1388] ss:$16 sps:$4 sm:$0xff]  }
 0xcb8   :  { %14573 = vmatprep.subr.bf16.mxu0 %v21537_v43  ;;  %v21594_v43 = vld [vmem:[#allocation12 + $0x13ac] ss:$16 sps:$4 sm:$0xff]  }
 0xcbb   :  { %14574 = vmatpush1.bf16.msra.mxu0 %v21535_v9  ;;  %v21592_v9 = vld [vmem:[#allocation12 + $0x13a8] ss:$16 sps:$4 sm:$0xff]  }
 0xcbc   :  { %14575 = vmatprep.subr.bf16.mxu0 %v21540_v60  ;;  %v21597_v60 = vld [vmem:[#allocation12 + $0x13cc] ss:$16 sps:$4 sm:$0xff]  }
 0xcbf   :  { %14576 = vmatpush1.bf16.msra.mxu0 %v21538_v57  ;;  %v21595_v57 = vld [vmem:[#allocation12 + $0x13c8] ss:$16 sps:$4 sm:$0xff]  }
 0xcc0   :  { %14577 = vmatprep.subr.bf16.mxu0 %v21543_v42  ;;  %v21600_v42 = vld [vmem:[#allocation12 + $0x13ec] ss:$16 sps:$4 sm:$0xff]  }
 0xcc3   :  { %14578 = vmatpush1.bf16.msra.mxu0 %v21541_v18  ;;  %v21598_v18 = vld [vmem:[#allocation12 + $0x13e8] ss:$16 sps:$4 sm:$0xff]  }
 0xcc4   :  { %14579 = vmatprep.subr.bf16.mxu0 %v21546_v63 }
 0xcc7   :  { %14580 = vmatpush1.bf16.msra.mxu0 %v21544_v54 }
 0xcc8   :  { %14581 = vmatprep.subr.bf16.mxu0 %v21549_v30 }
 0xccb   :  { %14582 = vmatpush1.bf16.msra.mxu0 %v21547_v39 }
 0xccc   :  { %14583 = vmatprep.subr.bf16.mxu0 %v21552_v50 }
 0xccf   :  { %14584 = vmatpush1.bf16.msra.mxu0 %v21550_v28 }
 0xcd0   :  { %14635 = vmatprep.subr.bf16.mxu0 %v21555_v25 }
 0xcd2   :  { %14586 = vmatmul.mubr.bf16.vlgmr.msra.gmra.mrb[112].mxu0 %v22861_v34 }
 0xcd3   :  { %14636 = vmatpush1.bf16.msra.mxu0 %v21553_v6  ;;  %14667 = vmatprep.mubr.bf16.mxu0 %v22844_v5 }
 0xcd4   :  { %14637 = vmatprep.subr.bf16.mxu0 %v21558_v52 }
 0xcd7   :  { %14638 = vmatpush1.bf16.msra.mxu0 %v21556_v61 }
 0xcd8   :  { %14639 = vmatprep.subr.bf16.mxu0 %v21561_v32 }
 0xcdb   :  { %14640 = vmatpush1.bf16.msra.mxu0 %v21559_v59 }
 0xcdc   :  { %14641 = vmatprep.subr.bf16.mxu0 %v21564_v21 }
 0xcdf   :  { %14642 = vmatpush1.bf16.msra.mxu0 %v21562_v62 }
 0xce0   :  { %14643 = vmatprep.subr.bf16.mxu0 %v21567_v2 }
 0xce3   :  { %14644 = vmatpush1.bf16.msra.mxu0 %v21565_v47 }
 0xce4   :  { %14645 = vmatprep.subr.bf16.mxu0 %v21570_v0 }
 0xce5   :  { %v12725_v5 = vpop.f32.mrb[100].mxu0 }
 0xce6   :  { %v12726_v45 = vadd.f32 %v12725_v5, %v22836_v58  ;;  %v22866_v7 = vpop.f32.mrb[96].mxu1  ;;  %v12727_v8 = vpop.f32.mrb[101].mxu0 }
 0xce7   :  { %v12728_v51 = vadd.f32 %v12727_v8, %v22841_v46  ;;  %v22869_v35 = vpop.f32.mrb[97].mxu1  ;;  %v12729_v23 = vpop.f32.mrb[102].mxu0  ;;  %14646 = vmatpush1.bf16.msra.mxu0 %v21568_v3  ;;  %v21577_v46 = vld [vmem:[#allocation12 + $0x1308] ss:$16 sps:$4 sm:$0xff]   ;;  %v14680_v3 = vld [vmem:[#allocation14] sm:$0xf] }
 0xce8   :  { %v22872_v37 = vadd.f32 %v12726_v45, %v22834_v33  ;;  %v13672_v19 = vpop.f32.mrb[98].mxu1  ;;  %v12730_v56 = vpop.f32.mrb[103].mxu0  ;;  %14647 = vmatprep.subr.bf16.mxu0 %v21573_v4  ;;  %v21585_v33 = vld [vmem:[#allocation12 + $0x134c] ss:$16 sps:$4 sm:$0xff]  }
 0xce9   :  { %v12735_v55 = vadd.f32 %v12728_v51, %v22839_v10  ;;  %v13673_v58 = vpop.f32.mrb[99].mxu1  ;;  %v21591_v10 = vld [vmem:[#allocation12 + $0x138c] ss:$16 sps:$4 sm:$0xff]   ;;  %v14689_v51 = vrot.slane %v14680_v3, %v22387_v40 }
 0xceb   :  { %14648 = vmatpush1.bf16.msra.mxu0 %v21571_v31 }
 0xcec   :  { %14649 = vmatprep.subr.bf16.mxu0 %v21576_v20 }
 0xcef   :  { %14650 = vmatpush1.bf16.msra.mxu0 %v21574_v24  ;;  %v14693_v24 = vrot.slane %v14680_v3, %v22375_v15  ;;  %v21604_v15 = vld [vmem:[#allocation15 + $0x210] ss:$8 sps:$4 sm:$0xff]  }
 0xcf0   :  { %14651 = vmatprep.subr.bf16.mxu0 %v21579_v26 }
 0xcf3   :  { %14652 = vmatpush1.bf16.msra.mxu0 %v21577_v46 }
 0xcf4   :  { %14653 = vmatprep.subr.bf16.mxu0 %v21582_v12 }
 0xcf7   :  { %14654 = vmatpush1.bf16.msra.mxu0 %v21580_v27  ;;  %v14697_v27 = vrot.slane %v14680_v3, %v22377_v16  ;;  %v21609_v16 = vld [vmem:[#allocation15 + $0x224] ss:$8 sps:$4 sm:$0xff]  }
 0xcf8   :  { %14655 = vmatprep.subr.bf16.mxu0 %v21585_v33 }
 0xcfb   :  { %14656 = vmatpush1.bf16.msra.mxu0 %v21583_v14 }
 0xcfc   :  { %14657 = vmatprep.subr.bf16.mxu0 %v21588_v44 }
 0xcff   :  { %14658 = vmatpush1.bf16.msra.mxu0 %v21586_v48 }
 0xd00   :  { %14659 = vmatprep.subr.bf16.mxu0 %v21591_v10 }
 0xd03   :  { %14660 = vmatpush1.bf16.msra.mxu0 %v21589_v11 }
 0xd04   :  { %14661 = vmatprep.subr.bf16.mxu0 %v21594_v43  ;;  %v21603_v43 = vld [vmem:[#allocation15 + $0x204] ss:$8 sps:$4 sm:$0xff]  }
 0xd07   :  { %14662 = vmatpush1.bf16.msra.mxu0 %v21592_v9 }
 0xd08   :  { %14663 = vmatprep.subr.bf16.mxu0 %v21597_v60  ;;  %v21601_v60 = vld [vmem:[#allocation15 + $0x200] ss:$8 sps:$4 sm:$0xff]  }
 0xd0b   :  { %14664 = vmatpush1.bf16.msra.mxu0 %v21595_v57  ;;  %v21607_v57 = vld [vmem:[#allocation15 + $0x220] ss:$8 sps:$4 sm:$0xff]  }
 0xd0c   :  { %14665 = vmatprep.subr.bf16.mxu0 %v21600_v42  ;;  %v21612_v42 = vld [vmem:[#allocation15 + $0x234] ss:$8 sps:$4 sm:$0xff]  }
 0xd0f   :  { %14666 = vmatpush1.bf16.msra.mxu0 %v21598_v18  ;;  %v21610_v18 = vld [vmem:[#allocation15 + $0x230] ss:$8 sps:$4 sm:$0xff]  }
 0xd12   :  { %14668 = vmatmul.mubr.bf16.vlgmr.msra.gmra.mrb[116].mxu0 %v22861_v34 }
 0xd25   :  { %v13627_v63 = vpop.f32.mrb[104].mxu0 }
 0xd26   :  { %v13628_v54 = vadd.f32 %v13627_v63, %v22850_v17  ;;  %v14546_v30 = vpop.f32.mrb[100].mxu1  ;;  %v13629_v39 = vpop.f32.mrb[105].mxu0  ;;  %v21615_v63 = vld [vmem:[#allocation15 + $0x244] ss:$8 sps:$4 sm:$0xff]  }
 0xd27   :  { %v13630_v50 = vadd.f32 %v13629_v39, %v22853_v22  ;;  %v14548_v53 = vpop.f32.mrb[101].mxu1  ;;  %v13631_v36 = vpop.f32.mrb[106].mxu0  ;;  %v21616_v39 = vld [vmem:[#allocation15 + $0x250] ss:$8 sps:$4 sm:$0xff]  }
 0xd28   :  { %v13716_v28 = vadd.f32 %v13628_v54, %v22856_v13  ;;  %v14550_v29 = vpop.f32.mrb[102].mxu1  ;;  %v13632_v25 = vpop.f32.mrb[107].mxu0  ;;  %v21613_v54 = vld [vmem:[#allocation15 + $0x240] ss:$8 sps:$4 sm:$0xff]   ;;  %v21622_v36 = vld [vmem:[#allocation15 + $0x270] ss:$8 sps:$4 sm:$0xff]  }
 0xd29   :  { %v13717_v6 = vadd.f32 %v13630_v50, %v22859_v49  ;;  %v14551_v52 = vpop.f32.mrb[103].mxu1  ;;  %v14685_v49 = vrot.slane %v14680_v3, %v22385_v38  ;;  %v21619_v50 = vld [vmem:[#allocation15 + $0x260] ss:$8 sps:$4 sm:$0xff]   ;;  %v21630_v25 = vld [vmem:[#allocation15 + $0x294] ss:$8 sps:$4 sm:$0xff]  }
 0xd2a   :  { %v21625_v29 = vld [vmem:[#allocation15 + $0x280] ss:$8 sps:$4 sm:$0xff]   ;;  %v21633_v52 = vld [vmem:[#allocation15 + $0x2a4] ss:$8 sps:$4 sm:$0xff]   ;;  %v21640_v3 = vld [vmem:[#allocation15 + $0x2d0] ss:$8 sps:$4 sm:$0xff]  }
 0xd65   :  { %v13709_v61 = vpop.f32.mrb[108].mxu0 }
 0xd66   :  { %v13710_v32 = vadd.f32 %v13709_v61, %v22866_v7  ;;  %v14628_v34 = vpop.f32.mrb[104].mxu1  ;;  %v13711_v59 = vpop.f32.mrb[109].mxu0  ;;  %v21631_v61 = vld [vmem:[#allocation15 + $0x2a0] ss:$8 sps:$4 sm:$0xff]  }
 0xd67   :  { %v13712_v17 = vadd.f32 %v13711_v59, %v22869_v35  ;;  %v14630_v21 = vpop.f32.mrb[105].mxu1  ;;  %v13713_v62 = vpop.f32.mrb[110].mxu0  ;;  %v21651_v59 = vld [vmem:[#allocation15 + $0x304] ss:$8 sps:$4 sm:$0xff]  }
 0xd68   :  { %v13718_v22 = vadd.f32 %v13710_v32, %v22872_v37  ;;  %v14632_v2 = vpop.f32.mrb[106].mxu1  ;;  %v13714_v47 = vpop.f32.mrb[111].mxu0  ;;  %v21636_v32 = vld [vmem:[#allocation15 + $0x2b4] ss:$8 sps:$4 sm:$0xff]   ;;  %15405 = vmatprep.subr.bf16.mxu0 %v21651_v59  ;;  %v21639_v62 = vld [vmem:[#allocation15 + $0x2c4] ss:$8 sps:$4 sm:$0xff]  }
 0xd69   :  { %v13719_v0 = vadd.f32 %v13712_v17, %v12735_v55  ;;  %v14633_v13 = vpop.f32.mrb[107].mxu1  ;;  %v21634_v17 = vld [vmem:[#allocation15 + $0x2b0] ss:$8 sps:$4 sm:$0xff]   ;;  %v21637_v2 = vld [vmem:[#allocation15 + $0x2c0] ss:$8 sps:$4 sm:$0xff]  }
 0xd6a   :  { %v21663_v47 = vld [vmem:[#allocation15 + $0x324] ss:$8 sps:$4 sm:$0xff]   ;;  %v21661_v13 = vld [vmem:[#allocation15 + $0x320] ss:$8 sps:$4 sm:$0xff]   ;;  %v21658_v59 = vld [vmem:[#allocation15 + $0x10] ss:$8 sps:$4 sm:$0xff]  }
 0xda5   :  { %v14587_v4 = vpop.f32.mrb[112].mxu0 }
 0xda6   :  { %v14588_v5 = vadd.f32 %v14587_v4, %v14546_v30  ;;  %v14589_v45 = vpop.f32.mrb[113].mxu0  ;;  %v21618_v30 = vld [vmem:[#allocation15 + $0x254] ss:$8 sps:$4 sm:$0xff]  }
 0xda7   :  { %v14590_v8 = vadd.f32 %v14589_v45, %v14548_v53  ;;  %v14591_v7 = vpop.f32.mrb[114].mxu0  ;;  %v21624_v53 = vld [vmem:[#allocation15 + $0x274] ss:$8 sps:$4 sm:$0xff]   ;;  %v21643_v45 = vld [vmem:[#allocation15 + $0x2e0] ss:$8 sps:$4 sm:$0xff]  }
 0xda8   :  { %v14676_v23 = vadd.f32 %v14588_v5, %v13716_v28  ;;  %v14592_v35 = vpop.f32.mrb[115].mxu0  ;;  %v21627_v28 = vld [vmem:[#allocation15 + $0x284] ss:$8 sps:$4 sm:$0xff]   ;;  %v21669_v4 = vld [vmem:[#allocation15 + $0x334] ss:$8 sps:$4 sm:$0xff]  }
 0xda9   :  { %v14677_v31 = vadd.f32 %v14590_v8, %v13717_v6  ;;  %v21628_v6 = vld [vmem:[#allocation15 + $0x290] ss:$8 sps:$4 sm:$0xff]   ;;  %v21645_v5 = vld [vmem:[#allocation15 + $0x2e4] ss:$8 sps:$4 sm:$0xff]   ;;  %v21648_v7 = vld [vmem:[#allocation15 + $0x2f4] ss:$8 sps:$4 sm:$0xff]  }
 0xdaa   :  { %v14702_v19 = vadd.f32 %v14685_v49, %v14676_v23  ;;  %v21667_v49 = vld [vmem:[#allocation15 + $0x330] ss:$8 sps:$4 sm:$0xff]   ;;  %v21675_v8 = vld [vmem:[#allocation15 + $0x344] ss:$8 sps:$4 sm:$0xff]   ;;  %v21681_v35 = vld [vmem:[#allocation15 + $0x354] ss:$8 sps:$4 sm:$0xff]  }
 0xdab   :  { %v14703_v56 = vadd.f32 %v14689_v51, %v14677_v31  ;;  %v21673_v51 = vld [vmem:[#allocation15 + $0x340] ss:$8 sps:$4 sm:$0xff]   ;;  %v21646_v23 = vld [vmem:[#allocation15 + $0x2f0] ss:$8 sps:$4 sm:$0xff]   ;;  %v21654_v31 = vld [vmem:[#allocation15 + $0x4] ss:$8 sps:$4 sm:$0xff]  }
 0xdac   :  { %v14706_v20 = vmax.f32 %v14702_v19, 0.0  ;;  %v21679_v19 = vld [vmem:[#allocation15 + $0x350] ss:$8 sps:$4 sm:$0xff]  }
 0xdad   :  { %v14707_v37 = vmax.f32 %v14703_v56, 0.0  ;;  %v21687_v56 = vld [vmem:[#allocation15 + $0x364] ss:$8 sps:$4 sm:$0xff]  }
 0xdaf   :  { %14710 = vmatprep.subr.mxu1 %v14707_v37  ;;  %v21685_v37 = vld [vmem:[#allocation15 + $0x360] ss:$8 sps:$4 sm:$0xff]  }
 0xdb0   :  { %14711 = vmatpush1.msra.mxu1 %v14706_v20  ;;  %v21693_v20 = vld [vmem:[#allocation15 + $0x374] ss:$8 sps:$4 sm:$0xff]  }
 0xdb1   :  { %18637 = vmatmul.mubr.msk.f32.vlgmr.msra.gmra.mrb[108].mxu1 %vm6343_vm5, %v22392_v41 }
 0xdb2   :  { %14845 = vmatprep.mubr.f32.mxu1 %v22160_v1  ;;  %v21606_v1 = vld [vmem:[#allocation15 + $0x214] ss:$8 sps:$4 sm:$0xff]  }
 0xde5   :  { %v14669_v55 = vpop.f32.mrb[116].mxu0 }
 0xde6   :  { %v14670_v58 = vadd.f32 %v14669_v55, %v14628_v34  ;;  %v14671_v26 = vpop.f32.mrb[117].mxu0  ;;  %v21649_v34 = vld [vmem:[#allocation15 + $0x300] ss:$8 sps:$4 sm:$0xff]   ;;  %v21691_v55 = vld [vmem:[#allocation15 + $0x370] ss:$8 sps:$4 sm:$0xff]  }
 0xde7   :  { %v14672_v46 = vadd.f32 %v14671_v26, %v14630_v21  ;;  %v14673_v12 = vpop.f32.mrb[118].mxu0  ;;  %v21657_v21 = vld [vmem:[#allocation15 + $0x314] ss:$8 sps:$4 sm:$0xff]   ;;  %15406 = vmatpush1.bf16.msra.mxu0 %v21649_v34 }
 0xde8   :  { %v14678_v33 = vadd.f32 %v14670_v58, %v13718_v22  ;;  %v14674_v14 = vpop.f32.mrb[119].mxu0  ;;  %v21655_v22 = vld [vmem:[#allocation15 + $0x310] ss:$8 sps:$4 sm:$0xff]   ;;  %15407 = vmatprep.subr.bf16.mxu0 %v21657_v21  ;;  %v21699_v58 = vld [vmem:[#allocation15 + $0x384] ss:$8 sps:$4 sm:$0xff]  }
 0xde9   :  { %v14679_v44 = vadd.f32 %v14672_v46, %v13719_v0  ;;  %v21642_v0 = vld [vmem:[#allocation15 + $0x2d4] ss:$8 sps:$4 sm:$0xff]   ;;  %v21703_v46 = vld [vmem:[#allocation15 + $0x390] ss:$8 sps:$4 sm:$0xff]   ;;  %v21711_v12 = vld [vmem:[#allocation15 + $0x3a4] ss:$8 sps:$4 sm:$0xff]  }
 0xdea   :  { %v14704_v48 = vadd.f32 %v14693_v24, %v14678_v33  ;;  %v21697_v24 = vld [vmem:[#allocation15 + $0x380] ss:$8 sps:$4 sm:$0xff]   ;;  %v21705_v26 = vld [vmem:[#allocation15 + $0x394] ss:$8 sps:$4 sm:$0xff]   ;;  %v21715_v33 = vld [vmem:[#allocation15 + $0x3b0] ss:$8 sps:$4 sm:$0xff]  }
 0xdeb   :  { %v14705_v10 = vadd.f32 %v14697_v27, %v14679_v44  ;;  %15408 = vmatpush1.bf16.msra.mxu0 %v21655_v22  ;;  %v21709_v27 = vld [vmem:[#allocation15 + $0x3a0] ss:$8 sps:$4 sm:$0xff]   ;;  %v21717_v14 = vld [vmem:[#allocation15 + $0x3b4] ss:$8 sps:$4 sm:$0xff]   ;;  %v21723_v44 = vld [vmem:[#allocation15 + $0x3c4] ss:$8 sps:$4 sm:$0xff]  }
 0xdec   :  { %v14708_v9 = vmax.f32 %v14704_v48, 0.0  ;;  %15409 = vmatprep.subr.bf16.mxu0 %v21663_v47  ;;  %v21721_v48 = vld [vmem:[#allocation15 + $0x3c0] ss:$8 sps:$4 sm:$0xff]   ;;  %v21660_v34 = vld [vmem:[#allocation15 + $0x14] ss:$8 sps:$4 sm:$0xff]  }
 0xded   :  { %v14709_v11 = vmax.f32 %v14705_v10, 0.0  ;;  %v21729_v10 = vld [vmem:[#allocation15 + $0x3d4] ss:$8 sps:$4 sm:$0xff]   ;;  %v21664_v21 = vld [vmem:[#allocation15 + $0x20] ss:$8 sps:$4 sm:$0xff]  }
 0xdee   :  { %v21670_v22 = vld [vmem:[#allocation15 + $0x30] ss:$8 sps:$4 sm:$0xff]   ;;  %v21676_v47 = vld [vmem:[#allocation15 + $0x40] ss:$8 sps:$4 sm:$0xff]  }
 0xdef   :  { %14781 = vmatprep.subr.mxu1 %v14709_v11  ;;  %15410 = vmatpush1.bf16.msra.mxu0 %v21661_v13  ;;  %v21727_v11 = vld [vmem:[#allocation15 + $0x3d0] ss:$8 sps:$4 sm:$0xff]  }
 0xdf0   :  { %14782 = vmatpush1.msra.mxu1 %v14708_v9  ;;  %15411 = vmatprep.subr.bf16.mxu0 %v21669_v4  ;;  %v21733_v9 = vld [vmem:[#allocation15 + $0x3e0] ss:$8 sps:$4 sm:$0xff]   ;;  %v21682_v13 = vld [vmem:[#allocation15 + $0x50] ss:$8 sps:$4 sm:$0xff]  }
 0xdf1   :  { %18638 = vmatmul.mubr.msk.f32.vlgmr.msra.gmra.mrb[110].mxu1 %vm6343_vm5, %v22392_v41  ;;  %15364 = vmatprep.subr.bf16.mxu1 %v21603_v43  ;;  %v21621_v41 = vld [vmem:[#allocation15 + $0x264] ss:$8 sps:$4 sm:$0xff]   ;;  %v21688_v4 = vld [vmem:[#allocation15 + $0x60] ss:$8 sps:$4 sm:$0xff]  }
 0xdf2   :  { %15365 = vmatpush1.bf16.msra.mxu1 %v21601_v60  ;;  %v21735_v43 = vld [vmem:[#allocation15 + $0x3e4] ss:$8 sps:$4 sm:$0xff]   ;;  %v21741_v60 = vld [vmem:[#allocation15 + $0x3f4] ss:$8 sps:$4 sm:$0xff]  }
 0xdf3   :  { %15366 = vmatprep.subr.bf16.mxu1 %v21606_v1  ;;  %15412 = vmatpush1.bf16.msra.mxu0 %v21667_v49  ;;  %v21739_v1 = vld [vmem:[#allocation15 + $0x3f0] ss:$8 sps:$4 sm:$0xff]  }
 0xdf4   :  { %15413 = vmatprep.subr.bf16.mxu0 %v21675_v8  ;;  %v21694_v49 = vld [vmem:[#allocation15 + $0x70] ss:$8 sps:$4 sm:$0xff]   ;;  %v21700_v8 = vld [vmem:[#allocation15 + $0x80] ss:$8 sps:$4 sm:$0xff]  }
 0xdf6   :  { %15367 = vmatpush1.bf16.msra.mxu1 %v21604_v15  ;;  %v21747_v15 = vld [vmem:[#allocation15 + $0x104] ss:$8 sps:$4 sm:$0xff]  }
 0xdf7   :  { %15368 = vmatprep.subr.bf16.mxu1 %v21609_v16  ;;  %15414 = vmatpush1.bf16.msra.mxu0 %v21673_v51  ;;  %v21706_v51 = vld [vmem:[#allocation15 + $0x90] ss:$8 sps:$4 sm:$0xff]  }
 0xdf8   :  { %15415 = vmatprep.subr.bf16.mxu0 %v21681_v35  ;;  %v21712_v35 = vld [vmem:[#allocation15 + $0xa0] ss:$8 sps:$4 sm:$0xff]  }
 0xdfa   :  { %15369 = vmatpush1.bf16.msra.mxu1 %v21607_v57 }
 0xdfb   :  { %15370 = vmatprep.subr.bf16.mxu1 %v21612_v42  ;;  %15416 = vmatpush1.bf16.msra.mxu0 %v21679_v19  ;;  %v21718_v19 = vld [vmem:[#allocation15 + $0xb0] ss:$8 sps:$4 sm:$0xff]  }
 0xdfc   :  { %15417 = vmatprep.subr.bf16.mxu0 %v21687_v56  ;;  %v21726_v56 = vld [vmem:[#allocation15 + $0xc4] ss:$8 sps:$4 sm:$0xff]  }
 0xdfe   :  { %15371 = vmatpush1.bf16.msra.mxu1 %v21610_v18 }
 0xdff   :  { %15372 = vmatprep.subr.bf16.mxu1 %v21615_v63  ;;  %15418 = vmatpush1.bf16.msra.mxu0 %v21685_v37 }
 0xe00   :  { %15419 = vmatprep.subr.bf16.mxu0 %v21693_v20 }
 0xe02   :  { %15373 = vmatpush1.bf16.msra.mxu1 %v21613_v54 }
 0xe03   :  { %15374 = vmatprep.subr.bf16.mxu1 %v21618_v30  ;;  %15420 = vmatpush1.bf16.msra.mxu0 %v21691_v55 }
 0xe04   :  { %15421 = vmatprep.subr.bf16.mxu0 %v21699_v58 }
 0xe06   :  { %15375 = vmatpush1.bf16.msra.mxu1 %v21616_v39 }
 0xe07   :  { %15376 = vmatprep.subr.bf16.mxu1 %v21621_v41  ;;  %15422 = vmatpush1.bf16.msra.mxu0 %v21697_v24  ;;  %v21724_v24 = vld [vmem:[#allocation15 + $0xc0] ss:$8 sps:$4 sm:$0xff]  }
 0xe08   :  { %15423 = vmatprep.subr.bf16.mxu0 %v21705_v26  ;;  %v21732_v26 = vld [vmem:[#allocation15 + $0xd4] ss:$8 sps:$4 sm:$0xff]  }
 0xe0a   :  { %15377 = vmatpush1.bf16.msra.mxu1 %v21619_v50 }
 0xe0b   :  { %15378 = vmatprep.subr.bf16.mxu1 %v21624_v53  ;;  %15424 = vmatpush1.bf16.msra.mxu0 %v21703_v46  ;;  %v21730_v46 = vld [vmem:[#allocation15 + $0xd0] ss:$8 sps:$4 sm:$0xff]  }
 0xe0c   :  { %15425 = vmatprep.subr.bf16.mxu0 %v21711_v12  ;;  %v21738_v12 = vld [vmem:[#allocation15 + $0xe4] ss:$8 sps:$4 sm:$0xff]  }
 0xe0e   :  { %15379 = vmatpush1.bf16.msra.mxu1 %v21622_v36 }
 0xe0f   :  { %15380 = vmatprep.subr.bf16.mxu1 %v21627_v28  ;;  %15426 = vmatpush1.bf16.msra.mxu0 %v21709_v27  ;;  %v21736_v27 = vld [vmem:[#allocation15 + $0xe0] ss:$8 sps:$4 sm:$0xff]  }
 0xe10   :  { %15427 = vmatprep.subr.bf16.mxu0 %v21717_v14  ;;  %v21744_v14 = vld [vmem:[#allocation15 + $0xf4] ss:$8 sps:$4 sm:$0xff]  }
 0xe12   :  { %15381 = vmatpush1.bf16.msra.mxu1 %v21625_v29 }
 0xe13   :  { %15382 = vmatprep.subr.bf16.mxu1 %v21630_v25  ;;  %15428 = vmatpush1.bf16.msra.mxu0 %v21715_v33 }
 0xe14   :  { %15429 = vmatprep.subr.bf16.mxu0 %v21723_v44 }
 0xe16   :  { %15383 = vmatpush1.bf16.msra.mxu1 %v21628_v6 }
 0xe17   :  { %15384 = vmatprep.subr.bf16.mxu1 %v21633_v52  ;;  %15430 = vmatpush1.bf16.msra.mxu0 %v21721_v48 }
 0xe18   :  { %15431 = vmatprep.subr.bf16.mxu0 %v21729_v10 }
 0xe1a   :  { %15385 = vmatpush1.bf16.msra.mxu1 %v21631_v61  ;;  %v21652_v61 = vld [vmem:[#allocation15] ss:$8 sps:$4 sm:$0xff]  }
 0xe1b   :  { %15386 = vmatprep.subr.bf16.mxu1 %v21636_v32  ;;  %15432 = vmatpush1.bf16.msra.mxu0 %v21727_v11 }
 0xe1c   :  { %15433 = vmatprep.subr.bf16.mxu0 %v21735_v43  ;;  %v21742_v43 = vld [vmem:[#allocation15 + $0xf0] ss:$8 sps:$4 sm:$0xff]  }
 0xe1e   :  { %15387 = vmatpush1.bf16.msra.mxu1 %v21634_v17  ;;  %v21666_v17 = vld [vmem:[#allocation15 + $0x24] ss:$8 sps:$4 sm:$0xff]  }
 0xe1f   :  { %15388 = vmatprep.subr.bf16.mxu1 %v21639_v62  ;;  %15434 = vmatpush1.bf16.msra.mxu0 %v21733_v9  ;;  %v21672_v62 = vld [vmem:[#allocation15 + $0x34] ss:$8 sps:$4 sm:$0xff]  }
 0xe20   :  { %15435 = vmatprep.subr.bf16.mxu0 %v21741_v60 }
 0xe22   :  { %15389 = vmatpush1.bf16.msra.mxu1 %v21637_v2  ;;  %v21678_v2 = vld [vmem:[#allocation15 + $0x44] ss:$8 sps:$4 sm:$0xff]  }
 0xe23   :  { %15390 = vmatprep.subr.bf16.mxu1 %v21642_v0  ;;  %15436 = vmatpush1.bf16.msra.mxu0 %v21739_v1  ;;  %v21684_v0 = vld [vmem:[#allocation15 + $0x54] ss:$8 sps:$4 sm:$0xff]   ;;  %v21750_v1 = vld [vmem:[#allocation15 + $0x404] ss:$8 sps:$4 sm:$0xff]  }
 0xe24   :  { %15807 = vmatprep.subr.bf16.mxu0 %v21747_v15 }
 0xe26   :  { %15391 = vmatpush1.bf16.msra.mxu1 %v21640_v3  ;;  %v21690_v3 = vld [vmem:[#allocation15 + $0x64] ss:$8 sps:$4 sm:$0xff]  }
 0xe27   :  { %15392 = vmatprep.subr.bf16.mxu1 %v21645_v5  ;;  %v21696_v5 = vld [vmem:[#allocation15 + $0x74] ss:$8 sps:$4 sm:$0xff]  }
 0xe2a   :  { %15393 = vmatpush1.bf16.msra.mxu1 %v21643_v45  ;;  %v21702_v45 = vld [vmem:[#allocation15 + $0x84] ss:$8 sps:$4 sm:$0xff]  }
 0xe2b   :  { %15394 = vmatprep.subr.bf16.mxu1 %v21648_v7  ;;  %v21708_v7 = vld [vmem:[#allocation15 + $0x94] ss:$8 sps:$4 sm:$0xff]  }
 0xe2e   :  { %15395 = vmatpush1.bf16.msra.mxu1 %v21646_v23  ;;  %v21714_v23 = vld [vmem:[#allocation15 + $0xa4] ss:$8 sps:$4 sm:$0xff]  }
 0xe2f   :  { %15766 = vmatprep.subr.bf16.mxu1 %v21654_v31  ;;  %v21720_v31 = vld [vmem:[#allocation15 + $0xb4] ss:$8 sps:$4 sm:$0xff]  }
 0xe84   :  { %v14776_v16 = vpop.f32.mrb[108].mxu1 }
 0xe85   :  { %v14856_v57 = vrot.slane %v14776_v16, 7  ;;  %v14778_v42 = vpop.f32.mrb[109].mxu1 }
 0xe86   :  { %v14857_v18 = vrot.slane %v14778_v42, 7 }
 0xe87   :  { %14864 = vst [vmem:[#allocation4] sm:$0x1e] %v14856_v57 }
 0xe88   :  { %14865 = vst [vmem:[#allocation4 + $0x8] sm:$0x1e] %v14857_v18 }
 0xe8e   :  { %v14940_v63 = vld [vmem:[#allocation4] sm:$0x1e] }
 0xe8f   :  { %v14941_v54 = vld [vmem:[#allocation4 + $0x8] sm:$0x1e]  ;;  %v14944_v30 = vpack.c.bf16 %v14940_v63, %v14940_v63  ;;  %v14868_v42 = vld [vmem:[#allocation4] sm:$0xf] }
 0xe90   :  { %v14945_v39 = vpack.c.bf16 %v14941_v54, %v14941_v54  ;;  %v14869_v29 = vld [vmem:[#allocation4 + $0x8] sm:$0xf] }
 0xe91   :  { %v15013_v41 = vshrl.u32 %v14944_v30, 16  ;;  %v15015_v50 = vshll.u32 %v14944_v30, 16  ;;  %v14873_v32 = vpack.c.bf16 %v14869_v29, %v14869_v29  ;;  %v15849_v60 = vld [vmem:[#allocation4 + $0x8] sm:$0x3c]  ;;  %v21745_v30 = vld [vmem:[#allocation15 + $0x100] ss:$8 sps:$4 sm:$0xff]  }
 0xe92   :  { %v15020_v53 = vshrl.u32 %v14945_v39, 16  ;;  %v15022_v36 = vshll.u32 %v14945_v39, 16  ;;  %v15853_v63 = vpack.c.bf16 %v15849_v60, %v15849_v60  ;;  %v21748_v39 = vld [vmem:[#allocation15 + $0x400] ss:$8 sps:$4 sm:$0xff]  }
 0xe93   :  { %v15017_v28 = vrot.slane %v15015_v50, 1  ;;  %v14872_v50 = vpack.c.bf16 %v14868_v42, %v14868_v42  ;;  %v21817_v60 = vld [vmem:[#allocation15 + $0x1c0] ss:$8 sps:$4 sm:$0xff]   ;;  %v21826_v42 = vld [vmem:[#allocation15 + $0x4d0] ss:$8 sps:$4 sm:$0xff]  }
 0xe94   :  { %v15024_v25 = vrot.slane %v15022_v36, 1  ;;  %v21753_v36 = vld [vmem:[#allocation15 + $0x114] ss:$8 sps:$4 sm:$0xff]   ;;  %v15925_v29 = vrot.slane %v15853_v63, 1  ;;  %v21834_v63 = vld [vmem:[#allocation15 + $0x4e4] ss:$8 sps:$4 sm:$0xff]  }
 0xe95   :  { %v15018_v6 = vor.u32 %v15017_v28, %v15013_v41  ;;  %v21756_v28 = vld [vmem:[#allocation15 + $0x414] ss:$8 sps:$4 sm:$0xff]  }
 0xe96   :  { %v15025_v52 = vor.u32 %v15024_v25, %v15020_v53 }
 0xe98   :  { %15396 = vmatprep.mubr.bf16.mxu1 %v15025_v52  ;;  %v21754_v52 = vld [vmem:[#allocation15 + $0x410] ss:$8 sps:$4 sm:$0xff]  }
 0xe99   :  { %15397 = vmatmul.mubr.bf16.vlgmr.msra.gmra.mrb[112].mxu1 %v15018_v6  ;;  %v21751_v6 = vld [vmem:[#allocation15 + $0x110] ss:$8 sps:$4 sm:$0xff]  }
 0xe9a   :  { %15767 = vmatpush1.bf16.msra.mxu1 %v21652_v61  ;;  %15798 = vmatprep.mubr.bf16.mxu1 %v14873_v32  ;;  %v21759_v61 = vld [vmem:[#allocation15 + $0x124] ss:$8 sps:$4 sm:$0xff]  }
 0xe9b   :  { %15768 = vmatprep.subr.bf16.mxu1 %v21660_v34  ;;  %v21762_v32 = vld [vmem:[#allocation15 + $0x424] ss:$8 sps:$4 sm:$0xff]   ;;  %v21757_v34 = vld [vmem:[#allocation15 + $0x120] ss:$8 sps:$4 sm:$0xff]  }
 0xe9e   :  { %15769 = vmatpush1.bf16.msra.mxu1 %v21658_v59  ;;  %v21760_v59 = vld [vmem:[#allocation15 + $0x420] ss:$8 sps:$4 sm:$0xff]  }
 0xe9f   :  { %15770 = vmatprep.subr.bf16.mxu1 %v21666_v17  ;;  %v21765_v17 = vld [vmem:[#allocation15 + $0x134] ss:$8 sps:$4 sm:$0xff]  }
 0xea2   :  { %15771 = vmatpush1.bf16.msra.mxu1 %v21664_v21  ;;  %v21768_v21 = vld [vmem:[#allocation15 + $0x434] ss:$8 sps:$4 sm:$0xff]  }
 0xea3   :  { %15772 = vmatprep.subr.bf16.mxu1 %v21672_v62  ;;  %v21763_v62 = vld [vmem:[#allocation15 + $0x130] ss:$8 sps:$4 sm:$0xff]  }
 0xea6   :  { %15773 = vmatpush1.bf16.msra.mxu1 %v21670_v22  ;;  %v21766_v22 = vld [vmem:[#allocation15 + $0x430] ss:$8 sps:$4 sm:$0xff]  }
 0xea7   :  { %15774 = vmatprep.subr.bf16.mxu1 %v21678_v2  ;;  %v21771_v2 = vld [vmem:[#allocation15 + $0x144] ss:$8 sps:$4 sm:$0xff]  }
 0xeaa   :  { %15775 = vmatpush1.bf16.msra.mxu1 %v21676_v47  ;;  %v21774_v47 = vld [vmem:[#allocation15 + $0x444] ss:$8 sps:$4 sm:$0xff]  }
 0xeab   :  { %15776 = vmatprep.subr.bf16.mxu1 %v21684_v0  ;;  %v21769_v0 = vld [vmem:[#allocation15 + $0x140] ss:$8 sps:$4 sm:$0xff]  }
 0xeae   :  { %15777 = vmatpush1.bf16.msra.mxu1 %v21682_v13  ;;  %v21772_v13 = vld [vmem:[#allocation15 + $0x440] ss:$8 sps:$4 sm:$0xff]  }
 0xeaf   :  { %15778 = vmatprep.subr.bf16.mxu1 %v21690_v3  ;;  %v21777_v3 = vld [vmem:[#allocation15 + $0x154] ss:$8 sps:$4 sm:$0xff]  }
 0xeb2   :  { %15779 = vmatpush1.bf16.msra.mxu1 %v21688_v4  ;;  %v21780_v4 = vld [vmem:[#allocation15 + $0x454] ss:$8 sps:$4 sm:$0xff]  }
 0xeb3   :  { %15780 = vmatprep.subr.bf16.mxu1 %v21696_v5  ;;  %v21775_v5 = vld [vmem:[#allocation15 + $0x150] ss:$8 sps:$4 sm:$0xff]  }
 0xeb6   :  { %15781 = vmatpush1.bf16.msra.mxu1 %v21694_v49  ;;  %v21778_v49 = vld [vmem:[#allocation15 + $0x450] ss:$8 sps:$4 sm:$0xff]  }
 0xeb7   :  { %15782 = vmatprep.subr.bf16.mxu1 %v21702_v45  ;;  %v21783_v45 = vld [vmem:[#allocation15 + $0x164] ss:$8 sps:$4 sm:$0xff]  }
 0xeba   :  { %15783 = vmatpush1.bf16.msra.mxu1 %v21700_v8  ;;  %v21786_v8 = vld [vmem:[#allocation15 + $0x464] ss:$8 sps:$4 sm:$0xff]  }
 0xebb   :  { %15784 = vmatprep.subr.bf16.mxu1 %v21708_v7  ;;  %v21781_v7 = vld [vmem:[#allocation15 + $0x160] ss:$8 sps:$4 sm:$0xff]  }
 0xebe   :  { %15785 = vmatpush1.bf16.msra.mxu1 %v21706_v51  ;;  %v21784_v51 = vld [vmem:[#allocation15 + $0x460] ss:$8 sps:$4 sm:$0xff]  }
 0xebf   :  { %15786 = vmatprep.subr.bf16.mxu1 %v21714_v23  ;;  %v21789_v23 = vld [vmem:[#allocation15 + $0x174] ss:$8 sps:$4 sm:$0xff]  }
 0xec2   :  { %15787 = vmatpush1.bf16.msra.mxu1 %v21712_v35  ;;  %v21792_v35 = vld [vmem:[#allocation15 + $0x474] ss:$8 sps:$4 sm:$0xff]  }
 0xec3   :  { %15788 = vmatprep.subr.bf16.mxu1 %v21720_v31  ;;  %v21787_v31 = vld [vmem:[#allocation15 + $0x170] ss:$8 sps:$4 sm:$0xff]  }
 0xec4   :  { %v14847_v37 = vpop.f32.mrb[110].mxu1 }
 0xec5   :  { %v14858_v20 = vrot.slane %v14847_v37, 7  ;;  %v14849_v55 = vpop.f32.mrb[111].mxu1  ;;  %v21798_v37 = vld [vmem:[#allocation15 + $0x484] ss:$8 sps:$4 sm:$0xff]  }
 0xec6   :  { %v14859_v58 = vrot.slane %v14849_v55, 7  ;;  %15789 = vmatpush1.bf16.msra.mxu1 %v21718_v19  ;;  %v21790_v19 = vld [vmem:[#allocation15 + $0x470] ss:$8 sps:$4 sm:$0xff]   ;;  %v21796_v55 = vld [vmem:[#allocation15 + $0x480] ss:$8 sps:$4 sm:$0xff]  }
 0xec7   :  { %14866 = vst [vmem:[#allocation4 + $0x10] sm:$0x1e] %v14858_v20  ;;  %15790 = vmatprep.subr.bf16.mxu1 %v21726_v56  ;;  %v21795_v56 = vld [vmem:[#allocation15 + $0x184] ss:$8 sps:$4 sm:$0xff]   ;;  %v21793_v20 = vld [vmem:[#allocation15 + $0x180] ss:$8 sps:$4 sm:$0xff]  }
 0xec8   :  { %14867 = vst [vmem:[#allocation4 + $0x18] sm:$0x1e] %v14859_v58  ;;  %v21801_v58 = vld [vmem:[#allocation15 + $0x194] ss:$8 sps:$4 sm:$0xff]  }
 0xeca   :  { %15791 = vmatpush1.bf16.msra.mxu1 %v21724_v24  ;;  %v21804_v24 = vld [vmem:[#allocation15 + $0x494] ss:$8 sps:$4 sm:$0xff]  }
 0xecb   :  { %15792 = vmatprep.subr.bf16.mxu1 %v21732_v26  ;;  %v21799_v26 = vld [vmem:[#allocation15 + $0x190] ss:$8 sps:$4 sm:$0xff]  }
 0xece   :  { %15793 = vmatpush1.bf16.msra.mxu1 %v21730_v46  ;;  %v14942_v33 = vld [vmem:[#allocation4 + $0x10] sm:$0x1e] }
 0xecf   :  { %15794 = vmatprep.subr.bf16.mxu1 %v21738_v12  ;;  %v14943_v44 = vld [vmem:[#allocation4 + $0x18] sm:$0x1e]  ;;  %v14946_v48 = vpack.c.bf16 %v14942_v33, %v14942_v33  ;;  %v21802_v46 = vld [vmem:[#allocation15 + $0x490] ss:$8 sps:$4 sm:$0xff]  }
 0xed0   :  { %v14947_v10 = vpack.c.bf16 %v14943_v44, %v14943_v44  ;;  %v14871_v41 = vld [vmem:[#allocation4 + $0x18] sm:$0xf]  ;;  %v21807_v12 = vld [vmem:[#allocation15 + $0x1a4] ss:$8 sps:$4 sm:$0xff]   ;;  %v21813_v44 = vld [vmem:[#allocation15 + $0x1b4] ss:$8 sps:$4 sm:$0xff]  }
 0xed1   :  { %v15029_v11 = vshll.u32 %v14946_v48, 16  ;;  %v15027_v18 = vshrl.u32 %v14946_v48, 16  ;;  %v14875_v25 = vpack.c.bf16 %v14871_v41, %v14871_v41  ;;  %v21805_v33 = vld [vmem:[#allocation15 + $0x1a0] ss:$8 sps:$4 sm:$0xff]   ;;  %v21816_v48 = vld [vmem:[#allocation15 + $0x4b4] ss:$8 sps:$4 sm:$0xff]  }
 0xed2   :  { %15795 = vmatpush1.bf16.msra.mxu1 %v21736_v27  ;;  %v15036_v9 = vshll.u32 %v14947_v10, 16  ;;  %v15034_v16 = vshrl.u32 %v14947_v10, 16  ;;  %v21810_v27 = vld [vmem:[#allocation15 + $0x4a4] ss:$8 sps:$4 sm:$0xff]   ;;  %v21811_v10 = vld [vmem:[#allocation15 + $0x1b0] ss:$8 sps:$4 sm:$0xff]  }
 0xed3   :  { %15796 = vmatprep.subr.bf16.mxu1 %v21744_v14  ;;  %v15031_v15 = vrot.slane %v15029_v11, 1  ;;  %v21808_v14 = vld [vmem:[#allocation15 + $0x4a0] ss:$8 sps:$4 sm:$0xff]   ;;  %v21814_v11 = vld [vmem:[#allocation15 + $0x4b0] ss:$8 sps:$4 sm:$0xff]  }
 0xed4   :  { %v15038_v57 = vrot.slane %v15036_v9, 1  ;;  %v21822_v9 = vld [vmem:[#allocation15 + $0x4c4] ss:$8 sps:$4 sm:$0xff]   ;;  %v21840_v41 = vld [vmem:[#allocation15 + $0x4f4] ss:$8 sps:$4 sm:$0xff]  }
 0xed5   :  { %v15032_v53 = vor.u32 %v15031_v15, %v15027_v18  ;;  %v21825_v15 = vld [vmem:[#allocation15 + $0x1d4] ss:$8 sps:$4 sm:$0xff]   ;;  %v21831_v18 = vld [vmem:[#allocation15 + $0x1e4] ss:$8 sps:$4 sm:$0xff]  }
 0xed6   :  { %15797 = vmatpush1.bf16.msra.mxu1 %v21742_v43  ;;  %v15039_v54 = vor.u32 %v15038_v57, %v15034_v16  ;;  %v21819_v43 = vld [vmem:[#allocation15 + $0x1c4] ss:$8 sps:$4 sm:$0xff]   ;;  %v21828_v16 = vld [vmem:[#allocation15 + $0x4d4] ss:$8 sps:$4 sm:$0xff]   ;;  %v21823_v57 = vld [vmem:[#allocation15 + $0x1d0] ss:$8 sps:$4 sm:$0xff]  }
 0xed7   :  { %16252 = vmatprep.subr.bf16.mxu1 %v21750_v1  ;;  %v21820_v1 = vld [vmem:[#allocation15 + $0x4c0] ss:$8 sps:$4 sm:$0xff]  }
 0xed8   :  { %15437 = vmatprep.mubr.bf16.mxu0 %v15039_v54  ;;  %v21829_v54 = vld [vmem:[#allocation15 + $0x1e0] ss:$8 sps:$4 sm:$0xff]  }
 0xed9   :  { %15799 = vmatmul.mubr.bf16.vlgmr.msra.gmra.mrb[116].mxu1 %v14872_v50  ;;  %15438 = vmatmul.mubr.bf16.vlgmr.msra.gmra.mrb[120].mxu0 %v15032_v53  ;;  %v15848_v50 = vld [vmem:[#allocation4] sm:$0x3c]  ;;  %v15851_v53 = vld [vmem:[#allocation4 + $0x18] sm:$0x3c] }
 0xeda   :  { %15808 = vmatpush1.bf16.msra.mxu0 %v21745_v30  ;;  %16253 = vmatpush1.bf16.msra.mxu1 %v21748_v39  ;;  %v21832_v30 = vld [vmem:[#allocation15 + $0x4e0] ss:$8 sps:$4 sm:$0xff]   ;;  %v21837_v39 = vld [vmem:[#allocation15 + $0x1f4] ss:$8 sps:$4 sm:$0xff]  }
 0xedb   :  { %16284 = vmatprep.mubr.bf16.mxu1 %v15925_v29  ;;  %15839 = vmatprep.mubr.bf16.mxu0 %v14875_v25  ;;  %v15852_v29 = vpack.c.bf16 %v15848_v50, %v15848_v50  ;;  %v21843_v25 = vld [vmem:[#allocation15 + $0x504] ss:$8 sps:$4 sm:$0xff]  }
 0xedc   :  { %15809 = vmatprep.subr.bf16.mxu0 %v21753_v36  ;;  %16254 = vmatprep.subr.bf16.mxu1 %v21756_v28  ;;  %v21835_v36 = vld [vmem:[#allocation15 + $0x1f0] ss:$8 sps:$4 sm:$0xff]  }
 0xedd   :  { %v21838_v28 = vld [vmem:[#allocation15 + $0x4f0] ss:$8 sps:$4 sm:$0xff]  }
 0xede   :  { %15810 = vmatpush1.bf16.msra.mxu0 %v21751_v6  ;;  %16255 = vmatpush1.bf16.msra.mxu1 %v21754_v52  ;;  %v14870_v6 = vld [vmem:[#allocation4 + $0x10] sm:$0xf]  ;;  %v15855_v52 = vpack.c.bf16 %v15851_v53, %v15851_v53 }
 0xedf   :  { %15811 = vmatprep.subr.bf16.mxu0 %v21759_v61  ;;  %16256 = vmatprep.subr.bf16.mxu1 %v21762_v32  ;;  %v21841_v61 = vld [vmem:[#allocation15 + $0x500] ss:$8 sps:$4 sm:$0xff]   ;;  %v14874_v32 = vpack.c.bf16 %v14870_v6, %v14870_v6  ;;  %v21896_v6 = vld [vmem:[%s23058_s7 + $0xc8] sm:$0xff]  }
 0xee2   :  { %15812 = vmatpush1.bf16.msra.mxu0 %v21757_v34  ;;  %16257 = vmatpush1.bf16.msra.mxu1 %v21760_v59  ;;  %v15924_v34 = vrot.slane %v15852_v29, 1  ;;  %v21846_v59 = vld [vmem:[#allocation15 + $0x514] ss:$8 sps:$4 sm:$0xff]  }
 0xee3   :  { %15813 = vmatprep.subr.bf16.mxu0 %v21765_v17  ;;  %16258 = vmatprep.subr.bf16.mxu1 %v21768_v21  ;;  %v15927_v17 = vrot.slane %v15855_v52, 1  ;;  %v21844_v21 = vld [vmem:[#allocation15 + $0x510] ss:$8 sps:$4 sm:$0xff]   ;;  %v21897_v52 = vld [vmem:[%s23058_s7 + $0x10] sm:$0xff]  }
 0xee6   :  { %15814 = vmatpush1.bf16.msra.mxu0 %v21763_v62  ;;  %16259 = vmatpush1.bf16.msra.mxu1 %v21766_v22  ;;  %v21849_v62 = vld [vmem:[#allocation15 + $0x524] ss:$8 sps:$4 sm:$0xff]   ;;  %v21847_v22 = vld [vmem:[#allocation15 + $0x520] ss:$8 sps:$4 sm:$0xff]  }
 0xee7   :  { %15815 = vmatprep.subr.bf16.mxu0 %v21771_v2  ;;  %16260 = vmatprep.subr.bf16.mxu1 %v21774_v47  ;;  %v21852_v2 = vld [vmem:[#allocation15 + $0x534] ss:$8 sps:$4 sm:$0xff]   ;;  %v21850_v47 = vld [vmem:[#allocation15 + $0x530] ss:$8 sps:$4 sm:$0xff]  }
 0xeea   :  { %15816 = vmatpush1.bf16.msra.mxu0 %v21769_v0  ;;  %16261 = vmatpush1.bf16.msra.mxu1 %v21772_v13  ;;  %v21855_v0 = vld [vmem:[#allocation15 + $0x544] ss:$8 sps:$4 sm:$0xff]   ;;  %v21853_v13 = vld [vmem:[#allocation15 + $0x540] ss:$8 sps:$4 sm:$0xff]  }
 0xeeb   :  { %15817 = vmatprep.subr.bf16.mxu0 %v21777_v3  ;;  %16262 = vmatprep.subr.bf16.mxu1 %v21780_v4  ;;  %v21858_v3 = vld [vmem:[#allocation15 + $0x554] ss:$8 sps:$4 sm:$0xff]   ;;  %v21856_v4 = vld [vmem:[#allocation15 + $0x550] ss:$8 sps:$4 sm:$0xff]  }
 0xeee   :  { %15818 = vmatpush1.bf16.msra.mxu0 %v21775_v5  ;;  %16263 = vmatpush1.bf16.msra.mxu1 %v21778_v49  ;;  %v21861_v5 = vld [vmem:[#allocation15 + $0x564] ss:$8 sps:$4 sm:$0xff]   ;;  %v21859_v49 = vld [vmem:[#allocation15 + $0x560] ss:$8 sps:$4 sm:$0xff]  }
 0xeef   :  { %15819 = vmatprep.subr.bf16.mxu0 %v21783_v45  ;;  %16264 = vmatprep.subr.bf16.mxu1 %v21786_v8  ;;  %v21864_v45 = vld [vmem:[#allocation15 + $0x574] ss:$8 sps:$4 sm:$0xff]   ;;  %v21862_v8 = vld [vmem:[#allocation15 + $0x570] ss:$8 sps:$4 sm:$0xff]  }
 0xef2   :  { %15820 = vmatpush1.bf16.msra.mxu0 %v21781_v7  ;;  %16265 = vmatpush1.bf16.msra.mxu1 %v21784_v51  ;;  %v21867_v7 = vld [vmem:[#allocation15 + $0x584] ss:$8 sps:$4 sm:$0xff]   ;;  %v21865_v51 = vld [vmem:[#allocation15 + $0x580] ss:$8 sps:$4 sm:$0xff]  }
 0xef3   :  { %15821 = vmatprep.subr.bf16.mxu0 %v21789_v23  ;;  %16266 = vmatprep.subr.bf16.mxu1 %v21792_v35  ;;  %v21870_v23 = vld [vmem:[#allocation15 + $0x594] ss:$8 sps:$4 sm:$0xff]   ;;  %v21868_v35 = vld [vmem:[#allocation15 + $0x590] ss:$8 sps:$4 sm:$0xff]  }
 0xef6   :  { %15822 = vmatpush1.bf16.msra.mxu0 %v21787_v31  ;;  %16267 = vmatpush1.bf16.msra.mxu1 %v21790_v19  ;;  %v21873_v31 = vld [vmem:[#allocation15 + $0x5a4] ss:$8 sps:$4 sm:$0xff]   ;;  %v21871_v19 = vld [vmem:[#allocation15 + $0x5a0] ss:$8 sps:$4 sm:$0xff]  }
 0xef7   :  { %15823 = vmatprep.subr.bf16.mxu0 %v21795_v56  ;;  %16268 = vmatprep.subr.bf16.mxu1 %v21798_v37  ;;  %v21876_v56 = vld [vmem:[#allocation15 + $0x5b4] ss:$8 sps:$4 sm:$0xff]   ;;  %v21874_v37 = vld [vmem:[#allocation15 + $0x5b0] ss:$8 sps:$4 sm:$0xff]  }
 0xefa   :  { %15824 = vmatpush1.bf16.msra.mxu0 %v21793_v20  ;;  %16269 = vmatpush1.bf16.msra.mxu1 %v21796_v55  ;;  %v21879_v20 = vld [vmem:[#allocation15 + $0x5c4] ss:$8 sps:$4 sm:$0xff]   ;;  %v21877_v55 = vld [vmem:[#allocation15 + $0x5c0] ss:$8 sps:$4 sm:$0xff]  }
 0xefb   :  { %15825 = vmatprep.subr.bf16.mxu0 %v21801_v58  ;;  %16270 = vmatprep.subr.bf16.mxu1 %v21804_v24  ;;  %v21882_v58 = vld [vmem:[#allocation15 + $0x5d4] ss:$8 sps:$4 sm:$0xff]   ;;  %v21880_v24 = vld [vmem:[#allocation15 + $0x5d0] ss:$8 sps:$4 sm:$0xff]  }
 0xefe   :  { %15826 = vmatpush1.bf16.msra.mxu0 %v21799_v26  ;;  %16271 = vmatpush1.bf16.msra.mxu1 %v21802_v46  ;;  %v21885_v26 = vld [vmem:[#allocation15 + $0x5e4] ss:$8 sps:$4 sm:$0xff]   ;;  %v21883_v46 = vld [vmem:[#allocation15 + $0x5e0] ss:$8 sps:$4 sm:$0xff]  }
 0xeff   :  { %15827 = vmatprep.subr.bf16.mxu0 %v21807_v12  ;;  %16272 = vmatprep.subr.bf16.mxu1 %v21810_v27  ;;  %v21888_v12 = vld [vmem:[#allocation15 + $0x5f4] ss:$8 sps:$4 sm:$0xff]  }
 0xf00   :  { %v15850_v27 = vld [vmem:[#allocation4 + $0x10] sm:$0x3c] }
 0xf02   :  { %15828 = vmatpush1.bf16.msra.mxu0 %v21805_v33  ;;  %16273 = vmatpush1.bf16.msra.mxu1 %v21808_v14  ;;  %v21886_v33 = vld [vmem:[#allocation15 + $0x5f0] ss:$8 sps:$4 sm:$0xff]   ;;  %v15854_v14 = vpack.c.bf16 %v15850_v27, %v15850_v27 }
 0xf03   :  { %15829 = vmatprep.subr.bf16.mxu0 %v21813_v44  ;;  %16274 = vmatprep.subr.bf16.mxu1 %v21816_v48 }
 0xf04   :  { %v15926_v44 = vrot.slane %v15854_v14, 1 }
 0xf06   :  { %15830 = vmatpush1.bf16.msra.mxu0 %v21811_v10  ;;  %16275 = vmatpush1.bf16.msra.mxu1 %v21814_v11 }
 0xf07   :  { %15831 = vmatprep.subr.bf16.mxu0 %v21819_v43  ;;  %16276 = vmatprep.subr.bf16.mxu1 %v21822_v9  ;;  %v21889_v9 = vld [vmem:[%s23058_s7 + $0x40] sm:$0xff]  }
 0xf0a   :  { %15832 = vmatpush1.bf16.msra.mxu0 %v21817_v60  ;;  %16277 = vmatpush1.bf16.msra.mxu1 %v21820_v1  ;;  %v21890_v60 = vld [vmem:[%s23058_s7] sm:$0xff]   ;;  %v21891_v1 = vld [vmem:[%s23058_s7 + $0x48] sm:$0xff]  }
 0xf0b   :  { %15833 = vmatprep.subr.bf16.mxu0 %v21825_v15  ;;  %16278 = vmatprep.subr.bf16.mxu1 %v21828_v16  ;;  %v21892_v15 = vld [vmem:[%s23058_s7 + $0xc0] sm:$0xff]  }
 0xf0c   :  { %v21894_v16 = vld [vmem:[%s23058_s7 + $0x80] sm:$0xff]  }
 0xf0e   :  { %15834 = vmatpush1.bf16.msra.mxu0 %v21823_v57  ;;  %16279 = vmatpush1.bf16.msra.mxu1 %v21826_v42  ;;  %v21893_v57 = vld [vmem:[%s23058_s7 + $0x8] sm:$0xff]  }
 0xf0f   :  { %15835 = vmatprep.subr.bf16.mxu0 %v21831_v18  ;;  %16280 = vmatprep.subr.bf16.mxu1 %v21834_v63 }
 0xf12   :  { %15836 = vmatpush1.bf16.msra.mxu0 %v21829_v54  ;;  %16281 = vmatpush1.bf16.msra.mxu1 %v21832_v30 }
 0xf13   :  { %15837 = vmatprep.subr.bf16.mxu0 %v21837_v39  ;;  %16282 = vmatprep.subr.bf16.mxu1 %v21840_v41 }
 0xf16   :  { %15838 = vmatpush1.bf16.msra.mxu0 %v21835_v36  ;;  %16283 = vmatpush1.bf16.msra.mxu1 %v21838_v28 }
 0xf17   :  { %16293 = vmatprep.subr.bf16.mxu0 %v21843_v25  ;;  %19010 = vmatprep.subr.bf16.mxu1 %v21892_v15  ;;  %v21895_v25 = vld [vmem:[%s23058_s7 + $0x50] sm:$0xff]  }
 0xf19   :  { %15840 = vmatmul.mubr.bf16.vlgmr.msra.gmra.mrb[124].mxu0 %v14874_v32  ;;  %16285 = vmatmul.mubr.bf16.vlgmr.msra.gmra.mrb[120].mxu1 %v15924_v34  ;;  %v21899_v32 = vld [vmem:[%s23058_s7 + $0x58] sm:$0xff]   ;;  %v21900_v34 = vld [vmem:[%s23058_s7 + $0xd0] sm:$0xff]  }
 0xf1a   :  { %16294 = vmatpush1.bf16.msra.mxu0 %v21841_v61  ;;  %16325 = vmatprep.mubr.bf16.mxu0 %v15927_v17  ;;  %v21898_v61 = vld [vmem:[%s23058_s7 + $0x88] sm:$0xff]   ;;  %v21902_v17 = vld [vmem:[%s23058_s7 + $0x90] sm:$0xff]  }
 0xf1b   :  { %16295 = vmatprep.subr.bf16.mxu0 %v21846_v59  ;;  %19011 = vmatpush3.bf16.msra.mxu1 %v21894_v16  ;;  %v21901_v59 = vld [vmem:[%s23058_s7 + $0x18] sm:$0xff]  }
 0xf1c   :  { %19012 = vmatprep.subr.bf16.mxu1 %v21896_v6 }
 0xf1e   :  { %16296 = vmatpush1.bf16.msra.mxu0 %v21844_v21  ;;  %v21903_v21 = vld [vmem:[%s23058_s7 + $0x60] sm:$0xff]  }
 0xf1f   :  { %16297 = vmatprep.subr.bf16.mxu0 %v21849_v62  ;;  %19013 = vmatpush3.bf16.msra.mxu1 %v21898_v61  ;;  %v21904_v62 = vld [vmem:[%s23058_s7 + $0xd8] sm:$0xff]  }
 0xf20   :  { %19014 = vmatprep.subr.bf16.mxu1 %v21900_v34 }
 0xf22   :  { %16298 = vmatpush1.bf16.msra.mxu0 %v21847_v22  ;;  %v21905_v22 = vld [vmem:[%s23058_s7 + $0x20] sm:$0xff]  }
 0xf23   :  { %16299 = vmatprep.subr.bf16.mxu0 %v21852_v2  ;;  %19015 = vmatpush3.bf16.msra.mxu1 %v21902_v17  ;;  %v21906_v2 = vld [vmem:[%s23058_s7 + $0x98] sm:$0xff]  }
 0xf24   :  { %19016 = vmatprep.subr.bf16.mxu1 %v21904_v62  ;;  %v21922_v62 = vld [vmem:[%s23058_s7 + $0x100] sm:$0xff]  }
 0xf26   :  { %16300 = vmatpush1.bf16.msra.mxu0 %v21850_v47  ;;  %v21907_v47 = vld [vmem:[%s23058_s7 + $0x68] sm:$0xff]  }
 0xf27   :  { %16301 = vmatprep.subr.bf16.mxu0 %v21855_v0  ;;  %v21908_v0 = vld [vmem:[%s23058_s7 + $0xe0] sm:$0xff]   ;;  %19017 = vmatpush3.bf16.msra.mxu1 %v21906_v2  ;;  %v21923_v2 = vld [vmem:[%s23058_s7 + $0x148] sm:$0xff]  }
 0xf28   :  { %19018 = vmatprep.subr.bf16.mxu1 %v21908_v0  ;;  %v21924_v0 = vld [vmem:[%s23058_s7 + $0x108] sm:$0xff]  }
 0xf2a   :  { %16302 = vmatpush1.bf16.msra.mxu0 %v21853_v13  ;;  %v21909_v13 = vld [vmem:[%s23058_s7 + $0x28] sm:$0xff]  }
 0xf2b   :  { %16303 = vmatprep.subr.bf16.mxu0 %v21858_v3  ;;  %v21910_v3 = vld [vmem:[%s23058_s7 + $0xa0] sm:$0xff]  }
 0xf2c   :  { %19019 = vmatpush3.bf16.msra.mxu1 %v21910_v3  ;;  %v21926_v3 = vld [vmem:[%s23058_s7 + $0x110] sm:$0xff]  }
 0xf2e   :  { %16304 = vmatpush1.bf16.msra.mxu0 %v21856_v4  ;;  %v21911_v4 = vld [vmem:[%s23058_s7 + $0x70] sm:$0xff]  }
 0xf2f   :  { %16305 = vmatprep.subr.bf16.mxu0 %v21861_v5  ;;  %v21912_v5 = vld [vmem:[%s23058_s7 + $0xe8] sm:$0xff]  }
 0xf30   :  { %19020 = vmatprep.subr.bf16.mxu1 %v21912_v5  ;;  %v21928_v5 = vld [vmem:[%s23058_s7 + $0x118] sm:$0xff]  }
 0xf32   :  { %16306 = vmatpush1.bf16.msra.mxu0 %v21859_v49  ;;  %v21913_v49 = vld [vmem:[%s23058_s7 + $0x30] sm:$0xff]  }
 0xf33   :  { %16307 = vmatprep.subr.bf16.mxu0 %v21864_v45  ;;  %v21914_v45 = vld [vmem:[%s23058_s7 + $0xa8] sm:$0xff]  }
 0xf34   :  { %19021 = vmatpush3.bf16.msra.mxu1 %v21914_v45  ;;  %v21930_v45 = vld [vmem:[%s23058_s7 + $0x120] sm:$0xff]  }
 0xf36   :  { %16308 = vmatpush1.bf16.msra.mxu0 %v21862_v8  ;;  %v21915_v8 = vld [vmem:[%s23058_s7 + $0x78] sm:$0xff]  }
 0xf37   :  { %16309 = vmatprep.subr.bf16.mxu0 %v21867_v7  ;;  %v21916_v7 = vld [vmem:[%s23058_s7 + $0xf0] sm:$0xff]  }
 0xf38   :  { %19022 = vmatprep.subr.bf16.mxu1 %v21916_v7  ;;  %v21932_v7 = vld [vmem:[%s23058_s7 + $0x128] sm:$0xff]  }
 0xf3a   :  { %16310 = vmatpush1.bf16.msra.mxu0 %v21865_v51  ;;  %v21917_v51 = vld [vmem:[%s23058_s7 + $0x38] sm:$0xff]  }
 0xf3b   :  { %16311 = vmatprep.subr.bf16.mxu0 %v21870_v23  ;;  %v21918_v23 = vld [vmem:[%s23058_s7 + $0xb0] sm:$0xff]  }
 0xf3c   :  { %19023 = vmatpush3.bf16.msra.mxu1 %v21918_v23  ;;  %v21934_v23 = vld [vmem:[%s23058_s7 + $0x130] sm:$0xff]  }
 0xf3e   :  { %16312 = vmatpush1.bf16.msra.mxu0 %v21868_v35  ;;  %v21919_v35 = vld [vmem:[%s23058_s7 + $0xf8] sm:$0xff]  }
 0xf3f   :  { %16313 = vmatprep.subr.bf16.mxu0 %v21873_v31  ;;  %v21920_v31 = vld [vmem:[%s23058_s7 + $0xb8] sm:$0xff]   ;;  %19024 = vmatprep.subr.bf16.mxu1 %v21919_v35 }
 0xf40   :  { %19025 = vmatpush3.bf16.msra.mxu1 %v21920_v31  ;;  %v21935_v35 = vld [vmem:[%s23058_s7 + $0x178] sm:$0xff]  }
 0xf42   :  { %16314 = vmatpush1.bf16.msra.mxu0 %v21871_v19  ;;  %v21921_v19 = vld [vmem:[%s23058_s7 + $0x140] sm:$0xff]  }
 0xf43   :  { %16315 = vmatprep.subr.bf16.mxu0 %v21876_v56  ;;  %19054 = vmatprep.subr.bf16.mxu1 %v21921_v19  ;;  %v21936_v19 = vld [vmem:[%s23058_s7 + $0x138] sm:$0xff]  }
 0xf46   :  { %16316 = vmatpush1.bf16.msra.mxu0 %v21874_v37 }
 0xf47   :  { %16317 = vmatprep.subr.bf16.mxu0 %v21879_v20 }
 0xf4a   :  { %16318 = vmatpush1.bf16.msra.mxu0 %v21877_v55 }
 0xf4b   :  { %16319 = vmatprep.subr.bf16.mxu0 %v21882_v58 }
 0xf4e   :  { %16320 = vmatpush1.bf16.msra.mxu0 %v21880_v24 }
 0xf4f   :  { %16321 = vmatprep.subr.bf16.mxu0 %v21885_v26 }
 0xf52   :  { %16322 = vmatpush1.bf16.msra.mxu0 %v21883_v46 }
 0xf53   :  { %16323 = vmatprep.subr.bf16.mxu0 %v21888_v12 }
 0xf56   :  { %16324 = vmatpush1.bf16.msra.mxu0 %v21886_v33  ;;  %v16336_v33 = vld [vmem:[#allocation17] sm:$0x3] }
 0xf57   :  { %19032 = vmatprep.subr.bf16.mxu0 %v21889_v9 }
 0xf59   :  { %16326 = vmatmul.mubr.bf16.vlgmr.msra.gmra.mrb[128].mxu0 %v15926_v44 }
 0xf5a   :  { %19033 = vmatpush3.bf16.msra.mxu0 %v21890_v60 }
 0xf5b   :  { %19034 = vmatprep.subr.bf16.mxu0 %v21891_v1 }
 0xf5e   :  { %19035 = vmatpush3.bf16.msra.mxu0 %v21893_v57 }
 0xf5f   :  { %19036 = vmatprep.subr.bf16.mxu0 %v21895_v25 }
 0xf62   :  { %19037 = vmatpush3.bf16.msra.mxu0 %v21897_v52 }
 0xf63   :  { %19038 = vmatprep.subr.bf16.mxu0 %v21899_v32 }
 0xf66   :  { %19039 = vmatpush3.bf16.msra.mxu0 %v21901_v59 }
 0xf67   :  { %19040 = vmatprep.subr.bf16.mxu0 %v21903_v21 }
 0xf6a   :  { %19041 = vmatpush3.bf16.msra.mxu0 %v21905_v22 }
 0xf6b   :  { %19042 = vmatprep.subr.bf16.mxu0 %v21907_v47 }
 0xf6c   :  { %v15398_v48 = vpop.f32.mrb[112].mxu1 }
 0xf6d   :  { %v15400_v10 = vpop.f32.mrb[113].mxu1 }
 0xf6e   :  { %v15402_v11 = vpop.f32.mrb[114].mxu1  ;;  %19043 = vmatpush3.bf16.msra.mxu0 %v21909_v13  ;;  %v21925_v13 = vld [vmem:[%s23058_s7 + $0x150] sm:$0xff]  }
 0xf6f   :  { %v15403_v43 = vpop.f32.mrb[115].mxu1  ;;  %19044 = vmatprep.subr.bf16.mxu0 %v21911_v4  ;;  %v21927_v4 = vld [vmem:[%s23058_s7 + $0x158] sm:$0xff]  }
 0xf70   :  { %v16345_v43 = vrot.slane %v16336_v33, %v22387_v40 }
 0xf72   :  { %19045 = vmatpush3.bf16.msra.mxu0 %v21913_v49  ;;  %v21929_v49 = vld [vmem:[%s23058_s7 + $0x160] sm:$0xff]  }
 0xf73   :  { %19046 = vmatprep.subr.bf16.mxu0 %v21915_v8  ;;  %v21931_v8 = vld [vmem:[%s23058_s7 + $0x168] sm:$0xff]  }
 0xf76   :  { %19047 = vmatpush3.bf16.msra.mxu0 %v21917_v51  ;;  %v21933_v51 = vld [vmem:[%s23058_s7 + $0x170] sm:$0xff]   ;;  %s22161_s7 = smov [#allocation20]  }
 0xf77   :  { %s16921_s0 = sshll.u32 %s22161_s7, 4  ;;  %s16922_s0 = int_to_ptr.vmem [resolvable:$true] %s16921_s0 }
 0xf78   :  { %s22113_s16 = scalar_lea.vmem %s16922_s0, 128  ;;  %p22118_p9 = scmp.lt.s32.totalorder %s16922_s0, %s16922_s0 }
 0xf79   :  { %p22114_p8 = scmp.ne.s32.totalorder %s16922_s0, %s22113_s16  ;;  %p22119_p10 = scmp.lt.s32.totalorder %s22113_s16, %s22113_s16 }
 0xf7b   :  { %p22120_p11 = por %p22119_p10, %p22118_p9 }
 0xf7d   :  { %p22121_p12 = pnand %p22120_p11, %p22114_p8 }
 0xfac   :  { %v15800_v42 = vpop.f32.mrb[116].mxu1  ;;  %v15439_v18 = vpop.f32.mrb[120].mxu0 }
 0xfad   :  { %v15440_v63 = vadd.f32 %v15439_v18, %v15398_v48  ;;  %v15802_v54 = vpop.f32.mrb[117].mxu1  ;;  %v15441_v30 = vpop.f32.mrb[121].mxu0  ;;  %v16341_v48 = vrot.slane %v16336_v33, %v22385_v38 }
 0xfae   :  { %v15442_v39 = vadd.f32 %v15441_v30, %v15400_v10  ;;  %v15804_v41 = vpop.f32.mrb[118].mxu1  ;;  %v15443_v50 = vpop.f32.mrb[122].mxu0 }
 0xfaf   :  { %v15805_v53 = vpop.f32.mrb[119].mxu1  ;;  %v15444_v36 = vpop.f32.mrb[123].mxu0  ;;  %v15801_v28 = vadd.f32 %v15800_v42, %v15440_v63 }
 0xfb0   :  { %v15803_v29 = vadd.f32 %v15802_v54, %v15442_v39 }
 0xfec   :  { %v15841_v56 = vpop.f32.mrb[124].mxu0  ;;  %v16286_v37 = vpop.f32.mrb[120].mxu1 }
 0xfed   :  { %v15842_v20 = vadd.f32 %v15841_v56, %v15801_v28  ;;  %v15843_v55 = vpop.f32.mrb[125].mxu0  ;;  %v16288_v58 = vpop.f32.mrb[121].mxu1 }
 0xfee   :  { %v15844_v24 = vadd.f32 %v15843_v55, %v15803_v29  ;;  %v15845_v26 = vpop.f32.mrb[126].mxu0  ;;  %v16290_v46 = vpop.f32.mrb[122].mxu1 }
 0xfef   :  { %v15846_v12 = vpop.f32.mrb[127].mxu0  ;;  %v16291_v27 = vpop.f32.mrb[123].mxu1 }
0x102c   :  { %v16327_v14 = vpop.f32.mrb[128].mxu0 }
0x102d   :  { %v16328_v44 = vadd.f32 %v16327_v14, %v16286_v37  ;;  %v16329_v10 = vpop.f32.mrb[129].mxu0 }
0x102e   :  { %v16330_v11 = vadd.f32 %v16329_v10, %v16288_v58  ;;  %v16331_v9 = vpop.f32.mrb[130].mxu0 }
0x102f   :  { %v16334_v60 = vadd.f32 %v16328_v44, %v15842_v20  ;;  %v16332_v1 = vpop.f32.mrb[131].mxu0  ;;  %v18943_v9 = vld [vmem:[#allocation18] ss:$0 sm:$0xff] }
0x1030   :  { %v16335_v15 = vadd.f32 %v16330_v11, %v15844_v24 }
0x1031   :  { %v16348_v16 = vadd.f32 %v16341_v48, %v16334_v60 }
0x1032   :  { %v16349_v57 = vadd.f32 %v16345_v43, %v16335_v15 }
0x1033   :  { %vm16350_vm11 = vcmp.ge.f32.partialorder %v16348_v16, 0.0  ;;  %v16352_v42 = vmul.f32 0.01, %v16348_v16 }
0x1034   :  { %vm16351_vm12 = vcmp.ge.f32.partialorder %v16349_v57, 0.0  ;;  %v16353_v18 = vmul.f32 0.01, %v16349_v57 }
0x1035   :  { %v16354_v63 = vsel %vm16350_vm11, %v16348_v16, %v16352_v42 }
0x1036   :  { %v16358_v54 = vrot.slane %v16354_v63, 7  ;;  %v16355_v30 = vsel %vm16351_vm12, %v16349_v57, %v16353_v18 }
0x1037   :  { %v16359_v39 = vrot.slane %v16355_v30, 7 }
0x1038   :  { %16362 = vst [vmem:[#allocation5] sm:$0x1e] %v16358_v54 }
0x1039   :  { %16363 = vst [vmem:[#allocation5 + $0x8] sm:$0x1e] %v16359_v39 }
0x103f   :  { %v16364_v38 = vld [vmem:[#allocation5] sm:$0xf] }
0x1040   :  { %v16400_v41 = vld [vmem:[#allocation5] sm:$0x1e]  ;;  %v16365_v50 = vld [vmem:[#allocation5 + $0x8] sm:$0xf]  ;;  %v16366_v29 = vpack.c.bf16 %v16364_v38, %v16364_v38 }
0x1041   :  { %v16401_v40 = vld [vmem:[#allocation5 + $0x8] sm:$0x1e]  ;;  %v16402_v53 = vpack.c.bf16 %v16400_v41, %v16400_v41  ;;  %v16367_v36 = vpack.c.bf16 %v16365_v50, %v16365_v50  ;;  %v16724_v31 = vld [vmem:[#allocation5] sm:$0x3c] }
0x1042   :  { %v16403_v28 = vpack.c.bf16 %v16401_v40, %v16401_v40  ;;  %v16725_v6 = vld [vmem:[#allocation5 + $0x8] sm:$0x3c]  ;;  %v16726_v56 = vpack.c.bf16 %v16724_v31, %v16724_v31 }
0x1043   :  { %v16439_v25 = vshll.u32 %v16402_v53, 16  ;;  %16716 = vmatprep.mubr.bf16.mxu0 %v16367_v36  ;;  %v16727_v59 = vpack.c.bf16 %v16725_v6, %v16725_v6  ;;  %v16437_v17 = vshrl.u32 %v16402_v53, 16 }
0x1044   :  { %v16446_v52 = vshll.u32 %v16403_v28, 16  ;;  %16717 = vmatmul.mubr.bf16.vlgmr.msra.gmra.mrb[132].mxu0 %v16366_v29  ;;  %v16444_v32 = vshrl.u32 %v16403_v28, 16  ;;  %v16762_v37 = vrot.slane %v16726_v56, 1 }
0x1045   :  { %v16441_v61 = vrot.slane %v16439_v25, 1  ;;  %v16763_v47 = vrot.slane %v16727_v59, 1 }
0x1046   :  { %v16448_v34 = vrot.slane %v16446_v52, 1 }
0x1047   :  { %v16442_v22 = vor.u32 %v16441_v61, %v16437_v17 }
0x1048   :  { %v16449_v21 = vor.u32 %v16448_v34, %v16444_v32 }
0x104a   :  { %16580 = vmatprep.mubr.bf16.mxu1 %v16449_v21 }
0x104b   :  { %16581 = vmatmul.mubr.bf16.vlgmr.msra.gmra.mrb[124].mxu1 %v16442_v22 }
0x104c   :  { %19055 = vmatpush3.bf16.msra.mxu1 %v21922_v62  ;;  %16894 = vmatprep.mubr.bf16.mxu1 %v16763_v47 }
0x104d   :  { %19056 = vmatprep.subr.bf16.mxu1 %v21923_v2 }
0x1050   :  { %19057 = vmatpush3.bf16.msra.mxu1 %v21924_v0 }
0x1051   :  { %19058 = vmatprep.subr.bf16.mxu1 %v21925_v13 }
0x1054   :  { %19059 = vmatpush3.bf16.msra.mxu1 %v21926_v3 }
0x1055   :  { %19060 = vmatprep.subr.bf16.mxu1 %v21927_v4 }
0x1058   :  { %19061 = vmatpush3.bf16.msra.mxu1 %v21928_v5 }
0x1059   :  { %19062 = vmatprep.subr.bf16.mxu1 %v21929_v49 }
0x105c   :  { %19063 = vmatpush3.bf16.msra.mxu1 %v21930_v45 }
0x105d   :  { %19064 = vmatprep.subr.bf16.mxu1 %v21931_v8 }
0x1060   :  { %19065 = vmatpush3.bf16.msra.mxu1 %v21932_v7 }
0x1061   :  { %19066 = vmatprep.subr.bf16.mxu1 %v21933_v51 }
0x1064   :  { %19067 = vmatpush3.bf16.msra.mxu1 %v21934_v23 }
0x1065   :  { %19068 = vmatprep.subr.bf16.mxu1 %v21935_v35 }
0x1068   :  { %19069 = vmatpush3.bf16.msra.mxu1 %v21936_v19 }
0x106b   :  { %16895 = vmatmul.mubr.bf16.vlgmr.msra.gmra.mrb[128].mxu1 %v16762_v37 }
0x1117   :  { %v19048_v20 = vpop.f32.mrb[132].mxu0 }
0x1118   :  { %v19049_v55 = vpop.f32.mrb[133].mxu0 }
0x1119   :  { %v19050_v58 = vadd.f32 %v19049_v55, %v19048_v20  ;;  %v19051_v24 = vpop.f32.mrb[134].mxu0 }
0x111a   :  { %v19052_v26 = vpop.f32.mrb[135].mxu0 }
0x111e   :  { %v19026_v46 = vpop.f32.mrb[124].mxu1 }
0x111f   :  { %v19027_v12 = vpop.f32.mrb[125].mxu1 }
0x1120   :  { %v19028_v27 = vadd.f32 %v19027_v12, %v19026_v46  ;;  %v19029_v33 = vpop.f32.mrb[126].mxu1 }
0x1121   :  { %v19030_v14 = vpop.f32.mrb[127].mxu1 }
0x1122   :  { %v16719_v44 = vadd.f32 %v19050_v58, %v19028_v27 }
0x113e   :  { %v19070_v48 = vpop.f32.mrb[128].mxu1 }
0x113f   :  { %v19071_v10 = vpop.f32.mrb[129].mxu1 }
0x1140   :  { %v19072_v11 = vadd.f32 %v19071_v10, %v19070_v48  ;;  %v19073_v43 = vpop.f32.mrb[130].mxu1 }
0x1141   :  { %v19074_v60 = vpop.f32.mrb[131].mxu1 }
0x1142   :  { %v16902_v1 = vadd.f32 %v19072_v11, %v16719_v44 }
0x1144   :  { %v16910_v15 = vadd.f32 %v18943_v9, %v16902_v1 }
0x1146   :  { %vm16911_vm13 = vcmp.ge.f32.partialorder %v16910_v15, 0.0  ;;  %v16912_v16 = vmul.f32 0.01, %v16910_v15 }
0x1148   :  { %v16913_v57 = vsel %vm16911_vm13, %v16910_v15, %v16912_v16 }
0x1149   :  { %16915 = vst.msk [vmem:[#allocation20 + $0x4] sm:$0xf] %vm135_vm0, %v16913_v57 }
0x114a   :  { %22124 = shalt.err (!%p22121_p12)
}
0x114b   :  { %s22125_s28 = scalar_lea.hbm %s23060_s9, 128 }
0x114c   :  { %p22126_p13 = scmp.ne.s32.totalorder %s23060_s9, %s22125_s28  ;;  %p22129_p0 = scmp.lt.u32.totalorder %s22125_s28, %s23060_s9 }
0x114e   :  { %p22131_p1 = pnand %p22129_p0, %p22126_p13 }
0x1150   :  { %22134 = shalt.err (!%p22131_p1)
}
0x1151   :  { %s22162_s6 = smov 64   ;;  %s22163_s1 = smov 4  }
0x1152   :  { %16927 = dma.vmem_to_hbm [thread:$0]  %s16922_s0, 128, %s23060_s9, [#allocation8], %s22162_s6, %s22162_s6, %s22163_s1  }
0x1153   :  { %22145 = dma.done.wait [#allocation8], 128  }
0x1154   :  { %22146 = vsyncadd [#allocation8], 4294967168 }
0x1155   :  { %16931 = vsyncpa [#allocation7], 1 }
0x1156   :  { %16932 = vsyncpa [#allocation10], 1 }
0x1157   :  { %16933 = vsyncpa [#allocation13], 1 }
0x1158   :  { %16934 = vsyncpa [#allocation16], 1 }
0x1159   :  { %16935 = vsyncpa [#allocation19], 1 }
0x115a   :  { %16936 = vsyncpa [#allocation8], 1 }

</bundles_post_ra>
